<compile_context>
chip_gen: v7x
topology: tpu7x:2x2x1
jax: 0.10.0
libtpu: 0.0.40
codegen_flags: <defaults>
</compile_context>

<pallas_src>
import functools

import jax
import jax.numpy as jnp
from jax import lax
from jax.experimental import pallas as pl
from jax.experimental.pallas import tpu as pltpu


TM_MAX = 256          # output-row tile of the im2col matrix (256-512 sweet spot)
VMEM_LIMIT = 32 * 1024 * 1024  # fits v5e/v6e/v7x scoped VMEM


def _round_up(x, m):
    return (x + m - 1) // m * m


# ----------------------------------------------------------------------------
# Kernel 1: conv tile as a single deep matmul
#           (TM, K)bf16 x (K, Cout)bf16 -> f32, + bias, [+stats], act, [+skip]
# ----------------------------------------------------------------------------
def _conv_mm_kernel(*refs, act, has_res, emit_stats, tm, m_true):
    p_ref, w_ref, b_ref = refs[0], refs[1], refs[2]
    idx = 3
    if has_res:
        res_ref = refs[idx]
        idx += 1
    o_ref = refs[idx]
    idx += 1
    if emit_stats:
        sum_ref, sq_ref = refs[idx], refs[idx + 1]

    acc = jnp.dot(p_ref[...], w_ref[...], preferred_element_type=jnp.float32)
    acc = acc + b_ref[...]                      # (1, Cout) broadcast

    if emit_stats:
        step = pl.program_id(0)

        @pl.when(step == 0)
        def _():
            sum_ref[...] = jnp.zeros_like(sum_ref)
            sq_ref[...] = jnp.zeros_like(sq_ref)

        # Mask rows that were added only to pad M up to a tile multiple.
        row0 = step * tm
        ridx = row0 + lax.broadcasted_iota(jnp.int32, (tm, 1), 0)
        valid = (ridx < m_true).astype(jnp.float32)
        yv = acc * valid
        sum_ref[...] += jnp.sum(yv, axis=0, keepdims=True)
        sq_ref[...] += jnp.sum(yv * yv, axis=0, keepdims=True)

    if act == "relu":
        acc = jnp.maximum(acc, 0.0)
    elif act == "sigmoid":
        acc = jax.nn.sigmoid(acc)

    if has_res:
        acc = acc + res_ref[...]

    o_ref[...] = acc.astype(o_ref.dtype)


# ----------------------------------------------------------------------------
# Kernel 2: BatchNorm apply (pre-folded scale/shift) + ReLU, element-wise tiles
# ----------------------------------------------------------------------------
def _scale_shift_relu_kernel(y_ref, sc_ref, sh_ref, o_ref):
    o_ref[...] = jnp.maximum(y_ref[...] * sc_ref[...] + sh_ref[...], 0.0)


# ----------------------------------------------------------------------------
# Wrapper: im2col + tiled pallas_call(s) for one conv layer
# ----------------------------------------------------------------------------
def _im2col(x, k, stride):
    """x: (N,H,W,Cin) -> patches (N,Ho,Wo,k*k*Cin) with zero padding k//2."""
    N, H, W, Cin = x.shape
    pad = k // 2
    Ho = (H + 2 * pad - k) // stride + 1
    Wo = (W + 2 * pad - k) // stride + 1
    xp = jnp.pad(x, ((0, 0), (pad, pad), (pad, pad), (0, 0)))
    cols = []
    for kh in range(k):
        for kw in range(k):
            cols.append(xp[:, kh:kh + (Ho - 1) * stride + 1:stride,
                              kw:kw + (Wo - 1) * stride + 1:stride, :])
    return jnp.concatenate(cols, axis=-1), Ho, Wo


def conv2d_layer(x, w, bias, *, stride, act, gamma=None, beta=None,
                 use_bn=False, res=None, eps=1e-3):
    """Conv2d (+BatchNorm with batch stats)(+act)(+skip-add).  x: NHWC f32."""
    N, H, W, Cin = x.shape
    KH, KW, _, Cout = w.shape

    patches, Ho, Wo = _im2col(x, KH, stride)
    M = N * Ho * Wo
    K = KH * KW * Cin

    tm = min(TM_MAX, _round_up(M, 8))
    m_pad = _round_up(M, tm)
    grid = (m_pad // tm,)

    p2 = patches.reshape(M, K)
    if m_pad != M:
        p2 = jnp.pad(p2, ((0, m_pad - M), (0, 0)))
    p2 = p2.astype(jnp.bfloat16)                       # bf16 MXU operands
    w2 = w.reshape(K, Cout).astype(jnp.bfloat16)
    b2 = bias.reshape(1, Cout).astype(jnp.float32)

    inputs = [p2, w2, b2]
    in_specs = [
        pl.BlockSpec((tm, K), lambda i: (i, 0)),       # tiled patch rows
        pl.BlockSpec((K, Cout), lambda i: (0, 0)),     # full weight block
        pl.BlockSpec((1, Cout), lambda i: (0, 0)),
    ]

    has_res = res is not None
    if has_res:
        r2 = res.reshape(M, Cout).astype(jnp.float32)
        if m_pad != M:
            r2 = jnp.pad(r2, ((0, m_pad - M), (0, 0)))
        inputs.append(r2)
        in_specs.append(pl.BlockSpec((tm, Cout), lambda i: (i, 0)))

    # BN layers: kernel emits conv+bias (no activation) + per-channel partial
    # stats; normalization + ReLU happen in a second cheap pass.
    kern_act = "none" if use_bn else act
    out_shapes = [jax.ShapeDtypeStruct((m_pad, Cout), jnp.float32)]
    out_specs = [pl.BlockSpec((tm, Cout), lambda i: (i, 0))]
    if use_bn:
        out_shapes += [jax.ShapeDtypeStruct((1, Cout), jnp.float32)] * 2
        out_specs += [pl.BlockSpec((1, Cout), lambda i: (0, 0))] * 2

    kernel = functools.partial(
        _conv_mm_kernel, act=kern_act, has_res=has_res,
        emit_stats=use_bn, tm=tm, m_true=M)

    sem = "arbitrary" if use_bn else "parallel"        # stats accumulate across grid
    outs = pl.pallas_call(
        kernel,
        grid=grid,
        out_shape=tuple(out_shapes),
        in_specs=in_specs,
        out_specs=tuple(out_specs),
        compiler_params=pltpu.CompilerParams(
            dimension_semantics=(sem,),
            vmem_limit_bytes=VMEM_LIMIT),
    )(*inputs)

    if use_bn:
        y2d, s, q = outs
        mean = s / M
        var = jnp.maximum(q / M - mean * mean, 0.0)    # biased variance (f32)
        scale = gamma.reshape(1, Cout).astype(jnp.float32) * lax.rsqrt(var + eps)
        shift = beta.reshape(1, Cout).astype(jnp.float32) - mean * scale
        # In this model every BN layer is followed by ReLU.
        y2d = pl.pallas_call(
            _scale_shift_relu_kernel,
            grid=grid,
            out_shape=jax.ShapeDtypeStruct((m_pad, Cout), jnp.float32),
            in_specs=[pl.BlockSpec((tm, Cout), lambda i: (i, 0)),
                      pl.BlockSpec((1, Cout), lambda i: (0, 0)),
                      pl.BlockSpec((1, Cout), lambda i: (0, 0))],
            out_specs=pl.BlockSpec((tm, Cout), lambda i: (i, 0)),
            compiler_params=pltpu.CompilerParams(
                dimension_semantics=("parallel",),
                vmem_limit_bytes=VMEM_LIMIT),
        )(y2d, scale, shift)
    else:
        (y2d,) = outs

    return y2d[:M].reshape(N, Ho, Wo, Cout)


# ----------------------------------------------------------------------------
# Model configuration (alpha = 1.0, in_channels = 3) and deterministic params
# ----------------------------------------------------------------------------
CONTRACT_CFG = [
    dict(cin=3, cout=32, k=9, stride=1),
    dict(cin=32, cout=64, k=3, stride=2),
    dict(cin=64, cout=128, k=3, stride=2),
]
N_RES = 5
RES_CH, RES_K = 128, 3
EXPAND_CFG = [
    dict(up=2, cin=128, cout=64, k=3, act="relu"),
    dict(up=2, cin=64, cout=32, k=3, act="relu"),
    dict(up=1, cin=32, cout=3, k=9, act="sigmoid"),
]


def init_params(key):
    def conv_init(k_, ks, cin, cout):
        kw_, kb_ = jax.random.split(k_)
        fan_in = ks * ks * cin
        w = jax.random.normal(kw_, (ks, ks, cin, cout), jnp.float32) / jnp.sqrt(fan_in)
        b = 0.01 * jax.random.normal(kb_, (cout,), jnp.float32)
        return w, b

    keys = iter(jax.random.split(key, 32))
    params = {"contract": [], "residual": [], "expand": []}
    for cfg in CONTRACT_CFG:
        w, b = conv_init(next(keys), cfg["k"], cfg["cin"], cfg["cout"])
        params["contract"].append(dict(
            w=w, b=b,
            gamma=jnp.ones((cfg["cout"],), jnp.float32),   # BatchNorm2d default weight
            beta=jnp.zeros((cfg["cout"],), jnp.float32)))  # BatchNorm2d default bias
    for _ in range(N_RES):
        w1, b1 = conv_init(next(keys), RES_K, RES_CH, RES_CH)
        w2, b2 = conv_init(next(keys), RES_K, RES_CH, RES_CH)
        params["residual"].append(dict(w1=w1, b1=b1, w2=w2, b2=b2))
    for cfg in EXPAND_CFG:
        w, b = conv_init(next(keys), cfg["k"], cfg["cin"], cfg["cout"])
        params["expand"].append(dict(w=w, b=b))
    return params


# ----------------------------------------------------------------------------
# Transform forward (glue in plain JAX, hot paths inside the Pallas kernels)
# ----------------------------------------------------------------------------
def transform_forward(x_nchw, params):
    # TODO(synk): the external `normalizer_fn` callable (style-conditional norm)
    # is caller-supplied in the PyTorch code; we pass None (falsy branch).
    x = jnp.transpose(x_nchw, (0, 2, 3, 1))  # NCHW -> NHWC

    # contract: conv + BN(batch stats) + ReLU
    for cfg, p in zip(CONTRACT_CFG, params["contract"]):
        x = conv2d_layer(x, p["w"], p["b"], stride=cfg["stride"], act="relu",
                         use_bn=True, gamma=p["gamma"], beta=p["beta"], eps=1e-3)

    # residual (x5): conv+ReLU, conv, add-skip (skip-add fused into 2nd kernel)
    for p in params["residual"]:
        h = conv2d_layer(x, p["w1"], p["b1"], stride=1, act="relu")
        x = conv2d_layer(h, p["w2"], p["b2"], stride=1, act="none", res=x)

    # expand: nearest x2 upsample + conv(+ReLU), final 9x9 conv + Sigmoid
    for cfg, p in zip(EXPAND_CFG, params["expand"]):
        if cfg["up"] > 1:
            x = jnp.repeat(jnp.repeat(x, cfg["up"], axis=1), cfg["up"], axis=2)
        x = conv2d_layer(x, p["w"], p["b"], stride=1, act=cfg["act"])

    return jnp.transpose(x, (0, 3, 1, 2))  # NHWC -> NCHW


# ----------------------------------------------------------------------------
# Pure-JAX reference.  quantize=True mirrors the kernel's bf16 MXU operands
# (so that check isolates the Pallas implementation); quantize=False is the
# true f32 module math (checked with a bf16-drift tolerance).
# ----------------------------------------------------------------------------
def _ref_conv(x, w, b, stride, quantize):
    if quantize:
        x = x.astype(jnp.bfloat16).astype(jnp.float32)
        w = w.astype(jnp.bfloat16).astype(jnp.float32)
    pad = w.shape[0] // 2
    y = lax.conv_general_dilated(
        x, w, window_strides=(stride, stride),
        padding=((pad, pad), (pad, pad)),
        dimension_numbers=("NHWC", "HWIO", "NHWC"),
        precision=lax.Precision.HIGHEST)
    return y + b


def _ref_bn(x, gamma, beta, eps=1e-3):
    mean = jnp.mean(x, axis=(0, 1, 2), keepdims=True)
    var = jnp.mean((x - mean) ** 2, axis=(0, 1, 2), keepdims=True)
    return (x - mean) * lax.rsqrt(var + eps) * gamma + beta


def ref_forward(x_nchw, params, quantize=False):
    x = jnp.transpose(x_nchw, (0, 2, 3, 1))
    for cfg, p in zip(CONTRACT_CFG, params["contract"]):
        x = jnp.maximum(_ref_bn(_ref_conv(x, p["w"], p["b"], cfg["stride"], quantize),
                                p["gamma"], p["beta"]), 0.0)
    for p in params["residual"]:
        h = jnp.maximum(_ref_conv(x, p["w1"], p["b1"], 1, quantize), 0.0)
        x = x + _ref_conv(h, p["w2"], p["b2"], 1, quantize)
    for cfg, p in zip(EXPAND_CFG, params["expand"]):
        if cfg["up"] > 1:
            x = jnp.repeat(jnp.repeat(x, cfg["up"], axis=1), cfg["up"], axis=2)
        y = _ref_conv(x, p["w"], p["b"], 1, quantize)
        x = jnp.maximum(y, 0.0) if cfg["act"] == "relu" else jax.nn.sigmoid(y)
    return jnp.transpose(x, (0, 3, 1, 2))


if __name__ == "__main__":
    key = jax.random.PRNGKey(0)
    kx, kp = jax.random.split(key)

    N, C, H, W = 2, 3, 16, 16  # PyTorch-convention NCHW input
    x_nchw = jax.random.uniform(kx, (N, C, H, W), jnp.float32)
    params = init_params(kp)

    fwd = jax.jit(transform_forward)
    y = jax.block_until_ready(fwd(x_nchw, params))

    assert y.shape == (N, 3, H, W), y.shape
    assert bool(jnp.all(jnp.isfinite(y)))

    # Tight check vs a reference with the same bf16 operand quantization
    # (validates the Pallas implementation itself).
    y_ref_bf = jax.block_until_ready(ref_forward(x_nchw, params, quantize=True))
    err_bf = float(jnp.max(jnp.abs(y - y_ref_bf)))
    assert err_bf < 5e-3, f"mismatch vs bf16-quantized reference: {err_bf}"

    # Drift check vs the pure-f32 module math (bf16 MXU operands only).
    y_ref_32 = jax.block_until_ready(ref_forward(x_nchw, params, quantize=False))
    err_32 = float(jnp.max(jnp.abs(y - y_ref_32)))
    assert err_32 < 5e-2, f"excessive drift vs f32 reference: {err_32}"

    print("KERNEL_OK")
</pallas_src>

<mosaic_0001>
module attributes {stable_mosaic.version = 11 : i64} {
  func.func @_conv_mm_kernel(%arg0: i32, %arg1: memref<256x243xbf16, #tpu.memory_space<vmem>>, %arg2: memref<243x32xbf16, #tpu.memory_space<vmem>>, %arg3: memref<1x32xf32, #tpu.memory_space<vmem>>, %arg4: memref<256x32xf32, #tpu.memory_space<vmem>>, %arg5: memref<1x32xf32, #tpu.memory_space<vmem>>, %arg6: memref<1x32xf32, #tpu.memory_space<vmem>>) attributes {dimension_semantics = [#tpu.dimension_semantics<arbitrary>], iteration_bounds = array<i64: 2>, scalar_prefetch = 0 : i64, scratch_operands = 0 : i64, tpu.core_type = #tpu.core_type<tc>, window_params = [{transform_indices = @transform_0, window_bounds = array<i64: 256, 243>}, {pipeline_mode = #tpu.pipeline_mode<synchronous>, transform_indices = @transform_1, window_bounds = array<i64: 243, 32>}, {pipeline_mode = #tpu.pipeline_mode<synchronous>, transform_indices = @transform_2, window_bounds = array<i64: 1, 32>}, {transform_indices = @transform_3, window_bounds = array<i64: 256, 32>}, {pipeline_mode = #tpu.pipeline_mode<synchronous>, transform_indices = @transform_4, window_bounds = array<i64: 1, 32>}, {pipeline_mode = #tpu.pipeline_mode<synchronous>, transform_indices = @transform_5, window_bounds = array<i64: 1, 32>}]} {
    %c0 = arith.constant 0 : index
    %c0_0 = arith.constant 0 : index
    %0 = vector.load %arg1[%c0, %c0_0] : memref<256x243xbf16, #tpu.memory_space<vmem>>, vector<256x243xbf16>
    %c0_1 = arith.constant 0 : index
    %c0_2 = arith.constant 0 : index
    %1 = vector.load %arg2[%c0_1, %c0_2] : memref<243x32xbf16, #tpu.memory_space<vmem>>, vector<243x32xbf16>
    %cst = arith.constant dense<0.000000e+00> : vector<256x32xf32>
    %2 = tpu.matmul %0, %1, %cst {dimension_numbers = #tpu.dot_dimension_numbers<[1], [0], [0], [1], [0, 0, 1, 1], [], []>} : vector<256x243xbf16>, vector<243x32xbf16>, vector<256x32xf32> -> vector<256x32xf32>
    %c0_3 = arith.constant 0 : index
    %c0_4 = arith.constant 0 : index
    %3 = vector.load %arg3[%c0_3, %c0_4] : memref<1x32xf32, #tpu.memory_space<vmem>>, vector<1x32xf32>
    %4 = vector.broadcast %3 : vector<1x32xf32> to vector<256x32xf32>
    %5 = arith.addf %2, %4 : vector<256x32xf32>
    %c0_i32 = arith.constant 0 : i32
    %6 = arith.cmpi eq, %arg0, %c0_i32 : i32
    %7 = arith.extui %6 : i1 to i32
    %c0_i32_5 = arith.constant 0 : i32
    %8 = arith.cmpi ne, %7, %c0_i32_5 : i32
    scf.if %8 {
      %cst_18 = arith.constant 0.000000e+00 : f32
      %31 = vector.broadcast %cst_18 : f32 to vector<1x32xf32>
      %c0_19 = arith.constant 0 : index
      %c0_20 = arith.constant 0 : index
      %32 = vector.load %arg5[%c0_19, %c0_20] : memref<1x32xf32, #tpu.memory_space<vmem>>, vector<1x32xf32>
      tpu.vector_store %arg5[%c0_19, %c0_20], %31 {strides = array<i32>} : memref<1x32xf32, #tpu.memory_space<vmem>>, vector<1x32xf32>,
      %cst_21 = arith.constant 0.000000e+00 : f32
      %33 = vector.broadcast %cst_21 : f32 to vector<1x32xf32>
      %c0_22 = arith.constant 0 : index
      %c0_23 = arith.constant 0 : index
      %34 = vector.load %arg6[%c0_22, %c0_23] : memref<1x32xf32, #tpu.memory_space<vmem>>, vector<1x32xf32>
      tpu.vector_store %arg6[%c0_22, %c0_23], %33 {strides = array<i32>} : memref<1x32xf32, #tpu.memory_space<vmem>>, vector<1x32xf32>,
    } else {
    }
    %c256_i32 = arith.constant 256 : i32
    %9 = arith.muli %arg0, %c256_i32 : i32
    %10 = tpu.iota {dimensions = array<i32: 0>} : vector<256x1xi32>
    %11 = vector.broadcast %9 : i32 to vector<256x1xi32>
    %12 = arith.addi %11, %10 : vector<256x1xi32>
    %c512_i32 = arith.constant 512 : i32
    %13 = vector.broadcast %c512_i32 : i32 to vector<256x1xi32>
    %14 = arith.cmpi slt, %12, %13 : vector<256x1xi32>
    %15 = arith.extui %14 : vector<256x1xi1> to vector<256x1xi32>
    %16 = arith.sitofp %15 : vector<256x1xi32> to vector<256x1xf32>
    %17 = vector.broadcast %16 : vector<256x1xf32> to vector<256x32xf32>
    %18 = arith.mulf %5, %17 : vector<256x32xf32>
    %c0_6 = arith.constant 0 : index
    %c0_7 = arith.constant 0 : index
    %19 = vector.load %arg5[%c0_6, %c0_7] : memref<1x32xf32, #tpu.memory_space<vmem>>, vector<1x32xf32>
    %cst_8 = arith.constant dense<0.000000e+00> : vector<32xf32>
    %20 = vector.multi_reduction <add>, %18, %cst_8 [0] : vector<256x32xf32> to vector<32xf32>
    %21 = vector.shape_cast %20 : vector<32xf32> to vector<1x32xf32>
    %22 = arith.addf %19, %21 : vector<1x32xf32>
    %c0_9 = arith.constant 0 : index
    %c0_10 = arith.constant 0 : index
    %23 = vector.load %arg5[%c0_9, %c0_10] : memref<1x32xf32, #tpu.memory_space<vmem>>, vector<1x32xf32>
    tpu.vector_store %arg5[%c0_9, %c0_10], %22 {strides = array<i32>} : memref<1x32xf32, #tpu.memory_space<vmem>>, vector<1x32xf32>,
    %c0_11 = arith.constant 0 : index
    %c0_12 = arith.constant 0 : index
    %24 = vector.load %arg6[%c0_11, %c0_12] : memref<1x32xf32, #tpu.memory_space<vmem>>, vector<1x32xf32>
    %25 = arith.mulf %18, %18 : vector<256x32xf32>
    %cst_13 = arith.constant dense<0.000000e+00> : vector<32xf32>
    %26 = vector.multi_reduction <add>, %25, %cst_13 [0] : vector<256x32xf32> to vector<32xf32>
    %27 = vector.shape_cast %26 : vector<32xf32> to vector<1x32xf32>
    %28 = arith.addf %24, %27 : vector<1x32xf32>
    %c0_14 = arith.constant 0 : index
    %c0_15 = arith.constant 0 : index
    %29 = vector.load %arg6[%c0_14, %c0_15] : memref<1x32xf32, #tpu.memory_space<vmem>>, vector<1x32xf32>
    tpu.vector_store %arg6[%c0_14, %c0_15], %28 {strides = array<i32>} : memref<1x32xf32, #tpu.memory_space<vmem>>, vector<1x32xf32>,
    %c0_16 = arith.constant 0 : index
    %c0_17 = arith.constant 0 : index
    %30 = vector.load %arg4[%c0_16, %c0_17] : memref<256x32xf32, #tpu.memory_space<vmem>>, vector<256x32xf32>
    tpu.vector_store %arg4[%c0_16, %c0_17], %5 {strides = array<i32>} : memref<256x32xf32, #tpu.memory_space<vmem>>, vector<256x32xf32>,
    return
  }
  func.func @transform_0(%arg0: i32) -> (i32, i32) {
    %c0_i32 = arith.constant 0 : i32
    %c0_i32_0 = arith.constant 0 : i32
    return %arg0, %c0_i32 : i32, i32
  }
  func.func @transform_1(%arg0: i32) -> (i32, i32) {
    %c0_i32 = arith.constant 0 : i32
    %c0_i32_0 = arith.constant 0 : i32
    %c0_i32_1 = arith.constant 0 : i32
    return %c0_i32, %c0_i32_0 : i32, i32
  }
  func.func @transform_2(%arg0: i32) -> (i32, i32) {
    %c0_i32 = arith.constant 0 : i32
    %c0_i32_0 = arith.constant 0 : i32
    %c0_i32_1 = arith.constant 0 : i32
    return %c0_i32, %c0_i32_0 : i32, i32
  }
  func.func @transform_3(%arg0: i32) -> (i32, i32) {
    %c0_i32 = arith.constant 0 : i32
    %c0_i32_0 = arith.constant 0 : i32
    return %arg0, %c0_i32 : i32, i32
  }
  func.func @transform_4(%arg0: i32) -> (i32, i32) {
    %c0_i32 = arith.constant 0 : i32
    %c0_i32_0 = arith.constant 0 : i32
    %c0_i32_1 = arith.constant 0 : i32
    return %c0_i32, %c0_i32_0 : i32, i32
  }
  func.func @transform_5(%arg0: i32) -> (i32, i32) {
    %c0_i32 = arith.constant 0 : i32
    %c0_i32_0 = arith.constant 0 : i32
    %c0_i32_1 = arith.constant 0 : i32
    return %c0_i32, %c0_i32_0 : i32, i32
  }
}

module attributes {stable_mosaic.version = 11 : i64} {
  func.func @_scale_shift_relu_kernel(%arg0: i32, %arg1: memref<256x32xf32, #tpu.memory_space<vmem>>, %arg2: memref<1x32xf32, #tpu.memory_space<vmem>>, %arg3: memref<1x32xf32, #tpu.memory_space<vmem>>, %arg4: memref<256x32xf32, #tpu.memory_space<vmem>>) attributes {dimension_semantics = [#tpu.dimension_semantics<parallel>], iteration_bounds = array<i64: 2>, scalar_prefetch = 0 : i64, scratch_operands = 0 : i64, tpu.core_type = #tpu.core_type<tc>, window_params = [{transform_indices = @transform_0, window_bounds = array<i64: 256, 32>}, {pipeline_mode = #tpu.pipeline_mode<synchronous>, transform_indices = @transform_1, window_bounds = array<i64: 1, 32>}, {pipeline_mode = #tpu.pipeline_mode<synchronous>, transform_indices = @transform_2, window_bounds = array<i64: 1, 32>}, {transform_indices = @transform_3, window_bounds = array<i64: 256, 32>}]} {
    %c0 = arith.constant 0 : index
    %c0_0 = arith.constant 0 : index
    %0 = vector.load %arg1[%c0, %c0_0] : memref<256x32xf32, #tpu.memory_space<vmem>>, vector<256x32xf32>
    %c0_1 = arith.constant 0 : index
    %c0_2 = arith.constant 0 : index
    %1 = vector.load %arg2[%c0_1, %c0_2] : memref<1x32xf32, #tpu.memory_space<vmem>>, vector<1x32xf32>
    %2 = vector.broadcast %1 : vector<1x32xf32> to vector<256x32xf32>
    %3 = arith.mulf %0, %2 : vector<256x32xf32>
    %c0_3 = arith.constant 0 : index
    %c0_4 = arith.constant 0 : index
    %4 = vector.load %arg3[%c0_3, %c0_4] : memref<1x32xf32, #tpu.memory_space<vmem>>, vector<1x32xf32>
    %5 = vector.broadcast %4 : vector<1x32xf32> to vector<256x32xf32>
    %6 = arith.addf %3, %5 : vector<256x32xf32>
    %cst = arith.constant 0.000000e+00 : f32
    %7 = vector.broadcast %cst : f32 to vector<256x32xf32>
    %8 = arith.maximumf %6, %7 : vector<256x32xf32>
    %c0_5 = arith.constant 0 : index
    %c0_6 = arith.constant 0 : index
    %9 = vector.load %arg4[%c0_5, %c0_6] : memref<256x32xf32, #tpu.memory_space<vmem>>, vector<256x32xf32>
    tpu.vector_store %arg4[%c0_5, %c0_6], %8 {strides = array<i32>} : memref<256x32xf32, #tpu.memory_space<vmem>>, vector<256x32xf32>,
    return
  }
  func.func @transform_0(%arg0: i32) -> (i32, i32) {
    %c0_i32 = arith.constant 0 : i32
    %c0_i32_0 = arith.constant 0 : i32
    return %arg0, %c0_i32 : i32, i32
  }
  func.func @transform_1(%arg0: i32) -> (i32, i32) {
    %c0_i32 = arith.constant 0 : i32
    %c0_i32_0 = arith.constant 0 : i32
    %c0_i32_1 = arith.constant 0 : i32
    return %c0_i32, %c0_i32_0 : i32, i32
  }
  func.func @transform_2(%arg0: i32) -> (i32, i32) {
    %c0_i32 = arith.constant 0 : i32
    %c0_i32_0 = arith.constant 0 : i32
    %c0_i32_1 = arith.constant 0 : i32
    return %c0_i32, %c0_i32_0 : i32, i32
  }
  func.func @transform_3(%arg0: i32) -> (i32, i32) {
    %c0_i32 = arith.constant 0 : i32
    %c0_i32_0 = arith.constant 0 : i32
    return %arg0, %c0_i32 : i32, i32
  }
}

module attributes {stable_mosaic.version = 11 : i64} {
  func.func @_conv_mm_kernel(%arg0: i32, %arg1: memref<128x288xbf16, #tpu.memory_space<vmem>>, %arg2: memref<288x64xbf16, #tpu.memory_space<vmem>>, %arg3: memref<1x64xf32, #tpu.memory_space<vmem>>, %arg4: memref<128x64xf32, #tpu.memory_space<vmem>>, %arg5: memref<1x64xf32, #tpu.memory_space<vmem>>, %arg6: memref<1x64xf32, #tpu.memory_space<vmem>>) attributes {dimension_semantics = [#tpu.dimension_semantics<arbitrary>], iteration_bounds = array<i64: 1>, scalar_prefetch = 0 : i64, scratch_operands = 0 : i64, tpu.core_type = #tpu.core_type<tc>, window_params = [{transform_indices = @transform_0, window_bounds = array<i64: 128, 288>}, {pipeline_mode = #tpu.pipeline_mode<synchronous>, transform_indices = @transform_1, window_bounds = array<i64: 288, 64>}, {pipeline_mode = #tpu.pipeline_mode<synchronous>, transform_indices = @transform_2, window_bounds = array<i64: 1, 64>}, {transform_indices = @transform_3, window_bounds = array<i64: 128, 64>}, {pipeline_mode = #tpu.pipeline_mode<synchronous>, transform_indices = @transform_4, window_bounds = array<i64: 1, 64>}, {pipeline_mode = #tpu.pipeline_mode<synchronous>, transform_indices = @transform_5, window_bounds = array<i64: 1, 64>}]} {
    %c0 = arith.constant 0 : index
    %c0_0 = arith.constant 0 : index
    %0 = vector.load %arg1[%c0, %c0_0] : memref<128x288xbf16, #tpu.memory_space<vmem>>, vector<128x288xbf16>
    %c0_1 = arith.constant 0 : index
    %c0_2 = arith.constant 0 : index
    %1 = vector.load %arg2[%c0_1, %c0_2] : memref<288x64xbf16, #tpu.memory_space<vmem>>, vector<288x64xbf16>
    %cst = arith.constant dense<0.000000e+00> : vector<128x64xf32>
    %2 = tpu.matmul %0, %1, %cst {dimension_numbers = #tpu.dot_dimension_numbers<[1], [0], [0], [1], [0, 0, 1, 1], [], []>} : vector<128x288xbf16>, vector<288x64xbf16>, vector<128x64xf32> -> vector<128x64xf32>
    %c0_3 = arith.constant 0 : index
    %c0_4 = arith.constant 0 : index
    %3 = vector.load %arg3[%c0_3, %c0_4] : memref<1x64xf32, #tpu.memory_space<vmem>>, vector<1x64xf32>
    %4 = vector.broadcast %3 : vector<1x64xf32> to vector<128x64xf32>
    %5 = arith.addf %2, %4 : vector<128x64xf32>
    %c0_i32 = arith.constant 0 : i32
    %6 = arith.cmpi eq, %arg0, %c0_i32 : i32
    %7 = arith.extui %6 : i1 to i32
    %c0_i32_5 = arith.constant 0 : i32
    %8 = arith.cmpi ne, %7, %c0_i32_5 : i32
    scf.if %8 {
      %cst_19 = arith.constant 0.000000e+00 : f32
      %31 = vector.broadcast %cst_19 : f32 to vector<1x64xf32>
      %c0_20 = arith.constant 0 : index
      %c0_21 = arith.constant 0 : index
      %32 = vector.load %arg5[%c0_20, %c0_21] : memref<1x64xf32, #tpu.memory_space<vmem>>, vector<1x64xf32>
      tpu.vector_store %arg5[%c0_20, %c0_21], %31 {strides = array<i32>} : memref<1x64xf32, #tpu.memory_space<vmem>>, vector<1x64xf32>,
      %cst_22 = arith.constant 0.000000e+00 : f32
      %33 = vector.broadcast %cst_22 : f32 to vector<1x64xf32>
      %c0_23 = arith.constant 0 : index
      %c0_24 = arith.constant 0 : index
      %34 = vector.load %arg6[%c0_23, %c0_24] : memref<1x64xf32, #tpu.memory_space<vmem>>, vector<1x64xf32>
      tpu.vector_store %arg6[%c0_23, %c0_24], %33 {strides = array<i32>} : memref<1x64xf32, #tpu.memory_space<vmem>>, vector<1x64xf32>,
    } else {
    }
    %c128_i32 = arith.constant 128 : i32
    %9 = arith.muli %arg0, %c128_i32 : i32
    %10 = tpu.iota {dimensions = array<i32: 0>} : vector<128x1xi32>
    %11 = vector.broadcast %9 : i32 to vector<128x1xi32>
    %12 = arith.addi %11, %10 : vector<128x1xi32>
    %c128_i32_6 = arith.constant 128 : i32
    %13 = vector.broadcast %c128_i32_6 : i32 to vector<128x1xi32>
    %14 = arith.cmpi slt, %12, %13 : vector<128x1xi32>
    %15 = arith.extui %14 : vector<128x1xi1> to vector<128x1xi32>
    %16 = arith.sitofp %15 : vector<128x1xi32> to vector<128x1xf32>
    %17 = vector.broadcast %16 : vector<128x1xf32> to vector<128x64xf32>
    %18 = arith.mulf %5, %17 : vector<128x64xf32>
    %c0_7 = arith.constant 0 : index
    %c0_8 = arith.constant 0 : index
    %19 = vector.load %arg5[%c0_7, %c0_8] : memref<1x64xf32, #tpu.memory_space<vmem>>, vector<1x64xf32>
    %cst_9 = arith.constant dense<0.000000e+00> : vector<64xf32>
    %20 = vector.multi_reduction <add>, %18, %cst_9 [0] : vector<128x64xf32> to vector<64xf32>
    %21 = vector.shape_cast %20 : vector<64xf32> to vector<1x64xf32>
    %22 = arith.addf %19, %21 : vector<1x64xf32>
    %c0_10 = arith.constant 0 : index
    %c0_11 = arith.constant 0 : index
    %23 = vector.load %arg5[%c0_10, %c0_11] : memref<1x64xf32, #tpu.memory_space<vmem>>, vector<1x64xf32>
    tpu.vector_store %arg5[%c0_10, %c0_11], %22 {strides = array<i32>} : memref<1x64xf32, #tpu.memory_space<vmem>>, vector<1x64xf32>,
    %c0_12 = arith.constant 0 : index
    %c0_13 = arith.constant 0 : index
    %24 = vector.load %arg6[%c0_12, %c0_13] : memref<1x64xf32, #tpu.memory_space<vmem>>, vector<1x64xf32>
    %25 = arith.mulf %18, %18 : vector<128x64xf32>
    %cst_14 = arith.constant dense<0.000000e+00> : vector<64xf32>
    %26 = vector.multi_reduction <add>, %25, %cst_14 [0] : vector<128x64xf32> to vector<64xf32>
    %27 = vector.shape_cast %26 : vector<64xf32> to vector<1x64xf32>
    %28 = arith.addf %24, %27 : vector<1x64xf32>
    %c0_15 = arith.constant 0 : index
    %c0_16 = arith.constant 0 : index
    %29 = vector.load %arg6[%c0_15, %c0_16] : memref<1x64xf32, #tpu.memory_space<vmem>>, vector<1x64xf32>
    tpu.vector_store %arg6[%c0_15, %c0_16], %28 {strides = array<i32>} : memref<1x64xf32, #tpu.memory_space<vmem>>, vector<1x64xf32>,
    %c0_17 = arith.constant 0 : index
    %c0_18 = arith.constant 0 : index
    %30 = vector.load %arg4[%c0_17, %c0_18] : memref<128x64xf32, #tpu.memory_space<vmem>>, vector<128x64xf32>
    tpu.vector_store %arg4[%c0_17, %c0_18], %5 {strides = array<i32>} : memref<128x64xf32, #tpu.memory_space<vmem>>, vector<128x64xf32>,
    return
  }
  func.func @transform_0(%arg0: i32) -> (i32, i32) {
    %c0_i32 = arith.constant 0 : i32
    %c0_i32_0 = arith.constant 0 : i32
    return %arg0, %c0_i32 : i32, i32
  }
  func.func @transform_1(%arg0: i32) -> (i32, i32) {
    %c0_i32 = arith.constant 0 : i32
    %c0_i32_0 = arith.constant 0 : i32
    %c0_i32_1 = arith.constant 0 : i32
    return %c0_i32, %c0_i32_0 : i32, i32
  }
  func.func @transform_2(%arg0: i32) -> (i32, i32) {
    %c0_i32 = arith.constant 0 : i32
    %c0_i32_0 = arith.constant 0 : i32
    %c0_i32_1 = arith.constant 0 : i32
    return %c0_i32, %c0_i32_0 : i32, i32
  }
  func.func @transform_3(%arg0: i32) -> (i32, i32) {
    %c0_i32 = arith.constant 0 : i32
    %c0_i32_0 = arith.constant 0 : i32
    return %arg0, %c0_i32 : i32, i32
  }
  func.func @transform_4(%arg0: i32) -> (i32, i32) {
    %c0_i32 = arith.constant 0 : i32
    %c0_i32_0 = arith.constant 0 : i32
    %c0_i32_1 = arith.constant 0 : i32
    return %c0_i32, %c0_i32_0 : i32, i32
  }
  func.func @transform_5(%arg0: i32) -> (i32, i32) {
    %c0_i32 = arith.constant 0 : i32
    %c0_i32_0 = arith.constant 0 : i32
    %c0_i32_1 = arith.constant 0 : i32
    return %c0_i32, %c0_i32_0 : i32, i32
  }
}

module attributes {stable_mosaic.version = 11 : i64} {
  func.func @_scale_shift_relu_kernel(%arg0: i32, %arg1: memref<128x64xf32, #tpu.memory_space<vmem>>, %arg2: memref<1x64xf32, #tpu.memory_space<vmem>>, %arg3: memref<1x64xf32, #tpu.memory_space<vmem>>, %arg4: memref<128x64xf32, #tpu.memory_space<vmem>>) attributes {dimension_semantics = [#tpu.dimension_semantics<parallel>], iteration_bounds = array<i64: 1>, scalar_prefetch = 0 : i64, scratch_operands = 0 : i64, tpu.core_type = #tpu.core_type<tc>, window_params = [{transform_indices = @transform_0, window_bounds = array<i64: 128, 64>}, {pipeline_mode = #tpu.pipeline_mode<synchronous>, transform_indices = @transform_1, window_bounds = array<i64: 1, 64>}, {pipeline_mode = #tpu.pipeline_mode<synchronous>, transform_indices = @transform_2, window_bounds = array<i64: 1, 64>}, {transform_indices = @transform_3, window_bounds = array<i64: 128, 64>}]} {
    %c0 = arith.constant 0 : index
    %c0_0 = arith.constant 0 : index
    %0 = vector.load %arg1[%c0, %c0_0] : memref<128x64xf32, #tpu.memory_space<vmem>>, vector<128x64xf32>
    %c0_1 = arith.constant 0 : index
    %c0_2 = arith.constant 0 : index
    %1 = vector.load %arg2[%c0_1, %c0_2] : memref<1x64xf32, #tpu.memory_space<vmem>>, vector<1x64xf32>
    %2 = vector.broadcast %1 : vector<1x64xf32> to vector<128x64xf32>
    %3 = arith.mulf %0, %2 : vector<128x64xf32>
    %c0_3 = arith.constant 0 : index
    %c0_4 = arith.constant 0 : index
    %4 = vector.load %arg3[%c0_3, %c0_4] : memref<1x64xf32, #tpu.memory_space<vmem>>, vector<1x64xf32>
    %5 = vector.broadcast %4 : vector<1x64xf32> to vector<128x64xf32>
    %6 = arith.addf %3, %5 : vector<128x64xf32>
    %cst = arith.constant 0.000000e+00 : f32
    %7 = vector.broadcast %cst : f32 to vector<128x64xf32>
    %8 = arith.maximumf %6, %7 : vector<128x64xf32>
    %c0_5 = arith.constant 0 : index
    %c0_6 = arith.constant 0 : index
    %9 = vector.load %arg4[%c0_5, %c0_6] : memref<128x64xf32, #tpu.memory_space<vmem>>, vector<128x64xf32>
    tpu.vector_store %arg4[%c0_5, %c0_6], %8 {strides = array<i32>} : memref<128x64xf32, #tpu.memory_space<vmem>>, vector<128x64xf32>,
    return
  }
  func.func @transform_0(%arg0: i32) -> (i32, i32) {
    %c0_i32 = arith.constant 0 : i32
    %c0_i32_0 = arith.constant 0 : i32
    return %arg0, %c0_i32 : i32, i32
  }
  func.func @transform_1(%arg0: i32) -> (i32, i32) {
    %c0_i32 = arith.constant 0 : i32
    %c0_i32_0 = arith.constant 0 : i32
    %c0_i32_1 = arith.constant 0 : i32
    return %c0_i32, %c0_i32_0 : i32, i32
  }
  func.func @transform_2(%arg0: i32) -> (i32, i32) {
    %c0_i32 = arith.constant 0 : i32
    %c0_i32_0 = arith.constant 0 : i32
    %c0_i32_1 = arith.constant 0 : i32
    return %c0_i32, %c0_i32_0 : i32, i32
  }
  func.func @transform_3(%arg0: i32) -> (i32, i32) {
    %c0_i32 = arith.constant 0 : i32
    %c0_i32_0 = arith.constant 0 : i32
    return %arg0, %c0_i32 : i32, i32
  }
}

module attributes {stable_mosaic.version = 11 : i64} {
  func.func @_conv_mm_kernel(%arg0: i32, %arg1: memref<32x576xbf16, #tpu.memory_space<vmem>>, %arg2: memref<576x128xbf16, #tpu.memory_space<vmem>>, %arg3: memref<1x128xf32, #tpu.memory_space<vmem>>, %arg4: memref<32x128xf32, #tpu.memory_space<vmem>>, %arg5: memref<1x128xf32, #tpu.memory_space<vmem>>, %arg6: memref<1x128xf32, #tpu.memory_space<vmem>>) attributes {dimension_semantics = [#tpu.dimension_semantics<arbitrary>], iteration_bounds = array<i64: 1>, scalar_prefetch = 0 : i64, scratch_operands = 0 : i64, tpu.core_type = #tpu.core_type<tc>, window_params = [{transform_indices = @transform_0, window_bounds = array<i64: 32, 576>}, {pipeline_mode = #tpu.pipeline_mode<synchronous>, transform_indices = @transform_1, window_bounds = array<i64: 576, 128>}, {pipeline_mode = #tpu.pipeline_mode<synchronous>, transform_indices = @transform_2, window_bounds = array<i64: 1, 128>}, {transform_indices = @transform_3, window_bounds = array<i64: 32, 128>}, {pipeline_mode = #tpu.pipeline_mode<synchronous>, transform_indices = @transform_4, window_bounds = array<i64: 1, 128>}, {pipeline_mode = #tpu.pipeline_mode<synchronous>, transform_indices = @transform_5, window_bounds = array<i64: 1, 128>}]} {
    %c0 = arith.constant 0 : index
    %c0_0 = arith.constant 0 : index
    %0 = vector.load %arg1[%c0, %c0_0] : memref<32x576xbf16, #tpu.memory_space<vmem>>, vector<32x576xbf16>
    %c0_1 = arith.constant 0 : index
    %c0_2 = arith.constant 0 : index
    %1 = vector.load %arg2[%c0_1, %c0_2] : memref<576x128xbf16, #tpu.memory_space<vmem>>, vector<576x128xbf16>
    %cst = arith.constant dense<0.000000e+00> : vector<32x128xf32>
    %2 = tpu.matmul %0, %1, %cst {dimension_numbers = #tpu.dot_dimension_numbers<[1], [0], [0], [1], [0, 0, 1, 1], [], []>} : vector<32x576xbf16>, vector<576x128xbf16>, vector<32x128xf32> -> vector<32x128xf32>
    %c0_3 = arith.constant 0 : index
    %c0_4 = arith.constant 0 : index
    %3 = vector.load %arg3[%c0_3, %c0_4] : memref<1x128xf32, #tpu.memory_space<vmem>>, vector<1x128xf32>
    %4 = vector.broadcast %3 : vector<1x128xf32> to vector<32x128xf32>
    %5 = arith.addf %2, %4 : vector<32x128xf32>
    %c0_i32 = arith.constant 0 : i32
    %6 = arith.cmpi eq, %arg0, %c0_i32 : i32
    %7 = arith.extui %6 : i1 to i32
    %c0_i32_5 = arith.constant 0 : i32
    %8 = arith.cmpi ne, %7, %c0_i32_5 : i32
    scf.if %8 {
      %cst_19 = arith.constant 0.000000e+00 : f32
      %31 = vector.broadcast %cst_19 : f32 to vector<1x128xf32>
      %c0_20 = arith.constant 0 : index
      %c0_21 = arith.constant 0 : index
      %32 = vector.load %arg5[%c0_20, %c0_21] : memref<1x128xf32, #tpu.memory_space<vmem>>, vector<1x128xf32>
      tpu.vector_store %arg5[%c0_20, %c0_21], %31 {strides = array<i32>} : memref<1x128xf32, #tpu.memory_space<vmem>>, vector<1x128xf32>,
      %cst_22 = arith.constant 0.000000e+00 : f32
      %33 = vector.broadcast %cst_22 : f32 to vector<1x128xf32>
      %c0_23 = arith.constant 0 : index
      %c0_24 = arith.constant 0 : index
      %34 = vector.load %arg6[%c0_23, %c0_24] : memref<1x128xf32, #tpu.memory_space<vmem>>, vector<1x128xf32>
      tpu.vector_store %arg6[%c0_23, %c0_24], %33 {strides = array<i32>} : memref<1x128xf32, #tpu.memory_space<vmem>>, vector<1x128xf32>,
    } else {
    }
    %c32_i32 = arith.constant 32 : i32
    %9 = arith.muli %arg0, %c32_i32 : i32
    %10 = tpu.iota {dimensions = array<i32: 0>} : vector<32x1xi32>
    %11 = vector.broadcast %9 : i32 to vector<32x1xi32>
    %12 = arith.addi %11, %10 : vector<32x1xi32>
    %c32_i32_6 = arith.constant 32 : i32
    %13 = vector.broadcast %c32_i32_6 : i32 to vector<32x1xi32>
    %14 = arith.cmpi slt, %12, %13 : vector<32x1xi32>
    %15 = arith.extui %14 : vector<32x1xi1> to vector<32x1xi32>
    %16 = arith.sitofp %15 : vector<32x1xi32> to vector<32x1xf32>
    %17 = vector.broadcast %16 : vector<32x1xf32> to vector<32x128xf32>
    %18 = arith.mulf %5, %17 : vector<32x128xf32>
    %c0_7 = arith.constant 0 : index
    %c0_8 = arith.constant 0 : index
    %19 = vector.load %arg5[%c0_7, %c0_8] : memref<1x128xf32, #tpu.memory_space<vmem>>, vector<1x128xf32>
    %cst_9 = arith.constant dense<0.000000e+00> : vector<128xf32>
    %20 = vector.multi_reduction <add>, %18, %cst_9 [0] : vector<32x128xf32> to vector<128xf32>
    %21 = vector.shape_cast %20 : vector<128xf32> to vector<1x128xf32>
    %22 = arith.addf %19, %21 : vector<1x128xf32>
    %c0_10 = arith.constant 0 : index
    %c0_11 = arith.constant 0 : index
    %23 = vector.load %arg5[%c0_10, %c0_11] : memref<1x128xf32, #tpu.memory_space<vmem>>, vector<1x128xf32>
    tpu.vector_store %arg5[%c0_10, %c0_11], %22 {strides = array<i32>} : memref<1x128xf32, #tpu.memory_space<vmem>>, vector<1x128xf32>,
    %c0_12 = arith.constant 0 : index
    %c0_13 = arith.constant 0 : index
    %24 = vector.load %arg6[%c0_12, %c0_13] : memref<1x128xf32, #tpu.memory_space<vmem>>, vector<1x128xf32>
    %25 = arith.mulf %18, %18 : vector<32x128xf32>
    %cst_14 = arith.constant dense<0.000000e+00> : vector<128xf32>
    %26 = vector.multi_reduction <add>, %25, %cst_14 [0] : vector<32x128xf32> to vector<128xf32>
    %27 = vector.shape_cast %26 : vector<128xf32> to vector<1x128xf32>
    %28 = arith.addf %24, %27 : vector<1x128xf32>
    %c0_15 = arith.constant 0 : index
    %c0_16 = arith.constant 0 : index
    %29 = vector.load %arg6[%c0_15, %c0_16] : memref<1x128xf32, #tpu.memory_space<vmem>>, vector<1x128xf32>
    tpu.vector_store %arg6[%c0_15, %c0_16], %28 {strides = array<i32>} : memref<1x128xf32, #tpu.memory_space<vmem>>, vector<1x128xf32>,
    %c0_17 = arith.constant 0 : index
    %c0_18 = arith.constant 0 : index
    %30 = vector.load %arg4[%c0_17, %c0_18] : memref<32x128xf32, #tpu.memory_space<vmem>>, vector<32x128xf32>
    tpu.vector_store %arg4[%c0_17, %c0_18], %5 {strides = array<i32>} : memref<32x128xf32, #tpu.memory_space<vmem>>, vector<32x128xf32>,
    return
  }
  func.func @transform_0(%arg0: i32) -> (i32, i32) {
    %c0_i32 = arith.constant 0 : i32
    %c0_i32_0 = arith.constant 0 : i32
    return %arg0, %c0_i32 : i32, i32
  }
  func.func @transform_1(%arg0: i32) -> (i32, i32) {
    %c0_i32 = arith.constant 0 : i32
    %c0_i32_0 = arith.constant 0 : i32
    %c0_i32_1 = arith.constant 0 : i32
    return %c0_i32, %c0_i32_0 : i32, i32
  }
  func.func @transform_2(%arg0: i32) -> (i32, i32) {
    %c0_i32 = arith.constant 0 : i32
    %c0_i32_0 = arith.constant 0 : i32
    %c0_i32_1 = arith.constant 0 : i32
    return %c0_i32, %c0_i32_0 : i32, i32
  }
  func.func @transform_3(%arg0: i32) -> (i32, i32) {
    %c0_i32 = arith.constant 0 : i32
    %c0_i32_0 = arith.constant 0 : i32
    return %arg0, %c0_i32 : i32, i32
  }
  func.func @transform_4(%arg0: i32) -> (i32, i32) {
    %c0_i32 = arith.constant 0 : i32
    %c0_i32_0 = arith.constant 0 : i32
    %c0_i32_1 = arith.constant 0 : i32
    return %c0_i32, %c0_i32_0 : i32, i32
  }
  func.func @transform_5(%arg0: i32) -> (i32, i32) {
    %c0_i32 = arith.constant 0 : i32
    %c0_i32_0 = arith.constant 0 : i32
    %c0_i32_1 = arith.constant 0 : i32
    return %c0_i32, %c0_i32_0 : i32, i32
  }
}

module attributes {stable_mosaic.version = 11 : i64} {
  func.func @_scale_shift_relu_kernel(%arg0: i32, %arg1: memref<32x128xf32, #tpu.memory_space<vmem>>, %arg2: memref<1x128xf32, #tpu.memory_space<vmem>>, %arg3: memref<1x128xf32, #tpu.memory_space<vmem>>, %arg4: memref<32x128xf32, #tpu.memory_space<vmem>>) attributes {dimension_semantics = [#tpu.dimension_semantics<parallel>], iteration_bounds = array<i64: 1>, scalar_prefetch = 0 : i64, scratch_operands = 0 : i64, tpu.core_type = #tpu.core_type<tc>, window_params = [{transform_indices = @transform_0, window_bounds = array<i64: 32, 128>}, {pipeline_mode = #tpu.pipeline_mode<synchronous>, transform_indices = @transform_1, window_bounds = array<i64: 1, 128>}, {pipeline_mode = #tpu.pipeline_mode<synchronous>, transform_indices = @transform_2, window_bounds = array<i64: 1, 128>}, {transform_indices = @transform_3, window_bounds = array<i64: 32, 128>}]} {
    %c0 = arith.constant 0 : index
    %c0_0 = arith.constant 0 : index
    %0 = vector.load %arg1[%c0, %c0_0] : memref<32x128xf32, #tpu.memory_space<vmem>>, vector<32x128xf32>
    %c0_1 = arith.constant 0 : index
    %c0_2 = arith.constant 0 : index
    %1 = vector.load %arg2[%c0_1, %c0_2] : memref<1x128xf32, #tpu.memory_space<vmem>>, vector<1x128xf32>
    %2 = vector.broadcast %1 : vector<1x128xf32> to vector<32x128xf32>
    %3 = arith.mulf %0, %2 : vector<32x128xf32>
    %c0_3 = arith.constant 0 : index
    %c0_4 = arith.constant 0 : index
    %4 = vector.load %arg3[%c0_3, %c0_4] : memref<1x128xf32, #tpu.memory_space<vmem>>, vector<1x128xf32>
    %5 = vector.broadcast %4 : vector<1x128xf32> to vector<32x128xf32>
    %6 = arith.addf %3, %5 : vector<32x128xf32>
    %cst = arith.constant 0.000000e+00 : f32
    %7 = vector.broadcast %cst : f32 to vector<32x128xf32>
    %8 = arith.maximumf %6, %7 : vector<32x128xf32>
    %c0_5 = arith.constant 0 : index
    %c0_6 = arith.constant 0 : index
    %9 = vector.load %arg4[%c0_5, %c0_6] : memref<32x128xf32, #tpu.memory_space<vmem>>, vector<32x128xf32>
    tpu.vector_store %arg4[%c0_5, %c0_6], %8 {strides = array<i32>} : memref<32x128xf32, #tpu.memory_space<vmem>>, vector<32x128xf32>,
    return
  }
  func.func @transform_0(%arg0: i32) -> (i32, i32) {
    %c0_i32 = arith.constant 0 : i32
    %c0_i32_0 = arith.constant 0 : i32
    return %arg0, %c0_i32 : i32, i32
  }
  func.func @transform_1(%arg0: i32) -> (i32, i32) {
    %c0_i32 = arith.constant 0 : i32
    %c0_i32_0 = arith.constant 0 : i32
    %c0_i32_1 = arith.constant 0 : i32
    return %c0_i32, %c0_i32_0 : i32, i32
  }
  func.func @transform_2(%arg0: i32) -> (i32, i32) {
    %c0_i32 = arith.constant 0 : i32
    %c0_i32_0 = arith.constant 0 : i32
    %c0_i32_1 = arith.constant 0 : i32
    return %c0_i32, %c0_i32_0 : i32, i32
  }
  func.func @transform_3(%arg0: i32) -> (i32, i32) {
    %c0_i32 = arith.constant 0 : i32
    %c0_i32_0 = arith.constant 0 : i32
    return %arg0, %c0_i32 : i32, i32
  }
}

module attributes {stable_mosaic.version = 11 : i64} {
  func.func @_conv_mm_kernel(%arg0: i32, %arg1: memref<32x1152xbf16, #tpu.memory_space<vmem>>, %arg2: memref<1152x128xbf16, #tpu.memory_space<vmem>>, %arg3: memref<1x128xf32, #tpu.memory_space<vmem>>, %arg4: memref<32x128xf32, #tpu.memory_space<vmem>>, %arg5: memref<32x128xf32, #tpu.memory_space<vmem>>) attributes {dimension_semantics = [#tpu.dimension_semantics<parallel>], iteration_bounds = array<i64: 1>, scalar_prefetch = 0 : i64, scratch_operands = 0 : i64, tpu.core_type = #tpu.core_type<tc>, window_params = [{transform_indices = @transform_0, window_bounds = array<i64: 32, 1152>}, {pipeline_mode = #tpu.pipeline_mode<synchronous>, transform_indices = @transform_1, window_bounds = array<i64: 1152, 128>}, {pipeline_mode = #tpu.pipeline_mode<synchronous>, transform_indices = @transform_2, window_bounds = array<i64: 1, 128>}, {transform_indices = @transform_3, window_bounds = array<i64: 32, 128>}, {transform_indices = @transform_4, window_bounds = array<i64: 32, 128>}]} {
    %c0 = arith.constant 0 : index
    %c0_0 = arith.constant 0 : index
    %0 = vector.load %arg1[%c0, %c0_0] : memref<32x1152xbf16, #tpu.memory_space<vmem>>, vector<32x1152xbf16>
    %c0_1 = arith.constant 0 : index
    %c0_2 = arith.constant 0 : index
    %1 = vector.load %arg2[%c0_1, %c0_2] : memref<1152x128xbf16, #tpu.memory_space<vmem>>, vector<1152x128xbf16>
    %cst = arith.constant dense<0.000000e+00> : vector<32x128xf32>
    %2 = tpu.matmul %0, %1, %cst {dimension_numbers = #tpu.dot_dimension_numbers<[1], [0], [0], [1], [0, 0, 1, 1], [], []>} : vector<32x1152xbf16>, vector<1152x128xbf16>, vector<32x128xf32> -> vector<32x128xf32>
    %c0_3 = arith.constant 0 : index
    %c0_4 = arith.constant 0 : index
    %3 = vector.load %arg3[%c0_3, %c0_4] : memref<1x128xf32, #tpu.memory_space<vmem>>, vector<1x128xf32>
    %4 = vector.broadcast %3 : vector<1x128xf32> to vector<32x128xf32>
    %5 = arith.addf %2, %4 : vector<32x128xf32>
    %c0_5 = arith.constant 0 : index
    %c0_6 = arith.constant 0 : index
    %6 = vector.load %arg4[%c0_5, %c0_6] : memref<32x128xf32, #tpu.memory_space<vmem>>, vector<32x128xf32>
    %7 = arith.addf %5, %6 : vector<32x128xf32>
    %c0_7 = arith.constant 0 : index
    %c0_8 = arith.constant 0 : index
    %8 = vector.load %arg5[%c0_7, %c0_8] : memref<32x128xf32, #tpu.memory_space<vmem>>, vector<32x128xf32>
    tpu.vector_store %arg5[%c0_7, %c0_8], %7 {strides = array<i32>} : memref<32x128xf32, #tpu.memory_space<vmem>>, vector<32x128xf32>,
    return
  }
  func.func @transform_0(%arg0: i32) -> (i32, i32) {
    %c0_i32 = arith.constant 0 : i32
    %c0_i32_0 = arith.constant 0 : i32
    return %arg0, %c0_i32 : i32, i32
  }
  func.func @transform_1(%arg0: i32) -> (i32, i32) {
    %c0_i32 = arith.constant 0 : i32
    %c0_i32_0 = arith.constant 0 : i32
    %c0_i32_1 = arith.constant 0 : i32
    return %c0_i32, %c0_i32_0 : i32, i32
  }
  func.func @transform_2(%arg0: i32) -> (i32, i32) {
    %c0_i32 = arith.constant 0 : i32
    %c0_i32_0 = arith.constant 0 : i32
    %c0_i32_1 = arith.constant 0 : i32
    return %c0_i32, %c0_i32_0 : i32, i32
  }
  func.func @transform_3(%arg0: i32) -> (i32, i32) {
    %c0_i32 = arith.constant 0 : i32
    %c0_i32_0 = arith.constant 0 : i32
    return %arg0, %c0_i32 : i32, i32
  }
  func.func @transform_4(%arg0: i32) -> (i32, i32) {
    %c0_i32 = arith.constant 0 : i32
    %c0_i32_0 = arith.constant 0 : i32
    return %arg0, %c0_i32 : i32, i32
  }
}

module attributes {stable_mosaic.version = 11 : i64} {
  func.func @_conv_mm_kernel(%arg0: i32, %arg1: memref<32x1152xbf16, #tpu.memory_space<vmem>>, %arg2: memref<1152x128xbf16, #tpu.memory_space<vmem>>, %arg3: memref<1x128xf32, #tpu.memory_space<vmem>>, %arg4: memref<32x128xf32, #tpu.memory_space<vmem>>) attributes {dimension_semantics = [#tpu.dimension_semantics<parallel>], iteration_bounds = array<i64: 1>, scalar_prefetch = 0 : i64, scratch_operands = 0 : i64, tpu.core_type = #tpu.core_type<tc>, window_params = [{transform_indices = @transform_0, window_bounds = array<i64: 32, 1152>}, {pipeline_mode = #tpu.pipeline_mode<synchronous>, transform_indices = @transform_1, window_bounds = array<i64: 1152, 128>}, {pipeline_mode = #tpu.pipeline_mode<synchronous>, transform_indices = @transform_2, window_bounds = array<i64: 1, 128>}, {transform_indices = @transform_3, window_bounds = array<i64: 32, 128>}]} {
    %c0 = arith.constant 0 : index
    %c0_0 = arith.constant 0 : index
    %0 = vector.load %arg1[%c0, %c0_0] : memref<32x1152xbf16, #tpu.memory_space<vmem>>, vector<32x1152xbf16>
    %c0_1 = arith.constant 0 : index
    %c0_2 = arith.constant 0 : index
    %1 = vector.load %arg2[%c0_1, %c0_2] : memref<1152x128xbf16, #tpu.memory_space<vmem>>, vector<1152x128xbf16>
    %cst = arith.constant dense<0.000000e+00> : vector<32x128xf32>
    %2 = tpu.matmul %0, %1, %cst {dimension_numbers = #tpu.dot_dimension_numbers<[1], [0], [0], [1], [0, 0, 1, 1], [], []>} : vector<32x1152xbf16>, vector<1152x128xbf16>, vector<32x128xf32> -> vector<32x128xf32>
    %c0_3 = arith.constant 0 : index
    %c0_4 = arith.constant 0 : index
    %3 = vector.load %arg3[%c0_3, %c0_4] : memref<1x128xf32, #tpu.memory_space<vmem>>, vector<1x128xf32>
    %4 = vector.broadcast %3 : vector<1x128xf32> to vector<32x128xf32>
    %5 = arith.addf %2, %4 : vector<32x128xf32>
    %cst_5 = arith.constant 0.000000e+00 : f32
    %6 = vector.broadcast %cst_5 : f32 to vector<32x128xf32>
    %7 = arith.maximumf %5, %6 : vector<32x128xf32>
    %c0_6 = arith.constant 0 : index
    %c0_7 = arith.constant 0 : index
    %8 = vector.load %arg4[%c0_6, %c0_7] : memref<32x128xf32, #tpu.memory_space<vmem>>, vector<32x128xf32>
    tpu.vector_store %arg4[%c0_6, %c0_7], %7 {strides = array<i32>} : memref<32x128xf32, #tpu.memory_space<vmem>>, vector<32x128xf32>,
    return
  }
  func.func @transform_0(%arg0: i32) -> (i32, i32) {
    %c0_i32 = arith.constant 0 : i32
    %c0_i32_0 = arith.constant 0 : i32
    return %arg0, %c0_i32 : i32, i32
  }
  func.func @transform_1(%arg0: i32) -> (i32, i32) {
    %c0_i32 = arith.constant 0 : i32
    %c0_i32_0 = arith.constant 0 : i32
    %c0_i32_1 = arith.constant 0 : i32
    return %c0_i32, %c0_i32_0 : i32, i32
  }
  func.func @transform_2(%arg0: i32) -> (i32, i32) {
    %c0_i32 = arith.constant 0 : i32
    %c0_i32_0 = arith.constant 0 : i32
    %c0_i32_1 = arith.constant 0 : i32
    return %c0_i32, %c0_i32_0 : i32, i32
  }
  func.func @transform_3(%arg0: i32) -> (i32, i32) {
    %c0_i32 = arith.constant 0 : i32
    %c0_i32_0 = arith.constant 0 : i32
    return %arg0, %c0_i32 : i32, i32
  }
}

module attributes {stable_mosaic.version = 11 : i64} {
  func.func @_conv_mm_kernel(%arg0: i32, %arg1: memref<128x1152xbf16, #tpu.memory_space<vmem>>, %arg2: memref<1152x64xbf16, #tpu.memory_space<vmem>>, %arg3: memref<1x64xf32, #tpu.memory_space<vmem>>, %arg4: memref<128x64xf32, #tpu.memory_space<vmem>>) attributes {dimension_semantics = [#tpu.dimension_semantics<parallel>], iteration_bounds = array<i64: 1>, scalar_prefetch = 0 : i64, scratch_operands = 0 : i64, tpu.core_type = #tpu.core_type<tc>, window_params = [{transform_indices = @transform_0, window_bounds = array<i64: 128, 1152>}, {pipeline_mode = #tpu.pipeline_mode<synchronous>, transform_indices = @transform_1, window_bounds = array<i64: 1152, 64>}, {pipeline_mode = #tpu.pipeline_mode<synchronous>, transform_indices = @transform_2, window_bounds = array<i64: 1, 64>}, {transform_indices = @transform_3, window_bounds = array<i64: 128, 64>}]} {
    %c0 = arith.constant 0 : index
    %c0_0 = arith.constant 0 : index
    %0 = vector.load %arg1[%c0, %c0_0] : memref<128x1152xbf16, #tpu.memory_space<vmem>>, vector<128x1152xbf16>
    %c0_1 = arith.constant 0 : index
    %c0_2 = arith.constant 0 : index
    %1 = vector.load %arg2[%c0_1, %c0_2] : memref<1152x64xbf16, #tpu.memory_space<vmem>>, vector<1152x64xbf16>
    %cst = arith.constant dense<0.000000e+00> : vector<128x64xf32>
    %2 = tpu.matmul %0, %1, %cst {dimension_numbers = #tpu.dot_dimension_numbers<[1], [0], [0], [1], [0, 0, 1, 1], [], []>} : vector<128x1152xbf16>, vector<1152x64xbf16>, vector<128x64xf32> -> vector<128x64xf32>
    %c0_3 = arith.constant 0 : index
    %c0_4 = arith.constant 0 : index
    %3 = vector.load %arg3[%c0_3, %c0_4] : memref<1x64xf32, #tpu.memory_space<vmem>>, vector<1x64xf32>
    %4 = vector.broadcast %3 : vector<1x64xf32> to vector<128x64xf32>
    %5 = arith.addf %2, %4 : vector<128x64xf32>
    %cst_5 = arith.constant 0.000000e+00 : f32
    %6 = vector.broadcast %cst_5 : f32 to vector<128x64xf32>
    %7 = arith.maximumf %5, %6 : vector<128x64xf32>
    %c0_6 = arith.constant 0 : index
    %c0_7 = arith.constant 0 : index
    %8 = vector.load %arg4[%c0_6, %c0_7] : memref<128x64xf32, #tpu.memory_space<vmem>>, vector<128x64xf32>
    tpu.vector_store %arg4[%c0_6, %c0_7], %7 {strides = array<i32>} : memref<128x64xf32, #tpu.memory_space<vmem>>, vector<128x64xf32>,
    return
  }
  func.func @transform_0(%arg0: i32) -> (i32, i32) {
    %c0_i32 = arith.constant 0 : i32
    %c0_i32_0 = arith.constant 0 : i32
    return %arg0, %c0_i32 : i32, i32
  }
  func.func @transform_1(%arg0: i32) -> (i32, i32) {
    %c0_i32 = arith.constant 0 : i32
    %c0_i32_0 = arith.constant 0 : i32
    %c0_i32_1 = arith.constant 0 : i32
    return %c0_i32, %c0_i32_0 : i32, i32
  }
  func.func @transform_2(%arg0: i32) -> (i32, i32) {
    %c0_i32 = arith.constant 0 : i32
    %c0_i32_0 = arith.constant 0 : i32
    %c0_i32_1 = arith.constant 0 : i32
    return %c0_i32, %c0_i32_0 : i32, i32
  }
  func.func @transform_3(%arg0: i32) -> (i32, i32) {
    %c0_i32 = arith.constant 0 : i32
    %c0_i32_0 = arith.constant 0 : i32
    return %arg0, %c0_i32 : i32, i32
  }
}

module attributes {stable_mosaic.version = 11 : i64} {
  func.func @_conv_mm_kernel(%arg0: i32, %arg1: memref<256x576xbf16, #tpu.memory_space<vmem>>, %arg2: memref<576x32xbf16, #tpu.memory_space<vmem>>, %arg3: memref<1x32xf32, #tpu.memory_space<vmem>>, %arg4: memref<256x32xf32, #tpu.memory_space<vmem>>) attributes {dimension_semantics = [#tpu.dimension_semantics<parallel>], iteration_bounds = array<i64: 2>, scalar_prefetch = 0 : i64, scratch_operands = 0 : i64, tpu.core_type = #tpu.core_type<tc>, window_params = [{transform_indices = @transform_0, window_bounds = array<i64: 256, 576>}, {pipeline_mode = #tpu.pipeline_mode<synchronous>, transform_indices = @transform_1, window_bounds = array<i64: 576, 32>}, {pipeline_mode = #tpu.pipeline_mode<synchronous>, transform_indices = @transform_2, window_bounds = array<i64: 1, 32>}, {transform_indices = @transform_3, window_bounds = array<i64: 256, 32>}]} {
    %c0 = arith.constant 0 : index
    %c0_0 = arith.constant 0 : index
    %0 = vector.load %arg1[%c0, %c0_0] : memref<256x576xbf16, #tpu.memory_space<vmem>>, vector<256x576xbf16>
    %c0_1 = arith.constant 0 : index
    %c0_2 = arith.constant 0 : index
    %1 = vector.load %arg2[%c0_1, %c0_2] : memref<576x32xbf16, #tpu.memory_space<vmem>>, vector<576x32xbf16>
    %cst = arith.constant dense<0.000000e+00> : vector<256x32xf32>
    %2 = tpu.matmul %0, %1, %cst {dimension_numbers = #tpu.dot_dimension_numbers<[1], [0], [0], [1], [0, 0, 1, 1], [], []>} : vector<256x576xbf16>, vector<576x32xbf16>, vector<256x32xf32> -> vector<256x32xf32>
    %c0_3 = arith.constant 0 : index
    %c0_4 = arith.constant 0 : index
    %3 = vector.load %arg3[%c0_3, %c0_4] : memref<1x32xf32, #tpu.memory_space<vmem>>, vector<1x32xf32>
    %4 = vector.broadcast %3 : vector<1x32xf32> to vector<256x32xf32>
    %5 = arith.addf %2, %4 : vector<256x32xf32>
    %cst_5 = arith.constant 0.000000e+00 : f32
    %6 = vector.broadcast %cst_5 : f32 to vector<256x32xf32>
    %7 = arith.maximumf %5, %6 : vector<256x32xf32>
    %c0_6 = arith.constant 0 : index
    %c0_7 = arith.constant 0 : index
    %8 = vector.load %arg4[%c0_6, %c0_7] : memref<256x32xf32, #tpu.memory_space<vmem>>, vector<256x32xf32>
    tpu.vector_store %arg4[%c0_6, %c0_7], %7 {strides = array<i32>} : memref<256x32xf32, #tpu.memory_space<vmem>>, vector<256x32xf32>,
    return
  }
  func.func @transform_0(%arg0: i32) -> (i32, i32) {
    %c0_i32 = arith.constant 0 : i32
    %c0_i32_0 = arith.constant 0 : i32
    return %arg0, %c0_i32 : i32, i32
  }
  func.func @transform_1(%arg0: i32) -> (i32, i32) {
    %c0_i32 = arith.constant 0 : i32
    %c0_i32_0 = arith.constant 0 : i32
    %c0_i32_1 = arith.constant 0 : i32
    return %c0_i32, %c0_i32_0 : i32, i32
  }
  func.func @transform_2(%arg0: i32) -> (i32, i32) {
    %c0_i32 = arith.constant 0 : i32
    %c0_i32_0 = arith.constant 0 : i32
    %c0_i32_1 = arith.constant 0 : i32
    return %c0_i32, %c0_i32_0 : i32, i32
  }
  func.func @transform_3(%arg0: i32) -> (i32, i32) {
    %c0_i32 = arith.constant 0 : i32
    %c0_i32_0 = arith.constant 0 : i32
    return %arg0, %c0_i32 : i32, i32
  }
}

module attributes {stable_mosaic.version = 11 : i64} {
  func.func @_conv_mm_kernel(%arg0: i32, %arg1: memref<256x2592xbf16, #tpu.memory_space<vmem>>, %arg2: memref<2592x3xbf16, #tpu.memory_space<vmem>>, %arg3: memref<1x3xf32, #tpu.memory_space<vmem>>, %arg4: memref<256x3xf32, #tpu.memory_space<vmem>>) attributes {dimension_semantics = [#tpu.dimension_semantics<parallel>], iteration_bounds = array<i64: 2>, scalar_prefetch = 0 : i64, scratch_operands = 0 : i64, tpu.core_type = #tpu.core_type<tc>, window_params = [{transform_indices = @transform_0, window_bounds = array<i64: 256, 2592>}, {pipeline_mode = #tpu.pipeline_mode<synchronous>, transform_indices = @transform_1, window_bounds = array<i64: 2592, 3>}, {pipeline_mode = #tpu.pipeline_mode<synchronous>, transform_indices = @transform_2, window_bounds = array<i64: 1, 3>}, {transform_indices = @transform_3, window_bounds = array<i64: 256, 3>}]} {
    %c0 = arith.constant 0 : index
    %c0_0 = arith.constant 0 : index
    %0 = vector.load %arg1[%c0, %c0_0] : memref<256x2592xbf16, #tpu.memory_space<vmem>>, vector<256x2592xbf16>
    %c0_1 = arith.constant 0 : index
    %c0_2 = arith.constant 0 : index
    %1 = vector.load %arg2[%c0_1, %c0_2] : memref<2592x3xbf16, #tpu.memory_space<vmem>>, vector<2592x3xbf16>
    %cst = arith.constant dense<0.000000e+00> : vector<256x3xf32>
    %2 = tpu.matmul %0, %1, %cst {dimension_numbers = #tpu.dot_dimension_numbers<[1], [0], [0], [1], [0, 0, 1, 1], [], []>} : vector<256x2592xbf16>, vector<2592x3xbf16>, vector<256x3xf32> -> vector<256x3xf32>
    %c0_3 = arith.constant 0 : index
    %c0_4 = arith.constant 0 : index
    %3 = vector.load %arg3[%c0_3, %c0_4] : memref<1x3xf32, #tpu.memory_space<vmem>>, vector<1x3xf32>
    %4 = vector.broadcast %3 : vector<1x3xf32> to vector<256x3xf32>
    %5 = arith.addf %2, %4 : vector<256x3xf32>
    %6 = arith.negf %5 : vector<256x3xf32>
    %7 = math.exp %6 : vector<256x3xf32>
    %cst_5 = arith.constant 1.000000e+00 : f32
    %8 = vector.broadcast %cst_5 : f32 to vector<256x3xf32>
    %9 = arith.addf %8, %7 : vector<256x3xf32>
    %10 = arith.divf %8, %9 : vector<256x3xf32>
    %c0_6 = arith.constant 0 : index
    %c0_7 = arith.constant 0 : index
    %11 = vector.load %arg4[%c0_6, %c0_7] : memref<256x3xf32, #tpu.memory_space<vmem>>, vector<256x3xf32>
    tpu.vector_store %arg4[%c0_6, %c0_7], %10 {strides = array<i32>} : memref<256x3xf32, #tpu.memory_space<vmem>>, vector<256x3xf32>,
    return
  }
  func.func @transform_0(%arg0: i32) -> (i32, i32) {
    %c0_i32 = arith.constant 0 : i32
    %c0_i32_0 = arith.constant 0 : i32
    return %arg0, %c0_i32 : i32, i32
  }
  func.func @transform_1(%arg0: i32) -> (i32, i32) {
    %c0_i32 = arith.constant 0 : i32
    %c0_i32_0 = arith.constant 0 : i32
    %c0_i32_1 = arith.constant 0 : i32
    return %c0_i32, %c0_i32_0 : i32, i32
  }
  func.func @transform_2(%arg0: i32) -> (i32, i32) {
    %c0_i32 = arith.constant 0 : i32
    %c0_i32_0 = arith.constant 0 : i32
    %c0_i32_1 = arith.constant 0 : i32
    return %c0_i32, %c0_i32_0 : i32, i32
  }
  func.func @transform_3(%arg0: i32) -> (i32, i32) {
    %c0_i32 = arith.constant 0 : i32
    %c0_i32_0 = arith.constant 0 : i32
    return %arg0, %c0_i32 : i32, i32
  }
}

</mosaic_0001>

<bundles_post_ra>
// kernel: transform_forward.20
= control target key start
LH: loop header
LB: loop body
LE: loop exit
PB: predicated region body
PF: predicated region fallthrough
CT: control target
= control target key end

     0   :  { %s454_s12 = smov 0   ;;  %s645_s0 = inlined_call_operand.vmem [shape: f32[512,32], index: 0, kind: input, shape index: {}]   ;;  %s646_s1 = inlined_call_operand.vmem [shape: f32[1,32], index: 1, kind: input, shape index: {}]   ;;  %s647_s2 = inlined_call_operand.vmem [shape: f32[1,32], index: 2, kind: input, shape index: {}]   ;;  %s648_s3 = inlined_call_operand.vmem [shape: f32[512,32], index: 3, kind: output, shape index: {}]  }
   0x1 LB: > { %s405_s13 = sadd.s32 4294967295, %s432_s12   ;;  %p409_p0 = scmp.ge.s32.totalorder %s432_s12, 1  ;;  %s432_s12 = sphi %s454_s12, %s13_s12  }
   0x2   : > { %p138_p1 = scmp.lt.s32.totalorder %s432_s12, 3 }
   0x4   : > { %p139_p2 = pnand %p409_p0, %p138_p1 }
   0x5   : > { %s410_s14 = sshll.u32 (!%p139_p2), %s405_s13, 5  ;;  %v465_v0 = vld [vmem:[%s646_s1] ss:$0 sm:$0xff] (!%p139_p2)  ;;  %vm316_vm0 = vcmask (!%p139_p2), 261120  }
   0x6   : > { %142 = sbr.rel (%p139_p2) target bundleno = 46 (0x2e), region = 32  ;;  %p163_p3 = scmp.lt.s32.totalorder (!%p139_p2), %s410_s14, 63  ;;  %v475_v1 = vld [vmem:[%s647_s2] ss:$0 sm:$0xff] (!%p139_p2) }
   0xd   : > { %s650_s14 = smov (!%p163_p3, %s410_s14), 63 }
   0xe   : > { %s411_s15 = sshll.u32 %s650_s14, 3 }
   0xf   : > { %s470_s20 = scalar_lea.vmem %s645_s0, %s411_s15  ;;  %s498_s25 = scalar_lea.vmem %s648_s3, %s411_s15 }
  0x10   : > { %v174_v2 = vld [vmem:[%s470_s20] sm:$0xff]  ;;  %v175_v3 = vld [vmem:[%s470_s20 + $0x8] sm:$0xff]  ;;  %v176_v4 = vld [vmem:[%s470_s20 + $0x10] sm:$0xff] }
  0x11   : > { %v213_v5 = vmul.f32 %v465_v0, %v174_v2  ;;  %v214_v6 = vmul.f32 %v465_v0, %v175_v3  ;;  %v215_v7 = vmul.f32 %v465_v0, %v176_v4  ;;  %v177_v8 = vld [vmem:[%s470_s20 + $0x18] sm:$0xff]  ;;  %v178_v9 = vld [vmem:[%s470_s20 + $0x20] sm:$0xff]  ;;  %v179_v10 = vld [vmem:[%s470_s20 + $0x28] sm:$0xff] }
  0x12   : > { %v216_v11 = vmul.f32 %v465_v0, %v177_v8  ;;  %v217_v12 = vmul.f32 %v465_v0, %v178_v9  ;;  %v218_v13 = vmul.f32 %v465_v0, %v179_v10  ;;  %v180_v14 = vld [vmem:[%s470_s20 + $0x30] sm:$0xff]  ;;  %v181_v15 = vld [vmem:[%s470_s20 + $0x38] sm:$0xff]  ;;  %v182_v24 = vld [vmem:[%s470_s20 + $0x40] sm:$0xff] }
  0x13   : > { %v252_v16 = vadd.f32 %v475_v1, %v213_v5  ;;  %v253_v17 = vadd.f32 %v475_v1, %v214_v6  ;;  %v254_v18 = vadd.f32 %v475_v1, %v215_v7  ;;  %v219_v19 = vmul.f32 %v465_v0, %v180_v14  ;;  %v183_v25 = vld [vmem:[%s470_s20 + $0x48] sm:$0xff]  ;;  %v184_v26 = vld [vmem:[%s470_s20 + $0x50] sm:$0xff]  ;;  %v185_v31 = vld [vmem:[%s470_s20 + $0x58] sm:$0xff] }
  0x14   : > { %v255_v20 = vadd.f32 %v475_v1, %v216_v11  ;;  %v256_v21 = vadd.f32 %v475_v1, %v217_v12  ;;  %v257_v22 = vadd.f32 %v475_v1, %v218_v13  ;;  %v220_v23 = vmul.f32 %v465_v0, %v181_v15  ;;  %v186_v32 = vld [vmem:[%s470_s20 + $0x60] sm:$0xff]  ;;  %v187_v33 = vld [vmem:[%s470_s20 + $0x68] sm:$0xff]  ;;  %v188_v38 = vld [vmem:[%s470_s20 + $0x70] sm:$0xff] }
  0x15   : > { %v284_v27 = vmax.f32 %v252_v16, 0.0  ;;  %v285_v28 = vmax.f32 %v253_v17, 0.0  ;;  %v286_v29 = vmax.f32 %v254_v18, 0.0  ;;  %v258_v30 = vadd.f32 %v475_v1, %v219_v19  ;;  %v189_v43 = vld [vmem:[%s470_s20 + $0x78] sm:$0xff]  ;;  %v190_v56 = vld [vmem:[%s470_s20 + $0x80] sm:$0xff]  ;;  %v191_v57 = vld [vmem:[%s470_s20 + $0x88] sm:$0xff] }
  0x16   : > { %v287_v34 = vmax.f32 %v255_v20, 0.0  ;;  %v288_v35 = vmax.f32 %v256_v21, 0.0  ;;  %v289_v36 = vmax.f32 %v257_v22, 0.0  ;;  %v259_v37 = vadd.f32 %v475_v1, %v220_v23  ;;  %v192_v58 = vld [vmem:[%s470_s20 + $0x90] sm:$0xff]  ;;  %v193_v63 = vld [vmem:[%s470_s20 + $0x98] sm:$0xff]  ;;  %v194_v2 = vld [vmem:[%s470_s20 + $0xa0] sm:$0xff] }
  0x17   : > { %317 = vst.msk [vmem:[%s498_s25] sm:$0xff] %vm316_vm0, %v284_v27  ;;  %318 = vst.msk [vmem:[%s498_s25 + $0x8] sm:$0xff] %vm316_vm0, %v285_v28  ;;  %v290_v39 = vmax.f32 %v258_v30, 0.0  ;;  %v221_v40 = vmul.f32 %v465_v0, %v182_v24  ;;  %v222_v41 = vmul.f32 %v465_v0, %v183_v25  ;;  %v223_v42 = vmul.f32 %v465_v0, %v184_v26  ;;  %v195_v3 = vld [vmem:[%s470_s20 + $0xa8] sm:$0xff]  ;;  %v196_v8 = vld [vmem:[%s470_s20 + $0xb0] sm:$0xff] }
  0x18   : > { %319 = vst.msk [vmem:[%s498_s25 + $0x10] sm:$0xff] %vm316_vm0, %v286_v29  ;;  %320 = vst.msk [vmem:[%s498_s25 + $0x18] sm:$0xff] %vm316_vm0, %v287_v34  ;;  %v291_v44 = vmax.f32 %v259_v37, 0.0  ;;  %v224_v45 = vmul.f32 %v465_v0, %v185_v31  ;;  %v225_v46 = vmul.f32 %v465_v0, %v186_v32  ;;  %v226_v47 = vmul.f32 %v465_v0, %v187_v33  ;;  %v197_v13 = vld [vmem:[%s470_s20 + $0xb8] sm:$0xff]  ;;  %v198_v26 = vld [vmem:[%s470_s20 + $0xc0] sm:$0xff] }
  0x19   : > { %321 = vst.msk [vmem:[%s498_s25 + $0x20] sm:$0xff] %vm316_vm0, %v288_v35  ;;  %322 = vst.msk [vmem:[%s498_s25 + $0x28] sm:$0xff] %vm316_vm0, %v289_v36  ;;  %v260_v48 = vadd.f32 %v475_v1, %v221_v40  ;;  %v261_v49 = vadd.f32 %v475_v1, %v222_v41  ;;  %v262_v50 = vadd.f32 %v475_v1, %v223_v42  ;;  %v199_v27 = vld [vmem:[%s470_s20 + $0xc8] sm:$0xff]  ;;  %v200_v28 = vld [vmem:[%s470_s20 + $0xd0] sm:$0xff] }
  0x1a   : > { %323 = vst.msk [vmem:[%s498_s25 + $0x30] sm:$0xff] %vm316_vm0, %v290_v39  ;;  %v227_v51 = vmul.f32 %v465_v0, %v188_v38  ;;  %324 = vst.msk [vmem:[%s498_s25 + $0x38] sm:$0xff] %vm316_vm0, %v291_v44  ;;  %v263_v52 = vadd.f32 %v475_v1, %v224_v45  ;;  %v264_v53 = vadd.f32 %v475_v1, %v225_v46  ;;  %v201_v33 = vld [vmem:[%s470_s20 + $0xd8] sm:$0xff]  ;;  %v202_v34 = vld [vmem:[%s470_s20 + $0xe0] sm:$0xff] }
  0x1b   : > { %v265_v54 = vadd.f32 %v475_v1, %v226_v47  ;;  %v228_v55 = vmul.f32 %v465_v0, %v189_v43  ;;  %v292_v59 = vmax.f32 %v260_v48, 0.0  ;;  %v293_v60 = vmax.f32 %v261_v49, 0.0  ;;  %v203_v35 = vld [vmem:[%s470_s20 + $0xe8] sm:$0xff]  ;;  %v204_v40 = vld [vmem:[%s470_s20 + $0xf0] sm:$0xff]  ;;  %v205_v45 = vld [vmem:[%s470_s20 + $0xf8] sm:$0xff] }
  0x1c   : > { %v294_v61 = vmax.f32 %v262_v50, 0.0  ;;  %v266_v62 = vadd.f32 %v475_v1, %v227_v51  ;;  %v295_v4 = vmax.f32 %v263_v52, 0.0  ;;  %v296_v5 = vmax.f32 %v264_v53, 0.0 }
  0x1d   : > { %v297_v6 = vmax.f32 %v265_v54, 0.0  ;;  %v267_v7 = vadd.f32 %v475_v1, %v228_v55  ;;  %325 = vst.msk [vmem:[%s498_s25 + $0x40] sm:$0xff] %vm316_vm0, %v292_v59  ;;  %326 = vst.msk [vmem:[%s498_s25 + $0x48] sm:$0xff] %vm316_vm0, %v293_v60  ;;  %v229_v10 = vmul.f32 %v465_v0, %v190_v56  ;;  %v230_v11 = vmul.f32 %v465_v0, %v191_v57 }
  0x1e   : > { %327 = vst.msk [vmem:[%s498_s25 + $0x50] sm:$0xff] %vm316_vm0, %v294_v61  ;;  %v298_v9 = vmax.f32 %v266_v62, 0.0  ;;  %v231_v12 = vmul.f32 %v465_v0, %v192_v58  ;;  %328 = vst.msk [vmem:[%s498_s25 + $0x58] sm:$0xff] %vm316_vm0, %v295_v4  ;;  %v232_v15 = vmul.f32 %v465_v0, %v193_v63  ;;  %v233_v16 = vmul.f32 %v465_v0, %v194_v2 }
  0x1f   : > { %329 = vst.msk [vmem:[%s498_s25 + $0x60] sm:$0xff] %vm316_vm0, %v296_v5  ;;  %330 = vst.msk [vmem:[%s498_s25 + $0x68] sm:$0xff] %vm316_vm0, %v297_v6  ;;  %v299_v14 = vmax.f32 %v267_v7, 0.0  ;;  %v234_v17 = vmul.f32 %v465_v0, %v195_v3  ;;  %v268_v18 = vadd.f32 %v475_v1, %v229_v10  ;;  %v269_v19 = vadd.f32 %v475_v1, %v230_v11 }
  0x20   : > { %331 = vst.msk [vmem:[%s498_s25 + $0x70] sm:$0xff] %vm316_vm0, %v298_v9  ;;  %v270_v20 = vadd.f32 %v475_v1, %v231_v12  ;;  %v235_v21 = vmul.f32 %v465_v0, %v196_v8  ;;  %v271_v22 = vadd.f32 %v475_v1, %v232_v15  ;;  %v272_v23 = vadd.f32 %v475_v1, %v233_v16 }
  0x21   : > { %332 = vst.msk [vmem:[%s498_s25 + $0x78] sm:$0xff] %vm316_vm0, %v299_v14  ;;  %v273_v24 = vadd.f32 %v475_v1, %v234_v17  ;;  %v236_v25 = vmul.f32 %v465_v0, %v197_v13  ;;  %v300_v29 = vmax.f32 %v268_v18, 0.0  ;;  %v301_v30 = vmax.f32 %v269_v19, 0.0 }
  0x22   : > { %v302_v31 = vmax.f32 %v270_v20, 0.0  ;;  %v274_v32 = vadd.f32 %v475_v1, %v235_v21  ;;  %v303_v36 = vmax.f32 %v271_v22, 0.0  ;;  %v304_v37 = vmax.f32 %v272_v23, 0.0 }
  0x23   : > { %v305_v38 = vmax.f32 %v273_v24, 0.0  ;;  %v275_v39 = vadd.f32 %v475_v1, %v236_v25  ;;  %333 = vst.msk [vmem:[%s498_s25 + $0x80] sm:$0xff] %vm316_vm0, %v300_v29  ;;  %334 = vst.msk [vmem:[%s498_s25 + $0x88] sm:$0xff] %vm316_vm0, %v301_v30  ;;  %v237_v42 = vmul.f32 %v465_v0, %v198_v26  ;;  %v238_v43 = vmul.f32 %v465_v0, %v199_v27 }
  0x24   : > { %335 = vst.msk [vmem:[%s498_s25 + $0x90] sm:$0xff] %vm316_vm0, %v302_v31  ;;  %v306_v41 = vmax.f32 %v274_v32, 0.0  ;;  %v239_v44 = vmul.f32 %v465_v0, %v200_v28  ;;  %336 = vst.msk [vmem:[%s498_s25 + $0x98] sm:$0xff] %vm316_vm0, %v303_v36  ;;  %v240_v47 = vmul.f32 %v465_v0, %v201_v33  ;;  %v241_v48 = vmul.f32 %v465_v0, %v202_v34 }
  0x25   : > { %337 = vst.msk [vmem:[%s498_s25 + $0xa0] sm:$0xff] %vm316_vm0, %v304_v37  ;;  %338 = vst.msk [vmem:[%s498_s25 + $0xa8] sm:$0xff] %vm316_vm0, %v305_v38  ;;  %v307_v46 = vmax.f32 %v275_v39, 0.0  ;;  %v242_v49 = vmul.f32 %v465_v0, %v203_v35  ;;  %v276_v50 = vadd.f32 %v475_v1, %v237_v42  ;;  %v277_v51 = vadd.f32 %v475_v1, %v238_v43 }
  0x26   : > { %339 = vst.msk [vmem:[%s498_s25 + $0xb0] sm:$0xff] %vm316_vm0, %v306_v41  ;;  %v278_v52 = vadd.f32 %v475_v1, %v239_v44  ;;  %v243_v53 = vmul.f32 %v465_v0, %v204_v40  ;;  %v279_v54 = vadd.f32 %v475_v1, %v240_v47  ;;  %v280_v55 = vadd.f32 %v475_v1, %v241_v48 }
  0x27   : > { %340 = vst.msk [vmem:[%s498_s25 + $0xb8] sm:$0xff] %vm316_vm0, %v307_v46  ;;  %v281_v56 = vadd.f32 %v475_v1, %v242_v49  ;;  %v244_v57 = vmul.f32 %v465_v0, %v205_v45  ;;  %v308_v58 = vmax.f32 %v276_v50, 0.0  ;;  %v309_v59 = vmax.f32 %v277_v51, 0.0 }
  0x28   : > { %v310_v60 = vmax.f32 %v278_v52, 0.0  ;;  %v282_v61 = vadd.f32 %v475_v1, %v243_v53  ;;  %v311_v62 = vmax.f32 %v279_v54, 0.0  ;;  %v312_v63 = vmax.f32 %v280_v55, 0.0 }
  0x29   : > { %v313_v2 = vmax.f32 %v281_v56, 0.0  ;;  %v283_v3 = vadd.f32 %v475_v1, %v244_v57  ;;  %341 = vst.msk [vmem:[%s498_s25 + $0xc0] sm:$0xff] %vm316_vm0, %v308_v58  ;;  %342 = vst.msk [vmem:[%s498_s25 + $0xc8] sm:$0xff] %vm316_vm0, %v309_v59 }
  0x2a   : > { %343 = vst.msk [vmem:[%s498_s25 + $0xd0] sm:$0xff] %vm316_vm0, %v310_v60  ;;  %v314_v4 = vmax.f32 %v282_v61, 0.0  ;;  %344 = vst.msk [vmem:[%s498_s25 + $0xd8] sm:$0xff] %vm316_vm0, %v311_v62 }
  0x2b   : > { %345 = vst.msk [vmem:[%s498_s25 + $0xe0] sm:$0xff] %vm316_vm0, %v312_v63  ;;  %346 = vst.msk [vmem:[%s498_s25 + $0xe8] sm:$0xff] %vm316_vm0, %v313_v2  ;;  %v315_v0 = vmax.f32 %v283_v3, 0.0 }
  0x2c   : > { %347 = vst.msk [vmem:[%s498_s25 + $0xf0] sm:$0xff] %vm316_vm0, %v314_v4 }
  0x2d   : > { %348 = vst.msk [vmem:[%s498_s25 + $0xf8] sm:$0xff] %vm316_vm0, %v315_v0 }
  0x2e PF: > { %s13_s12 = sadd.s32 1, %s432_s12  }
  0x2f   : > { %p10_p4 = scmp.ge.s32.totalorder %s13_s12, 4  }
  0x31   :  { %12 = sbr.rel (!%p10_p4) target bundleno = 1 (0x1), region = 62 }

// kernel: transform_forward.19
= control target key start
LH: loop header
LB: loop body
LE: loop exit
PB: predicated region body
PF: predicated region fallthrough
CT: control target
= control target key end

     0   :  { %s1587_s18 = smov 0   ;;  %s2316_s0 = inlined_call_operand.vmem [shape: bf16[512,243], index: 0, kind: input, shape index: {}]   ;;  %s2317_s1 = inlined_call_operand.vmem [shape: bf16[243,32], index: 1, kind: input, shape index: {}]   ;;  %s2318_s2 = inlined_call_operand.vmem [shape: f32[1,32], index: 2, kind: input, shape index: {}]   ;;  %s2319_s3 = inlined_call_operand.vmem [shape: f32[512,32], index: 3, kind: output, shape index: {0}]   ;;  %s2320_s4 = inlined_call_operand.vmem [shape: f32[1,32], index: 4, kind: output, shape index: {1}]   ;;  %s2321_s5 = inlined_call_operand.vmem [shape: f32[1,32], index: 5, kind: output, shape index: {2}]  }
   0x1 LB: > { %s1593_s19 = sadd.s32 4294967295, %s1552_s18   ;;  %p1235_p0 = scmp.ge.s32.totalorder %s1552_s18, 1  ;;  %s1552_s18 = sphi %s1587_s18, %s16_s18  }
   0x2   : > { %p184_p1 = scmp.lt.s32.totalorder %s1552_s18, 3 }
   0x4   : > { %p185_p2 = pnand %p1235_p0, %p184_p1 }
   0x6   : > { %188 = sbr.rel (%p185_p2) target bundleno = 437 (0x1b5), region = 32 }
   0xd   : > { %v1482_v0 = vld [vmem:[%s2317_s1 + $0x40] sm:$0xff]   ;;  %v1484_v2 = vld [vmem:[%s2317_s1 + $0x48] sm:$0xff]   ;;  %v1486_v4 = vld [vmem:[%s2317_s1 + $0x50] sm:$0xff]   ;;  %s1236_s30 = sshll.u32 %s1593_s19, 5  ;;  %vm583_vm0 = vcmask 1040384   ;;  %vm534_vm1 = vcmask 941056  }
   0xe   : > { %v1483_v1 = vld [vmem:[%s2317_s1] sm:$0xff]   ;;  %1343 = vmatprep.subr.bf16.mxu0 %v1482_v0  ;;  %1455 = vmatprep.subr.bf16.mxu1 %v1482_v0  ;;  %v1485_v3 = vld [vmem:[%s2317_s1 + $0x8] sm:$0xff]   ;;  %p214_p3 = scmp.lt.s32.totalorder %s1236_s30, 63  ;;  %v1487_v5 = vld [vmem:[%s2317_s1 + $0x10] sm:$0xff]   ;;  %vm584_vm2 = vcmask 1041408   ;;  %v1554_v12 = vmov 65535  }
   0xf   : > { %1344 = vmatpush3.bf16.msra.mxu0 %v1483_v1  ;;  %1463 = vmatpush3.bf16.msra.mxu1 %v1483_v1  ;;  %v1488_v6 = vld [vmem:[%s2317_s1 + $0x58] sm:$0xff]   ;;  %v1490_v8 = vld [vmem:[%s2317_s1 + $0x60] sm:$0xff]   ;;  %v1492_v10 = vld [vmem:[%s2317_s1 + $0x68] sm:$0xff]   ;;  %v585_v13 = vsel %vm583_vm0, 4294967295, %v1554_v12  ;;  %p1306_p4 = scmp.ne.s32.totalorder %s1593_s19, 0 }
  0x10   : > { %1345 = vmatprep.subr.bf16.mxu0 %v1484_v2  ;;  %1456 = vmatprep.subr.bf16.mxu1 %v1484_v2  ;;  %s2350_s30 = smov (!%p214_p3, %s1236_s30), 63  ;;  %v1489_v7 = vld [vmem:[%s2317_s1 + $0x18] sm:$0xff]   ;;  %v1491_v9 = vld [vmem:[%s2317_s1 + $0x20] sm:$0xff]   ;;  %v1493_v15 = vld [vmem:[%s2317_s1 + $0x28] sm:$0xff]   ;;  %v586_v18 = vsel %vm584_vm2, %v585_v13, 0  ;;  %vm755_vm3 = vcmask (!%p1306_p4), 253952  }
  0x11   : > { %s1342_s10 = sshll.u32 %s2350_s30, 3  ;;  %v1494_v16 = vld [vmem:[%s2317_s1 + $0x70] sm:$0xff]   ;;  %v1496_v17 = vld [vmem:[%s2317_s1 + $0x78] ss:$0 sps:$4 sm:$0x33]  }
  0x12   : > { %s1625_s15 = scalar_lea.vmem %s2319_s3, %s1342_s10  ;;  %s1633_s22 = scalar_lea.vmem %s2316_s0, %s1342_s10  ;;  %v1495_v19 = vld [vmem:[%s2317_s1 + $0x30] sm:$0xff]   ;;  %v588_v20 = vand.u32 %v1496_v17, %v586_v18  ;;  %v1497_v21 = vld [vmem:[%s2317_s1 + $0x38] sm:$0xff]   ;;  %v1707_v54 = vld [vmem:[%s2318_s2] ss:$0 sm:$0xff] }
  0x13   : > { %1346 = vmatpush3.bf16.msra.mxu0 %v1485_v3  ;;  %1464 = vmatpush3.bf16.msra.mxu1 %v1485_v3  ;;  %v1500_v11 = vld [vmem:[%s1633_s22 + $0x4] ss:$8 sps:$4 sm:$0xff]   ;;  %v1498_v22 = vld [vmem:[%s1633_s22] ss:$8 sps:$4 sm:$0xff]   ;;  %v1504_v24 = vld [vmem:[%s1633_s22 + $0x14] ss:$8 sps:$4 sm:$0xff]  }
  0x14   : > { %1347 = vmatprep.subr.bf16.mxu0 %v1486_v4  ;;  %1457 = vmatprep.subr.bf16.mxu1 %v1486_v4  ;;  %v1503_v14 = vld [vmem:[%s1633_s22 + $0x84] ss:$8 sps:$4 sm:$0xff]   ;;  %v1501_v23 = vld [vmem:[%s1633_s22 + $0x80] ss:$8 sps:$4 sm:$0xff]   ;;  %v1506_v25 = vld [vmem:[%s1633_s22 + $0x94] ss:$8 sps:$4 sm:$0xff]  }
  0x15   : > { %1290 = vmatprep.mubr.msk.bf16.mxu0 %vm534_vm1, %v1500_v11  ;;  %1298 = vmatprep.mubr.msk.bf16.mxu1 %vm534_vm1, %v1503_v14  ;;  %v1508_v26 = vld [vmem:[%s1633_s22 + $0x10] ss:$8 sps:$4 sm:$0xff]   ;;  %v1510_v28 = vld [vmem:[%s1633_s22 + $0x24] ss:$8 sps:$4 sm:$0xff]   ;;  %v1514_v30 = vld [vmem:[%s1633_s22 + $0x20] ss:$8 sps:$4 sm:$0xff]  }
  0x16   : > { %v1509_v27 = vld [vmem:[%s1633_s22 + $0x90] ss:$8 sps:$4 sm:$0xff]   ;;  %v1512_v29 = vld [vmem:[%s1633_s22 + $0xa4] ss:$8 sps:$4 sm:$0xff]   ;;  %v1515_v31 = vld [vmem:[%s1633_s22 + $0xa0] ss:$8 sps:$4 sm:$0xff]  }
  0x17   : > { %1348 = vmatpush3.bf16.msra.mxu0 %v1487_v5  ;;  %1465 = vmatpush3.bf16.msra.mxu1 %v1487_v5  ;;  %v1516_v32 = vld [vmem:[%s1633_s22 + $0x34] ss:$8 sps:$4 sm:$0xff]   ;;  %v1520_v34 = vld [vmem:[%s1633_s22 + $0x30] ss:$8 sps:$4 sm:$0xff]   ;;  %v1522_v36 = vld [vmem:[%s1633_s22 + $0x44] ss:$8 sps:$4 sm:$0xff]  }
  0x18   : > { %1349 = vmatprep.subr.bf16.mxu0 %v1488_v6  ;;  %1458 = vmatprep.subr.bf16.mxu1 %v1488_v6  ;;  %v1518_v33 = vld [vmem:[%s1633_s22 + $0xb4] ss:$8 sps:$4 sm:$0xff]   ;;  %v1521_v35 = vld [vmem:[%s1633_s22 + $0xb0] ss:$8 sps:$4 sm:$0xff]   ;;  %v1524_v37 = vld [vmem:[%s1633_s22 + $0xc4] ss:$8 sps:$4 sm:$0xff]  }
  0x19   : > { %v1526_v38 = vld [vmem:[%s1633_s22 + $0x40] ss:$8 sps:$4 sm:$0xff]   ;;  %v1528_v40 = vld [vmem:[%s1633_s22 + $0x54] ss:$8 sps:$4 sm:$0xff]   ;;  %v1532_v42 = vld [vmem:[%s1633_s22 + $0x50] ss:$8 sps:$4 sm:$0xff]  }
  0x1a   : > { %v1527_v39 = vld [vmem:[%s1633_s22 + $0xc0] ss:$8 sps:$4 sm:$0xff]   ;;  %v1530_v41 = vld [vmem:[%s1633_s22 + $0xd4] ss:$8 sps:$4 sm:$0xff]   ;;  %v1533_v43 = vld [vmem:[%s1633_s22 + $0xd0] ss:$8 sps:$4 sm:$0xff]  }
  0x1b   : > { %1350 = vmatpush3.bf16.msra.mxu0 %v1489_v7  ;;  %1466 = vmatpush3.bf16.msra.mxu1 %v1489_v7  ;;  %v1534_v44 = vld [vmem:[%s1633_s22 + $0x64] ss:$8 sps:$4 sm:$0xff]   ;;  %v1538_v46 = vld [vmem:[%s1633_s22 + $0x60] ss:$8 sps:$4 sm:$0xff]   ;;  %v1540_v48 = vld [vmem:[%s1633_s22 + $0x74] ss:$8 sps:$4 sm:$0xff]  }
  0x1c   : > { %1351 = vmatprep.subr.bf16.mxu0 %v1490_v8  ;;  %1459 = vmatprep.subr.bf16.mxu1 %v1490_v8  ;;  %v1536_v45 = vld [vmem:[%s1633_s22 + $0xe4] ss:$8 sps:$4 sm:$0xff]   ;;  %v1539_v47 = vld [vmem:[%s1633_s22 + $0xe0] ss:$8 sps:$4 sm:$0xff]   ;;  %v1542_v49 = vld [vmem:[%s1633_s22 + $0xf4] ss:$8 sps:$4 sm:$0xff]  }
  0x1d   : > { %v1544_v50 = vld [vmem:[%s1633_s22 + $0x70] ss:$8 sps:$4 sm:$0xff]  }
  0x1e   : > { %v1545_v51 = vld [vmem:[%s1633_s22 + $0xf0] ss:$8 sps:$4 sm:$0xff]  }
  0x1f   : > { %1352 = vmatpush3.bf16.msra.mxu0 %v1491_v9  ;;  %1467 = vmatpush3.bf16.msra.mxu1 %v1491_v9 }
  0x20   : > { %1353 = vmatprep.subr.bf16.mxu0 %v1492_v10  ;;  %1460 = vmatprep.subr.bf16.mxu1 %v1492_v10 }
  0x23   : > { %1354 = vmatpush3.bf16.msra.mxu0 %v1493_v15  ;;  %1468 = vmatpush3.bf16.msra.mxu1 %v1493_v15 }
  0x24   : > { %1355 = vmatprep.subr.bf16.mxu0 %v1494_v16  ;;  %1461 = vmatprep.subr.bf16.mxu1 %v1494_v16 }
  0x27   : > { %1356 = vmatpush3.bf16.msra.mxu0 %v1495_v19  ;;  %1469 = vmatpush3.bf16.msra.mxu1 %v1495_v19 }
  0x28   : > { %1357 = vmatprep.subr.bf16.mxu0 %v588_v20  ;;  %1462 = vmatprep.subr.bf16.mxu1 %v588_v20 }
  0x2b   : > { %1358 = vmatpush3.bf16.msra.mxu0 %v1497_v21  ;;  %1470 = vmatpush3.bf16.msra.mxu1 %v1497_v21 }
  0x2e   : > { %623 = vmatmul.mubr.bf16.vlgmr.msra.gmra.mrb[0].mxu0 %v1498_v22  ;;  %687 = vmatmul.mubr.bf16.vlgmr.msra.gmra.mrb[0].mxu1 %v1501_v23 }
  0x2f   : > { %1291 = vmatprep.mubr.msk.bf16.mxu0 %vm534_vm1, %v1504_v24  ;;  %1299 = vmatprep.mubr.msk.bf16.mxu1 %vm534_vm1, %v1506_v25 }
  0x36   : > { %631 = vmatmul.mubr.bf16.gmra.mrb[4].mxu0 %v1508_v26  ;;  %695 = vmatmul.mubr.bf16.gmra.mrb[4].mxu1 %v1509_v27 }
  0x37   : > { %1292 = vmatprep.mubr.msk.bf16.mxu0 %vm534_vm1, %v1510_v28  ;;  %1300 = vmatprep.mubr.msk.bf16.mxu1 %vm534_vm1, %v1512_v29 }
  0x3e   : > { %639 = vmatmul.mubr.bf16.gmra.mrb[8].mxu0 %v1514_v30  ;;  %703 = vmatmul.mubr.bf16.gmra.mrb[8].mxu1 %v1515_v31 }
  0x3f   : > { %1293 = vmatprep.mubr.msk.bf16.mxu0 %vm534_vm1, %v1516_v32  ;;  %1301 = vmatprep.mubr.msk.bf16.mxu1 %vm534_vm1, %v1518_v33 }
  0x46   : > { %647 = vmatmul.mubr.bf16.gmra.mrb[12].mxu0 %v1520_v34  ;;  %711 = vmatmul.mubr.bf16.gmra.mrb[12].mxu1 %v1521_v35 }
  0x47   : > { %1294 = vmatprep.mubr.msk.bf16.mxu0 %vm534_vm1, %v1522_v36  ;;  %1302 = vmatprep.mubr.msk.bf16.mxu1 %vm534_vm1, %v1524_v37 }
  0x4e   : > { %655 = vmatmul.mubr.bf16.gmra.mrb[16].mxu0 %v1526_v38  ;;  %719 = vmatmul.mubr.bf16.gmra.mrb[16].mxu1 %v1527_v39 }
  0x4f   : > { %1295 = vmatprep.mubr.msk.bf16.mxu0 %vm534_vm1, %v1528_v40  ;;  %1303 = vmatprep.mubr.msk.bf16.mxu1 %vm534_vm1, %v1530_v41 }
  0x56   : > { %663 = vmatmul.mubr.bf16.gmra.mrb[20].mxu0 %v1532_v42  ;;  %727 = vmatmul.mubr.bf16.gmra.mrb[20].mxu1 %v1533_v43 }
  0x57   : > { %1296 = vmatprep.mubr.msk.bf16.mxu0 %vm534_vm1, %v1534_v44  ;;  %1304 = vmatprep.mubr.msk.bf16.mxu1 %vm534_vm1, %v1536_v45 }
  0x5e   : > { %671 = vmatmul.mubr.bf16.gmra.mrb[24].mxu0 %v1538_v46  ;;  %735 = vmatmul.mubr.bf16.gmra.mrb[24].mxu1 %v1539_v47 }
  0x5f   : > { %1297 = vmatprep.mubr.msk.bf16.mxu0 %vm534_vm1, %v1540_v48  ;;  %1305 = vmatprep.mubr.msk.bf16.mxu1 %vm534_vm1, %v1542_v49 }
  0x66   : > { %679 = vmatmul.mubr.bf16.gmra.mrb[28].mxu0 %v1544_v50  ;;  %743 = vmatmul.mubr.bf16.gmra.mrb[28].mxu1 %v1545_v51 }
 0x101   : > { %v1359_v52 = vpop.f32.mrb[0].mxu0  ;;  %v1407_v53 = vpop.f32.mrb[0].mxu1 }
 0x102   : > { %v1360_v55 = vpop.f32.mrb[1].mxu0  ;;  %v1408_v56 = vpop.f32.mrb[1].mxu1 }
 0x103   : > { %v1361_v57 = vadd.f32 %v1360_v55, %v1359_v52  ;;  %v1409_v58 = vadd.f32 %v1408_v56, %v1407_v53  ;;  %v1362_v59 = vpop.f32.mrb[2].mxu0  ;;  %v1410_v60 = vpop.f32.mrb[2].mxu1 }
 0x104   : > { %v1363_v61 = vpop.f32.mrb[3].mxu0  ;;  %v1411_v62 = vpop.f32.mrb[3].mxu1 }
 0x105   : > { %v1710_v63 = vadd.f32 %v1361_v57, %v1707_v54  ;;  %v1713_v0 = vadd.f32 %v1409_v58, %v1707_v54  ;;  %v1364_v1 = vadd.f32 %v1363_v61, %v1362_v59  ;;  %v1412_v2 = vadd.f32 %v1411_v62, %v1410_v60 }
 0x107   : > { %v1716_v3 = vadd.f32 %v1364_v1, %v1707_v54  ;;  %v1719_v4 = vadd.f32 %v1412_v2, %v1707_v54 }
 0x109   : > { %v1365_v5 = vpop.f32.mrb[4].mxu0  ;;  %v1413_v6 = vpop.f32.mrb[4].mxu1 }
 0x10a   : > { %v1366_v7 = vpop.f32.mrb[5].mxu0  ;;  %v1414_v8 = vpop.f32.mrb[5].mxu1 }
 0x10b   : > { %v1367_v9 = vadd.f32 %v1366_v7, %v1365_v5  ;;  %v1415_v10 = vadd.f32 %v1414_v8, %v1413_v6  ;;  %v1368_v11 = vpop.f32.mrb[6].mxu0  ;;  %v1416_v12 = vpop.f32.mrb[6].mxu1 }
 0x10c   : > { %v1369_v13 = vpop.f32.mrb[7].mxu0  ;;  %v1417_v14 = vpop.f32.mrb[7].mxu1 }
 0x10d   : > { %v1722_v15 = vadd.f32 %v1367_v9, %v1707_v54  ;;  %v1725_v16 = vadd.f32 %v1415_v10, %v1707_v54  ;;  %v1370_v17 = vadd.f32 %v1369_v13, %v1368_v11  ;;  %v1418_v18 = vadd.f32 %v1417_v14, %v1416_v12 }
 0x10f   : > { %v1728_v19 = vadd.f32 %v1370_v17, %v1707_v54  ;;  %v1731_v20 = vadd.f32 %v1418_v18, %v1707_v54 }
 0x111   : > { %v1371_v21 = vpop.f32.mrb[8].mxu0  ;;  %v1419_v22 = vpop.f32.mrb[8].mxu1 }
 0x112   : > { %v1372_v23 = vpop.f32.mrb[9].mxu0  ;;  %v1420_v24 = vpop.f32.mrb[9].mxu1 }
 0x113   : > { %v1373_v25 = vadd.f32 %v1372_v23, %v1371_v21  ;;  %v1421_v26 = vadd.f32 %v1420_v24, %v1419_v22  ;;  %v1374_v27 = vpop.f32.mrb[10].mxu0  ;;  %v1422_v28 = vpop.f32.mrb[10].mxu1 }
 0x114   : > { %v1375_v29 = vpop.f32.mrb[11].mxu0  ;;  %v1423_v30 = vpop.f32.mrb[11].mxu1 }
 0x115   : > { %v1734_v31 = vadd.f32 %v1373_v25, %v1707_v54  ;;  %v1737_v32 = vadd.f32 %v1421_v26, %v1707_v54  ;;  %v1376_v33 = vadd.f32 %v1375_v29, %v1374_v27  ;;  %v1424_v34 = vadd.f32 %v1423_v30, %v1422_v28 }
 0x117   : > { %v1740_v35 = vadd.f32 %v1376_v33, %v1707_v54  ;;  %v1743_v36 = vadd.f32 %v1424_v34, %v1707_v54 }
 0x119   : > { %v1377_v37 = vpop.f32.mrb[12].mxu0  ;;  %v1425_v38 = vpop.f32.mrb[12].mxu1 }
 0x11a   : > { %v1378_v39 = vpop.f32.mrb[13].mxu0  ;;  %v1426_v40 = vpop.f32.mrb[13].mxu1 }
 0x11b   : > { %v1379_v41 = vadd.f32 %v1378_v39, %v1377_v37  ;;  %v1427_v42 = vadd.f32 %v1426_v40, %v1425_v38  ;;  %v1380_v43 = vpop.f32.mrb[14].mxu0  ;;  %v1428_v44 = vpop.f32.mrb[14].mxu1 }
 0x11c   : > { %v1381_v45 = vpop.f32.mrb[15].mxu0  ;;  %v1429_v46 = vpop.f32.mrb[15].mxu1 }
 0x11d   : > { %v1746_v47 = vadd.f32 %v1379_v41, %v1707_v54  ;;  %v1749_v48 = vadd.f32 %v1427_v42, %v1707_v54  ;;  %v1382_v49 = vadd.f32 %v1381_v45, %v1380_v43  ;;  %v1430_v50 = vadd.f32 %v1429_v46, %v1428_v44 }
 0x11f   : > { %v1752_v51 = vadd.f32 %v1382_v49, %v1707_v54  ;;  %v1755_v52 = vadd.f32 %v1430_v50, %v1707_v54 }
 0x121   : > { %2331 = vst [vmem:[#allocation2_spill] sm:$0xff] %v1755_v52  ;;  %v1383_v53 = vpop.f32.mrb[16].mxu0  ;;  %v1431_v55 = vpop.f32.mrb[16].mxu1 }
 0x122   : > { %v1384_v56 = vpop.f32.mrb[17].mxu0  ;;  %v1432_v57 = vpop.f32.mrb[17].mxu1 }
 0x123   : > { %v1385_v58 = vadd.f32 %v1384_v56, %v1383_v53  ;;  %v1433_v59 = vadd.f32 %v1432_v57, %v1431_v55  ;;  %v1386_v60 = vpop.f32.mrb[18].mxu0  ;;  %v1434_v61 = vpop.f32.mrb[18].mxu1 }
 0x124   : > { %v1387_v62 = vpop.f32.mrb[19].mxu0  ;;  %v1435_v1 = vpop.f32.mrb[19].mxu1 }
 0x125   : > { %v1758_v2 = vadd.f32 %v1385_v58, %v1707_v54  ;;  %v1761_v5 = vadd.f32 %v1433_v59, %v1707_v54  ;;  %v1388_v6 = vadd.f32 %v1387_v62, %v1386_v60  ;;  %v1436_v7 = vadd.f32 %v1435_v1, %v1434_v61 }
 0x127   : > { %2332 = vst [vmem:[#allocation3_spill] sm:$0xff] %v1761_v5  ;;  %v1764_v8 = vadd.f32 %v1388_v6, %v1707_v54  ;;  %v1767_v9 = vadd.f32 %v1436_v7, %v1707_v54 }
 0x129   : > { %2333 = vst [vmem:[#allocation4_spill] sm:$0xff] %v1767_v9  ;;  %v1389_v10 = vpop.f32.mrb[20].mxu0  ;;  %v1437_v11 = vpop.f32.mrb[20].mxu1 }
 0x12a   : > { %v1390_v12 = vpop.f32.mrb[21].mxu0  ;;  %v1438_v13 = vpop.f32.mrb[21].mxu1 }
 0x12b   : > { %v1391_v14 = vadd.f32 %v1390_v12, %v1389_v10  ;;  %v1439_v17 = vadd.f32 %v1438_v13, %v1437_v11  ;;  %v1392_v18 = vpop.f32.mrb[22].mxu0  ;;  %v1440_v21 = vpop.f32.mrb[22].mxu1 }
 0x12c   : > { %v1393_v22 = vpop.f32.mrb[23].mxu0  ;;  %v1441_v23 = vpop.f32.mrb[23].mxu1 }
 0x12d   : > { %v1770_v24 = vadd.f32 %v1391_v14, %v1707_v54  ;;  %v1773_v25 = vadd.f32 %v1439_v17, %v1707_v54  ;;  %v1394_v26 = vadd.f32 %v1393_v22, %v1392_v18  ;;  %v1442_v27 = vadd.f32 %v1441_v23, %v1440_v21 }
 0x12e   : > { %v1555_v17 = vmov (!%p1306_p4), 0.0  }
 0x12f   : > { %2334 = vst [vmem:[#allocation5_spill] sm:$0xff] %v1773_v25  ;;  %v1776_v28 = vadd.f32 %v1394_v26, %v1707_v54  ;;  %v1779_v29 = vadd.f32 %v1442_v27, %v1707_v54  ;;  %756 = vst.msk [vmem:[%s2320_s4] sm:$0x1] (!%p1306_p4), %vm755_vm3, %v1555_v17 }
 0x130   : > { %757 = vst.msk [vmem:[%s2321_s5] sm:$0x1] (!%p1306_p4), %vm755_vm3, %v1555_v17 }
 0x131   : > { %2335 = vst [vmem:[#allocation6_spill] sm:$0xff] %v1779_v29  ;;  %v1395_v30 = vpop.f32.mrb[24].mxu0  ;;  %v1443_v33 = vpop.f32.mrb[24].mxu1 }
 0x132   : > { %v1396_v34 = vpop.f32.mrb[25].mxu0  ;;  %v1444_v37 = vpop.f32.mrb[25].mxu1 }
 0x133   : > { %v1397_v38 = vadd.f32 %v1396_v34, %v1395_v30  ;;  %v1445_v39 = vadd.f32 %v1444_v37, %v1443_v33  ;;  %v1398_v40 = vpop.f32.mrb[26].mxu0  ;;  %v1446_v41 = vpop.f32.mrb[26].mxu1 }
 0x134   : > { %v1399_v42 = vpop.f32.mrb[27].mxu0  ;;  %v1447_v43 = vpop.f32.mrb[27].mxu1 }
 0x135   : > { %v1782_v44 = vadd.f32 %v1397_v38, %v1707_v54  ;;  %v1785_v45 = vadd.f32 %v1445_v39, %v1707_v54  ;;  %v1400_v46 = vadd.f32 %v1399_v42, %v1398_v40  ;;  %v1448_v49 = vadd.f32 %v1447_v43, %v1446_v41 }
 0x137   : > { %2336 = vst [vmem:[#allocation7_spill] sm:$0xff] %v1785_v45  ;;  %v1788_v50 = vadd.f32 %v1400_v46, %v1707_v54  ;;  %v1791_v53 = vadd.f32 %v1448_v49, %v1707_v54 }
 0x139   : > { %2337 = vst [vmem:[#allocation8_spill] sm:$0xff] %v1791_v53  ;;  %v1401_v55 = vpop.f32.mrb[28].mxu0  ;;  %v1449_v56 = vpop.f32.mrb[28].mxu1 }
 0x13a   : > { %v1402_v57 = vpop.f32.mrb[29].mxu0  ;;  %v1450_v58 = vpop.f32.mrb[29].mxu1 }
 0x13b   : > { %v1403_v59 = vadd.f32 %v1402_v57, %v1401_v55  ;;  %v1451_v60 = vadd.f32 %v1450_v58, %v1449_v56  ;;  %v1404_v61 = vpop.f32.mrb[30].mxu0  ;;  %v1452_v62 = vpop.f32.mrb[30].mxu1  ;;  %754 = sbr.rel (%p1306_p4) target bundleno = 322 (0x142), region = 36 }
 0x13c   : > { %v1405_v1 = vpop.f32.mrb[31].mxu0  ;;  %v1453_v6 = vpop.f32.mrb[31].mxu1 }
 0x13d   : > { %v1794_v7 = vadd.f32 %v1403_v59, %v1707_v54  ;;  %v1797_v10 = vadd.f32 %v1451_v60, %v1707_v54  ;;  %v1406_v11 = vadd.f32 %v1405_v1, %v1404_v61  ;;  %v1454_v12 = vadd.f32 %v1453_v6, %v1452_v62 }
 0x13f   : > { %2338 = vst [vmem:[#allocation9_spill] sm:$0xff] %v1797_v10  ;;  %v1800_v13 = vadd.f32 %v1406_v11, %v1707_v54  ;;  %v1803_v14 = vadd.f32 %v1454_v12, %v1707_v54 }
 0x141   : > { %2339 = vst [vmem:[#allocation10_spill] sm:$0xff] %v1803_v14 }
 0x142 PF: > { %vm954_vm4 = vcmask 261120   ;;  %v759_v54 = vlaneseq  ;;  %s1307_s21 = sshll.u32 %s1593_s19, 8 }
 0x143   : > { %1131 = vst.msk [vmem:[%s1625_s15] sm:$0xff] %vm954_vm4, %v1710_v63  ;;  %1132 = vst.msk [vmem:[%s1625_s15 + $0x8] sm:$0xff] %vm954_vm4, %v1716_v3  ;;  %v1909_v23 = vstv %s1307_s21 }
 0x144   : > { %1133 = vst.msk [vmem:[%s1625_s15 + $0x10] sm:$0xff] %vm954_vm4, %v1722_v15  ;;  %1134 = vst.msk [vmem:[%s1625_s15 + $0x18] sm:$0xff] %vm954_vm4, %v1728_v19  ;;  %v760_v18 = vshrl.u32 %v759_v54, 7 }
 0x145   : > { %1135 = vst.msk [vmem:[%s1625_s15 + $0x20] sm:$0xff] %vm954_vm4, %v1734_v31  ;;  %1136 = vst.msk [vmem:[%s1625_s15 + $0x28] sm:$0xff] %vm954_vm4, %v1740_v35 }
 0x146   : > { %1137 = vst.msk [vmem:[%s1625_s15 + $0x30] sm:$0xff] %vm954_vm4, %v1746_v47  ;;  %1138 = vst.msk [vmem:[%s1625_s15 + $0x38] sm:$0xff] %vm954_vm4, %v1752_v51  ;;  %v761_v21 = vadd.s32 8, %v760_v18  ;;  %v762_v22 = vadd.s32 16, %v760_v18  ;;  %v763_v26 = vadd.s32 24, %v760_v18  ;;  %v764_v27 = vadd.s32 32, %v760_v18 }
 0x147   : > { %1139 = vst.msk [vmem:[%s1625_s15 + $0x40] sm:$0xff] %vm954_vm4, %v1758_v2  ;;  %1140 = vst.msk [vmem:[%s1625_s15 + $0x48] sm:$0xff] %vm954_vm4, %v1764_v8  ;;  %v765_v30 = vadd.s32 40, %v760_v18  ;;  %v766_v33 = vadd.s32 48, %v760_v18  ;;  %v767_v34 = vadd.s32 56, %v760_v18  ;;  %v768_v37 = vadd.s32 64, %v760_v18 }
 0x148   : > { %1141 = vst.msk [vmem:[%s1625_s15 + $0x50] sm:$0xff] %vm954_vm4, %v1770_v24  ;;  %1142 = vst.msk [vmem:[%s1625_s15 + $0x58] sm:$0xff] %vm954_vm4, %v1776_v28  ;;  %v769_v38 = vadd.s32 72, %v760_v18  ;;  %v770_v39 = vadd.s32 80, %v760_v18  ;;  %v793_v40 = vadd.s32 %v1909_v23, %v760_v18  ;;  %v771_v41 = vadd.s32 88, %v760_v18 }
 0x149   : > { %1143 = vst.msk [vmem:[%s1625_s15 + $0x60] sm:$0xff] %vm954_vm4, %v1782_v44  ;;  %1144 = vst.msk [vmem:[%s1625_s15 + $0x68] sm:$0xff] %vm954_vm4, %v1788_v50  ;;  %v772_v42 = vadd.s32 96, %v760_v18  ;;  %v794_v43 = vadd.s32 %v1909_v23, %v761_v21  ;;  %v795_v46 = vadd.s32 %v1909_v23, %v762_v22  ;;  %v773_v49 = vadd.s32 104, %v760_v18 }
 0x14a   : > { %1145 = vst.msk [vmem:[%s1625_s15 + $0x70] sm:$0xff] %vm954_vm4, %v1794_v7  ;;  %1146 = vst.msk [vmem:[%s1625_s15 + $0x78] sm:$0xff] %vm954_vm4, %v1800_v13  ;;  %v774_v55 = vadd.s32 112, %v760_v18  ;;  %v775_v56 = vadd.s32 120, %v760_v18  ;;  %v776_v57 = vadd.s32 128, %v760_v18  ;;  %v777_v58 = vadd.s32 136, %v760_v18 }
 0x14b   : > { %1147 = vst.msk [vmem:[%s1625_s15 + $0x80] sm:$0xff] %vm954_vm4, %v1713_v0  ;;  %1148 = vst.msk [vmem:[%s1625_s15 + $0x88] sm:$0xff] %vm954_vm4, %v1719_v4  ;;  %v778_v59 = vadd.s32 144, %v760_v18  ;;  %v779_v60 = vadd.s32 152, %v760_v18  ;;  %v796_v61 = vadd.s32 %v1909_v23, %v763_v26  ;;  %v780_v62 = vadd.s32 160, %v760_v18 }
 0x14c   : > { %1149 = vst.msk [vmem:[%s1625_s15 + $0x90] sm:$0xff] %vm954_vm4, %v1725_v16  ;;  %1150 = vst.msk [vmem:[%s1625_s15 + $0x98] sm:$0xff] %vm954_vm4, %v1731_v20  ;;  %v781_v1 = vadd.s32 168, %v760_v18  ;;  %v1915_v6 = vadd.s32 176, %v760_v18  ;;  %vm825_vm5 = vcmp.lt.s32.totalorder %v793_v40, 512  ;;  %v1917_v11 = vadd.s32 184, %v760_v18 }
 0x14d   : > { %1151 = vst.msk [vmem:[%s1625_s15 + $0xa0] sm:$0xff] %vm954_vm4, %v1737_v32  ;;  %1152 = vst.msk [vmem:[%s1625_s15 + $0xa8] sm:$0xff] %vm954_vm4, %v1743_v36  ;;  %v797_v12 = vadd.s32 %v1909_v23, %v764_v27  ;;  %vm826_vm6 = vcmp.lt.s32.totalorder %v794_v43, 512  ;;  %vm827_vm7 = vcmp.lt.s32.totalorder %v795_v46, 512  ;;  %v784_v17 = vadd.s32 192, %v760_v18 }
 0x14e   : > { %1153 = vst.msk [vmem:[%s1625_s15 + $0xb0] sm:$0xff] %vm954_vm4, %v1749_v48  ;;  %1154 = vst.msk [vmem:[%s1625_s15 + $0xb8] sm:$0xff] %vm954_vm4, %v1755_v52  ;;  %v1920_v54 = vadd.s32 200, %v760_v18  ;;  %v1922_v21 = vadd.s32 208, %v760_v18  ;;  %v1924_v22 = vadd.s32 216, %v760_v18  ;;  %v798_v26 = vadd.s32 %v1909_v23, %v765_v30 }
 0x14f   : > { %1155 = vst.msk [vmem:[%s1625_s15 + $0xc0] sm:$0xff] %vm954_vm4, %v1761_v5  ;;  %1156 = vst.msk [vmem:[%s1625_s15 + $0xc8] sm:$0xff] %vm954_vm4, %v1767_v9  ;;  %vm828_vm8 = vcmp.lt.s32.totalorder %v796_v61, 512  ;;  %v1932_v27 = vadd.s32 240, %v760_v18  ;;  %vm829_vm9 = vcmp.lt.s32.totalorder %v797_v12, 512  ;;  %v801_v30 = vadd.s32 %v1909_v23, %v768_v37 }
 0x150   : > { %1157 = vst.msk [vmem:[%s1625_s15 + $0xd0] sm:$0xff] %vm954_vm4, %v1773_v25  ;;  %1158 = vst.msk [vmem:[%s1625_s15 + $0xd8] sm:$0xff] %vm954_vm4, %v1779_v29  ;;  %v799_v29 = vadd.s32 %v1909_v23, %v766_v33  ;;  %v800_v25 = vadd.s32 %v1909_v23, %v767_v34  ;;  %v802_v61 = vadd.s32 %v1909_v23, %v769_v38  ;;  %vm830_vm10 = vcmp.lt.s32.totalorder %v798_v26, 512 }
 0x151   : > { %1159 = vst.msk [vmem:[%s1625_s15 + $0xe0] sm:$0xff] %vm954_vm4, %v1785_v45  ;;  %1160 = vst.msk [vmem:[%s1625_s15 + $0xe8] sm:$0xff] %vm954_vm4, %v1791_v53  ;;  %v1930_v53 = vadd.s32 232, %v760_v18  ;;  %v1936_v45 = vadd.s32 248, %v760_v18  ;;  %v803_v52 = vadd.s32 %v1909_v23, %v770_v39  ;;  %v804_v34 = vadd.s32 %v1909_v23, %v771_v41 }
 0x152   : > { %1161 = vst.msk [vmem:[%s1625_s15 + $0xf0] sm:$0xff] %vm954_vm4, %v1797_v10  ;;  %1162 = vst.msk [vmem:[%s1625_s15 + $0xf8] sm:$0xff] %vm954_vm4, %v1803_v14  ;;  %v1926_v14 = vadd.s32 224, %v760_v18  ;;  %v1556_v10 = vmov 0.0   ;;  %v805_v37 = vadd.s32 %v1909_v23, %v772_v42  ;;  %vm831_vm11 = vcmp.lt.s32.totalorder %v799_v29, 512 }
 0x153   : > { %v1308_v40 = vsel %vm825_vm5, 1.0, %v1556_v10  ;;  %v1309_v43 = vsel %vm826_vm6, 1.0, %v1556_v10  ;;  %v1310_v46 = vsel %vm827_vm7, 1.0, %v1556_v10  ;;  %v1311_v9 = vsel %vm828_vm8, 1.0, %v1556_v10 }
 0x154   : > { %v1944_v5 = vmul.f32 %v1308_v40, %v1710_v63  ;;  %v1948_v18 = vmul.f32 %v1309_v43, %v1716_v3  ;;  %v1951_v33 = vmul.f32 %v1310_v46, %v1722_v15  ;;  %v1312_v38 = vsel %vm829_vm9, 1.0, %v1556_v10 }
 0x155   : > { %v1959_v63 = vmul.f32 %v1311_v9, %v1728_v19  ;;  %v1966_v39 = vadd.s32 %v1909_v23, %v773_v49  ;;  %v1969_v41 = vadd.s32 %v1909_v23, %v774_v55  ;;  %v1313_v42 = vsel %vm830_vm10, 1.0, %v1556_v10 }
 0x156   : > { %v955_v12 = vsel %vm954_vm4, %v1944_v5, 0.0  ;;  %v956_v3 = vsel %vm954_vm4, %v1948_v18, 0.0  ;;  %v958_v15 = vsel %vm954_vm4, %v1951_v33, 0.0  ;;  %v1973_v29 = vadd.s32 %v1909_v23, %v775_v56 }
 0x157   : > { %v957_v26 = vadd.f32 %v956_v3, %v955_v12  ;;  %vm832_vm12 = vcmp.lt.s32.totalorder %v800_v25, 512  ;;  %v925_v19 = vmul.f32 %v1312_v38, %v1734_v31  ;;  %v960_v9 = vsel %vm954_vm4, %v1959_v63, 0.0 }
 0x158   : > { %v1979_v40 = vadd.s32 %v1909_v23, %v776_v57  ;;  %v1982_v49 = vadd.s32 %v1909_v23, %v777_v58  ;;  %v1314_v55 = vsel %vm831_vm11, 1.0, %v1556_v10  ;;  %v1986_v46 = vadd.s32 %v1909_v23, %v778_v59 }
 0x159   : > { %v959_v43 = vadd.f32 %v958_v15, %v957_v26  ;;  %vm833_vm13 = vcmp.lt.s32.totalorder %v801_v30, 512  ;;  %v1989_v25 = vmul.f32 %v1313_v42, %v1740_v35  ;;  %v962_v31 = vsel %vm954_vm4, %v925_v19, 0.0 }
 0x15a   : > { %v1993_v56 = vadd.s32 %v1909_v23, %v779_v60  ;;  %v1996_v57 = vadd.s32 %v1909_v23, %v780_v62  ;;  %v1315_v58 = vsel %vm832_vm12, 1.0, %v1556_v10  ;;  %v2000_v12 = vadd.s32 %v1909_v23, %v781_v1 }
 0x15b   : > { %v961_v38 = vadd.f32 %v960_v9, %v959_v43  ;;  %vm834_vm14 = vcmp.lt.s32.totalorder %v802_v61, 512  ;;  %v2003_v59 = vmul.f32 %v1314_v55, %v1746_v47  ;;  %v964_v35 = vsel %vm954_vm4, %v1989_v25, 0.0 }
 0x15c   : > { %v2009_v60 = vadd.s32 %v1909_v23, %v1915_v6  ;;  %vm835_vm15 = vcmp.lt.s32.totalorder %v803_v52, 512  ;;  %v1316_v62 = vsel %vm833_vm13, 1.0, %v1556_v10  ;;  %v2014_v3 = vadd.s32 %v1909_v23, %v1917_v11 }
 0x15d   : > { %v963_v30 = vadd.f32 %v962_v31, %v961_v38  ;;  %v2017_v1 = vadd.s32 %v1909_v23, %v784_v17  ;;  %v2020_v47 = vmul.f32 %v1315_v58, %v1752_v51  ;;  %v966_v61 = vsel %vm954_vm4, %v2003_v59, 0.0 }
 0x15e   : > { %v2026_v6 = vadd.s32 %v1909_v23, %v1920_v54  ;;  %vm836_vm0 = vcmp.lt.s32.totalorder %v804_v34, 512  ;;  %v1317_v52 = vsel %vm834_vm14, 1.0, %v1556_v10  ;;  %vm837_vm1 = vcmp.lt.s32.totalorder %v805_v37, 512 }
 0x15f   : > { %v965_v15 = vadd.f32 %v964_v35, %v963_v30  ;;  %v1318_v11 = vsel %vm835_vm15, 1.0, %v1556_v10  ;;  %v2031_v17 = vmul.f32 %v1316_v62, %v1758_v2  ;;  %v968_v51 = vsel %vm954_vm4, %v2020_v47, 0.0 }
 0x160   : > { %v2037_v42 = vadd.s32 %v1909_v23, %v1922_v21  ;;  %v2041_v54 = vadd.s32 %v1909_v23, %v1924_v22  ;;  %v2045_v34 = vadd.s32 %v1909_v23, %v1926_v14  ;;  %v2049_v2 = vadd.s32 %v1909_v23, %v1930_v53 }
 0x161   : > { %v967_v37 = vadd.f32 %v966_v61, %v965_v15  ;;  %v1319_v26 = vsel %vm836_vm0, 1.0, %v1556_v10  ;;  %v2053_v9 = vmul.f32 %v1317_v52, %v1764_v8  ;;  %v970_v21 = vsel %vm954_vm4, %v2031_v17, 0.0 }
 0x162   : > { %vm838_vm2 = vcmp.lt.s32.totalorder %v1966_v39, 512  ;;  %v1320_v22 = vsel %vm837_vm1, 1.0, %v1556_v10  ;;  %v2060_v14 = vmul.f32 %v1318_v11, %v1770_v24  ;;  %v1028_v43 = vmul.f32 %v1944_v5, %v1944_v5 }
 0x163   : > { %v969_v55 = vadd.f32 %v968_v51, %v967_v37  ;;  %v972_v53 = vsel %vm954_vm4, %v2053_v9, 0.0  ;;  %v1029_v8 = vmul.f32 %v1948_v18, %v1948_v18  ;;  %v1030_v31 = vmul.f32 %v1951_v33, %v1951_v33 }
 0x164   : > { %v2072_v58 = vadd.s32 %v1909_v23, %v1932_v27  ;;  %v2076_v24 = vadd.s32 %v1909_v23, %v1936_v45  ;;  %v2079_v38 = vmul.f32 %v1319_v26, %v1776_v28  ;;  %vm839_vm3 = vcmp.lt.s32.totalorder %v1969_v41, 512 }
 0x165   : > { %v971_v35 = vadd.f32 %v970_v21, %v969_v55  ;;  %vm840_vm5 = vcmp.lt.s32.totalorder %v1973_v29, 512  ;;  %v974_v5 = vsel %vm954_vm4, %v2060_v14, 0.0  ;;  %v1031_v18 = vmul.f32 %v1959_v63, %v1959_v63 }
 0x166   : > { %v1321_v27 = vsel %vm838_vm2, 1.0, %v1556_v10  ;;  %v2091_v45 = vmul.f32 %v1320_v22, %v1782_v44  ;;  %v976_v23 = vsel %vm954_vm4, %v2079_v38, 0.0  ;;  %v1032_v33 = vmul.f32 %v925_v19, %v925_v19 }
 0x167   : > { %v973_v28 = vadd.f32 %v972_v53, %v971_v35  ;;  %v1060_v41 = vsel %vm954_vm4, %v1028_v43, 0.0  ;;  %v1061_v62 = vsel %vm954_vm4, %v1029_v8, 0.0  ;;  %v1063_v30 = vsel %vm954_vm4, %v1030_v31, 0.0 }
 0x168   : > { %vm841_vm6 = vcmp.lt.s32.totalorder %v1979_v40, 512  ;;  %v1322_v63 = vsel %vm839_vm3, 1.0, %v1556_v10  ;;  %v1062_v61 = vadd.f32 %v1061_v62, %v1060_v41  ;;  %v2101_v44 = vmul.f32 %v1321_v27, %v1788_v50 }
 0x169   : > { %v975_v39 = vadd.f32 %v974_v5, %v973_v28  ;;  %v978_v52 = vsel %vm954_vm4, %v2091_v45, 0.0  ;;  %v1033_v19 = vmul.f32 %v1989_v25, %v1989_v25  ;;  %v1065_v15 = vsel %vm954_vm4, %v1031_v18, 0.0 }
 0x16a   : > { %vm842_vm7 = vcmp.lt.s32.totalorder %v1982_v49, 512  ;;  %v1323_v11 = vsel %vm840_vm5, 1.0, %v1556_v10  ;;  %v1064_v37 = vadd.f32 %v1063_v30, %v1062_v61  ;;  %v2113_v26 = vmul.f32 %v1322_v63, %v1794_v7 }
 0x16b   : > { %v977_v51 = vadd.f32 %v976_v23, %v975_v39  ;;  %v980_v50 = vsel %vm954_vm4, %v2101_v44, 0.0  ;;  %v1034_v21 = vmul.f32 %v2003_v59, %v2003_v59  ;;  %v1067_v25 = vsel %vm954_vm4, %v1032_v33, 0.0 }
 0x16c   : > { %vm843_vm8 = vcmp.lt.s32.totalorder %v1986_v46, 512  ;;  %v1324_v29 = vsel %vm841_vm6, 1.0, %v1556_v10  ;;  %v1066_v55 = vadd.f32 %v1065_v15, %v1064_v37  ;;  %v2125_v53 = vmul.f32 %v1323_v11, %v1800_v13 }
 0x16d   : > { %v979_v22 = vadd.f32 %v978_v52, %v977_v51  ;;  %v982_v7 = vsel %vm954_vm4, %v2113_v26, 0.0  ;;  %v1035_v43 = vmul.f32 %v2020_v47, %v2020_v47  ;;  %v1069_v59 = vsel %vm954_vm4, %v1033_v19, 0.0 }
 0x16e   : > { %vm844_vm9 = vcmp.lt.s32.totalorder %v1993_v56, 512  ;;  %v1325_v40 = vsel %vm842_vm7, 1.0, %v1556_v10  ;;  %v1068_v31 = vadd.f32 %v1067_v25, %v1066_v55  ;;  %v2137_v35 = vmul.f32 %v1324_v29, %v1713_v0 }
 0x16f   : > { %v981_v8 = vadd.f32 %v980_v50, %v979_v22  ;;  %v984_v13 = vsel %vm954_vm4, %v2125_v53, 0.0  ;;  %v1036_v5 = vmul.f32 %v2031_v17, %v2031_v17  ;;  %v1071_v47 = vsel %vm954_vm4, %v1034_v21, 0.0 }
 0x170   : > { %vm845_vm10 = vcmp.lt.s32.totalorder %v1996_v57, 512  ;;  %v1326_v49 = vsel %vm843_vm8, 1.0, %v1556_v10  ;;  %v1070_v27 = vadd.f32 %v1069_v59, %v1068_v31  ;;  %v2149_v28 = vmul.f32 %v1325_v40, %v1719_v4  ;;  %v2340_v40 = vld [vmem:[#allocation2_spill] sm:$0xff] }
 0x171   : > { %v983_v18 = vadd.f32 %v982_v7, %v981_v8  ;;  %v986_v0 = vsel %vm954_vm4, %v2137_v35, 0.0  ;;  %v1037_v23 = vmul.f32 %v2053_v9, %v2053_v9  ;;  %v1073_v17 = vsel %vm954_vm4, %v1035_v43, 0.0 }
 0x172   : > { %vm846_vm11 = vcmp.lt.s32.totalorder %v2000_v12, 512  ;;  %v1327_v46 = vsel %vm844_vm9, 1.0, %v1556_v10  ;;  %v1072_v41 = vadd.f32 %v1071_v47, %v1070_v27  ;;  %v2161_v62 = vmul.f32 %v1326_v49, %v1725_v16  ;;  %v2341_v47 = vld [vmem:[#allocation3_spill] sm:$0xff] }
 0x173   : > { %v985_v33 = vadd.f32 %v984_v13, %v983_v18  ;;  %v988_v4 = vsel %vm954_vm4, %v2149_v28, 0.0  ;;  %v1038_v30 = vmul.f32 %v2060_v14, %v2060_v14  ;;  %v1075_v9 = vsel %vm954_vm4, %v1036_v5, 0.0 }
 0x174   : > { %vm847_vm12 = vcmp.lt.s32.totalorder %v2009_v60, 512  ;;  %v1328_v56 = vsel %vm845_vm10, 1.0, %v1556_v10  ;;  %v1074_v39 = vadd.f32 %v1073_v17, %v1072_v41  ;;  %v2173_v61 = vmul.f32 %v1327_v46, %v1731_v20  ;;  %v2342_v17 = vld [vmem:[#allocation4_spill] sm:$0xff] }
 0x175   : > { %v987_v63 = vadd.f32 %v986_v0, %v985_v33  ;;  %v990_v16 = vsel %vm954_vm4, %v2161_v62, 0.0  ;;  %v1039_v52 = vmul.f32 %v2079_v38, %v2079_v38  ;;  %v1077_v14 = vsel %vm954_vm4, %v1037_v23, 0.0 }
 0x176   : > { %vm848_vm13 = vcmp.lt.s32.totalorder %v2014_v3, 512  ;;  %v1329_v57 = vsel %vm846_vm11, 1.0, %v1556_v10  ;;  %v1076_v15 = vadd.f32 %v1075_v9, %v1074_v39  ;;  %v2185_v11 = vmul.f32 %v1328_v56, %v1737_v32  ;;  %v2343_v9 = vld [vmem:[#allocation5_spill] sm:$0xff] }
 0x177   : > { %v989_v19 = vadd.f32 %v988_v4, %v987_v63  ;;  %v992_v20 = vsel %vm954_vm4, %v2173_v61, 0.0  ;;  %v1040_v51 = vmul.f32 %v2091_v45, %v2091_v45  ;;  %v1079_v38 = vsel %vm954_vm4, %v1038_v30, 0.0 }
 0x178   : > { %vm849_vm14 = vcmp.lt.s32.totalorder %v2017_v1, 512  ;;  %v1330_v12 = vsel %vm847_vm12, 1.0, %v1556_v10  ;;  %v1078_v50 = vadd.f32 %v1077_v14, %v1076_v15  ;;  %v2197_v21 = vmul.f32 %v1329_v57, %v1743_v36  ;;  %v2344_v14 = vld [vmem:[#allocation6_spill] sm:$0xff] }
 0x179   : > { %v991_v37 = vadd.f32 %v990_v16, %v989_v19  ;;  %v994_v32 = vsel %vm954_vm4, %v2185_v11, 0.0  ;;  %v1041_v25 = vmul.f32 %v2101_v44, %v2101_v44  ;;  %v1081_v45 = vsel %vm954_vm4, %v1039_v52, 0.0 }
 0x17a   : > { %vm850_vm15 = vcmp.lt.s32.totalorder %v2026_v6, 512  ;;  %v1331_v60 = vsel %vm848_vm13, 1.0, %v1556_v10  ;;  %v1080_v22 = vadd.f32 %v1079_v38, %v1078_v50  ;;  %v2209_v55 = vmul.f32 %v1330_v12, %v1749_v48  ;;  %v2345_v38 = vld [vmem:[#allocation7_spill] sm:$0xff] }
 0x17b   : > { %v993_v29 = vadd.f32 %v992_v20, %v991_v37  ;;  %v996_v36 = vsel %vm954_vm4, %v2197_v21, 0.0  ;;  %v1042_v7 = vmul.f32 %v2113_v26, %v2113_v26  ;;  %v1083_v44 = vsel %vm954_vm4, %v1040_v51, 0.0 }
 0x17c   : > { %vm851_vm0 = vcmp.lt.s32.totalorder %v2037_v42, 512  ;;  %v1332_v3 = vsel %vm849_vm14, 1.0, %v1556_v10  ;;  %v1082_v59 = vadd.f32 %v1081_v45, %v1080_v22  ;;  %v944_v8 = vmul.f32 %v1331_v60, %v2340_v40  ;;  %v2346_v45 = vld [vmem:[#allocation8_spill] sm:$0xff] }
 0x17d   : > { %v995_v43 = vadd.f32 %v994_v32, %v993_v29  ;;  %v998_v48 = vsel %vm954_vm4, %v2209_v55, 0.0  ;;  %v1043_v31 = vmul.f32 %v2125_v53, %v2125_v53  ;;  %v1085_v26 = vsel %vm954_vm4, %v1041_v25, 0.0 }
 0x17e   : > { %vm852_vm1 = vcmp.lt.s32.totalorder %v2041_v54, 512  ;;  %v1333_v13 = vsel %vm850_vm15, 1.0, %v1556_v10  ;;  %v1084_v5 = vadd.f32 %v1083_v44, %v1082_v59  ;;  %v945_v49 = vmul.f32 %v1332_v3, %v2341_v47  ;;  %v2347_v44 = vld [vmem:[#allocation9_spill] sm:$0xff] }
 0x17f   : > { %v997_v1 = vadd.f32 %v996_v36, %v995_v43  ;;  %v1000_v18 = vsel %vm954_vm4, %v944_v8, 0.0  ;;  %v1044_v27 = vmul.f32 %v2137_v35, %v2137_v35  ;;  %v1087_v0 = vsel %vm954_vm4, %v1042_v7, 0.0 }
 0x180   : > { %vm853_vm2 = vcmp.lt.s32.totalorder %v2045_v34, 512  ;;  %v1334_v53 = vsel %vm851_vm0, 1.0, %v1556_v10  ;;  %v1086_v6 = vadd.f32 %v1085_v26, %v1084_v5  ;;  %v946_v46 = vmul.f32 %v1333_v13, %v2342_v17 }
 0x181   : > { %v999_v23 = vadd.f32 %v998_v48, %v997_v1  ;;  %v1002_v33 = vsel %vm954_vm4, %v945_v49, 0.0  ;;  %v1045_v41 = vmul.f32 %v2149_v28, %v2149_v28  ;;  %v1089_v4 = vsel %vm954_vm4, %v1043_v31, 0.0  ;;  %v2348_v31 = vld [vmem:[#allocation10_spill] sm:$0xff] }
 0x182   : > { %vm854_vm3 = vcmp.lt.s32.totalorder %v2049_v2, 512  ;;  %v1335_v35 = vsel %vm852_vm1, 1.0, %v1556_v10  ;;  %v1088_v42 = vadd.f32 %v1087_v0, %v1086_v6  ;;  %v947_v56 = vmul.f32 %v1334_v53, %v2343_v9 }
 0x183   : > { %v1001_v30 = vadd.f32 %v1000_v18, %v999_v23  ;;  %v1004_v63 = vsel %vm954_vm4, %v946_v46, 0.0  ;;  %v1046_v39 = vmul.f32 %v2161_v62, %v2161_v62  ;;  %v1091_v16 = vsel %vm954_vm4, %v1044_v27, 0.0 }
 0x184   : > { %vm855_vm5 = vcmp.lt.s32.totalorder %v2072_v58, 512  ;;  %v1336_v28 = vsel %vm853_vm2, 1.0, %v1556_v10  ;;  %v1090_v54 = vadd.f32 %v1089_v4, %v1088_v42  ;;  %v948_v57 = vmul.f32 %v1335_v35, %v2344_v14 }
 0x185   : > { %v1003_v52 = vadd.f32 %v1002_v33, %v1001_v30  ;;  %v1006_v19 = vsel %vm954_vm4, %v947_v56, 0.0  ;;  %v1047_v15 = vmul.f32 %v2173_v61, %v2173_v61  ;;  %v1093_v20 = vsel %vm954_vm4, %v1045_v41, 0.0 }
 0x186   : > { %vm856_vm6 = vcmp.lt.s32.totalorder %v2076_v24, 512  ;;  %v1337_v62 = vsel %vm854_vm3, 1.0, %v1556_v10  ;;  %v1092_v34 = vadd.f32 %v1091_v16, %v1090_v54  ;;  %v949_v12 = vmul.f32 %v1336_v28, %v2345_v38 }
 0x187   : > { %v1005_v51 = vadd.f32 %v1004_v63, %v1003_v52  ;;  %v1008_v37 = vsel %vm954_vm4, %v948_v57, 0.0  ;;  %v1048_v50 = vmul.f32 %v2185_v11, %v2185_v11  ;;  %v1095_v32 = vsel %vm954_vm4, %v1046_v39, 0.0 }
 0x188   : > { %v1338_v61 = vsel %vm855_vm5, 1.0, %v1556_v10  ;;  %v1094_v25 = vadd.f32 %v1093_v20, %v1092_v34  ;;  %v950_v2 = vmul.f32 %v1337_v62, %v2346_v45  ;;  %v1010_v60 = vsel %vm954_vm4, %v949_v12, 0.0 }
 0x189   : > { %v1007_v24 = vadd.f32 %v1006_v19, %v1005_v51  ;;  %v1049_v29 = vmul.f32 %v2197_v21, %v2197_v21  ;;  %v1097_v22 = vsel %vm954_vm4, %v1047_v15, 0.0  ;;  %v1339_v36 = vsel %vm856_vm6, 1.0, %v1556_v10 }
 0x18a   : > { %v1096_v7 = vadd.f32 %v1095_v32, %v1094_v25  ;;  %v951_v3 = vmul.f32 %v1338_v61, %v2347_v44  ;;  %v1012_v58 = vsel %vm954_vm4, %v950_v2, 0.0  ;;  %v1050_v43 = vmul.f32 %v2209_v55, %v2209_v55 }
 0x18b   : > { %v1009_v11 = vadd.f32 %v1008_v37, %v1007_v24  ;;  %v1099_v59 = vsel %vm954_vm4, %v1048_v50, 0.0  ;;  %v952_v26 = vmul.f32 %v1339_v36, %v2348_v31  ;;  %v1051_v13 = vmul.f32 %v944_v8, %v944_v8 }
 0x18c   : > { %v1098_v48 = vadd.f32 %v1097_v22, %v1096_v7  ;;  %v1014_v21 = vsel %vm954_vm4, %v951_v3, 0.0  ;;  %v1101_v10 = vsel %vm954_vm4, %v1049_v29, 0.0  ;;  %v1052_v18 = vmul.f32 %v945_v49, %v945_v49  ;;  %v1027_v29 = vld [vmem:[%s2321_s5] sm:$0x1] }
 0x18d   : > { %v1011_v40 = vadd.f32 %v1010_v60, %v1009_v11  ;;  %v1016_v47 = vsel %vm954_vm4, %v952_v26, 0.0  ;;  %v1103_v27 = vsel %vm954_vm4, %v1050_v43, 0.0  ;;  %v1053_v53 = vmul.f32 %v946_v46, %v946_v46 }
 0x18e   : > { %v1100_v5 = vadd.f32 %v1099_v59, %v1098_v48  ;;  %v1105_v23 = vsel %vm954_vm4, %v1051_v13, 0.0  ;;  %v1054_v33 = vmul.f32 %v947_v56, %v947_v56  ;;  %v1107_v41 = vsel %vm954_vm4, %v1052_v18, 0.0 }
 0x18f   : > { %v1013_v1 = vadd.f32 %v1012_v58, %v1011_v40  ;;  %v1055_v35 = vmul.f32 %v948_v57, %v948_v57  ;;  %v1109_v30 = vsel %vm954_vm4, %v1053_v53, 0.0  ;;  %v1056_v49 = vmul.f32 %v949_v12, %v949_v12  ;;  %v953_v57 = vld [vmem:[%s2320_s4] sm:$0x1] }
 0x190   : > { %v1102_v55 = vadd.f32 %v1101_v10, %v1100_v5  ;;  %v1111_v63 = vsel %vm954_vm4, %v1054_v33, 0.0  ;;  %v1057_v46 = vmul.f32 %v950_v2, %v950_v2  ;;  %v1058_v56 = vmul.f32 %v951_v3, %v951_v3 }
 0x191   : > { %v1015_v0 = vadd.f32 %v1014_v21, %v1013_v1  ;;  %v1113_v28 = vsel %vm954_vm4, %v1055_v35, 0.0  ;;  %v1115_v14 = vsel %vm954_vm4, %v1056_v49, 0.0  ;;  %v1059_v20 = vmul.f32 %v952_v26, %v952_v26 }
 0x192   : > { %v1104_v17 = vadd.f32 %v1103_v27, %v1102_v55  ;;  %v1117_v62 = vsel %vm954_vm4, %v1057_v46, 0.0  ;;  %vm1025_vm7 = vcmask 253952   ;;  %v1119_v38 = vsel %vm954_vm4, %v1058_v56, 0.0 }
 0x193   : > { %v1017_v6 = vadd.f32 %v1016_v47, %v1015_v0  ;;  %v1121_v50 = vsel %vm954_vm4, %v1059_v20, 0.0 }
 0x194   : > { %v1106_v4 = vadd.f32 %v1105_v23, %v1104_v17 }
 0x195   : > { %v1018_v8 = vrot.slane %v1017_v6, 4 }
 0x196   : > { %v1108_v9 = vadd.f32 %v1107_v41, %v1106_v4 }
 0x197   : > { %v1019_v42 = vadd.f32 %v1018_v8, %v1017_v6 }
 0x198   : > { %v1110_v16 = vadd.f32 %v1109_v30, %v1108_v9 }
 0x199   : > { %v1020_v39 = vrot.slane %v1019_v42, 2 }
 0x19a   : > { %v1112_v54 = vadd.f32 %v1111_v63, %v1110_v16 }
 0x19b   : > { %v1021_v52 = vadd.f32 %v1020_v39, %v1019_v42 }
 0x19c   : > { %v1114_v15 = vadd.f32 %v1113_v28, %v1112_v54 }
 0x19d   : > { %v1022_v19 = vrot.slane %v1021_v52, 1 }
 0x19e   : > { %v1116_v34 = vadd.f32 %v1115_v14, %v1114_v15 }
 0x19f   : > { %v1023_v51 = vadd.f32 %v1022_v19, %v1021_v52 }
 0x1a0   : > { %v1118_v37 = vadd.f32 %v1117_v62, %v1116_v34 }
 0x1a1   : > { %v1024_v12 = vadd.f32 %v1023_v51, %v953_v57 }
 0x1a2   : > { %v1120_v32 = vadd.f32 %v1119_v38, %v1118_v37 }
 0x1a3   : > { %1026 = vst.msk [vmem:[%s2320_s4] sm:$0x1] %vm1025_vm7, %v1024_v12 }
 0x1a4   : > { %v1122_v61 = vadd.f32 %v1121_v50, %v1120_v32 }
 0x1a6   : > { %v1123_v24 = vrot.slane %v1122_v61, 4 }
 0x1a8   : > { %v1124_v25 = vadd.f32 %v1123_v24, %v1122_v61 }
 0x1aa   : > { %v1125_v45 = vrot.slane %v1124_v25, 2 }
 0x1ac   : > { %v1126_v2 = vadd.f32 %v1125_v45, %v1124_v25 }
 0x1ae   : > { %v1127_v60 = vrot.slane %v1126_v2, 1 }
 0x1b0   : > { %v1128_v22 = vadd.f32 %v1127_v60, %v1126_v2 }
 0x1b2   : > { %v1129_v36 = vadd.f32 %v1128_v22, %v1027_v29 }
 0x1b4   : > { %1130 = vst.msk [vmem:[%s2321_s5] sm:$0x1] %vm1025_vm7, %v1129_v36 }
 0x1b5 PF: > { %s16_s18 = sadd.s32 1, %s1552_s18  }
 0x1b6   : > { %p13_p5 = scmp.ge.s32.totalorder %s16_s18, 4  }
 0x1b8   :  { %15 = sbr.rel (!%p13_p5) target bundleno = 1 (0x1), region = 82 }

// kernel: transform_forward.22
= control target key start
LH: loop header
LB: loop body
LE: loop exit
PB: predicated region body
PF: predicated region fallthrough
CT: control target
= control target key end

     0   :  { %vm92_vm0 = vcmask 523264   ;;  %s271_s0 = inlined_call_operand.vmem [shape: f32[128,64], index: 0, kind: input, shape index: {}]   ;;  %s272_s1 = inlined_call_operand.vmem [shape: f32[1,64], index: 1, kind: input, shape index: {}]   ;;  %s273_s2 = inlined_call_operand.vmem [shape: f32[1,64], index: 2, kind: input, shape index: {}]   ;;  %s274_s3 = inlined_call_operand.vmem [shape: f32[128,64], index: 3, kind: output, shape index: {}]  }
   0x1   :  { %v14_v0 = vld [vmem:[%s271_s0] sm:$0xff]  ;;  %v15_v4 = vld [vmem:[%s271_s0 + $0x8] sm:$0xff]  ;;  %v16_v5 = vld [vmem:[%s271_s0 + $0x10] sm:$0xff] }
   0x2   :  { %v113_v1 = vld [vmem:[%s272_s1] ss:$0 sm:$0xff]  ;;  %v17_v6 = vld [vmem:[%s271_s0 + $0x18] sm:$0xff]  ;;  %v19_v11 = vld [vmem:[%s271_s0 + $0x28] sm:$0xff] }
   0x3   :  { %v144_v2 = vld [vmem:[%s273_s2] ss:$0 sm:$0xff]  ;;  %v37_v3 = vmul.f32 %v113_v1, %v14_v0  ;;  %v38_v7 = vmul.f32 %v113_v1, %v15_v4  ;;  %v39_v8 = vmul.f32 %v113_v1, %v16_v5  ;;  %v40_v9 = vmul.f32 %v113_v1, %v17_v6  ;;  %v20_v12 = vld [vmem:[%s271_s0 + $0x30] sm:$0xff]  ;;  %v21_v17 = vld [vmem:[%s271_s0 + $0x38] sm:$0xff] }
   0x4   :  { %v18_v10 = vld [vmem:[%s271_s0 + $0x20] sm:$0xff]  ;;  %v42_v15 = vmul.f32 %v113_v1, %v19_v11  ;;  %v43_v16 = vmul.f32 %v113_v1, %v20_v12  ;;  %v44_v21 = vmul.f32 %v113_v1, %v21_v17  ;;  %v23_v27 = vld [vmem:[%s271_s0 + $0x48] sm:$0xff]  ;;  %v24_v28 = vld [vmem:[%s271_s0 + $0x50] sm:$0xff] }
   0x5   :  { %v60_v13 = vadd.f32 %v144_v2, %v37_v3  ;;  %v41_v14 = vmul.f32 %v113_v1, %v18_v10  ;;  %v61_v18 = vadd.f32 %v144_v2, %v38_v7  ;;  %v62_v19 = vadd.f32 %v144_v2, %v39_v8  ;;  %v22_v22 = vld [vmem:[%s271_s0 + $0x40] sm:$0xff]  ;;  %v25_v29 = vld [vmem:[%s271_s0 + $0x58] sm:$0xff]  ;;  %v27_v35 = vld [vmem:[%s271_s0 + $0x68] sm:$0xff] }
   0x6   :  { %v63_v20 = vadd.f32 %v144_v2, %v40_v9  ;;  %v65_v25 = vadd.f32 %v144_v2, %v42_v15  ;;  %v66_v26 = vadd.f32 %v144_v2, %v43_v16  ;;  %v67_v33 = vadd.f32 %v144_v2, %v44_v21  ;;  %v26_v34 = vld [vmem:[%s271_s0 + $0x60] sm:$0xff]  ;;  %v28_v36 = vld [vmem:[%s271_s0 + $0x70] sm:$0xff]  ;;  %v29_v41 = vld [vmem:[%s271_s0 + $0x78] sm:$0xff] }
   0x7   :  { %v76_v23 = vmax.f32 %v60_v13, 0.0  ;;  %v64_v24 = vadd.f32 %v144_v2, %v41_v14  ;;  %v77_v30 = vmax.f32 %v61_v18, 0.0  ;;  %v78_v31 = vmax.f32 %v62_v19, 0.0 }
   0x8   :  { %v79_v32 = vmax.f32 %v63_v20, 0.0  ;;  %v81_v38 = vmax.f32 %v65_v25, 0.0  ;;  %v82_v39 = vmax.f32 %v66_v26, 0.0  ;;  %v45_v40 = vmul.f32 %v113_v1, %v22_v22 }
   0x9   :  { %93 = vst.msk [vmem:[%s274_s3] sm:$0xff] %vm92_vm0, %v76_v23  ;;  %v80_v37 = vmax.f32 %v64_v24, 0.0  ;;  %94 = vst.msk [vmem:[%s274_s3 + $0x8] sm:$0xff] %vm92_vm0, %v77_v30  ;;  %v83_v42 = vmax.f32 %v67_v33, 0.0  ;;  %v46_v43 = vmul.f32 %v113_v1, %v23_v27  ;;  %v47_v44 = vmul.f32 %v113_v1, %v24_v28 }
   0xa   :  { %95 = vst.msk [vmem:[%s274_s3 + $0x10] sm:$0xff] %vm92_vm0, %v78_v31  ;;  %96 = vst.msk [vmem:[%s274_s3 + $0x18] sm:$0xff] %vm92_vm0, %v79_v32  ;;  %v48_v45 = vmul.f32 %v113_v1, %v25_v29  ;;  %v68_v46 = vadd.f32 %v144_v2, %v45_v40  ;;  %v49_v47 = vmul.f32 %v113_v1, %v26_v34 }
   0xb   :  { %97 = vst.msk [vmem:[%s274_s3 + $0x20] sm:$0xff] %vm92_vm0, %v80_v37  ;;  %98 = vst.msk [vmem:[%s274_s3 + $0x28] sm:$0xff] %vm92_vm0, %v81_v38  ;;  %v50_v48 = vmul.f32 %v113_v1, %v27_v35  ;;  %v51_v49 = vmul.f32 %v113_v1, %v28_v36  ;;  %v69_v50 = vadd.f32 %v144_v2, %v46_v43 }
   0xc   :  { %99 = vst.msk [vmem:[%s274_s3 + $0x30] sm:$0xff] %vm92_vm0, %v82_v39  ;;  %100 = vst.msk [vmem:[%s274_s3 + $0x38] sm:$0xff] %vm92_vm0, %v83_v42  ;;  %v70_v51 = vadd.f32 %v144_v2, %v47_v44  ;;  %v71_v52 = vadd.f32 %v144_v2, %v48_v45  ;;  %v52_v53 = vmul.f32 %v113_v1, %v29_v41  ;;  %v84_v54 = vmax.f32 %v68_v46, 0.0 }
   0xd   :  { %v72_v55 = vadd.f32 %v144_v2, %v49_v47  ;;  %v73_v56 = vadd.f32 %v144_v2, %v50_v48  ;;  %v74_v57 = vadd.f32 %v144_v2, %v51_v49  ;;  %v85_v58 = vmax.f32 %v69_v50, 0.0 }
   0xe   :  { %v86_v59 = vmax.f32 %v70_v51, 0.0  ;;  %v87_v60 = vmax.f32 %v71_v52, 0.0  ;;  %v75_v61 = vadd.f32 %v144_v2, %v52_v53  ;;  %101 = vst.msk [vmem:[%s274_s3 + $0x40] sm:$0xff] %vm92_vm0, %v84_v54 }
   0xf   :  { %v88_v62 = vmax.f32 %v72_v55, 0.0  ;;  %v89_v63 = vmax.f32 %v73_v56, 0.0  ;;  %v90_v0 = vmax.f32 %v74_v57, 0.0  ;;  %102 = vst.msk [vmem:[%s274_s3 + $0x48] sm:$0xff] %vm92_vm0, %v85_v58 }
  0x10   :  { %103 = vst.msk [vmem:[%s274_s3 + $0x50] sm:$0xff] %vm92_vm0, %v86_v59  ;;  %104 = vst.msk [vmem:[%s274_s3 + $0x58] sm:$0xff] %vm92_vm0, %v87_v60  ;;  %v91_v1 = vmax.f32 %v75_v61, 0.0 }
  0x11   :  { %105 = vst.msk [vmem:[%s274_s3 + $0x60] sm:$0xff] %vm92_vm0, %v88_v62  ;;  %106 = vst.msk [vmem:[%s274_s3 + $0x68] sm:$0xff] %vm92_vm0, %v89_v63 }
  0x12   :  { %107 = vst.msk [vmem:[%s274_s3 + $0x70] sm:$0xff] %vm92_vm0, %v90_v0  ;;  %108 = vst.msk [vmem:[%s274_s3 + $0x78] sm:$0xff] %vm92_vm0, %v91_v1 }

// kernel: transform_forward.21
= control target key start
LH: loop header
LB: loop body
LE: loop exit
PB: predicated region body
PF: predicated region fallthrough
CT: control target
= control target key end

     0   :  { %vm321_vm0 = vcmask 261120   ;;  %vm544_vm1 = vcmask 516096   ;;  %v984_v42 = vmov 0.0   ;;  %vm647_vm2 = vcmask 523264   ;;  %s1300_s1 = inlined_call_operand.vmem [shape: bf16[288,64], index: 1, kind: input, shape index: {}]   ;;  %s1301_s0 = inlined_call_operand.vmem [shape: bf16[128,288], index: 0, kind: input, shape index: {}]   ;;  %s1302_s4 = inlined_call_operand.vmem [shape: f32[1,64], index: 4, kind: output, shape index: {1}]   ;;  %s1303_s5 = inlined_call_operand.vmem [shape: f32[1,64], index: 5, kind: output, shape index: {2}]   ;;  %s1304_s2 = inlined_call_operand.vmem [shape: f32[1,64], index: 2, kind: input, shape index: {}]   ;;  %s1305_s3 = inlined_call_operand.vmem [shape: f32[128,64], index: 3, kind: output, shape index: {0}]  }
   0x1   :  { %v934_v0 = vld [vmem:[%s1300_s1 + $0x40] sm:$0xff]   ;;  %v936_v2 = vld [vmem:[%s1300_s1 + $0x48] sm:$0xff]   ;;  %v938_v4 = vld [vmem:[%s1300_s1 + $0x50] sm:$0xff]   ;;  %545 = vst.msk [vmem:[%s1302_s4] sm:$0x1] %vm544_vm1, %v984_v42 }
   0x2   :  { %v935_v1 = vld [vmem:[%s1300_s1] sm:$0xff]   ;;  %823 = vmatprep.subr.bf16.mxu0 %v934_v0  ;;  %917 = vmatprep.subr.bf16.mxu1 %v934_v0  ;;  %v937_v3 = vld [vmem:[%s1300_s1 + $0x8] sm:$0xff]   ;;  %v939_v5 = vld [vmem:[%s1300_s1 + $0x10] sm:$0xff]   ;;  %546 = vst.msk [vmem:[%s1303_s5] sm:$0x1] %vm544_vm1, %v984_v42 }
   0x3   :  { %824 = vmatpush3.bf16.msra.mxu0 %v935_v1  ;;  %925 = vmatpush3.bf16.msra.mxu1 %v935_v1  ;;  %v940_v6 = vld [vmem:[%s1300_s1 + $0x58] sm:$0xff]   ;;  %v942_v8 = vld [vmem:[%s1300_s1 + $0x60] sm:$0xff]   ;;  %v944_v10 = vld [vmem:[%s1300_s1 + $0x68] sm:$0xff]  }
   0x4   :  { %825 = vmatprep.subr.bf16.mxu0 %v936_v2  ;;  %918 = vmatprep.subr.bf16.mxu1 %v936_v2  ;;  %v941_v7 = vld [vmem:[%s1300_s1 + $0x18] sm:$0xff]   ;;  %v943_v9 = vld [vmem:[%s1300_s1 + $0x20] sm:$0xff]   ;;  %v945_v13 = vld [vmem:[%s1300_s1 + $0x28] sm:$0xff]  }
   0x5   :  { %v952_v11 = vld [vmem:[%s1301_s0 + $0x4] ss:$12 sps:$4 sm:$0xff]   ;;  %v955_v12 = vld [vmem:[%s1301_s0 + $0x94] ss:$12 sps:$4 sm:$0xff]   ;;  %v948_v16 = vld [vmem:[%s1300_s1 + $0x78] sm:$0xff]  }
   0x6   :  { %v946_v14 = vld [vmem:[%s1300_s1 + $0x70] sm:$0xff]   ;;  %378 = vmatprep.mubr.bf16.mxu0 %v952_v11  ;;  %426 = vmatprep.mubr.bf16.mxu1 %v955_v12  ;;  %v949_v17 = vld [vmem:[%s1300_s1 + $0x38] sm:$0xff]   ;;  %v950_v18 = vld [vmem:[%s1301_s0] ss:$12 sps:$4 sm:$0xff]  }
   0x7   :  { %826 = vmatpush3.bf16.msra.mxu0 %v937_v3  ;;  %926 = vmatpush3.bf16.msra.mxu1 %v937_v3  ;;  %v947_v15 = vld [vmem:[%s1300_s1 + $0x30] sm:$0xff]   ;;  %v960_v19 = vld [vmem:[%s1300_s1 + $0x80] sm:$0xff]   ;;  %v956_v21 = vld [vmem:[%s1301_s0 + $0x1c] ss:$12 sps:$4 sm:$0xff]  }
   0x8   :  { %827 = vmatprep.subr.bf16.mxu0 %v938_v4  ;;  %919 = vmatprep.subr.bf16.mxu1 %v938_v4  ;;  %v953_v20 = vld [vmem:[%s1301_s0 + $0x90] ss:$12 sps:$4 sm:$0xff]   ;;  %v958_v22 = vld [vmem:[%s1301_s0 + $0xac] ss:$12 sps:$4 sm:$0xff]   ;;  %v962_v25 = vld [vmem:[%s1301_s0 + $0xa8] ss:$12 sps:$4 sm:$0xff]  }
   0x9   :  { %v963_v23 = vld [vmem:[%s1300_s1 + $0x88] sm:$0xff]   ;;  %v961_v24 = vld [vmem:[%s1301_s0 + $0x18] ss:$12 sps:$4 sm:$0xff]   ;;  %v964_v26 = vld [vmem:[%s1301_s0 + $0x34] ss:$12 sps:$4 sm:$0xff]  }
   0xa   :  { %v966_v27 = vld [vmem:[%s1301_s0 + $0x8] ss:$12 sps:$4 sm:$0xff]   ;;  %v967_v28 = vld [vmem:[%s1301_s0 + $0x30] ss:$12 sps:$4 sm:$0xff]   ;;  %v968_v29 = vld [vmem:[%s1301_s0 + $0x20] ss:$12 sps:$4 sm:$0xff]  }
   0xb   :  { %828 = vmatpush3.bf16.msra.mxu0 %v939_v5  ;;  %927 = vmatpush3.bf16.msra.mxu1 %v939_v5  ;;  %v969_v30 = vld [vmem:[%s1301_s0 + $0x4c] ss:$12 sps:$4 sm:$0xff]   ;;  %v972_v32 = vld [vmem:[%s1301_s0 + $0x48] ss:$12 sps:$4 sm:$0xff]   ;;  %v973_v33 = vld [vmem:[%s1301_s0 + $0x50] ss:$12 sps:$4 sm:$0xff]  }
   0xc   :  { %829 = vmatprep.subr.bf16.mxu0 %v940_v6  ;;  %920 = vmatprep.subr.bf16.mxu1 %v940_v6  ;;  %v971_v31 = vld [vmem:[%s1301_s0 + $0x38] ss:$12 sps:$4 sm:$0xff]   ;;  %v976_v35 = vld [vmem:[%s1301_s0 + $0x68] ss:$12 sps:$4 sm:$0xff]   ;;  %v977_v36 = vld [vmem:[%s1301_s0 + $0x60] ss:$12 sps:$4 sm:$0xff]  }
   0xd   :  { %v974_v34 = vld [vmem:[%s1301_s0 + $0x64] ss:$12 sps:$4 sm:$0xff]   ;;  %v978_v37 = vld [vmem:[%s1301_s0 + $0x80] ss:$12 sps:$4 sm:$0xff]   ;;  %v979_v38 = vld [vmem:[%s1301_s0 + $0x7c] ss:$12 sps:$4 sm:$0xff]  }
   0xe   :  { %v981_v39 = vld [vmem:[%s1301_s0 + $0x98] ss:$12 sps:$4 sm:$0xff]   ;;  %v983_v41 = vld [vmem:[%s1301_s0 + $0xb0] ss:$12 sps:$4 sm:$0xff]   ;;  %v1168_v3 = vld [vmem:[%s1304_s2] ss:$0 sm:$0xff] }
   0xf   :  { %830 = vmatpush3.bf16.msra.mxu0 %v941_v7  ;;  %928 = vmatpush3.bf16.msra.mxu1 %v941_v7  ;;  %v982_v40 = vld [vmem:[%s1301_s0 + $0x78] ss:$12 sps:$4 sm:$0xff]  }
  0x10   :  { %831 = vmatprep.subr.bf16.mxu0 %v942_v8  ;;  %921 = vmatprep.subr.bf16.mxu1 %v942_v8 }
  0x13   :  { %832 = vmatpush3.bf16.msra.mxu0 %v943_v9  ;;  %929 = vmatpush3.bf16.msra.mxu1 %v943_v9 }
  0x14   :  { %833 = vmatprep.subr.bf16.mxu0 %v944_v10  ;;  %922 = vmatprep.subr.bf16.mxu1 %v944_v10 }
  0x17   :  { %834 = vmatpush3.bf16.msra.mxu0 %v945_v13  ;;  %930 = vmatpush3.bf16.msra.mxu1 %v945_v13 }
  0x18   :  { %835 = vmatprep.subr.bf16.mxu0 %v946_v14  ;;  %923 = vmatprep.subr.bf16.mxu1 %v946_v14 }
  0x1b   :  { %836 = vmatpush3.bf16.msra.mxu0 %v947_v15  ;;  %931 = vmatpush3.bf16.msra.mxu1 %v947_v15 }
  0x1c   :  { %837 = vmatprep.subr.bf16.mxu0 %v948_v16  ;;  %924 = vmatprep.subr.bf16.mxu1 %v948_v16 }
  0x1f   :  { %838 = vmatpush3.bf16.msra.mxu0 %v949_v17  ;;  %932 = vmatpush3.bf16.msra.mxu1 %v949_v17 }
  0x20   :  { %897 = vmatprep.subr.bf16.mxu1 %v960_v19 }
  0x22   :  { %379 = vmatmul.mubr.bf16.vlgmr.msra.gmra.mrb[0].mxu0 %v950_v18  ;;  %427 = vmatmul.mubr.bf16.vlgmr.msra.gmra.mrb[0].mxu1 %v953_v20 }
  0x23   :  { %386 = vmatprep.mubr.bf16.mxu0 %v956_v21  ;;  %434 = vmatprep.mubr.bf16.mxu1 %v958_v22 }
  0x24   :  { %898 = vmatpush3.bf16.msra.mxu1 %v960_v19 }
  0x25   :  { %899 = vmatprep.subr.bf16.mxu1 %v963_v23 }
  0x28   :  { %900 = vmatpush3.bf16.msra.mxu1 %v963_v23 }
  0x2a   :  { %387 = vmatmul.mubr.bf16.gmra.mrb[4].mxu0 %v961_v24  ;;  %435 = vmatmul.mubr.bf16.gmra.mrb[4].mxu1 %v962_v25 }
  0x2b   :  { %394 = vmatprep.mubr.bf16.mxu0 %v964_v26  ;;  %901 = vmatprep.mubr.msk.bf16.mxu1 %vm321_vm0, %v966_v27 }
  0x32   :  { %395 = vmatmul.mubr.bf16.gmra.mrb[8].mxu0 %v967_v28  ;;  %902 = vmatmul.mubr.msk.bf16.vlgmr.msra.gmra.mrb[8].mxu1 %vm321_vm0, %v968_v29 }
  0x33   :  { %402 = vmatprep.mubr.bf16.mxu0 %v969_v30  ;;  %905 = vmatprep.mubr.msk.bf16.mxu1 %vm321_vm0, %v971_v31 }
  0x3a   :  { %403 = vmatmul.mubr.bf16.gmra.mrb[12].mxu0 %v972_v32  ;;  %906 = vmatmul.mubr.msk.bf16.gmra.mrb[12].mxu1 %vm321_vm0, %v973_v33 }
  0x3b   :  { %410 = vmatprep.mubr.bf16.mxu0 %v974_v34  ;;  %909 = vmatprep.mubr.msk.bf16.mxu1 %vm321_vm0, %v976_v35 }
  0x42   :  { %411 = vmatmul.mubr.bf16.gmra.mrb[16].mxu0 %v977_v36  ;;  %910 = vmatmul.mubr.msk.bf16.gmra.mrb[16].mxu1 %vm321_vm0, %v978_v37 }
  0x43   :  { %418 = vmatprep.mubr.bf16.mxu0 %v979_v38  ;;  %913 = vmatprep.mubr.msk.bf16.mxu1 %vm321_vm0, %v981_v39 }
  0x4a   :  { %419 = vmatmul.mubr.bf16.gmra.mrb[20].mxu0 %v982_v40  ;;  %914 = vmatmul.mubr.msk.bf16.gmra.mrb[20].mxu1 %vm321_vm0, %v983_v41 }
  0xf5   :  { %v839_v43 = vpop.f32.mrb[0].mxu0  ;;  %v875_v44 = vpop.f32.mrb[0].mxu1 }
  0xf6   :  { %v840_v45 = vpop.f32.mrb[1].mxu0  ;;  %v876_v46 = vpop.f32.mrb[1].mxu1 }
  0xf7   :  { %v841_v47 = vadd.f32 %v840_v45, %v839_v43  ;;  %v842_v48 = vpop.f32.mrb[2].mxu0  ;;  %v1157_v49 = vadd.f32 %v876_v46, %v875_v44  ;;  %v878_v50 = vpop.f32.mrb[2].mxu1 }
  0xf8   :  { %v843_v51 = vpop.f32.mrb[3].mxu0  ;;  %v879_v52 = vpop.f32.mrb[3].mxu1 }
  0xf9   :  { %v844_v53 = vadd.f32 %v843_v51, %v842_v48  ;;  %v1159_v54 = vadd.f32 %v879_v52, %v878_v50  ;;  %v381_v7 = vadd.f32 %v841_v47, %v1168_v3 }
  0xfb   :  { %v384_v16 = vadd.f32 %v844_v53, %v1168_v3 }
  0xfd   :  { %v845_v55 = vpop.f32.mrb[4].mxu0  ;;  %v881_v56 = vpop.f32.mrb[4].mxu1 }
  0xfe   :  { %v846_v57 = vpop.f32.mrb[5].mxu0  ;;  %v882_v58 = vpop.f32.mrb[5].mxu1 }
  0xff   :  { %v847_v59 = vadd.f32 %v846_v57, %v845_v55  ;;  %v848_v60 = vpop.f32.mrb[6].mxu0  ;;  %v1161_v61 = vadd.f32 %v882_v58, %v881_v56  ;;  %v884_v62 = vpop.f32.mrb[6].mxu1 }
 0x100   :  { %v849_v63 = vpop.f32.mrb[7].mxu0  ;;  %v885_v0 = vpop.f32.mrb[7].mxu1 }
 0x101   :  { %v850_v1 = vadd.f32 %v849_v63, %v848_v60  ;;  %v1163_v2 = vadd.f32 %v885_v0, %v884_v62  ;;  %v389_v4 = vadd.f32 %v847_v59, %v1168_v3 }
 0x103   :  { %v392_v11 = vadd.f32 %v850_v1, %v1168_v3 }
 0x105   :  { %v851_v5 = vpop.f32.mrb[8].mxu0  ;;  %v903_v6 = vpop.f32.mrb[8].mxu1 }
 0x106   :  { %v486_v8 = vadd.f32 %v903_v6, %v389_v4  ;;  %v852_v9 = vpop.f32.mrb[9].mxu0  ;;  %v477_v10 = vpop.f32.mrb[9].mxu1 }
 0x107   :  { %v853_v12 = vadd.f32 %v852_v9, %v851_v5  ;;  %v478_v13 = vadd.f32 %v477_v10, %v381_v7  ;;  %v854_v14 = vpop.f32.mrb[10].mxu0  ;;  %v904_v15 = vpop.f32.mrb[10].mxu1 }
 0x108   :  { %746 = vst.msk [vmem:[%s1305_s3 + $0x10] sm:$0xff] %vm647_vm2, %v486_v8  ;;  %v489_v17 = vadd.f32 %v904_v15, %v392_v11  ;;  %v855_v18 = vpop.f32.mrb[11].mxu0  ;;  %v480_v19 = vpop.f32.mrb[11].mxu1  ;;  %v691_v23 = vmul.f32 %v486_v8, %v486_v8  ;;  %v651_v29 = vsel %vm647_vm2, %v486_v8, 0.0 }
 0x109   :  { %v689_v20 = vmul.f32 %v478_v13, %v478_v13  ;;  %744 = vst.msk [vmem:[%s1305_s3] sm:$0xff] %vm647_vm2, %v478_v13  ;;  %v856_v21 = vadd.f32 %v855_v18, %v854_v14  ;;  %v481_v22 = vadd.f32 %v480_v19, %v384_v16  ;;  %v648_v24 = vsel %vm647_vm2, %v478_v13, 0.0 }
 0x10a   :  { %747 = vst.msk [vmem:[%s1305_s3 + $0x18] sm:$0xff] %vm647_vm2, %v489_v17  ;;  %v692_v27 = vmul.f32 %v489_v17, %v489_v17  ;;  %v397_v34 = vadd.f32 %v853_v12, %v1168_v3  ;;  %v708_v39 = vsel %vm647_vm2, %v691_v23, 0.0  ;;  %v653_v40 = vsel %vm647_vm2, %v489_v17, 0.0 }
 0x10b   :  { %v649_v25 = vsel %vm647_vm2, %v481_v22, 0.0  ;;  %v690_v26 = vmul.f32 %v481_v22, %v481_v22  ;;  %745 = vst.msk [vmem:[%s1305_s3 + $0x8] sm:$0xff] %vm647_vm2, %v481_v22  ;;  %v705_v30 = vsel %vm647_vm2, %v689_v20, 0.0  ;;  %v400_v50 = vadd.f32 %v856_v21, %v1168_v3 }
 0x10c   :  { %v650_v28 = vadd.f32 %v649_v25, %v648_v24  ;;  %v710_v45 = vsel %vm647_vm2, %v692_v27, 0.0 }
 0x10d   :  { %v706_v31 = vsel %vm647_vm2, %v690_v26, 0.0  ;;  %v857_v32 = vpop.f32.mrb[12].mxu0  ;;  %v907_v33 = vpop.f32.mrb[12].mxu1 }
 0x10e   :  { %v652_v35 = vadd.f32 %v651_v29, %v650_v28  ;;  %v707_v36 = vadd.f32 %v706_v31, %v705_v30  ;;  %v858_v37 = vpop.f32.mrb[13].mxu0  ;;  %v493_v38 = vpop.f32.mrb[13].mxu1 }
 0x10f   :  { %v859_v41 = vadd.f32 %v858_v37, %v857_v32  ;;  %v494_v42 = vadd.f32 %v493_v38, %v397_v34  ;;  %v860_v43 = vpop.f32.mrb[14].mxu0  ;;  %v908_v44 = vpop.f32.mrb[14].mxu1  ;;  %v437_v32 = vadd.f32 %v1161_v61, %v1168_v3 }
 0x110   :  { %v709_v46 = vadd.f32 %v708_v39, %v707_v36  ;;  %v654_v47 = vadd.f32 %v653_v40, %v652_v35  ;;  %v861_v48 = vpop.f32.mrb[15].mxu0  ;;  %v496_v51 = vpop.f32.mrb[15].mxu1  ;;  %v429_v40 = vadd.f32 %v1157_v49, %v1168_v3 }
 0x111   :  { %v405_v52 = vadd.f32 %v859_v41, %v1168_v3  ;;  %v655_v53 = vsel %vm647_vm2, %v494_v42, 0.0  ;;  %v693_v55 = vmul.f32 %v494_v42, %v494_v42  ;;  %748 = vst.msk [vmem:[%s1305_s3 + $0x20] sm:$0xff] %vm647_vm2, %v494_v42  ;;  %v862_v56 = vadd.f32 %v861_v48, %v860_v43 }
 0x112   :  { %v656_v57 = vadd.f32 %v655_v53, %v654_v47  ;;  %v711_v58 = vadd.f32 %v710_v45, %v709_v46  ;;  %v497_v59 = vadd.f32 %v496_v51, %v400_v50  ;;  %v440_v48 = vadd.f32 %v1163_v2, %v1168_v3 }
 0x113   :  { %v502_v60 = vadd.f32 %v907_v33, %v405_v52  ;;  %v712_v62 = vsel %vm647_vm2, %v693_v55, 0.0  ;;  %v408_v63 = vadd.f32 %v862_v56, %v1168_v3  ;;  %v432_v51 = vadd.f32 %v1159_v54, %v1168_v3 }
 0x114   :  { %v713_v0 = vadd.f32 %v712_v62, %v711_v58  ;;  %v657_v1 = vsel %vm647_vm2, %v497_v59, 0.0  ;;  %v694_v4 = vmul.f32 %v497_v59, %v497_v59  ;;  %749 = vst.msk [vmem:[%s1305_s3 + $0x28] sm:$0xff] %vm647_vm2, %v497_v59 }
 0x115   :  { %v695_v5 = vmul.f32 %v502_v60, %v502_v60  ;;  %750 = vst.msk [vmem:[%s1305_s3 + $0x30] sm:$0xff] %vm647_vm2, %v502_v60  ;;  %v505_v6 = vadd.f32 %v908_v44, %v408_v63  ;;  %v658_v7 = vadd.f32 %v657_v1, %v656_v57  ;;  %v659_v8 = vsel %vm647_vm2, %v502_v60, 0.0  ;;  %v863_v9 = vpop.f32.mrb[16].mxu0  ;;  %v911_v10 = vpop.f32.mrb[16].mxu1 }
 0x116   :  { %v714_v11 = vsel %vm647_vm2, %v694_v4, 0.0  ;;  %v864_v12 = vpop.f32.mrb[17].mxu0  ;;  %v509_v13 = vpop.f32.mrb[17].mxu1 }
 0x117   :  { %v696_v14 = vmul.f32 %v505_v6, %v505_v6  ;;  %751 = vst.msk [vmem:[%s1305_s3 + $0x38] sm:$0xff] %vm647_vm2, %v505_v6  ;;  %v660_v15 = vadd.f32 %v659_v8, %v658_v7  ;;  %v715_v16 = vadd.f32 %v714_v11, %v713_v0  ;;  %v716_v17 = vsel %vm647_vm2, %v695_v5, 0.0  ;;  %v866_v18 = vpop.f32.mrb[18].mxu0  ;;  %v912_v19 = vpop.f32.mrb[18].mxu1 }
 0x118   :  { %v865_v20 = vadd.f32 %v864_v12, %v863_v9  ;;  %v867_v21 = vpop.f32.mrb[19].mxu0  ;;  %v661_v22 = vsel %vm647_vm2, %v505_v6, 0.0  ;;  %v512_v23 = vpop.f32.mrb[19].mxu1 }
 0x119   :  { %v717_v24 = vadd.f32 %v716_v17, %v715_v16  ;;  %v868_v25 = vadd.f32 %v867_v21, %v866_v18  ;;  %v662_v26 = vadd.f32 %v661_v22, %v660_v15  ;;  %v718_v27 = vsel %vm647_vm2, %v696_v14, 0.0 }
 0x11a   :  { %v413_v28 = vadd.f32 %v865_v20, %v1168_v3 }
 0x11b   :  { %v719_v29 = vadd.f32 %v718_v27, %v717_v24  ;;  %v416_v30 = vadd.f32 %v868_v25, %v1168_v3 }
 0x11c   :  { %v510_v31 = vadd.f32 %v509_v13, %v413_v28 }
 0x11d   :  { %v513_v33 = vadd.f32 %v512_v23, %v416_v30  ;;  %v869_v34 = vpop.f32.mrb[20].mxu0  ;;  %v915_v35 = vpop.f32.mrb[20].mxu1 }
 0x11e   :  { %v663_v36 = vsel %vm647_vm2, %v510_v31, 0.0  ;;  %v697_v37 = vmul.f32 %v510_v31, %v510_v31  ;;  %752 = vst.msk [vmem:[%s1305_s3 + $0x40] sm:$0xff] %vm647_vm2, %v510_v31  ;;  %v534_v38 = vadd.f32 %v915_v35, %v437_v32  ;;  %v870_v39 = vpop.f32.mrb[21].mxu0  ;;  %v525_v41 = vpop.f32.mrb[21].mxu1 }
 0x11f   :  { %v664_v42 = vadd.f32 %v663_v36, %v662_v26  ;;  %v665_v61 = vsel %vm647_vm2, %v513_v33, 0.0  ;;  %v698_v43 = vmul.f32 %v513_v33, %v513_v33  ;;  %753 = vst.msk [vmem:[%s1305_s3 + $0x48] sm:$0xff] %vm647_vm2, %v513_v33  ;;  %v871_v44 = vadd.f32 %v870_v39, %v869_v34  ;;  %v872_v45 = vpop.f32.mrb[22].mxu0  ;;  %v916_v46 = vpop.f32.mrb[22].mxu1 }
 0x120   :  { %v720_v47 = vsel %vm647_vm2, %v697_v37, 0.0  ;;  %758 = vst.msk [vmem:[%s1305_s3 + $0x70] sm:$0xff] %vm647_vm2, %v534_v38  ;;  %v526_v49 = vadd.f32 %v525_v41, %v429_v40  ;;  %v873_v50 = vpop.f32.mrb[23].mxu0  ;;  %v528_v52 = vpop.f32.mrb[23].mxu1  ;;  %v537_v58 = vadd.f32 %v916_v46, %v440_v48  ;;  %v703_v15 = vmul.f32 %v534_v38, %v534_v38  ;;  %v646_v40 = vld [vmem:[%s1302_s4] sm:$0x1] }
 0x121   :  { %v721_v53 = vadd.f32 %v720_v47, %v719_v29  ;;  %v666_v55 = vadd.f32 %v665_v61, %v664_v42  ;;  %v722_v56 = vsel %vm647_vm2, %v698_v43, 0.0  ;;  %v421_v57 = vadd.f32 %v871_v44, %v1168_v3  ;;  %v688_v61 = vld [vmem:[%s1303_s5] sm:$0x1] }
 0x122   :  { %756 = vst.msk [vmem:[%s1305_s3 + $0x60] sm:$0xff] %vm647_vm2, %v526_v49  ;;  %v874_v2 = vadd.f32 %v873_v50, %v872_v45  ;;  %v529_v62 = vadd.f32 %v528_v52, %v432_v51  ;;  %759 = vst.msk [vmem:[%s1305_s3 + $0x78] sm:$0xff] %vm647_vm2, %v537_v58  ;;  %v701_v7 = vmul.f32 %v526_v49, %v526_v49  ;;  %v675_v20 = vsel %vm647_vm2, %v534_v38, 0.0 }
 0x123   :  { %v723_v59 = vadd.f32 %v722_v56, %v721_v53  ;;  %v518_v60 = vadd.f32 %v911_v10, %v421_v57  ;;  %v671_v10 = vsel %vm647_vm2, %v526_v49, 0.0  ;;  %v704_v21 = vmul.f32 %v537_v58, %v537_v58 }
 0x124   :  { %v424_v0 = vadd.f32 %v874_v2, %v1168_v3  ;;  %757 = vst.msk [vmem:[%s1305_s3 + $0x68] sm:$0xff] %vm647_vm2, %v529_v62  ;;  %v702_v12 = vmul.f32 %v529_v62, %v529_v62  ;;  %v728_v16 = vsel %vm647_vm2, %v701_v7, 0.0  ;;  %v673_v17 = vsel %vm647_vm2, %v529_v62, 0.0 }
 0x125   :  { %v667_v54 = vsel %vm647_vm2, %v518_v60, 0.0  ;;  %v699_v63 = vmul.f32 %v518_v60, %v518_v60  ;;  %754 = vst.msk [vmem:[%s1305_s3 + $0x50] sm:$0xff] %vm647_vm2, %v518_v60  ;;  %v732_v25 = vsel %vm647_vm2, %v703_v15, 0.0  ;;  %v677_v26 = vsel %vm647_vm2, %v537_v58, 0.0 }
 0x126   :  { %v668_v1 = vadd.f32 %v667_v54, %v666_v55  ;;  %v521_v5 = vadd.f32 %v912_v19, %v424_v0  ;;  %v730_v22 = vsel %vm647_vm2, %v702_v12, 0.0  ;;  %v734_v29 = vsel %vm647_vm2, %v704_v21, 0.0 }
 0x127   :  { %v724_v4 = vsel %vm647_vm2, %v699_v63, 0.0 }
 0x128   :  { %v725_v6 = vadd.f32 %v724_v4, %v723_v59  ;;  %v669_v8 = vsel %vm647_vm2, %v521_v5, 0.0  ;;  %v700_v9 = vmul.f32 %v521_v5, %v521_v5  ;;  %755 = vst.msk [vmem:[%s1305_s3 + $0x58] sm:$0xff] %vm647_vm2, %v521_v5 }
 0x129   :  { %v670_v3 = vadd.f32 %v669_v8, %v668_v1 }
 0x12a   :  { %v726_v11 = vsel %vm647_vm2, %v700_v9, 0.0 }
 0x12b   :  { %v672_v13 = vadd.f32 %v671_v10, %v670_v3  ;;  %v727_v14 = vadd.f32 %v726_v11, %v725_v6 }
 0x12d   :  { %v674_v18 = vadd.f32 %v673_v17, %v672_v13  ;;  %v729_v19 = vadd.f32 %v728_v16, %v727_v14 }
 0x12f   :  { %v676_v23 = vadd.f32 %v675_v20, %v674_v18  ;;  %v731_v24 = vadd.f32 %v730_v22, %v729_v19 }
 0x131   :  { %v678_v27 = vadd.f32 %v677_v26, %v676_v23  ;;  %v733_v28 = vadd.f32 %v732_v25, %v731_v24 }
 0x133   :  { %v679_v30 = vrot.slane %v678_v27, 4  ;;  %v735_v31 = vadd.f32 %v734_v29, %v733_v28 }
 0x135   :  { %v680_v32 = vadd.f32 %v679_v30, %v678_v27  ;;  %v736_v33 = vrot.slane %v735_v31, 4 }
 0x137   :  { %v681_v34 = vrot.slane %v680_v32, 2  ;;  %v737_v35 = vadd.f32 %v736_v33, %v735_v31 }
 0x139   :  { %v682_v36 = vadd.f32 %v681_v34, %v680_v32  ;;  %v738_v37 = vrot.slane %v737_v35, 2 }
 0x13b   :  { %v683_v38 = vrot.slane %v682_v36, 1  ;;  %v739_v39 = vadd.f32 %v738_v37, %v737_v35 }
 0x13d   :  { %v684_v41 = vadd.f32 %v683_v38, %v682_v36  ;;  %v740_v42 = vrot.slane %v739_v39, 1 }
 0x13f   :  { %v685_v43 = vadd.f32 %v684_v41, %v646_v40  ;;  %v741_v44 = vadd.f32 %v740_v42, %v739_v39 }
 0x141   :  { %687 = vst.msk [vmem:[%s1302_s4] sm:$0x1] %vm544_vm1, %v685_v43  ;;  %v742_v45 = vadd.f32 %v741_v44, %v688_v61 }
 0x143   :  { %743 = vst.msk [vmem:[%s1303_s5] sm:$0x1] %vm544_vm1, %v742_v45 }

// kernel: transform_forward.24
= control target key start
LH: loop header
LB: loop body
LE: loop exit
PB: predicated region body
PF: predicated region fallthrough
CT: control target
= control target key end

     0   :  { %s104_s0 = inlined_call_operand.vmem [shape: f32[32,128], index: 0, kind: input, shape index: {}]   ;;  %s105_s1 = inlined_call_operand.vmem [shape: f32[1,128], index: 1, kind: input, shape index: {}]   ;;  %s106_s2 = inlined_call_operand.vmem [shape: f32[1,128], index: 2, kind: input, shape index: {}]   ;;  %s107_s3 = inlined_call_operand.vmem [shape: f32[32,128], index: 3, kind: output, shape index: {}]  }
   0x1   :  { %v14_v0 = vld [vmem:[%s104_s0] sm:$0xff]  ;;  %v15_v4 = vld [vmem:[%s104_s0 + $0x8] sm:$0xff]  ;;  %v16_v5 = vld [vmem:[%s104_s0 + $0x10] sm:$0xff] }
   0x2   :  { %v52_v1 = vld [vmem:[%s105_s1] ss:$0 sm:$0xff]  ;;  %v17_v6 = vld [vmem:[%s104_s0 + $0x18] sm:$0xff] }
   0x3   :  { %v53_v2 = vld [vmem:[%s106_s2] ss:$0 sm:$0xff]  ;;  %v25_v3 = vmul.f32 %v52_v1, %v14_v0  ;;  %v26_v7 = vmul.f32 %v52_v1, %v15_v4  ;;  %v27_v8 = vmul.f32 %v52_v1, %v16_v5  ;;  %v28_v9 = vmul.f32 %v52_v1, %v17_v6 }
   0x5   :  { %v36_v10 = vadd.f32 %v53_v2, %v25_v3  ;;  %v37_v11 = vadd.f32 %v53_v2, %v26_v7  ;;  %v38_v12 = vadd.f32 %v53_v2, %v27_v8  ;;  %v39_v13 = vadd.f32 %v53_v2, %v28_v9 }
   0x7   :  { %v40_v14 = vmax.f32 %v36_v10, 0.0  ;;  %v41_v15 = vmax.f32 %v37_v11, 0.0  ;;  %v42_v16 = vmax.f32 %v38_v12, 0.0  ;;  %v43_v17 = vmax.f32 %v39_v13, 0.0 }
   0x9   :  { %44 = vst [vmem:[%s107_s3] sm:$0xff] %v40_v14  ;;  %45 = vst [vmem:[%s107_s3 + $0x8] sm:$0xff] %v41_v15 }
   0xa   :  { %46 = vst [vmem:[%s107_s3 + $0x10] sm:$0xff] %v42_v16  ;;  %47 = vst [vmem:[%s107_s3 + $0x18] sm:$0xff] %v43_v17 }

// kernel: transform_forward.23
= control target key start
LH: loop header
LB: loop body
LE: loop exit
PB: predicated region body
PF: predicated region fallthrough
CT: control target
= control target key end

     0   :  { %vm375_vm0 = vcmask 523264   ;;  %v780_v46 = vmov 0.0   ;;  %s982_s1 = inlined_call_operand.vmem [shape: bf16[576,128], index: 1, kind: input, shape index: {}]   ;;  %s983_s0 = inlined_call_operand.vmem [shape: bf16[32,576], index: 0, kind: input, shape index: {}]   ;;  %s984_s4 = inlined_call_operand.vmem [shape: f32[1,128], index: 4, kind: output, shape index: {1}]   ;;  %s985_s5 = inlined_call_operand.vmem [shape: f32[1,128], index: 5, kind: output, shape index: {2}]   ;;  %s986_s2 = inlined_call_operand.vmem [shape: f32[1,128], index: 2, kind: input, shape index: {}]   ;;  %s987_s3 = inlined_call_operand.vmem [shape: f32[32,128], index: 3, kind: output, shape index: {0}]  }
   0x1   :  { %v730_v0 = vld [vmem:[%s982_s1 + $0x40] sm:$0xff]   ;;  %v734_v4 = vld [vmem:[%s982_s1 + $0x48] sm:$0xff]   ;;  %v738_v8 = vld [vmem:[%s982_s1 + $0x50] sm:$0xff]   ;;  %533 = vst [vmem:[%s984_s4] sm:$0x1] %v780_v46 }
   0x2   :  { %v731_v1 = vld [vmem:[%s982_s1] sm:$0xff]   ;;  %655 = vmatprep.subr.bf16.mxu0 %v730_v0  ;;  %v735_v5 = vld [vmem:[%s982_s1 + $0x8] sm:$0xff]   ;;  %v739_v9 = vld [vmem:[%s982_s1 + $0x10] sm:$0xff]   ;;  %534 = vst [vmem:[%s985_s5] sm:$0x1] %v780_v46 }
   0x3   :  { %v732_v2 = vld [vmem:[%s982_s1 + $0xc0] sm:$0xff]   ;;  %656 = vmatpush3.bf16.msra.mxu0 %v731_v1  ;;  %v736_v6 = vld [vmem:[%s982_s1 + $0xc8] sm:$0xff]   ;;  %v740_v10 = vld [vmem:[%s982_s1 + $0xd0] sm:$0xff]  }
   0x4   :  { %v733_v3 = vld [vmem:[%s982_s1 + $0x80] sm:$0xff]   ;;  %683 = vmatprep.subr.bf16.mxu1 %v732_v2  ;;  %657 = vmatprep.subr.bf16.mxu0 %v734_v4  ;;  %v737_v7 = vld [vmem:[%s982_s1 + $0x88] sm:$0xff]   ;;  %v741_v11 = vld [vmem:[%s982_s1 + $0x90] sm:$0xff]  }
   0x5   :  { %684 = vmatpush3.bf16.msra.mxu1 %v733_v3  ;;  %v742_v12 = vld [vmem:[%s982_s1 + $0x58] sm:$0xff]   ;;  %v746_v16 = vld [vmem:[%s982_s1 + $0x60] sm:$0xff]   ;;  %v750_v20 = vld [vmem:[%s982_s1 + $0x68] sm:$0xff]  }
   0x6   :  { %685 = vmatprep.subr.bf16.mxu1 %v736_v6  ;;  %v743_v13 = vld [vmem:[%s982_s1 + $0x18] sm:$0xff]   ;;  %v747_v17 = vld [vmem:[%s982_s1 + $0x20] sm:$0xff]   ;;  %v751_v21 = vld [vmem:[%s982_s1 + $0x28] sm:$0xff]  }
   0x7   :  { %658 = vmatpush3.bf16.msra.mxu0 %v735_v5  ;;  %v744_v14 = vld [vmem:[%s982_s1 + $0xd8] sm:$0xff]   ;;  %v748_v18 = vld [vmem:[%s982_s1 + $0xe0] sm:$0xff]   ;;  %v752_v22 = vld [vmem:[%s982_s1 + $0xe8] sm:$0xff]  }
   0x8   :  { %659 = vmatprep.subr.bf16.mxu0 %v738_v8  ;;  %v745_v15 = vld [vmem:[%s982_s1 + $0x98] sm:$0xff]   ;;  %v749_v19 = vld [vmem:[%s982_s1 + $0xa0] sm:$0xff]   ;;  %v753_v23 = vld [vmem:[%s982_s1 + $0xa8] sm:$0xff]  }
   0x9   :  { %686 = vmatpush3.bf16.msra.mxu1 %v737_v7  ;;  %v754_v24 = vld [vmem:[%s982_s1 + $0x70] sm:$0xff]   ;;  %v758_v28 = vld [vmem:[%s982_s1 + $0x78] sm:$0xff]   ;;  %v765_v34 = vld [vmem:[%s982_s1 + $0x100] sm:$0xff]  }
   0xa   :  { %687 = vmatprep.subr.bf16.mxu1 %v740_v10  ;;  %v755_v25 = vld [vmem:[%s982_s1 + $0x30] sm:$0xff]   ;;  %v759_v29 = vld [vmem:[%s982_s1 + $0x38] sm:$0xff]   ;;  %v768_v36 = vld [vmem:[%s983_s0 + $0xc] ss:$20 sps:$4 sm:$0xff]  }
   0xb   :  { %660 = vmatpush3.bf16.msra.mxu0 %v739_v9  ;;  %v756_v26 = vld [vmem:[%s982_s1 + $0xf0] sm:$0xff]   ;;  %v760_v30 = vld [vmem:[%s982_s1 + $0xf8] sm:$0xff]   ;;  %v769_v37 = vld [vmem:[%s982_s1 + $0x108] sm:$0xff]   ;;  %463 = vmatprep.mubr.bf16.mxu1 %v768_v36 }
   0xc   :  { %661 = vmatprep.subr.bf16.mxu0 %v742_v12  ;;  %v757_v27 = vld [vmem:[%s982_s1 + $0xb0] sm:$0xff]   ;;  %v763_v32 = vld [vmem:[%s983_s0 + $0x4] ss:$20 sps:$4 sm:$0xff]   ;;  %v766_v35 = vld [vmem:[%s983_s0 + $0x8] ss:$20 sps:$4 sm:$0xff]  }
   0xd   :  { %688 = vmatpush3.bf16.msra.mxu1 %v741_v11  ;;  %v761_v31 = vld [vmem:[%s983_s0] ss:$20 sps:$4 sm:$0xff]   ;;  %v764_v33 = vld [vmem:[%s982_s1 + $0xb8] sm:$0xff]   ;;  %414 = vmatprep.mubr.bf16.mxu0 %v763_v32  ;;  %v776_v42 = vld [vmem:[%s983_s0 + $0x30] ss:$20 sps:$4 sm:$0xff]  }
   0xe   :  { %689 = vmatprep.subr.bf16.mxu1 %v744_v14  ;;  %v770_v38 = vld [vmem:[%s983_s0 + $0x2c] ss:$20 sps:$4 sm:$0xff]   ;;  %v772_v39 = vld [vmem:[%s983_s0 + $0x28] ss:$20 sps:$4 sm:$0xff]   ;;  %v773_v40 = vld [vmem:[%s982_s1 + $0x110] sm:$0xff]  }
   0xf   :  { %662 = vmatpush3.bf16.msra.mxu0 %v743_v13  ;;  %v774_v41 = vld [vmem:[%s983_s0 + $0x34] ss:$20 sps:$4 sm:$0xff]   ;;  %v777_v43 = vld [vmem:[%s982_s1 + $0x118] sm:$0xff]   ;;  %v778_v44 = vld [vmem:[%s983_s0 + $0x10] ss:$20 sps:$4 sm:$0xff]  }
  0x10   :  { %663 = vmatprep.subr.bf16.mxu0 %v746_v16  ;;  %v779_v45 = vld [vmem:[%s983_s0 + $0x38] ss:$20 sps:$4 sm:$0xff]   ;;  %v606_v48 = vld [vmem:[%s986_s2] ss:$0 sm:$0xff] }
  0x11   :  { %690 = vmatpush3.bf16.msra.mxu1 %v745_v15  ;;  %v574_v46 = vld [vmem:[%s985_s5] sm:$0x1] }
  0x12   :  { %691 = vmatprep.subr.bf16.mxu1 %v748_v18 }
  0x13   :  { %664 = vmatpush3.bf16.msra.mxu0 %v747_v17 }
  0x14   :  { %665 = vmatprep.subr.bf16.mxu0 %v750_v20 }
  0x15   :  { %692 = vmatpush3.bf16.msra.mxu1 %v749_v19 }
  0x16   :  { %693 = vmatprep.subr.bf16.mxu1 %v752_v22 }
  0x17   :  { %666 = vmatpush3.bf16.msra.mxu0 %v751_v21 }
  0x18   :  { %667 = vmatprep.subr.bf16.mxu0 %v754_v24 }
  0x19   :  { %694 = vmatpush3.bf16.msra.mxu1 %v753_v23 }
  0x1a   :  { %695 = vmatprep.subr.bf16.mxu1 %v756_v26 }
  0x1b   :  { %668 = vmatpush3.bf16.msra.mxu0 %v755_v25 }
  0x1c   :  { %669 = vmatprep.subr.bf16.mxu0 %v758_v28 }
  0x1d   :  { %696 = vmatpush3.bf16.msra.mxu1 %v757_v27 }
  0x1e   :  { %697 = vmatprep.subr.bf16.mxu1 %v760_v30 }
  0x1f   :  { %670 = vmatpush3.bf16.msra.mxu0 %v759_v29 }
  0x20   :  { %717 = vmatprep.subr.bf16.mxu0 %v765_v34 }
  0x21   :  { %698 = vmatpush3.bf16.msra.mxu1 %v764_v33 }
  0x22   :  { %415 = vmatmul.mubr.bf16.vlgmr.msra.gmra.mrb[0].mxu0 %v761_v31 }
  0x23   :  { %718 = vmatpush3.bf16.msra.mxu0 %v765_v34  ;;  %422 = vmatprep.mubr.bf16.mxu0 %v770_v38 }
  0x24   :  { %464 = vmatmul.mubr.bf16.vlgmr.msra.gmra.mrb[0].mxu1 %v766_v35  ;;  %719 = vmatprep.subr.bf16.mxu0 %v769_v37 }
  0x25   :  { %471 = vmatprep.mubr.bf16.mxu1 %v774_v41 }
  0x27   :  { %720 = vmatpush3.bf16.msra.mxu0 %v769_v37 }
  0x28   :  { %721 = vmatprep.subr.bf16.mxu0 %v773_v40 }
  0x2a   :  { %423 = vmatmul.mubr.bf16.gmra.mrb[4].mxu0 %v772_v39 }
  0x2b   :  { %725 = vmatprep.mubr.msk.bf16.mxu0 %vm375_vm0, %v778_v44  ;;  %722 = vmatpush3.bf16.msra.mxu0 %v773_v40 }
  0x2c   :  { %472 = vmatmul.mubr.bf16.gmra.mrb[4].mxu1 %v776_v42  ;;  %723 = vmatprep.subr.bf16.mxu0 %v777_v43 }
  0x2f   :  { %724 = vmatpush3.bf16.msra.mxu0 %v777_v43  ;;  %v562_v43 = vld [vmem:[%s984_s4] sm:$0x1] }
  0x32   :  { %726 = vmatmul.mubr.msk.bf16.vlgmr.msra.gmra.mrb[8].mxu0 %vm375_vm0, %v779_v45 }
  0xf5   :  { %v671_v47 = vpop.f32.mrb[0].mxu0 }
  0xf6   :  { %v672_v49 = vpop.f32.mrb[1].mxu0 }
  0xf7   :  { %v673_v50 = vadd.f32 %v672_v49, %v671_v47  ;;  %v674_v51 = vpop.f32.mrb[2].mxu0  ;;  %v699_v52 = vpop.f32.mrb[0].mxu1 }
  0xf8   :  { %v675_v53 = vpop.f32.mrb[3].mxu0  ;;  %v700_v56 = vpop.f32.mrb[1].mxu1 }
  0xf9   :  { %v417_v54 = vadd.f32 %v673_v50, %v606_v48  ;;  %v676_v55 = vadd.f32 %v675_v53, %v674_v51  ;;  %v701_v57 = vadd.f32 %v700_v56, %v699_v52  ;;  %v702_v58 = vpop.f32.mrb[2].mxu1 }
  0xfa   :  { %v703_v60 = vpop.f32.mrb[3].mxu1 }
  0xfb   :  { %v420_v59 = vadd.f32 %v676_v55, %v606_v48  ;;  %v704_v61 = vadd.f32 %v703_v60, %v702_v58  ;;  %v466_v62 = vadd.f32 %v701_v57, %v417_v54 }
  0xfd   :  { %v677_v63 = vpop.f32.mrb[4].mxu0  ;;  %v469_v1 = vadd.f32 %v704_v61, %v420_v59 }
  0xfe   :  { %v678_v0 = vpop.f32.mrb[5].mxu0 }
  0xff   :  { %v679_v2 = vadd.f32 %v678_v0, %v677_v63  ;;  %v680_v3 = vpop.f32.mrb[6].mxu0  ;;  %v705_v4 = vpop.f32.mrb[4].mxu1 }
 0x100   :  { %v681_v5 = vpop.f32.mrb[7].mxu0  ;;  %v706_v8 = vpop.f32.mrb[5].mxu1 }
 0x101   :  { %v425_v6 = vadd.f32 %v679_v2, %v606_v48  ;;  %v682_v7 = vadd.f32 %v681_v5, %v680_v3  ;;  %v707_v9 = vadd.f32 %v706_v8, %v705_v4  ;;  %v708_v10 = vpop.f32.mrb[6].mxu1 }
 0x102   :  { %v709_v12 = vpop.f32.mrb[7].mxu1 }
 0x103   :  { %v428_v11 = vadd.f32 %v682_v7, %v606_v48  ;;  %v710_v13 = vadd.f32 %v709_v12, %v708_v10  ;;  %v474_v14 = vadd.f32 %v707_v9, %v425_v6 }
 0x105   :  { %v727_v15 = vpop.f32.mrb[8].mxu0  ;;  %v477_v16 = vadd.f32 %v710_v13, %v428_v11 }
 0x106   :  { %v523_v17 = vadd.f32 %v727_v15, %v474_v14  ;;  %v514_v18 = vpop.f32.mrb[9].mxu0 }
 0x107   :  { %v515_v19 = vadd.f32 %v514_v18, %v466_v62  ;;  %v728_v20 = vpop.f32.mrb[10].mxu0 }
 0x108   :  { %592 = vst [vmem:[%s987_s3 + $0x10] sm:$0xff] %v523_v17  ;;  %v526_v21 = vadd.f32 %v728_v20, %v477_v16  ;;  %v517_v22 = vpop.f32.mrb[11].mxu0  ;;  %v577_v27 = vmul.f32 %v523_v17, %v523_v17 }
 0x109   :  { %590 = vst [vmem:[%s987_s3] sm:$0xff] %v515_v19  ;;  %v518_v23 = vadd.f32 %v517_v22, %v469_v1  ;;  %v575_v24 = vmul.f32 %v515_v19, %v515_v19 }
 0x10a   :  { %593 = vst [vmem:[%s987_s3 + $0x18] sm:$0xff] %v526_v21  ;;  %v578_v30 = vmul.f32 %v526_v21, %v526_v21 }
 0x10b   :  { %v563_v25 = vadd.f32 %v518_v23, %v515_v19  ;;  %v576_v26 = vmul.f32 %v518_v23, %v518_v23  ;;  %591 = vst [vmem:[%s987_s3 + $0x8] sm:$0xff] %v518_v23 }
 0x10d   :  { %v564_v28 = vadd.f32 %v563_v25, %v523_v17  ;;  %v579_v29 = vadd.f32 %v576_v26, %v575_v24 }
 0x10f   :  { %v565_v31 = vadd.f32 %v564_v28, %v526_v21  ;;  %v580_v32 = vadd.f32 %v579_v29, %v577_v27 }
 0x111   :  { %v566_v33 = vrot.slane %v565_v31, 4  ;;  %v581_v34 = vadd.f32 %v580_v32, %v578_v30 }
 0x113   :  { %v567_v35 = vadd.f32 %v566_v33, %v565_v31  ;;  %v582_v36 = vrot.slane %v581_v34, 4 }
 0x115   :  { %v568_v37 = vrot.slane %v567_v35, 2  ;;  %v583_v38 = vadd.f32 %v582_v36, %v581_v34 }
 0x117   :  { %v569_v39 = vadd.f32 %v568_v37, %v567_v35  ;;  %v584_v40 = vrot.slane %v583_v38, 2 }
 0x119   :  { %v570_v41 = vrot.slane %v569_v39, 1  ;;  %v585_v42 = vadd.f32 %v584_v40, %v583_v38 }
 0x11b   :  { %v571_v44 = vadd.f32 %v570_v41, %v569_v39  ;;  %v586_v45 = vrot.slane %v585_v42, 1 }
 0x11d   :  { %v572_v47 = vadd.f32 %v571_v44, %v562_v43  ;;  %v587_v48 = vadd.f32 %v586_v45, %v585_v42 }
 0x11f   :  { %573 = vst [vmem:[%s984_s4] sm:$0x1] %v572_v47  ;;  %v588_v49 = vadd.f32 %v587_v48, %v574_v46 }
 0x121   :  { %589 = vst [vmem:[%s985_s5] sm:$0x1] %v588_v49 }

// kernel: transform_forward.26
= control target key start
LH: loop header
LB: loop body
LE: loop exit
PB: predicated region body
PF: predicated region fallthrough
CT: control target
= control target key end

     0   :  { %s1627_s1 = inlined_call_operand.vmem [shape: bf16[1152,128], index: 1, kind: input, shape index: {}]   ;;  %s1628_s0 = inlined_call_operand.vmem [shape: bf16[32,1152], index: 0, kind: input, shape index: {}]   ;;  %s1629_s2 = inlined_call_operand.vmem [shape: f32[1,128], index: 2, kind: input, shape index: {}]   ;;  %s1630_s3 = inlined_call_operand.vmem [shape: f32[32,128], index: 3, kind: input, shape index: {}]   ;;  %s1631_s4 = inlined_call_operand.vmem [shape: f32[32,128], index: 4, kind: output, shape index: {}]  }
   0x1   :  { %v1207_v0 = vld [vmem:[%s1627_s1 + $0x40] sm:$0xff]   ;;  %v1211_v4 = vld [vmem:[%s1627_s1 + $0x48] sm:$0xff]   ;;  %v1215_v8 = vld [vmem:[%s1627_s1 + $0x50] sm:$0xff]  }
   0x2   :  { %v1208_v1 = vld [vmem:[%s1627_s1] sm:$0xff]   ;;  %1065 = vmatprep.subr.bf16.mxu0 %v1207_v0  ;;  %v1212_v5 = vld [vmem:[%s1627_s1 + $0x8] sm:$0xff]   ;;  %v1216_v9 = vld [vmem:[%s1627_s1 + $0x10] sm:$0xff]  }
   0x3   :  { %v1209_v2 = vld [vmem:[%s1627_s1 + $0xc0] sm:$0xff]   ;;  %1066 = vmatpush3.bf16.msra.mxu0 %v1208_v1  ;;  %v1213_v6 = vld [vmem:[%s1627_s1 + $0xc8] sm:$0xff]   ;;  %v1217_v10 = vld [vmem:[%s1627_s1 + $0xd0] sm:$0xff]  }
   0x4   :  { %v1210_v3 = vld [vmem:[%s1627_s1 + $0x80] sm:$0xff]   ;;  %1093 = vmatprep.subr.bf16.mxu1 %v1209_v2  ;;  %1067 = vmatprep.subr.bf16.mxu0 %v1211_v4  ;;  %v1214_v7 = vld [vmem:[%s1627_s1 + $0x88] sm:$0xff]   ;;  %v1218_v11 = vld [vmem:[%s1627_s1 + $0x90] sm:$0xff]  }
   0x5   :  { %1094 = vmatpush3.bf16.msra.mxu1 %v1210_v3  ;;  %v1219_v12 = vld [vmem:[%s1627_s1 + $0x58] sm:$0xff]   ;;  %v1223_v16 = vld [vmem:[%s1627_s1 + $0x60] sm:$0xff]   ;;  %v1227_v20 = vld [vmem:[%s1627_s1 + $0x68] sm:$0xff]  }
   0x6   :  { %1095 = vmatprep.subr.bf16.mxu1 %v1213_v6  ;;  %v1220_v13 = vld [vmem:[%s1627_s1 + $0x18] sm:$0xff]   ;;  %v1224_v17 = vld [vmem:[%s1627_s1 + $0x20] sm:$0xff]   ;;  %v1228_v21 = vld [vmem:[%s1627_s1 + $0x28] sm:$0xff]  }
   0x7   :  { %1068 = vmatpush3.bf16.msra.mxu0 %v1212_v5  ;;  %v1221_v14 = vld [vmem:[%s1627_s1 + $0xd8] sm:$0xff]   ;;  %v1225_v18 = vld [vmem:[%s1627_s1 + $0xe0] sm:$0xff]   ;;  %v1229_v22 = vld [vmem:[%s1627_s1 + $0xe8] sm:$0xff]  }
   0x8   :  { %1069 = vmatprep.subr.bf16.mxu0 %v1215_v8  ;;  %v1222_v15 = vld [vmem:[%s1627_s1 + $0x98] sm:$0xff]   ;;  %v1226_v19 = vld [vmem:[%s1627_s1 + $0xa0] sm:$0xff]   ;;  %v1230_v23 = vld [vmem:[%s1627_s1 + $0xa8] sm:$0xff]  }
   0x9   :  { %1096 = vmatpush3.bf16.msra.mxu1 %v1214_v7  ;;  %v1231_v24 = vld [vmem:[%s1627_s1 + $0x70] sm:$0xff]   ;;  %v1235_v28 = vld [vmem:[%s1627_s1 + $0x78] sm:$0xff]   ;;  %v1238_v31 = vld [vmem:[%s1628_s0] ss:$36 sps:$4 sm:$0xff]  }
   0xa   :  { %1097 = vmatprep.subr.bf16.mxu1 %v1217_v10  ;;  %v1232_v25 = vld [vmem:[%s1627_s1 + $0x30] sm:$0xff]   ;;  %v1236_v29 = vld [vmem:[%s1627_s1 + $0x38] sm:$0xff]   ;;  %v1240_v32 = vld [vmem:[%s1628_s0 + $0x4] ss:$36 sps:$4 sm:$0xff]  }
   0xb   :  { %1070 = vmatpush3.bf16.msra.mxu0 %v1216_v9  ;;  %v1233_v26 = vld [vmem:[%s1627_s1 + $0xf0] sm:$0xff]   ;;  %v1237_v30 = vld [vmem:[%s1627_s1 + $0xf8] sm:$0xff]   ;;  %745 = vmatprep.mubr.bf16.mxu0 %v1240_v32  ;;  %v1242_v34 = vld [vmem:[%s1627_s1 + $0x140] sm:$0xff]  }
   0xc   :  { %1071 = vmatprep.subr.bf16.mxu0 %v1219_v12  ;;  %v1234_v27 = vld [vmem:[%s1627_s1 + $0xb0] sm:$0xff]   ;;  %v1241_v33 = vld [vmem:[%s1627_s1 + $0xb8] sm:$0xff]   ;;  %v1243_v35 = vld [vmem:[%s1628_s0 + $0x8] ss:$36 sps:$4 sm:$0xff]  }
   0xd   :  { %1098 = vmatpush3.bf16.msra.mxu1 %v1218_v11  ;;  %v1245_v36 = vld [vmem:[%s1628_s0 + $0xc] ss:$36 sps:$4 sm:$0xff]   ;;  %v1246_v37 = vld [vmem:[%s1627_s1 + $0x100] sm:$0xff]   ;;  %v1257_v48 = vld [vmem:[%s1627_s1 + $0x158] sm:$0xff]  }
   0xe   :  { %1099 = vmatprep.subr.bf16.mxu1 %v1221_v14  ;;  %794 = vmatprep.mubr.bf16.mxu1 %v1245_v36  ;;  %v1247_v38 = vld [vmem:[%s1627_s1 + $0x1c0] sm:$0xff]   ;;  %v1249_v40 = vld [vmem:[%s1627_s1 + $0x148] sm:$0xff]   ;;  %v1253_v44 = vld [vmem:[%s1627_s1 + $0x150] sm:$0xff]  }
   0xf   :  { %1072 = vmatpush3.bf16.msra.mxu0 %v1220_v13  ;;  %v1248_v39 = vld [vmem:[%s1627_s1 + $0x180] sm:$0xff]   ;;  %v1250_v41 = vld [vmem:[%s1627_s1 + $0x108] sm:$0xff]   ;;  %v1254_v45 = vld [vmem:[%s1627_s1 + $0x110] sm:$0xff]  }
  0x10   :  { %1073 = vmatprep.subr.bf16.mxu0 %v1223_v16  ;;  %v1251_v42 = vld [vmem:[%s1627_s1 + $0x1c8] sm:$0xff]   ;;  %v1255_v46 = vld [vmem:[%s1627_s1 + $0x1d0] sm:$0xff]   ;;  %v1258_v49 = vld [vmem:[%s1627_s1 + $0x118] sm:$0xff]  }
  0x11   :  { %1100 = vmatpush3.bf16.msra.mxu1 %v1222_v15  ;;  %v1252_v43 = vld [vmem:[%s1627_s1 + $0x188] sm:$0xff]   ;;  %v1256_v47 = vld [vmem:[%s1627_s1 + $0x190] sm:$0xff]   ;;  %v1259_v50 = vld [vmem:[%s1627_s1 + $0x1d8] sm:$0xff]  }
  0x12   :  { %1101 = vmatprep.subr.bf16.mxu1 %v1225_v18  ;;  %v1260_v51 = vld [vmem:[%s1627_s1 + $0x198] sm:$0xff]   ;;  %v1261_v52 = vld [vmem:[%s1627_s1 + $0x160] sm:$0xff]   ;;  %v1265_v56 = vld [vmem:[%s1627_s1 + $0x168] sm:$0xff]  }
  0x13   :  { %1074 = vmatpush3.bf16.msra.mxu0 %v1224_v17  ;;  %v1262_v53 = vld [vmem:[%s1627_s1 + $0x120] sm:$0xff]   ;;  %v1266_v57 = vld [vmem:[%s1628_s0 + $0x4c] ss:$36 sps:$4 sm:$0xff]   ;;  %v1271_v61 = vld [vmem:[%s1628_s0 + $0x54] ss:$36 sps:$4 sm:$0xff]  }
  0x14   :  { %1075 = vmatprep.subr.bf16.mxu0 %v1227_v20  ;;  %v1263_v54 = vld [vmem:[%s1627_s1 + $0x1e0] sm:$0xff]   ;;  %v1268_v58 = vld [vmem:[%s1627_s1 + $0x128] sm:$0xff]   ;;  %v1274_v63 = vld [vmem:[%s1628_s0 + $0x50] ss:$36 sps:$4 sm:$0xff]  }
  0x15   :  { %1102 = vmatpush3.bf16.msra.mxu1 %v1226_v19  ;;  %v1264_v55 = vld [vmem:[%s1627_s1 + $0x1a0] sm:$0xff]   ;;  %v1269_v59 = vld [vmem:[%s1628_s0 + $0x48] ss:$36 sps:$4 sm:$0xff]   ;;  %v1275_v0 = vld [vmem:[%s1627_s1 + $0x170] sm:$0xff]  }
  0x16   :  { %1103 = vmatprep.subr.bf16.mxu1 %v1229_v22  ;;  %v1270_v60 = vld [vmem:[%s1627_s1 + $0x1e8] sm:$0xff]   ;;  %v1276_v1 = vld [vmem:[%s1627_s1 + $0x130] sm:$0xff]   ;;  %v1279_v4 = vld [vmem:[%s1627_s1 + $0x178] sm:$0xff]  }
  0x17   :  { %1076 = vmatpush3.bf16.msra.mxu0 %v1228_v21  ;;  %v1273_v62 = vld [vmem:[%s1627_s1 + $0x1a8] sm:$0xff]   ;;  %v1277_v2 = vld [vmem:[%s1627_s1 + $0x1f0] sm:$0xff]   ;;  %v1280_v5 = vld [vmem:[%s1627_s1 + $0x138] sm:$0xff]  }
  0x18   :  { %1077 = vmatprep.subr.bf16.mxu0 %v1231_v24  ;;  %v1278_v3 = vld [vmem:[%s1627_s1 + $0x1b0] sm:$0xff]   ;;  %v1281_v6 = vld [vmem:[%s1627_s1 + $0x1f8] sm:$0xff]   ;;  %v1286_v10 = vld [vmem:[%s1627_s1 + $0x200] sm:$0xff]  }
  0x19   :  { %1104 = vmatpush3.bf16.msra.mxu1 %v1230_v23  ;;  %v1282_v7 = vld [vmem:[%s1628_s0 + $0x10] ss:$36 sps:$4 sm:$0xff]   ;;  %v1285_v9 = vld [vmem:[%s1627_s1 + $0x1b8] sm:$0xff]   ;;  %v1290_v13 = vld [vmem:[%s1627_s1 + $0x208] sm:$0xff]  }
  0x1a   :  { %1105 = vmatprep.subr.bf16.mxu1 %v1233_v26  ;;  %v1284_v8 = vld [vmem:[%s1628_s0 + $0x14] ss:$36 sps:$4 sm:$0xff]   ;;  %v1289_v12 = vld [vmem:[%s1628_s0 + $0x1c] ss:$36 sps:$4 sm:$0xff]   ;;  %v1295_v17 = vld [vmem:[%s1628_s0 + $0x64] ss:$36 sps:$4 sm:$0xff]  }
  0x1b   :  { %1078 = vmatpush3.bf16.msra.mxu0 %v1232_v25  ;;  %v1287_v11 = vld [vmem:[%s1628_s0 + $0x18] ss:$36 sps:$4 sm:$0xff]   ;;  %v1294_v16 = vld [vmem:[%s1627_s1 + $0x210] sm:$0xff]   ;;  %v1297_v18 = vld [vmem:[%s1628_s0 + $0x60] ss:$36 sps:$4 sm:$0xff]  }
  0x1c   :  { %1079 = vmatprep.subr.bf16.mxu0 %v1235_v28  ;;  %v1291_v14 = vld [vmem:[%s1628_s0 + $0x5c] ss:$36 sps:$4 sm:$0xff]   ;;  %v1300_v22 = vld [vmem:[%s1627_s1 + $0x228] sm:$0xff]   ;;  %v1301_v23 = vld [vmem:[%s1627_s1 + $0x230] sm:$0xff]  }
  0x1d   :  { %1106 = vmatpush3.bf16.msra.mxu1 %v1234_v27  ;;  %v1293_v15 = vld [vmem:[%s1628_s0 + $0x58] ss:$36 sps:$4 sm:$0xff]   ;;  %v1299_v20 = vld [vmem:[%s1627_s1 + $0x220] sm:$0xff]   ;;  %v1304_v25 = vld [vmem:[%s1628_s0 + $0x68] ss:$36 sps:$4 sm:$0xff]  }
  0x1e   :  { %1107 = vmatprep.subr.bf16.mxu1 %v1237_v30  ;;  %v1298_v19 = vld [vmem:[%s1627_s1 + $0x218] sm:$0xff]   ;;  %v1303_v21 = vld [vmem:[%s1628_s0 + $0x20] ss:$36 sps:$4 sm:$0xff]  }
  0x1f   :  { %1080 = vmatpush3.bf16.msra.mxu0 %v1236_v29  ;;  %v1302_v24 = vld [vmem:[%s1627_s1 + $0x238] sm:$0xff]   ;;  %v974_v27 = vld [vmem:[%s1629_s2] ss:$0 sm:$0xff] }
  0x20   :  { %1121 = vmatprep.subr.bf16.mxu0 %v1242_v34 }
  0x21   :  { %1108 = vmatpush3.bf16.msra.mxu1 %v1241_v33 }
  0x22   :  { %746 = vmatmul.mubr.bf16.vlgmr.msra.gmra.mrb[0].mxu0 %v1238_v31  ;;  %1149 = vmatprep.subr.bf16.mxu1 %v1247_v38 }
  0x23   :  { %1122 = vmatpush3.bf16.msra.mxu0 %v1246_v37  ;;  %753 = vmatprep.mubr.bf16.mxu0 %v1266_v57 }
  0x24   :  { %795 = vmatmul.mubr.bf16.vlgmr.msra.gmra.mrb[0].mxu1 %v1243_v35  ;;  %1123 = vmatprep.subr.bf16.mxu0 %v1249_v40 }
  0x25   :  { %1150 = vmatpush3.bf16.msra.mxu1 %v1248_v39  ;;  %802 = vmatprep.mubr.bf16.mxu1 %v1271_v61 }
  0x26   :  { %1151 = vmatprep.subr.bf16.mxu1 %v1251_v42 }
  0x27   :  { %1124 = vmatpush3.bf16.msra.mxu0 %v1250_v41 }
  0x28   :  { %1125 = vmatprep.subr.bf16.mxu0 %v1253_v44 }
  0x29   :  { %1152 = vmatpush3.bf16.msra.mxu1 %v1252_v43 }
  0x2a   :  { %1153 = vmatprep.subr.bf16.mxu1 %v1255_v46  ;;  %754 = vmatmul.mubr.bf16.gmra.mrb[4].mxu0 %v1269_v59 }
  0x2b   :  { %1126 = vmatpush3.bf16.msra.mxu0 %v1254_v45  ;;  %843 = vmatprep.mubr.bf16.mxu0 %v1284_v8 }
  0x2c   :  { %1127 = vmatprep.subr.bf16.mxu0 %v1257_v48  ;;  %803 = vmatmul.mubr.bf16.gmra.mrb[4].mxu1 %v1274_v63 }
  0x2d   :  { %1154 = vmatpush3.bf16.msra.mxu1 %v1256_v47  ;;  %892 = vmatprep.mubr.bf16.mxu1 %v1289_v12 }
  0x2e   :  { %1155 = vmatprep.subr.bf16.mxu1 %v1259_v50 }
  0x2f   :  { %1128 = vmatpush3.bf16.msra.mxu0 %v1258_v49 }
  0x30   :  { %1129 = vmatprep.subr.bf16.mxu0 %v1261_v52 }
  0x31   :  { %1156 = vmatpush3.bf16.msra.mxu1 %v1260_v51 }
  0x32   :  { %1157 = vmatprep.subr.bf16.mxu1 %v1263_v54 }
  0x33   :  { %1130 = vmatpush3.bf16.msra.mxu0 %v1262_v53 }
  0x34   :  { %1131 = vmatprep.subr.bf16.mxu0 %v1265_v56 }
  0x35   :  { %1158 = vmatpush3.bf16.msra.mxu1 %v1264_v55 }
  0x36   :  { %1159 = vmatprep.subr.bf16.mxu1 %v1270_v60 }
  0x37   :  { %1132 = vmatpush3.bf16.msra.mxu0 %v1268_v58 }
  0x38   :  { %1133 = vmatprep.subr.bf16.mxu0 %v1275_v0 }
  0x39   :  { %1160 = vmatpush3.bf16.msra.mxu1 %v1273_v62 }
  0x3a   :  { %1161 = vmatprep.subr.bf16.mxu1 %v1277_v2 }
  0x3b   :  { %1134 = vmatpush3.bf16.msra.mxu0 %v1276_v1 }
  0x3c   :  { %1135 = vmatprep.subr.bf16.mxu0 %v1279_v4 }
  0x3d   :  { %1162 = vmatpush3.bf16.msra.mxu1 %v1278_v3 }
  0x3e   :  { %1163 = vmatprep.subr.bf16.mxu1 %v1281_v6 }
  0x3f   :  { %1136 = vmatpush3.bf16.msra.mxu0 %v1280_v5 }
  0x40   :  { %1187 = vmatprep.subr.bf16.mxu0 %v1286_v10 }
  0x41   :  { %1164 = vmatpush3.bf16.msra.mxu1 %v1285_v9 }
  0x42   :  { %844 = vmatmul.mubr.bf16.vlgmr.msra.gmra.mrb[8].mxu0 %v1282_v7 }
  0x43   :  { %1188 = vmatpush3.bf16.msra.mxu0 %v1286_v10  ;;  %851 = vmatprep.mubr.bf16.mxu0 %v1291_v14 }
  0x44   :  { %893 = vmatmul.mubr.bf16.vlgmr.msra.gmra.mrb[8].mxu1 %v1287_v11  ;;  %1189 = vmatprep.subr.bf16.mxu0 %v1290_v13 }
  0x45   :  { %900 = vmatprep.mubr.bf16.mxu1 %v1295_v17 }
  0x47   :  { %1190 = vmatpush3.bf16.msra.mxu0 %v1290_v13 }
  0x48   :  { %1191 = vmatprep.subr.bf16.mxu0 %v1294_v16 }
  0x4a   :  { %852 = vmatmul.mubr.bf16.gmra.mrb[12].mxu0 %v1293_v15 }
  0x4b   :  { %1192 = vmatpush3.bf16.msra.mxu0 %v1294_v16  ;;  %1203 = vmatprep.mubr.bf16.mxu0 %v1303_v21 }
  0x4c   :  { %901 = vmatmul.mubr.bf16.gmra.mrb[12].mxu1 %v1297_v18  ;;  %1193 = vmatprep.subr.bf16.mxu0 %v1298_v19 }
  0x4f   :  { %1194 = vmatpush3.bf16.msra.mxu0 %v1298_v19 }
  0x50   :  { %1195 = vmatprep.subr.bf16.mxu0 %v1299_v20 }
  0x53   :  { %1196 = vmatpush3.bf16.msra.mxu0 %v1299_v20 }
  0x54   :  { %1197 = vmatprep.subr.bf16.mxu0 %v1300_v22 }
  0x57   :  { %1198 = vmatpush3.bf16.msra.mxu0 %v1300_v22 }
  0x58   :  { %1199 = vmatprep.subr.bf16.mxu0 %v1301_v23 }
  0x5b   :  { %1200 = vmatpush3.bf16.msra.mxu0 %v1301_v23 }
  0x5c   :  { %1201 = vmatprep.subr.bf16.mxu0 %v1302_v24 }
  0x5f   :  { %1202 = vmatpush3.bf16.msra.mxu0 %v1302_v24 }
  0x62   :  { %1204 = vmatmul.mubr.bf16.vlgmr.msra.gmra.mrb[16].mxu0 %v1304_v25 }
  0xf5   :  { %v1081_v26 = vpop.f32.mrb[0].mxu0 }
  0xf6   :  { %v1082_v28 = vpop.f32.mrb[1].mxu0 }
  0xf7   :  { %v1083_v29 = vadd.f32 %v1082_v28, %v1081_v26  ;;  %v1084_v30 = vpop.f32.mrb[2].mxu0  ;;  %v1109_v31 = vpop.f32.mrb[0].mxu1  ;;  %v960_v28 = vld [vmem:[%s1630_s3 + $0x10] sm:$0xff] }
  0xf8   :  { %v1085_v32 = vpop.f32.mrb[3].mxu0  ;;  %v1110_v35 = vpop.f32.mrb[1].mxu1 }
  0xf9   :  { %v748_v33 = vadd.f32 %v1083_v29, %v974_v27  ;;  %v1086_v34 = vadd.f32 %v1085_v32, %v1084_v30  ;;  %v1111_v36 = vadd.f32 %v1110_v35, %v1109_v31  ;;  %v1112_v37 = vpop.f32.mrb[2].mxu1  ;;  %v958_v31 = vld [vmem:[%s1630_s3] sm:$0xff] }
  0xfa   :  { %v1113_v39 = vpop.f32.mrb[3].mxu1 }
  0xfb   :  { %v751_v38 = vadd.f32 %v1086_v34, %v974_v27  ;;  %v797_v40 = vadd.f32 %v1111_v36, %v748_v33  ;;  %v1114_v41 = vadd.f32 %v1113_v39, %v1112_v37  ;;  %v961_v34 = vld [vmem:[%s1630_s3 + $0x18] sm:$0xff] }
  0xfd   :  { %v800_v42 = vadd.f32 %v1114_v41, %v751_v38  ;;  %v1087_v43 = vpop.f32.mrb[4].mxu0  ;;  %v959_v38 = vld [vmem:[%s1630_s3 + $0x8] sm:$0xff] }
  0xfe   :  { %v1088_v44 = vpop.f32.mrb[5].mxu0 }
  0xff   :  { %v1089_v45 = vadd.f32 %v1088_v44, %v1087_v43  ;;  %v1090_v46 = vpop.f32.mrb[6].mxu0  ;;  %v1115_v47 = vpop.f32.mrb[4].mxu1 }
 0x100   :  { %v1091_v48 = vpop.f32.mrb[7].mxu0  ;;  %v1116_v51 = vpop.f32.mrb[5].mxu1 }
 0x101   :  { %v756_v49 = vadd.f32 %v1089_v45, %v974_v27  ;;  %v1092_v50 = vadd.f32 %v1091_v48, %v1090_v46  ;;  %v1117_v52 = vadd.f32 %v1116_v51, %v1115_v47  ;;  %v1118_v53 = vpop.f32.mrb[6].mxu1 }
 0x102   :  { %v1119_v55 = vpop.f32.mrb[7].mxu1 }
 0x103   :  { %v759_v54 = vadd.f32 %v1092_v50, %v974_v27  ;;  %v805_v56 = vadd.f32 %v1117_v52, %v756_v49  ;;  %v1120_v57 = vadd.f32 %v1119_v55, %v1118_v53 }
 0x105   :  { %v808_v58 = vadd.f32 %v1120_v57, %v759_v54 }
 0x115   :  { %v1137_v59 = vpop.f32.mrb[8].mxu0 }
 0x116   :  { %v1138_v60 = vpop.f32.mrb[9].mxu0 }
 0x117   :  { %v1139_v61 = vadd.f32 %v1138_v60, %v1137_v59  ;;  %v1140_v62 = vpop.f32.mrb[10].mxu0  ;;  %v1165_v63 = vpop.f32.mrb[8].mxu1 }
 0x118   :  { %v1141_v0 = vpop.f32.mrb[11].mxu0  ;;  %v1166_v3 = vpop.f32.mrb[9].mxu1 }
 0x119   :  { %v846_v1 = vadd.f32 %v1139_v61, %v797_v40  ;;  %v1142_v2 = vadd.f32 %v1141_v0, %v1140_v62  ;;  %v1167_v4 = vadd.f32 %v1166_v3, %v1165_v63  ;;  %v1168_v5 = vpop.f32.mrb[10].mxu1 }
 0x11a   :  { %v1169_v7 = vpop.f32.mrb[11].mxu1 }
 0x11b   :  { %v849_v6 = vadd.f32 %v1142_v2, %v800_v42  ;;  %v1170_v8 = vadd.f32 %v1169_v7, %v1168_v5  ;;  %v895_v9 = vadd.f32 %v1167_v4, %v846_v1 }
 0x11d   :  { %v1143_v10 = vpop.f32.mrb[12].mxu0  ;;  %v898_v12 = vadd.f32 %v1170_v8, %v849_v6 }
 0x11e   :  { %v1144_v11 = vpop.f32.mrb[13].mxu0 }
 0x11f   :  { %v1145_v13 = vadd.f32 %v1144_v11, %v1143_v10  ;;  %v1146_v14 = vpop.f32.mrb[14].mxu0  ;;  %v1171_v15 = vpop.f32.mrb[12].mxu1 }
 0x120   :  { %v1147_v16 = vpop.f32.mrb[15].mxu0  ;;  %v1172_v19 = vpop.f32.mrb[13].mxu1 }
 0x121   :  { %v854_v17 = vadd.f32 %v1145_v13, %v805_v56  ;;  %v1148_v18 = vadd.f32 %v1147_v16, %v1146_v14  ;;  %v1173_v20 = vadd.f32 %v1172_v19, %v1171_v15  ;;  %v1174_v21 = vpop.f32.mrb[14].mxu1 }
 0x122   :  { %v1175_v23 = vpop.f32.mrb[15].mxu1 }
 0x123   :  { %v857_v22 = vadd.f32 %v1148_v18, %v808_v58  ;;  %v1176_v24 = vadd.f32 %v1175_v23, %v1174_v21  ;;  %v903_v25 = vadd.f32 %v1173_v20, %v854_v17 }
 0x125   :  { %v906_v26 = vadd.f32 %v1176_v24, %v857_v22 }
 0x135   :  { %v1205_v27 = vpop.f32.mrb[16].mxu0 }
 0x136   :  { %v952_v29 = vadd.f32 %v1205_v27, %v903_v25  ;;  %v943_v30 = vpop.f32.mrb[17].mxu0 }
 0x137   :  { %v944_v32 = vadd.f32 %v943_v30, %v895_v9  ;;  %v1206_v33 = vpop.f32.mrb[18].mxu0 }
 0x138   :  { %v964_v35 = vadd.f32 %v960_v28, %v952_v29  ;;  %v955_v36 = vadd.f32 %v1206_v33, %v906_v26  ;;  %v946_v37 = vpop.f32.mrb[19].mxu0 }
 0x139   :  { %v962_v39 = vadd.f32 %v958_v31, %v944_v32  ;;  %v947_v40 = vadd.f32 %v946_v37, %v898_v12 }
 0x13a   :  { %968 = vst [vmem:[%s1631_s4 + $0x10] sm:$0xff] %v964_v35  ;;  %v965_v41 = vadd.f32 %v961_v34, %v955_v36 }
 0x13b   :  { %966 = vst [vmem:[%s1631_s4] sm:$0xff] %v962_v39  ;;  %v963_v42 = vadd.f32 %v959_v38, %v947_v40 }
 0x13c   :  { %969 = vst [vmem:[%s1631_s4 + $0x18] sm:$0xff] %v965_v41 }
 0x13d   :  { %967 = vst [vmem:[%s1631_s4 + $0x8] sm:$0xff] %v963_v42 }

// kernel: transform_forward.25
= control target key start
LH: loop header
LB: loop body
LE: loop exit
PB: predicated region body
PF: predicated region fallthrough
CT: control target
= control target key end

     0   :  { %s1603_s1 = inlined_call_operand.vmem [shape: bf16[1152,128], index: 1, kind: input, shape index: {}]   ;;  %s1604_s0 = inlined_call_operand.vmem [shape: bf16[32,1152], index: 0, kind: input, shape index: {}]   ;;  %s1605_s2 = inlined_call_operand.vmem [shape: f32[1,128], index: 2, kind: input, shape index: {}]   ;;  %s1606_s3 = inlined_call_operand.vmem [shape: f32[32,128], index: 3, kind: output, shape index: {}]  }
   0x1   :  { %v1200_v0 = vld [vmem:[%s1603_s1 + $0x40] sm:$0xff]   ;;  %v1204_v4 = vld [vmem:[%s1603_s1 + $0x48] sm:$0xff]   ;;  %v1208_v8 = vld [vmem:[%s1603_s1 + $0x50] sm:$0xff]  }
   0x2   :  { %v1201_v1 = vld [vmem:[%s1603_s1] sm:$0xff]   ;;  %1058 = vmatprep.subr.bf16.mxu0 %v1200_v0  ;;  %v1205_v5 = vld [vmem:[%s1603_s1 + $0x8] sm:$0xff]   ;;  %v1209_v9 = vld [vmem:[%s1603_s1 + $0x10] sm:$0xff]  }
   0x3   :  { %v1202_v2 = vld [vmem:[%s1603_s1 + $0xc0] sm:$0xff]   ;;  %1059 = vmatpush3.bf16.msra.mxu0 %v1201_v1  ;;  %v1206_v6 = vld [vmem:[%s1603_s1 + $0xc8] sm:$0xff]   ;;  %v1210_v10 = vld [vmem:[%s1603_s1 + $0xd0] sm:$0xff]  }
   0x4   :  { %v1203_v3 = vld [vmem:[%s1603_s1 + $0x80] sm:$0xff]   ;;  %1086 = vmatprep.subr.bf16.mxu1 %v1202_v2  ;;  %1060 = vmatprep.subr.bf16.mxu0 %v1204_v4  ;;  %v1207_v7 = vld [vmem:[%s1603_s1 + $0x88] sm:$0xff]   ;;  %v1211_v11 = vld [vmem:[%s1603_s1 + $0x90] sm:$0xff]  }
   0x5   :  { %1087 = vmatpush3.bf16.msra.mxu1 %v1203_v3  ;;  %v1212_v12 = vld [vmem:[%s1603_s1 + $0x58] sm:$0xff]   ;;  %v1216_v16 = vld [vmem:[%s1603_s1 + $0x60] sm:$0xff]   ;;  %v1220_v20 = vld [vmem:[%s1603_s1 + $0x68] sm:$0xff]  }
   0x6   :  { %1088 = vmatprep.subr.bf16.mxu1 %v1206_v6  ;;  %v1213_v13 = vld [vmem:[%s1603_s1 + $0x18] sm:$0xff]   ;;  %v1217_v17 = vld [vmem:[%s1603_s1 + $0x20] sm:$0xff]   ;;  %v1221_v21 = vld [vmem:[%s1603_s1 + $0x28] sm:$0xff]  }
   0x7   :  { %1061 = vmatpush3.bf16.msra.mxu0 %v1205_v5  ;;  %v1214_v14 = vld [vmem:[%s1603_s1 + $0xd8] sm:$0xff]   ;;  %v1218_v18 = vld [vmem:[%s1603_s1 + $0xe0] sm:$0xff]   ;;  %v1222_v22 = vld [vmem:[%s1603_s1 + $0xe8] sm:$0xff]  }
   0x8   :  { %1062 = vmatprep.subr.bf16.mxu0 %v1208_v8  ;;  %v1215_v15 = vld [vmem:[%s1603_s1 + $0x98] sm:$0xff]   ;;  %v1219_v19 = vld [vmem:[%s1603_s1 + $0xa0] sm:$0xff]   ;;  %v1223_v23 = vld [vmem:[%s1603_s1 + $0xa8] sm:$0xff]  }
   0x9   :  { %1089 = vmatpush3.bf16.msra.mxu1 %v1207_v7  ;;  %v1224_v24 = vld [vmem:[%s1603_s1 + $0x70] sm:$0xff]   ;;  %v1228_v28 = vld [vmem:[%s1603_s1 + $0x78] sm:$0xff]   ;;  %v1231_v31 = vld [vmem:[%s1604_s0] ss:$36 sps:$4 sm:$0xff]  }
   0xa   :  { %1090 = vmatprep.subr.bf16.mxu1 %v1210_v10  ;;  %v1225_v25 = vld [vmem:[%s1603_s1 + $0x30] sm:$0xff]   ;;  %v1229_v29 = vld [vmem:[%s1603_s1 + $0x38] sm:$0xff]   ;;  %v1233_v32 = vld [vmem:[%s1604_s0 + $0x4] ss:$36 sps:$4 sm:$0xff]  }
   0xb   :  { %1063 = vmatpush3.bf16.msra.mxu0 %v1209_v9  ;;  %v1226_v26 = vld [vmem:[%s1603_s1 + $0xf0] sm:$0xff]   ;;  %v1230_v30 = vld [vmem:[%s1603_s1 + $0xf8] sm:$0xff]   ;;  %742 = vmatprep.mubr.bf16.mxu0 %v1233_v32  ;;  %v1235_v34 = vld [vmem:[%s1603_s1 + $0x140] sm:$0xff]  }
   0xc   :  { %1064 = vmatprep.subr.bf16.mxu0 %v1212_v12  ;;  %v1227_v27 = vld [vmem:[%s1603_s1 + $0xb0] sm:$0xff]   ;;  %v1234_v33 = vld [vmem:[%s1603_s1 + $0xb8] sm:$0xff]   ;;  %v1236_v35 = vld [vmem:[%s1604_s0 + $0x8] ss:$36 sps:$4 sm:$0xff]  }
   0xd   :  { %1091 = vmatpush3.bf16.msra.mxu1 %v1211_v11  ;;  %v1238_v36 = vld [vmem:[%s1604_s0 + $0xc] ss:$36 sps:$4 sm:$0xff]   ;;  %v1239_v37 = vld [vmem:[%s1603_s1 + $0x100] sm:$0xff]   ;;  %v1250_v48 = vld [vmem:[%s1603_s1 + $0x158] sm:$0xff]  }
   0xe   :  { %1092 = vmatprep.subr.bf16.mxu1 %v1214_v14  ;;  %791 = vmatprep.mubr.bf16.mxu1 %v1238_v36  ;;  %v1240_v38 = vld [vmem:[%s1603_s1 + $0x1c0] sm:$0xff]   ;;  %v1242_v40 = vld [vmem:[%s1603_s1 + $0x148] sm:$0xff]   ;;  %v1246_v44 = vld [vmem:[%s1603_s1 + $0x150] sm:$0xff]  }
   0xf   :  { %1065 = vmatpush3.bf16.msra.mxu0 %v1213_v13  ;;  %v1241_v39 = vld [vmem:[%s1603_s1 + $0x180] sm:$0xff]   ;;  %v1243_v41 = vld [vmem:[%s1603_s1 + $0x108] sm:$0xff]   ;;  %v1247_v45 = vld [vmem:[%s1603_s1 + $0x110] sm:$0xff]  }
  0x10   :  { %1066 = vmatprep.subr.bf16.mxu0 %v1216_v16  ;;  %v1244_v42 = vld [vmem:[%s1603_s1 + $0x1c8] sm:$0xff]   ;;  %v1248_v46 = vld [vmem:[%s1603_s1 + $0x1d0] sm:$0xff]   ;;  %v1251_v49 = vld [vmem:[%s1603_s1 + $0x118] sm:$0xff]  }
  0x11   :  { %1093 = vmatpush3.bf16.msra.mxu1 %v1215_v15  ;;  %v1245_v43 = vld [vmem:[%s1603_s1 + $0x188] sm:$0xff]   ;;  %v1249_v47 = vld [vmem:[%s1603_s1 + $0x190] sm:$0xff]   ;;  %v1252_v50 = vld [vmem:[%s1603_s1 + $0x1d8] sm:$0xff]  }
  0x12   :  { %1094 = vmatprep.subr.bf16.mxu1 %v1218_v18  ;;  %v1253_v51 = vld [vmem:[%s1603_s1 + $0x198] sm:$0xff]   ;;  %v1254_v52 = vld [vmem:[%s1603_s1 + $0x160] sm:$0xff]   ;;  %v1258_v56 = vld [vmem:[%s1603_s1 + $0x168] sm:$0xff]  }
  0x13   :  { %1067 = vmatpush3.bf16.msra.mxu0 %v1217_v17  ;;  %v1255_v53 = vld [vmem:[%s1603_s1 + $0x120] sm:$0xff]   ;;  %v1259_v57 = vld [vmem:[%s1604_s0 + $0x4c] ss:$36 sps:$4 sm:$0xff]   ;;  %v1264_v61 = vld [vmem:[%s1604_s0 + $0x54] ss:$36 sps:$4 sm:$0xff]  }
  0x14   :  { %1068 = vmatprep.subr.bf16.mxu0 %v1220_v20  ;;  %v1256_v54 = vld [vmem:[%s1603_s1 + $0x1e0] sm:$0xff]   ;;  %v1261_v58 = vld [vmem:[%s1603_s1 + $0x128] sm:$0xff]   ;;  %v1267_v63 = vld [vmem:[%s1604_s0 + $0x50] ss:$36 sps:$4 sm:$0xff]  }
  0x15   :  { %1095 = vmatpush3.bf16.msra.mxu1 %v1219_v19  ;;  %v1257_v55 = vld [vmem:[%s1603_s1 + $0x1a0] sm:$0xff]   ;;  %v1262_v59 = vld [vmem:[%s1604_s0 + $0x48] ss:$36 sps:$4 sm:$0xff]   ;;  %v1268_v0 = vld [vmem:[%s1603_s1 + $0x170] sm:$0xff]  }
  0x16   :  { %1096 = vmatprep.subr.bf16.mxu1 %v1222_v22  ;;  %v1263_v60 = vld [vmem:[%s1603_s1 + $0x1e8] sm:$0xff]   ;;  %v1269_v1 = vld [vmem:[%s1603_s1 + $0x130] sm:$0xff]   ;;  %v1272_v4 = vld [vmem:[%s1603_s1 + $0x178] sm:$0xff]  }
  0x17   :  { %1069 = vmatpush3.bf16.msra.mxu0 %v1221_v21  ;;  %v1266_v62 = vld [vmem:[%s1603_s1 + $0x1a8] sm:$0xff]   ;;  %v1270_v2 = vld [vmem:[%s1603_s1 + $0x1f0] sm:$0xff]   ;;  %v1273_v5 = vld [vmem:[%s1603_s1 + $0x138] sm:$0xff]  }
  0x18   :  { %1070 = vmatprep.subr.bf16.mxu0 %v1224_v24  ;;  %v1271_v3 = vld [vmem:[%s1603_s1 + $0x1b0] sm:$0xff]   ;;  %v1274_v6 = vld [vmem:[%s1603_s1 + $0x1f8] sm:$0xff]   ;;  %v1279_v10 = vld [vmem:[%s1603_s1 + $0x200] sm:$0xff]  }
  0x19   :  { %1097 = vmatpush3.bf16.msra.mxu1 %v1223_v23  ;;  %v1275_v7 = vld [vmem:[%s1604_s0 + $0x10] ss:$36 sps:$4 sm:$0xff]   ;;  %v1278_v9 = vld [vmem:[%s1603_s1 + $0x1b8] sm:$0xff]   ;;  %v1283_v13 = vld [vmem:[%s1603_s1 + $0x208] sm:$0xff]  }
  0x1a   :  { %1098 = vmatprep.subr.bf16.mxu1 %v1226_v26  ;;  %v1277_v8 = vld [vmem:[%s1604_s0 + $0x14] ss:$36 sps:$4 sm:$0xff]   ;;  %v1282_v12 = vld [vmem:[%s1604_s0 + $0x1c] ss:$36 sps:$4 sm:$0xff]   ;;  %v1288_v17 = vld [vmem:[%s1604_s0 + $0x64] ss:$36 sps:$4 sm:$0xff]  }
  0x1b   :  { %1071 = vmatpush3.bf16.msra.mxu0 %v1225_v25  ;;  %v1280_v11 = vld [vmem:[%s1604_s0 + $0x18] ss:$36 sps:$4 sm:$0xff]   ;;  %v1287_v16 = vld [vmem:[%s1603_s1 + $0x210] sm:$0xff]   ;;  %v1290_v18 = vld [vmem:[%s1604_s0 + $0x60] ss:$36 sps:$4 sm:$0xff]  }
  0x1c   :  { %1072 = vmatprep.subr.bf16.mxu0 %v1228_v28  ;;  %v1284_v14 = vld [vmem:[%s1604_s0 + $0x5c] ss:$36 sps:$4 sm:$0xff]   ;;  %v1293_v22 = vld [vmem:[%s1603_s1 + $0x228] sm:$0xff]   ;;  %v1294_v23 = vld [vmem:[%s1603_s1 + $0x230] sm:$0xff]  }
  0x1d   :  { %1099 = vmatpush3.bf16.msra.mxu1 %v1227_v27  ;;  %v1286_v15 = vld [vmem:[%s1604_s0 + $0x58] ss:$36 sps:$4 sm:$0xff]   ;;  %v1292_v20 = vld [vmem:[%s1603_s1 + $0x220] sm:$0xff]   ;;  %v1297_v25 = vld [vmem:[%s1604_s0 + $0x68] ss:$36 sps:$4 sm:$0xff]  }
  0x1e   :  { %1100 = vmatprep.subr.bf16.mxu1 %v1230_v30  ;;  %v1291_v19 = vld [vmem:[%s1603_s1 + $0x218] sm:$0xff]   ;;  %v1296_v21 = vld [vmem:[%s1604_s0 + $0x20] ss:$36 sps:$4 sm:$0xff]  }
  0x1f   :  { %1073 = vmatpush3.bf16.msra.mxu0 %v1229_v29  ;;  %v1295_v24 = vld [vmem:[%s1603_s1 + $0x238] sm:$0xff]   ;;  %v967_v27 = vld [vmem:[%s1605_s2] ss:$0 sm:$0xff] }
  0x20   :  { %1114 = vmatprep.subr.bf16.mxu0 %v1235_v34 }
  0x21   :  { %1101 = vmatpush3.bf16.msra.mxu1 %v1234_v33 }
  0x22   :  { %743 = vmatmul.mubr.bf16.vlgmr.msra.gmra.mrb[0].mxu0 %v1231_v31  ;;  %1142 = vmatprep.subr.bf16.mxu1 %v1240_v38 }
  0x23   :  { %1115 = vmatpush3.bf16.msra.mxu0 %v1239_v37  ;;  %750 = vmatprep.mubr.bf16.mxu0 %v1259_v57 }
  0x24   :  { %792 = vmatmul.mubr.bf16.vlgmr.msra.gmra.mrb[0].mxu1 %v1236_v35  ;;  %1116 = vmatprep.subr.bf16.mxu0 %v1242_v40 }
  0x25   :  { %1143 = vmatpush3.bf16.msra.mxu1 %v1241_v39  ;;  %799 = vmatprep.mubr.bf16.mxu1 %v1264_v61 }
  0x26   :  { %1144 = vmatprep.subr.bf16.mxu1 %v1244_v42 }
  0x27   :  { %1117 = vmatpush3.bf16.msra.mxu0 %v1243_v41 }
  0x28   :  { %1118 = vmatprep.subr.bf16.mxu0 %v1246_v44 }
  0x29   :  { %1145 = vmatpush3.bf16.msra.mxu1 %v1245_v43 }
  0x2a   :  { %1146 = vmatprep.subr.bf16.mxu1 %v1248_v46  ;;  %751 = vmatmul.mubr.bf16.gmra.mrb[4].mxu0 %v1262_v59 }
  0x2b   :  { %1119 = vmatpush3.bf16.msra.mxu0 %v1247_v45  ;;  %840 = vmatprep.mubr.bf16.mxu0 %v1277_v8 }
  0x2c   :  { %1120 = vmatprep.subr.bf16.mxu0 %v1250_v48  ;;  %800 = vmatmul.mubr.bf16.gmra.mrb[4].mxu1 %v1267_v63 }
  0x2d   :  { %1147 = vmatpush3.bf16.msra.mxu1 %v1249_v47  ;;  %889 = vmatprep.mubr.bf16.mxu1 %v1282_v12 }
  0x2e   :  { %1148 = vmatprep.subr.bf16.mxu1 %v1252_v50 }
  0x2f   :  { %1121 = vmatpush3.bf16.msra.mxu0 %v1251_v49 }
  0x30   :  { %1122 = vmatprep.subr.bf16.mxu0 %v1254_v52 }
  0x31   :  { %1149 = vmatpush3.bf16.msra.mxu1 %v1253_v51 }
  0x32   :  { %1150 = vmatprep.subr.bf16.mxu1 %v1256_v54 }
  0x33   :  { %1123 = vmatpush3.bf16.msra.mxu0 %v1255_v53 }
  0x34   :  { %1124 = vmatprep.subr.bf16.mxu0 %v1258_v56 }
  0x35   :  { %1151 = vmatpush3.bf16.msra.mxu1 %v1257_v55 }
  0x36   :  { %1152 = vmatprep.subr.bf16.mxu1 %v1263_v60 }
  0x37   :  { %1125 = vmatpush3.bf16.msra.mxu0 %v1261_v58 }
  0x38   :  { %1126 = vmatprep.subr.bf16.mxu0 %v1268_v0 }
  0x39   :  { %1153 = vmatpush3.bf16.msra.mxu1 %v1266_v62 }
  0x3a   :  { %1154 = vmatprep.subr.bf16.mxu1 %v1270_v2 }
  0x3b   :  { %1127 = vmatpush3.bf16.msra.mxu0 %v1269_v1 }
  0x3c   :  { %1128 = vmatprep.subr.bf16.mxu0 %v1272_v4 }
  0x3d   :  { %1155 = vmatpush3.bf16.msra.mxu1 %v1271_v3 }
  0x3e   :  { %1156 = vmatprep.subr.bf16.mxu1 %v1274_v6 }
  0x3f   :  { %1129 = vmatpush3.bf16.msra.mxu0 %v1273_v5 }
  0x40   :  { %1180 = vmatprep.subr.bf16.mxu0 %v1279_v10 }
  0x41   :  { %1157 = vmatpush3.bf16.msra.mxu1 %v1278_v9 }
  0x42   :  { %841 = vmatmul.mubr.bf16.vlgmr.msra.gmra.mrb[8].mxu0 %v1275_v7 }
  0x43   :  { %1181 = vmatpush3.bf16.msra.mxu0 %v1279_v10  ;;  %848 = vmatprep.mubr.bf16.mxu0 %v1284_v14 }
  0x44   :  { %890 = vmatmul.mubr.bf16.vlgmr.msra.gmra.mrb[8].mxu1 %v1280_v11  ;;  %1182 = vmatprep.subr.bf16.mxu0 %v1283_v13 }
  0x45   :  { %897 = vmatprep.mubr.bf16.mxu1 %v1288_v17 }
  0x47   :  { %1183 = vmatpush3.bf16.msra.mxu0 %v1283_v13 }
  0x48   :  { %1184 = vmatprep.subr.bf16.mxu0 %v1287_v16 }
  0x4a   :  { %849 = vmatmul.mubr.bf16.gmra.mrb[12].mxu0 %v1286_v15 }
  0x4b   :  { %1185 = vmatpush3.bf16.msra.mxu0 %v1287_v16  ;;  %1196 = vmatprep.mubr.bf16.mxu0 %v1296_v21 }
  0x4c   :  { %898 = vmatmul.mubr.bf16.gmra.mrb[12].mxu1 %v1290_v18  ;;  %1186 = vmatprep.subr.bf16.mxu0 %v1291_v19 }
  0x4f   :  { %1187 = vmatpush3.bf16.msra.mxu0 %v1291_v19 }
  0x50   :  { %1188 = vmatprep.subr.bf16.mxu0 %v1292_v20 }
  0x53   :  { %1189 = vmatpush3.bf16.msra.mxu0 %v1292_v20 }
  0x54   :  { %1190 = vmatprep.subr.bf16.mxu0 %v1293_v22 }
  0x57   :  { %1191 = vmatpush3.bf16.msra.mxu0 %v1293_v22 }
  0x58   :  { %1192 = vmatprep.subr.bf16.mxu0 %v1294_v23 }
  0x5b   :  { %1193 = vmatpush3.bf16.msra.mxu0 %v1294_v23 }
  0x5c   :  { %1194 = vmatprep.subr.bf16.mxu0 %v1295_v24 }
  0x5f   :  { %1195 = vmatpush3.bf16.msra.mxu0 %v1295_v24 }
  0x62   :  { %1197 = vmatmul.mubr.bf16.vlgmr.msra.gmra.mrb[16].mxu0 %v1297_v25 }
  0xf5   :  { %v1074_v26 = vpop.f32.mrb[0].mxu0 }
  0xf6   :  { %v1075_v28 = vpop.f32.mrb[1].mxu0 }
  0xf7   :  { %v1076_v29 = vadd.f32 %v1075_v28, %v1074_v26  ;;  %v1077_v30 = vpop.f32.mrb[2].mxu0  ;;  %v1102_v31 = vpop.f32.mrb[0].mxu1 }
  0xf8   :  { %v1078_v32 = vpop.f32.mrb[3].mxu0  ;;  %v1103_v35 = vpop.f32.mrb[1].mxu1 }
  0xf9   :  { %v745_v33 = vadd.f32 %v1076_v29, %v967_v27  ;;  %v1079_v34 = vadd.f32 %v1078_v32, %v1077_v30  ;;  %v1104_v36 = vadd.f32 %v1103_v35, %v1102_v31  ;;  %v1105_v37 = vpop.f32.mrb[2].mxu1 }
  0xfa   :  { %v1106_v39 = vpop.f32.mrb[3].mxu1 }
  0xfb   :  { %v748_v38 = vadd.f32 %v1079_v34, %v967_v27  ;;  %v794_v40 = vadd.f32 %v1104_v36, %v745_v33  ;;  %v1107_v41 = vadd.f32 %v1106_v39, %v1105_v37 }
  0xfd   :  { %v797_v42 = vadd.f32 %v1107_v41, %v748_v38  ;;  %v1080_v43 = vpop.f32.mrb[4].mxu0 }
  0xfe   :  { %v1081_v44 = vpop.f32.mrb[5].mxu0 }
  0xff   :  { %v1082_v45 = vadd.f32 %v1081_v44, %v1080_v43  ;;  %v1083_v46 = vpop.f32.mrb[6].mxu0  ;;  %v1108_v47 = vpop.f32.mrb[4].mxu1 }
 0x100   :  { %v1084_v48 = vpop.f32.mrb[7].mxu0  ;;  %v1109_v51 = vpop.f32.mrb[5].mxu1 }
 0x101   :  { %v753_v49 = vadd.f32 %v1082_v45, %v967_v27  ;;  %v1085_v50 = vadd.f32 %v1084_v48, %v1083_v46  ;;  %v1110_v52 = vadd.f32 %v1109_v51, %v1108_v47  ;;  %v1111_v53 = vpop.f32.mrb[6].mxu1 }
 0x102   :  { %v1112_v55 = vpop.f32.mrb[7].mxu1 }
 0x103   :  { %v756_v54 = vadd.f32 %v1085_v50, %v967_v27  ;;  %v802_v56 = vadd.f32 %v1110_v52, %v753_v49  ;;  %v1113_v57 = vadd.f32 %v1112_v55, %v1111_v53 }
 0x105   :  { %v805_v58 = vadd.f32 %v1113_v57, %v756_v54 }
 0x115   :  { %v1130_v59 = vpop.f32.mrb[8].mxu0 }
 0x116   :  { %v1131_v60 = vpop.f32.mrb[9].mxu0 }
 0x117   :  { %v1132_v61 = vadd.f32 %v1131_v60, %v1130_v59  ;;  %v1133_v62 = vpop.f32.mrb[10].mxu0  ;;  %v1158_v63 = vpop.f32.mrb[8].mxu1 }
 0x118   :  { %v1134_v0 = vpop.f32.mrb[11].mxu0  ;;  %v1159_v3 = vpop.f32.mrb[9].mxu1 }
 0x119   :  { %v843_v1 = vadd.f32 %v1132_v61, %v794_v40  ;;  %v1135_v2 = vadd.f32 %v1134_v0, %v1133_v62  ;;  %v1160_v4 = vadd.f32 %v1159_v3, %v1158_v63  ;;  %v1161_v5 = vpop.f32.mrb[10].mxu1 }
 0x11a   :  { %v1162_v7 = vpop.f32.mrb[11].mxu1 }
 0x11b   :  { %v846_v6 = vadd.f32 %v1135_v2, %v797_v42  ;;  %v1163_v8 = vadd.f32 %v1162_v7, %v1161_v5  ;;  %v892_v9 = vadd.f32 %v1160_v4, %v843_v1 }
 0x11d   :  { %v1136_v10 = vpop.f32.mrb[12].mxu0  ;;  %v895_v12 = vadd.f32 %v1163_v8, %v846_v6 }
 0x11e   :  { %v1137_v11 = vpop.f32.mrb[13].mxu0 }
 0x11f   :  { %v1138_v13 = vadd.f32 %v1137_v11, %v1136_v10  ;;  %v1139_v14 = vpop.f32.mrb[14].mxu0  ;;  %v1164_v15 = vpop.f32.mrb[12].mxu1 }
 0x120   :  { %v1140_v16 = vpop.f32.mrb[15].mxu0  ;;  %v1165_v19 = vpop.f32.mrb[13].mxu1 }
 0x121   :  { %v851_v17 = vadd.f32 %v1138_v13, %v802_v56  ;;  %v1141_v18 = vadd.f32 %v1140_v16, %v1139_v14  ;;  %v1166_v20 = vadd.f32 %v1165_v19, %v1164_v15  ;;  %v1167_v21 = vpop.f32.mrb[14].mxu1 }
 0x122   :  { %v1168_v23 = vpop.f32.mrb[15].mxu1 }
 0x123   :  { %v854_v22 = vadd.f32 %v1141_v18, %v805_v58  ;;  %v1169_v24 = vadd.f32 %v1168_v23, %v1167_v21  ;;  %v900_v25 = vadd.f32 %v1166_v20, %v851_v17 }
 0x125   :  { %v903_v26 = vadd.f32 %v1169_v24, %v854_v22 }
 0x135   :  { %v1198_v27 = vpop.f32.mrb[16].mxu0 }
 0x136   :  { %v949_v28 = vadd.f32 %v1198_v27, %v900_v25  ;;  %v940_v29 = vpop.f32.mrb[17].mxu0 }
 0x137   :  { %v941_v30 = vadd.f32 %v940_v29, %v892_v9  ;;  %v1199_v31 = vpop.f32.mrb[18].mxu0 }
 0x138   :  { %v957_v32 = vmax.f32 %v949_v28, 0.0  ;;  %v952_v33 = vadd.f32 %v1199_v31, %v903_v26  ;;  %v943_v34 = vpop.f32.mrb[19].mxu0 }
 0x139   :  { %v955_v35 = vmax.f32 %v941_v30, 0.0  ;;  %v944_v36 = vadd.f32 %v943_v34, %v895_v12 }
 0x13a   :  { %961 = vst [vmem:[%s1606_s3 + $0x10] sm:$0xff] %v957_v32  ;;  %v958_v37 = vmax.f32 %v952_v33, 0.0 }
 0x13b   :  { %959 = vst [vmem:[%s1606_s3] sm:$0xff] %v955_v35  ;;  %v956_v38 = vmax.f32 %v944_v36, 0.0 }
 0x13c   :  { %962 = vst [vmem:[%s1606_s3 + $0x18] sm:$0xff] %v958_v37 }
 0x13d   :  { %960 = vst [vmem:[%s1606_s3 + $0x8] sm:$0xff] %v956_v38 }

// kernel: transform_forward.35
= control target key start
LH: loop header
LB: loop body
LE: loop exit
PB: predicated region body
PF: predicated region fallthrough
CT: control target
= control target key end

     0   :  { %vm1547_vm0 = vcmask 523264   ;;  %s2824_s1 = inlined_call_operand.vmem [shape: bf16[1152,64], index: 1, kind: input, shape index: {}]   ;;  %s2825_s0 = inlined_call_operand.vmem [shape: bf16[128,1152], index: 0, kind: input, shape index: {}]   ;;  %s2826_s2 = inlined_call_operand.vmem [shape: f32[1,64], index: 2, kind: input, shape index: {}]   ;;  %s2827_s3 = inlined_call_operand.vmem [shape: f32[128,64], index: 3, kind: output, shape index: {}]  }
   0x1   :  { %v2033_v0 = vld [vmem:[%s2824_s1 + $0x40] sm:$0xff]   ;;  %v2037_v4 = vld [vmem:[%s2824_s1 + $0x48] sm:$0xff]   ;;  %v2041_v8 = vld [vmem:[%s2824_s1 + $0x50] sm:$0xff]  }
   0x2   :  { %v2034_v1 = vld [vmem:[%s2824_s1 + $0xc0] sm:$0xff]   ;;  %1713 = vmatprep.subr.bf16.mxu0 %v2033_v0  ;;  %v2038_v5 = vld [vmem:[%s2824_s1 + $0xc8] sm:$0xff]   ;;  %v2042_v9 = vld [vmem:[%s2824_s1 + $0xd0] sm:$0xff]  }
   0x3   :  { %v2035_v2 = vld [vmem:[%s2824_s1] sm:$0xff]   ;;  %1777 = vmatprep.subr.bf16.mxu1 %v2034_v1  ;;  %v2039_v6 = vld [vmem:[%s2824_s1 + $0x8] sm:$0xff]   ;;  %v2043_v10 = vld [vmem:[%s2824_s1 + $0x10] sm:$0xff]  }
   0x4   :  { %v2036_v3 = vld [vmem:[%s2824_s1 + $0x80] sm:$0xff]   ;;  %1714 = vmatpush3.bf16.msra.mxu0 %v2035_v2  ;;  %v2040_v7 = vld [vmem:[%s2824_s1 + $0x88] sm:$0xff]   ;;  %v2044_v11 = vld [vmem:[%s2824_s1 + $0x90] sm:$0xff]  }
   0x5   :  { %1778 = vmatpush3.bf16.msra.mxu1 %v2036_v3  ;;  %1715 = vmatprep.subr.bf16.mxu0 %v2037_v4  ;;  %v2045_v12 = vld [vmem:[%s2824_s1 + $0x58] sm:$0xff]   ;;  %v2049_v16 = vld [vmem:[%s2824_s1 + $0x60] sm:$0xff]   ;;  %v2053_v20 = vld [vmem:[%s2824_s1 + $0x68] sm:$0xff]  }
   0x6   :  { %1779 = vmatprep.subr.bf16.mxu1 %v2038_v5  ;;  %v2046_v13 = vld [vmem:[%s2824_s1 + $0xd8] sm:$0xff]   ;;  %v2050_v17 = vld [vmem:[%s2824_s1 + $0xe0] sm:$0xff]   ;;  %v2054_v21 = vld [vmem:[%s2824_s1 + $0xe8] sm:$0xff]  }
   0x7   :  { %v2047_v14 = vld [vmem:[%s2824_s1 + $0x18] sm:$0xff]   ;;  %v2051_v18 = vld [vmem:[%s2824_s1 + $0x20] sm:$0xff]   ;;  %v2055_v22 = vld [vmem:[%s2824_s1 + $0x28] sm:$0xff]  }
   0x8   :  { %1716 = vmatpush3.bf16.msra.mxu0 %v2039_v6  ;;  %v2048_v15 = vld [vmem:[%s2824_s1 + $0x98] sm:$0xff]   ;;  %v2052_v19 = vld [vmem:[%s2824_s1 + $0xa0] sm:$0xff]   ;;  %v2056_v23 = vld [vmem:[%s2824_s1 + $0xa8] sm:$0xff]  }
   0x9   :  { %1780 = vmatpush3.bf16.msra.mxu1 %v2040_v7  ;;  %1717 = vmatprep.subr.bf16.mxu0 %v2041_v8  ;;  %v2057_v24 = vld [vmem:[%s2824_s1 + $0x70] sm:$0xff]   ;;  %v2061_v28 = vld [vmem:[%s2824_s1 + $0x78] sm:$0xff]   ;;  %v2065_v32 = vld [vmem:[%s2825_s0] ss:$36 sps:$4 sm:$0xff]  }
   0xa   :  { %1781 = vmatprep.subr.bf16.mxu1 %v2042_v9  ;;  %v2058_v25 = vld [vmem:[%s2824_s1 + $0xf0] sm:$0xff]   ;;  %v2062_v29 = vld [vmem:[%s2824_s1 + $0xf8] sm:$0xff]   ;;  %v2067_v33 = vld [vmem:[%s2825_s0 + $0x4] ss:$36 sps:$4 sm:$0xff]  }
   0xb   :  { %v2059_v26 = vld [vmem:[%s2824_s1 + $0x30] sm:$0xff]   ;;  %v2063_v30 = vld [vmem:[%s2824_s1 + $0x38] sm:$0xff]   ;;  %v2068_v34 = vld [vmem:[%s2825_s0 + $0x8] ss:$36 sps:$4 sm:$0xff]   ;;  %1078 = vmatprep.mubr.bf16.mxu0 %v2067_v33 }
   0xc   :  { %1718 = vmatpush3.bf16.msra.mxu0 %v2043_v10  ;;  %v2060_v27 = vld [vmem:[%s2824_s1 + $0xb0] sm:$0xff]   ;;  %v2064_v31 = vld [vmem:[%s2824_s1 + $0xb8] sm:$0xff]   ;;  %v2071_v36 = vld [vmem:[%s2824_s1 + $0x140] sm:$0xff]  }
   0xd   :  { %1782 = vmatpush3.bf16.msra.mxu1 %v2044_v11  ;;  %1719 = vmatprep.subr.bf16.mxu0 %v2045_v12  ;;  %v2070_v35 = vld [vmem:[%s2825_s0 + $0xc] ss:$36 sps:$4 sm:$0xff]   ;;  %v2072_v37 = vld [vmem:[%s2824_s1 + $0x1c0] sm:$0xff]   ;;  %v2077_v41 = vld [vmem:[%s2825_s0 + $0x54] ss:$36 sps:$4 sm:$0xff]  }
   0xe   :  { %1783 = vmatprep.subr.bf16.mxu1 %v2046_v13  ;;  %1175 = vmatprep.mubr.bf16.mxu1 %v2070_v35  ;;  %v2073_v38 = vld [vmem:[%s2824_s1 + $0x100] sm:$0xff]   ;;  %v2075_v40 = vld [vmem:[%s2825_s0 + $0x4c] ss:$36 sps:$4 sm:$0xff]   ;;  %v2085_v48 = vld [vmem:[%s2825_s0 + $0x94] ss:$36 sps:$4 sm:$0xff]  }
   0xf   :  { %v2074_v39 = vld [vmem:[%s2824_s1 + $0x180] sm:$0xff]   ;;  %v2079_v42 = vld [vmem:[%s2825_s0 + $0x48] ss:$36 sps:$4 sm:$0xff]   ;;  %v2080_v43 = vld [vmem:[%s2825_s0 + $0x50] ss:$36 sps:$4 sm:$0xff]  }
  0x10   :  { %1720 = vmatpush3.bf16.msra.mxu0 %v2047_v14  ;;  %v2081_v44 = vld [vmem:[%s2824_s1 + $0x148] sm:$0xff]   ;;  %v2087_v49 = vld [vmem:[%s2825_s0 + $0x9c] ss:$36 sps:$4 sm:$0xff]   ;;  %v2089_v50 = vld [vmem:[%s2825_s0 + $0x90] ss:$36 sps:$4 sm:$0xff]  }
  0x11   :  { %1784 = vmatpush3.bf16.msra.mxu1 %v2048_v15  ;;  %1721 = vmatprep.subr.bf16.mxu0 %v2049_v16  ;;  %v2082_v45 = vld [vmem:[%s2824_s1 + $0x1c8] sm:$0xff]   ;;  %v2090_v51 = vld [vmem:[%s2825_s0 + $0x98] ss:$36 sps:$4 sm:$0xff]   ;;  %v2091_v52 = vld [vmem:[%s2824_s1 + $0x150] sm:$0xff]  }
  0x12   :  { %1785 = vmatprep.subr.bf16.mxu1 %v2050_v17  ;;  %v2083_v46 = vld [vmem:[%s2824_s1 + $0x108] sm:$0xff]   ;;  %v2092_v53 = vld [vmem:[%s2824_s1 + $0x1d0] sm:$0xff]   ;;  %v2095_v56 = vld [vmem:[%s2825_s0 + $0xdc] ss:$36 sps:$4 sm:$0xff]  }
  0x13   :  { %v2084_v47 = vld [vmem:[%s2824_s1 + $0x188] sm:$0xff]   ;;  %v2093_v54 = vld [vmem:[%s2824_s1 + $0x110] sm:$0xff]   ;;  %v2099_v58 = vld [vmem:[%s2825_s0 + $0xd8] ss:$36 sps:$4 sm:$0xff]  }
  0x14   :  { %1722 = vmatpush3.bf16.msra.mxu0 %v2051_v18  ;;  %v2094_v55 = vld [vmem:[%s2824_s1 + $0x190] sm:$0xff]   ;;  %v2097_v57 = vld [vmem:[%s2825_s0 + $0xe4] ss:$36 sps:$4 sm:$0xff]   ;;  %v2101_v60 = vld [vmem:[%s2824_s1 + $0x158] sm:$0xff]  }
  0x15   :  { %1786 = vmatpush3.bf16.msra.mxu1 %v2052_v19  ;;  %1723 = vmatprep.subr.bf16.mxu0 %v2053_v20  ;;  %v2100_v59 = vld [vmem:[%s2825_s0 + $0xe0] ss:$36 sps:$4 sm:$0xff]   ;;  %v2102_v61 = vld [vmem:[%s2824_s1 + $0x1d8] sm:$0xff]   ;;  %v2107_v1 = vld [vmem:[%s2825_s0 + $0x12c] ss:$36 sps:$4 sm:$0xff]  }
  0x16   :  { %1787 = vmatprep.subr.bf16.mxu1 %v2054_v21  ;;  %v2103_v62 = vld [vmem:[%s2824_s1 + $0x118] sm:$0xff]   ;;  %v2105_v0 = vld [vmem:[%s2825_s0 + $0x124] ss:$36 sps:$4 sm:$0xff]   ;;  %v2115_v8 = vld [vmem:[%s2825_s0 + $0x16c] ss:$36 sps:$4 sm:$0xff]  }
  0x17   :  { %v2104_v63 = vld [vmem:[%s2824_s1 + $0x198] sm:$0xff]   ;;  %v2109_v2 = vld [vmem:[%s2825_s0 + $0x120] ss:$36 sps:$4 sm:$0xff]   ;;  %v2110_v4 = vld [vmem:[%s2825_s0 + $0x128] ss:$36 sps:$4 sm:$0xff]  }
  0x18   :  { %1724 = vmatpush3.bf16.msra.mxu0 %v2055_v22  ;;  %v2111_v3 = vld [vmem:[%s2824_s1 + $0x160] sm:$0xff]   ;;  %v2117_v9 = vld [vmem:[%s2825_s0 + $0x174] ss:$36 sps:$4 sm:$0xff]   ;;  %v2121_v10 = vld [vmem:[%s2824_s1 + $0x168] sm:$0xff]  }
  0x19   :  { %1788 = vmatpush3.bf16.msra.mxu1 %v2056_v23  ;;  %1725 = vmatprep.subr.bf16.mxu0 %v2057_v24  ;;  %v2112_v5 = vld [vmem:[%s2824_s1 + $0x1e0] sm:$0xff]   ;;  %v2122_v11 = vld [vmem:[%s2824_s1 + $0x1e8] sm:$0xff]   ;;  %v2120_v15 = vld [vmem:[%s2825_s0 + $0x170] ss:$36 sps:$4 sm:$0xff]  }
  0x1a   :  { %1789 = vmatprep.subr.bf16.mxu1 %v2058_v25  ;;  %v2113_v6 = vld [vmem:[%s2824_s1 + $0x120] sm:$0xff]   ;;  %v2119_v12 = vld [vmem:[%s2825_s0 + $0x168] ss:$36 sps:$4 sm:$0xff]   ;;  %v2125_v16 = vld [vmem:[%s2825_s0 + $0x1b4] ss:$36 sps:$4 sm:$0xff]  }
  0x1b   :  { %v2114_v7 = vld [vmem:[%s2824_s1 + $0x1a0] sm:$0xff]   ;;  %v2123_v13 = vld [vmem:[%s2824_s1 + $0x128] sm:$0xff]   ;;  %v2131_v18 = vld [vmem:[%s2824_s1 + $0x170] sm:$0xff]  }
  0x1c   :  { %1726 = vmatpush3.bf16.msra.mxu0 %v2059_v26  ;;  %v2124_v14 = vld [vmem:[%s2824_s1 + $0x1a8] sm:$0xff]   ;;  %v2127_v17 = vld [vmem:[%s2825_s0 + $0x1bc] ss:$36 sps:$4 sm:$0xff]   ;;  %v2132_v19 = vld [vmem:[%s2824_s1 + $0x1f0] sm:$0xff]  }
  0x1d   :  { %1790 = vmatpush3.bf16.msra.mxu1 %v2060_v27  ;;  %1727 = vmatprep.subr.bf16.mxu0 %v2061_v28  ;;  %v2133_v20 = vld [vmem:[%s2824_s1 + $0x130] sm:$0xff]   ;;  %v2130_v23 = vld [vmem:[%s2825_s0 + $0x1b8] ss:$36 sps:$4 sm:$0xff]   ;;  %v2137_v25 = vld [vmem:[%s2825_s0 + $0x204] ss:$36 sps:$4 sm:$0xff]  }
  0x1e   :  { %1791 = vmatprep.subr.bf16.mxu1 %v2062_v29  ;;  %v2134_v21 = vld [vmem:[%s2824_s1 + $0x1b0] sm:$0xff]   ;;  %v2135_v24 = vld [vmem:[%s2825_s0 + $0x1fc] ss:$36 sps:$4 sm:$0xff]  }
  0x1f   :  { %v2129_v22 = vld [vmem:[%s2825_s0 + $0x1b0] ss:$36 sps:$4 sm:$0xff]   ;;  %v2141_v26 = vld [vmem:[%s2824_s1 + $0x178] sm:$0xff]  }
  0x20   :  { %1728 = vmatpush3.bf16.msra.mxu0 %v2063_v30  ;;  %v2142_v27 = vld [vmem:[%s2824_s1 + $0x1f8] sm:$0xff]   ;;  %v2145_v35 = vld [vmem:[%s2825_s0 + $0x10] ss:$36 sps:$4 sm:$0xff]  }
  0x21   :  { %1792 = vmatpush3.bf16.msra.mxu1 %v2064_v31  ;;  %1841 = vmatprep.subr.bf16.mxu0 %v2071_v36  ;;  %v2143_v28 = vld [vmem:[%s2824_s1 + $0x138] sm:$0xff]   ;;  %v2140_v31 = vld [vmem:[%s2825_s0 + $0x200] ss:$36 sps:$4 sm:$0xff]  }
  0x22   :  { %1905 = vmatprep.subr.bf16.mxu1 %v2072_v37  ;;  %v2144_v29 = vld [vmem:[%s2824_s1 + $0x1b8] sm:$0xff]  }
  0x23   :  { %1079 = vmatmul.mubr.bf16.vlgmr.msra.gmra.mrb[0].mxu0 %v2065_v32  ;;  %v2139_v30 = vld [vmem:[%s2825_s0 + $0x1f8] ss:$36 sps:$4 sm:$0xff]   ;;  %v2151_v32 = vld [vmem:[%s2824_s1 + $0x200] sm:$0xff]  }
  0x24   :  { %1176 = vmatmul.mubr.bf16.vlgmr.msra.gmra.mrb[0].mxu1 %v2068_v34  ;;  %1842 = vmatpush3.bf16.msra.mxu0 %v2073_v38  ;;  %v2147_v33 = vld [vmem:[%s2825_s0 + $0x14] ss:$36 sps:$4 sm:$0xff]   ;;  %v2150_v34 = vld [vmem:[%s2825_s0 + $0x1c] ss:$36 sps:$4 sm:$0xff]   ;;  %v2154_v38 = vld [vmem:[%s2825_s0 + $0x64] ss:$36 sps:$4 sm:$0xff]  }
  0x25   :  { %1906 = vmatpush3.bf16.msra.mxu1 %v2074_v39  ;;  %1086 = vmatprep.mubr.bf16.mxu0 %v2075_v40  ;;  %v2148_v36 = vld [vmem:[%s2825_s0 + $0x18] ss:$36 sps:$4 sm:$0xff]   ;;  %v2158_v39 = vld [vmem:[%s2824_s1 + $0x208] sm:$0xff]   ;;  %v2165_v40 = vld [vmem:[%s2824_s1 + $0x210] sm:$0xff]  }
  0x26   :  { %1183 = vmatprep.mubr.bf16.mxu1 %v2077_v41  ;;  %1843 = vmatprep.subr.bf16.mxu0 %v2081_v44  ;;  %v2152_v37 = vld [vmem:[%s2825_s0 + $0x5c] ss:$36 sps:$4 sm:$0xff]   ;;  %v2161_v44 = vld [vmem:[%s2825_s0 + $0xac] ss:$36 sps:$4 sm:$0xff]  }
  0x27   :  { %1907 = vmatprep.subr.bf16.mxu1 %v2082_v45  ;;  %v2156_v41 = vld [vmem:[%s2825_s0 + $0x58] ss:$36 sps:$4 sm:$0xff]  }
  0x28   :  { %1844 = vmatpush3.bf16.msra.mxu0 %v2083_v46  ;;  %v2172_v45 = vld [vmem:[%s2824_s1 + $0x218] sm:$0xff]   ;;  %v2179_v46 = vld [vmem:[%s2824_s1 + $0x220] sm:$0xff]  }
  0x29   :  { %1908 = vmatpush3.bf16.msra.mxu1 %v2084_v47  ;;  %1845 = vmatprep.subr.bf16.mxu0 %v2091_v52  ;;  %v2163_v47 = vld [vmem:[%s2825_s0 + $0xa0] ss:$36 sps:$4 sm:$0xff]   ;;  %v2170_v52 = vld [vmem:[%s2825_s0 + $0xe8] ss:$36 sps:$4 sm:$0xff]  }
  0x2a   :  { %1909 = vmatprep.subr.bf16.mxu1 %v2092_v53  ;;  %v2193_v53 = vld [vmem:[%s2824_s1 + $0x230] sm:$0xff]  }
  0x2b   :  { %1087 = vmatmul.mubr.bf16.gmra.mrb[4].mxu0 %v2079_v42  ;;  %v2157_v42 = vld [vmem:[%s2825_s0 + $0x60] ss:$36 sps:$4 sm:$0xff]  }
  0x2c   :  { %1184 = vmatmul.mubr.bf16.gmra.mrb[4].mxu1 %v2080_v43  ;;  %1094 = vmatprep.mubr.bf16.mxu0 %v2085_v48  ;;  %v2159_v43 = vld [vmem:[%s2825_s0 + $0xa4] ss:$36 sps:$4 sm:$0xff]  }
  0x2d   :  { %1191 = vmatprep.mubr.bf16.mxu1 %v2087_v49  ;;  %1846 = vmatpush3.bf16.msra.mxu0 %v2093_v54  ;;  %v2164_v48 = vld [vmem:[%s2825_s0 + $0xa8] ss:$36 sps:$4 sm:$0xff]   ;;  %v2171_v54 = vld [vmem:[%s2825_s0 + $0xf0] ss:$36 sps:$4 sm:$0xff]  }
  0x2e   :  { %1910 = vmatpush3.bf16.msra.mxu1 %v2094_v55  ;;  %1847 = vmatprep.subr.bf16.mxu0 %v2101_v60  ;;  %v2166_v49 = vld [vmem:[%s2825_s0 + $0xec] ss:$36 sps:$4 sm:$0xff]   ;;  %v2173_v55 = vld [vmem:[%s2825_s0 + $0x134] ss:$36 sps:$4 sm:$0xff]   ;;  %v2180_v60 = vld [vmem:[%s2825_s0 + $0x17c] ss:$36 sps:$4 sm:$0xff]  }
  0x2f   :  { %1911 = vmatprep.subr.bf16.mxu1 %v2102_v61  ;;  %v2182_v61 = vld [vmem:[%s2825_s0 + $0x184] ss:$36 sps:$4 sm:$0xff]  }
  0x31   :  { %1848 = vmatpush3.bf16.msra.mxu0 %v2103_v62  ;;  %v2184_v62 = vld [vmem:[%s2825_s0 + $0x178] ss:$36 sps:$4 sm:$0xff]  }
  0x32   :  { %1912 = vmatpush3.bf16.msra.mxu1 %v2104_v63  ;;  %1849 = vmatprep.subr.bf16.mxu0 %v2111_v3  ;;  %v2185_v63 = vld [vmem:[%s2825_s0 + $0x180] ss:$36 sps:$4 sm:$0xff]   ;;  %v2192_v3 = vld [vmem:[%s2825_s0 + $0x1c8] ss:$36 sps:$4 sm:$0xff]  }
  0x33   :  { %1095 = vmatmul.mubr.bf16.gmra.mrb[8].mxu0 %v2089_v50  ;;  %1913 = vmatprep.subr.bf16.mxu1 %v2112_v5  ;;  %v2168_v50 = vld [vmem:[%s2825_s0 + $0xf4] ss:$36 sps:$4 sm:$0xff]  }
  0x34   :  { %1192 = vmatmul.mubr.bf16.gmra.mrb[8].mxu1 %v2090_v51  ;;  %1102 = vmatprep.mubr.bf16.mxu0 %v2095_v56  ;;  %v2186_v51 = vld [vmem:[%s2824_s1 + $0x228] sm:$0xff]   ;;  %v2175_v56 = vld [vmem:[%s2825_s0 + $0x13c] ss:$36 sps:$4 sm:$0xff]   ;;  %v2196_v5 = vld [vmem:[%s2825_s0 + $0x214] ss:$36 sps:$4 sm:$0xff]  }
  0x35   :  { %1199 = vmatprep.mubr.bf16.mxu1 %v2097_v57  ;;  %1850 = vmatpush3.bf16.msra.mxu0 %v2113_v6  ;;  %v2200_v57 = vld [vmem:[%s2824_s1 + $0x238] sm:$0xff]   ;;  %v2198_v6 = vld [vmem:[%s2825_s0 + $0x208] ss:$36 sps:$4 sm:$0xff]  }
  0x36   :  { %1914 = vmatpush3.bf16.msra.mxu1 %v2114_v7  ;;  %1851 = vmatprep.subr.bf16.mxu0 %v2121_v10  ;;  %v2199_v7 = vld [vmem:[%s2825_s0 + $0x210] ss:$36 sps:$4 sm:$0xff]   ;;  %v2203_v10 = vld [vmem:[%s2825_s0 + $0x68] ss:$36 sps:$4 sm:$0xff]  }
  0x37   :  { %1915 = vmatprep.subr.bf16.mxu1 %v2122_v11  ;;  %v2204_v11 = vld [vmem:[%s2825_s0 + $0x188] ss:$36 sps:$4 sm:$0xff]  }
  0x39   :  { %1852 = vmatpush3.bf16.msra.mxu0 %v2123_v13  ;;  %v2206_v13 = vld [vmem:[%s2825_s0 + $0x1d0] ss:$36 sps:$4 sm:$0xff]  }
  0x3a   :  { %1916 = vmatpush3.bf16.msra.mxu1 %v2124_v14  ;;  %1853 = vmatprep.subr.bf16.mxu0 %v2131_v18  ;;  %v2207_v14 = vld [vmem:[%s2825_s0 + $0xf8] ss:$36 sps:$4 sm:$0xff]   ;;  %v2664_v18 = vld [vmem:[%s2826_s2] ss:$0 sm:$0xff] }
  0x3b   :  { %1103 = vmatmul.mubr.bf16.gmra.mrb[12].mxu0 %v2099_v58  ;;  %1917 = vmatprep.subr.bf16.mxu1 %v2132_v19  ;;  %v2177_v58 = vld [vmem:[%s2825_s0 + $0x130] ss:$36 sps:$4 sm:$0xff]  }
  0x3c   :  { %1200 = vmatmul.mubr.bf16.gmra.mrb[12].mxu1 %v2100_v59  ;;  %1110 = vmatprep.mubr.bf16.mxu0 %v2105_v0  ;;  %v2178_v59 = vld [vmem:[%s2825_s0 + $0x138] ss:$36 sps:$4 sm:$0xff]   ;;  %v2187_v0 = vld [vmem:[%s2825_s0 + $0x1c4] ss:$36 sps:$4 sm:$0xff]  }
  0x3d   :  { %1207 = vmatprep.mubr.bf16.mxu1 %v2107_v1  ;;  %1854 = vmatpush3.bf16.msra.mxu0 %v2133_v20  ;;  %v2189_v1 = vld [vmem:[%s2825_s0 + $0x1cc] ss:$36 sps:$4 sm:$0xff]  }
  0x3e   :  { %1918 = vmatpush3.bf16.msra.mxu1 %v2134_v21  ;;  %1855 = vmatprep.subr.bf16.mxu0 %v2141_v26 }
  0x3f   :  { %1919 = vmatprep.subr.bf16.mxu1 %v2142_v27 }
  0x41   :  { %1856 = vmatpush3.bf16.msra.mxu0 %v2143_v28 }
  0x42   :  { %1920 = vmatpush3.bf16.msra.mxu1 %v2144_v29  ;;  %1985 = vmatprep.subr.bf16.mxu0 %v2151_v32 }
  0x43   :  { %1111 = vmatmul.mubr.bf16.gmra.mrb[16].mxu0 %v2109_v2  ;;  %2017 = vmatprep.subr.bf16.mxu1 %v2151_v32  ;;  %v2191_v2 = vld [vmem:[%s2825_s0 + $0x1c0] ss:$36 sps:$4 sm:$0xff]  }
  0x44   :  { %1208 = vmatmul.mubr.bf16.gmra.mrb[16].mxu1 %v2110_v4  ;;  %1118 = vmatprep.mubr.bf16.mxu0 %v2115_v8  ;;  %v2194_v4 = vld [vmem:[%s2825_s0 + $0x20c] ss:$36 sps:$4 sm:$0xff]   ;;  %v2201_v8 = vld [vmem:[%s2825_s0 + $0x20] ss:$36 sps:$4 sm:$0xff]  }
  0x45   :  { %1215 = vmatprep.mubr.bf16.mxu1 %v2117_v9  ;;  %v2202_v9 = vld [vmem:[%s2825_s0 + $0x140] ss:$36 sps:$4 sm:$0xff]  }
  0x4b   :  { %1119 = vmatmul.mubr.bf16.gmra.mrb[20].mxu0 %v2119_v12  ;;  %v2205_v12 = vld [vmem:[%s2825_s0 + $0xb0] ss:$36 sps:$4 sm:$0xff]  }
  0x4c   :  { %1216 = vmatmul.mubr.bf16.gmra.mrb[20].mxu1 %v2120_v15  ;;  %1126 = vmatprep.mubr.bf16.mxu0 %v2125_v16  ;;  %v2208_v15 = vld [vmem:[%s2825_s0 + $0x218] ss:$36 sps:$4 sm:$0xff]  }
  0x4d   :  { %1223 = vmatprep.mubr.bf16.mxu1 %v2127_v17 }
  0x53   :  { %1127 = vmatmul.mubr.bf16.gmra.mrb[24].mxu0 %v2129_v22 }
  0x54   :  { %1224 = vmatmul.mubr.bf16.gmra.mrb[24].mxu1 %v2130_v23  ;;  %1134 = vmatprep.mubr.bf16.mxu0 %v2135_v24 }
  0x55   :  { %1231 = vmatprep.mubr.bf16.mxu1 %v2137_v25 }
  0x5b   :  { %1135 = vmatmul.mubr.bf16.gmra.mrb[28].mxu0 %v2139_v30 }
  0x5c   :  { %1232 = vmatmul.mubr.bf16.gmra.mrb[28].mxu1 %v2140_v31  ;;  %1272 = vmatprep.mubr.bf16.mxu0 %v2147_v33 }
  0x5d   :  { %1369 = vmatprep.mubr.bf16.mxu1 %v2150_v34 }
  0x63   :  { %1273 = vmatmul.mubr.bf16.vlgmr.msra.gmra.mrb[32].mxu0 %v2145_v35 }
  0x64   :  { %1370 = vmatmul.mubr.bf16.vlgmr.msra.gmra.mrb[32].mxu1 %v2148_v36  ;;  %1986 = vmatpush3.bf16.msra.mxu0 %v2151_v32 }
  0x65   :  { %2025 = vmatpush3.bf16.msra.mxu1 %v2151_v32  ;;  %1280 = vmatprep.mubr.bf16.mxu0 %v2152_v37 }
  0x66   :  { %1377 = vmatprep.mubr.bf16.mxu1 %v2154_v38  ;;  %1987 = vmatprep.subr.bf16.mxu0 %v2158_v39 }
  0x67   :  { %2018 = vmatprep.subr.bf16.mxu1 %v2158_v39 }
  0x68   :  { %1988 = vmatpush3.bf16.msra.mxu0 %v2158_v39 }
  0x69   :  { %2026 = vmatpush3.bf16.msra.mxu1 %v2158_v39  ;;  %1989 = vmatprep.subr.bf16.mxu0 %v2165_v40 }
  0x6a   :  { %2019 = vmatprep.subr.bf16.mxu1 %v2165_v40 }
  0x6b   :  { %1281 = vmatmul.mubr.bf16.gmra.mrb[36].mxu0 %v2156_v41 }
  0x6c   :  { %1378 = vmatmul.mubr.bf16.gmra.mrb[36].mxu1 %v2157_v42  ;;  %1288 = vmatprep.mubr.bf16.mxu0 %v2159_v43 }
  0x6d   :  { %1385 = vmatprep.mubr.bf16.mxu1 %v2161_v44  ;;  %1990 = vmatpush3.bf16.msra.mxu0 %v2165_v40 }
  0x6e   :  { %2027 = vmatpush3.bf16.msra.mxu1 %v2165_v40  ;;  %1991 = vmatprep.subr.bf16.mxu0 %v2172_v45 }
  0x6f   :  { %2020 = vmatprep.subr.bf16.mxu1 %v2172_v45 }
  0x71   :  { %1992 = vmatpush3.bf16.msra.mxu0 %v2172_v45 }
  0x72   :  { %2028 = vmatpush3.bf16.msra.mxu1 %v2172_v45  ;;  %1993 = vmatprep.subr.bf16.mxu0 %v2179_v46 }
  0x73   :  { %1289 = vmatmul.mubr.bf16.gmra.mrb[40].mxu0 %v2163_v47  ;;  %2021 = vmatprep.subr.bf16.mxu1 %v2179_v46 }
  0x74   :  { %1386 = vmatmul.mubr.bf16.gmra.mrb[40].mxu1 %v2164_v48  ;;  %1296 = vmatprep.mubr.bf16.mxu0 %v2166_v49 }
  0x75   :  { %1393 = vmatprep.mubr.bf16.mxu1 %v2168_v50  ;;  %1994 = vmatpush3.bf16.msra.mxu0 %v2179_v46 }
  0x76   :  { %2029 = vmatpush3.bf16.msra.mxu1 %v2179_v46  ;;  %1995 = vmatprep.subr.bf16.mxu0 %v2186_v51 }
  0x77   :  { %2022 = vmatprep.subr.bf16.mxu1 %v2186_v51 }
  0x79   :  { %1996 = vmatpush3.bf16.msra.mxu0 %v2186_v51 }
  0x7a   :  { %2030 = vmatpush3.bf16.msra.mxu1 %v2186_v51  ;;  %1997 = vmatprep.subr.bf16.mxu0 %v2193_v53 }
  0x7b   :  { %1297 = vmatmul.mubr.bf16.gmra.mrb[44].mxu0 %v2170_v52  ;;  %2023 = vmatprep.subr.bf16.mxu1 %v2193_v53 }
  0x7c   :  { %1394 = vmatmul.mubr.bf16.gmra.mrb[44].mxu1 %v2171_v54  ;;  %1304 = vmatprep.mubr.bf16.mxu0 %v2173_v55 }
  0x7d   :  { %1401 = vmatprep.mubr.bf16.mxu1 %v2175_v56  ;;  %1998 = vmatpush3.bf16.msra.mxu0 %v2193_v53 }
  0x7e   :  { %2031 = vmatpush3.bf16.msra.mxu1 %v2193_v53  ;;  %1999 = vmatprep.subr.bf16.mxu0 %v2200_v57 }
  0x7f   :  { %2024 = vmatprep.subr.bf16.mxu1 %v2200_v57 }
  0x81   :  { %2000 = vmatpush3.bf16.msra.mxu0 %v2200_v57 }
  0x82   :  { %2032 = vmatpush3.bf16.msra.mxu1 %v2200_v57 }
  0x83   :  { %1305 = vmatmul.mubr.bf16.gmra.mrb[48].mxu0 %v2177_v58 }
  0x84   :  { %1402 = vmatmul.mubr.bf16.gmra.mrb[48].mxu1 %v2178_v59  ;;  %1312 = vmatprep.mubr.bf16.mxu0 %v2180_v60 }
  0x85   :  { %1409 = vmatprep.mubr.bf16.mxu1 %v2182_v61 }
  0x8b   :  { %1313 = vmatmul.mubr.bf16.gmra.mrb[52].mxu0 %v2184_v62 }
  0x8c   :  { %1410 = vmatmul.mubr.bf16.gmra.mrb[52].mxu1 %v2185_v63  ;;  %1320 = vmatprep.mubr.bf16.mxu0 %v2187_v0 }
  0x8d   :  { %1417 = vmatprep.mubr.bf16.mxu1 %v2189_v1 }
  0x93   :  { %1321 = vmatmul.mubr.bf16.gmra.mrb[56].mxu0 %v2191_v2 }
  0x94   :  { %1418 = vmatmul.mubr.bf16.gmra.mrb[56].mxu1 %v2192_v3  ;;  %1328 = vmatprep.mubr.bf16.mxu0 %v2194_v4 }
  0x95   :  { %1425 = vmatprep.mubr.bf16.mxu1 %v2196_v5 }
  0x9b   :  { %1329 = vmatmul.mubr.bf16.gmra.mrb[60].mxu0 %v2198_v6 }
  0x9c   :  { %1426 = vmatmul.mubr.bf16.gmra.mrb[60].mxu1 %v2199_v7  ;;  %2001 = vmatprep.mubr.bf16.mxu0 %v2201_v8 }
  0x9d   :  { %2009 = vmatprep.mubr.bf16.mxu1 %v2202_v9 }
  0xa3   :  { %2002 = vmatmul.mubr.bf16.vlgmr.msra.gmra.mrb[64].mxu0 %v2203_v10 }
  0xa4   :  { %2010 = vmatmul.mubr.bf16.vlgmr.msra.gmra.mrb[64].mxu1 %v2204_v11  ;;  %2005 = vmatprep.mubr.bf16.mxu0 %v2205_v12 }
  0xa5   :  { %2013 = vmatprep.mubr.bf16.mxu1 %v2206_v13 }
  0xab   :  { %2006 = vmatmul.mubr.bf16.gmra.mrb[68].mxu0 %v2207_v14 }
  0xac   :  { %2014 = vmatmul.mubr.bf16.gmra.mrb[68].mxu1 %v2208_v15 }
  0xf6   :  { %v1729_v16 = vpop.f32.mrb[0].mxu0 }
  0xf7   :  { %v1793_v17 = vpop.f32.mrb[0].mxu1  ;;  %v1730_v19 = vpop.f32.mrb[1].mxu0 }
  0xf8   :  { %v1731_v20 = vadd.f32 %v1730_v19, %v1729_v16  ;;  %v1794_v21 = vpop.f32.mrb[1].mxu1  ;;  %v1732_v22 = vpop.f32.mrb[2].mxu0 }
  0xf9   :  { %v1795_v23 = vadd.f32 %v1794_v21, %v1793_v17  ;;  %v1796_v24 = vpop.f32.mrb[2].mxu1  ;;  %v1733_v25 = vpop.f32.mrb[3].mxu0 }
  0xfa   :  { %v1081_v26 = vadd.f32 %v1731_v20, %v2664_v18  ;;  %v1734_v27 = vadd.f32 %v1733_v25, %v1732_v22  ;;  %v1797_v28 = vpop.f32.mrb[3].mxu1 }
  0xfb   :  { %v1798_v29 = vadd.f32 %v1797_v28, %v1796_v24 }
  0xfc   :  { %v2667_v30 = vadd.f32 %v1795_v23, %v1081_v26  ;;  %v1084_v31 = vadd.f32 %v1734_v27, %v2664_v18 }
  0xfe   :  { %v2670_v32 = vadd.f32 %v1798_v29, %v1084_v31  ;;  %v1735_v33 = vpop.f32.mrb[4].mxu0 }
  0xff   :  { %v1799_v34 = vpop.f32.mrb[4].mxu1  ;;  %v1736_v35 = vpop.f32.mrb[5].mxu0 }
 0x100   :  { %v1737_v36 = vadd.f32 %v1736_v35, %v1735_v33  ;;  %v1800_v37 = vpop.f32.mrb[5].mxu1  ;;  %v1738_v38 = vpop.f32.mrb[6].mxu0 }
 0x101   :  { %v1801_v39 = vadd.f32 %v1800_v37, %v1799_v34  ;;  %v1802_v40 = vpop.f32.mrb[6].mxu1  ;;  %v1739_v41 = vpop.f32.mrb[7].mxu0 }
 0x102   :  { %v1089_v42 = vadd.f32 %v1737_v36, %v2664_v18  ;;  %v1740_v43 = vadd.f32 %v1739_v41, %v1738_v38  ;;  %v1803_v44 = vpop.f32.mrb[7].mxu1 }
 0x103   :  { %v1804_v45 = vadd.f32 %v1803_v44, %v1802_v40 }
 0x104   :  { %v2673_v46 = vadd.f32 %v1801_v39, %v1089_v42  ;;  %v1092_v47 = vadd.f32 %v1740_v43, %v2664_v18 }
 0x106   :  { %v2676_v48 = vadd.f32 %v1804_v45, %v1092_v47  ;;  %v1741_v49 = vpop.f32.mrb[8].mxu0 }
 0x107   :  { %v1805_v50 = vpop.f32.mrb[8].mxu1  ;;  %v1742_v51 = vpop.f32.mrb[9].mxu0 }
 0x108   :  { %v1743_v52 = vadd.f32 %v1742_v51, %v1741_v49  ;;  %v1806_v53 = vpop.f32.mrb[9].mxu1  ;;  %v1744_v54 = vpop.f32.mrb[10].mxu0 }
 0x109   :  { %v1807_v55 = vadd.f32 %v1806_v53, %v1805_v50  ;;  %v1808_v56 = vpop.f32.mrb[10].mxu1  ;;  %v1745_v57 = vpop.f32.mrb[11].mxu0 }
 0x10a   :  { %v1097_v58 = vadd.f32 %v1743_v52, %v2664_v18  ;;  %v1746_v59 = vadd.f32 %v1745_v57, %v1744_v54  ;;  %v1809_v60 = vpop.f32.mrb[11].mxu1 }
 0x10b   :  { %v1810_v61 = vadd.f32 %v1809_v60, %v1808_v56 }
 0x10c   :  { %v2679_v62 = vadd.f32 %v1807_v55, %v1097_v58  ;;  %v1100_v63 = vadd.f32 %v1746_v59, %v2664_v18 }
 0x10e   :  { %v2682_v0 = vadd.f32 %v1810_v61, %v1100_v63  ;;  %v1747_v1 = vpop.f32.mrb[12].mxu0 }
 0x10f   :  { %v1811_v2 = vpop.f32.mrb[12].mxu1  ;;  %v1748_v3 = vpop.f32.mrb[13].mxu0 }
 0x110   :  { %v1749_v4 = vadd.f32 %v1748_v3, %v1747_v1  ;;  %v1812_v5 = vpop.f32.mrb[13].mxu1  ;;  %v1750_v6 = vpop.f32.mrb[14].mxu0 }
 0x111   :  { %v1813_v7 = vadd.f32 %v1812_v5, %v1811_v2  ;;  %v1814_v8 = vpop.f32.mrb[14].mxu1  ;;  %v1751_v9 = vpop.f32.mrb[15].mxu0 }
 0x112   :  { %v1105_v10 = vadd.f32 %v1749_v4, %v2664_v18  ;;  %v1752_v11 = vadd.f32 %v1751_v9, %v1750_v6  ;;  %v1815_v12 = vpop.f32.mrb[15].mxu1 }
 0x113   :  { %v1816_v13 = vadd.f32 %v1815_v12, %v1814_v8 }
 0x114   :  { %v2685_v14 = vadd.f32 %v1813_v7, %v1105_v10  ;;  %v1108_v15 = vadd.f32 %v1752_v11, %v2664_v18 }
 0x116   :  { %v2688_v16 = vadd.f32 %v1816_v13, %v1108_v15  ;;  %v1753_v17 = vpop.f32.mrb[16].mxu0 }
 0x117   :  { %v1817_v19 = vpop.f32.mrb[16].mxu1  ;;  %v1754_v20 = vpop.f32.mrb[17].mxu0 }
 0x118   :  { %v1755_v21 = vadd.f32 %v1754_v20, %v1753_v17  ;;  %v1818_v22 = vpop.f32.mrb[17].mxu1  ;;  %v1756_v23 = vpop.f32.mrb[18].mxu0 }
 0x119   :  { %v1819_v24 = vadd.f32 %v1818_v22, %v1817_v19  ;;  %v1820_v25 = vpop.f32.mrb[18].mxu1  ;;  %v1757_v26 = vpop.f32.mrb[19].mxu0 }
 0x11a   :  { %v1113_v27 = vadd.f32 %v1755_v21, %v2664_v18  ;;  %v1758_v28 = vadd.f32 %v1757_v26, %v1756_v23  ;;  %v1821_v29 = vpop.f32.mrb[19].mxu1 }
 0x11b   :  { %v1822_v31 = vadd.f32 %v1821_v29, %v1820_v25 }
 0x11c   :  { %v2691_v33 = vadd.f32 %v1819_v24, %v1113_v27  ;;  %v1116_v34 = vadd.f32 %v1758_v28, %v2664_v18 }
 0x11e   :  { %v2694_v35 = vadd.f32 %v1822_v31, %v1116_v34  ;;  %v1759_v36 = vpop.f32.mrb[20].mxu0 }
 0x11f   :  { %v1823_v37 = vpop.f32.mrb[20].mxu1  ;;  %v1760_v38 = vpop.f32.mrb[21].mxu0 }
 0x120   :  { %v1761_v39 = vadd.f32 %v1760_v38, %v1759_v36  ;;  %v1824_v40 = vpop.f32.mrb[21].mxu1  ;;  %v1762_v41 = vpop.f32.mrb[22].mxu0 }
 0x121   :  { %v1825_v42 = vadd.f32 %v1824_v40, %v1823_v37  ;;  %v1826_v43 = vpop.f32.mrb[22].mxu1  ;;  %v1763_v44 = vpop.f32.mrb[23].mxu0 }
 0x122   :  { %v1121_v45 = vadd.f32 %v1761_v39, %v2664_v18  ;;  %v1764_v47 = vadd.f32 %v1763_v44, %v1762_v41  ;;  %v1827_v49 = vpop.f32.mrb[23].mxu1 }
 0x123   :  { %v1828_v50 = vadd.f32 %v1827_v49, %v1826_v43 }
 0x124   :  { %v2697_v51 = vadd.f32 %v1825_v42, %v1121_v45  ;;  %v1124_v52 = vadd.f32 %v1764_v47, %v2664_v18 }
 0x126   :  { %v2700_v53 = vadd.f32 %v1828_v50, %v1124_v52  ;;  %v1765_v54 = vpop.f32.mrb[24].mxu0 }
 0x127   :  { %v1829_v55 = vpop.f32.mrb[24].mxu1  ;;  %v1766_v56 = vpop.f32.mrb[25].mxu0 }
 0x128   :  { %v1767_v57 = vadd.f32 %v1766_v56, %v1765_v54  ;;  %v1830_v58 = vpop.f32.mrb[25].mxu1  ;;  %v1768_v59 = vpop.f32.mrb[26].mxu0 }
 0x129   :  { %v1831_v60 = vadd.f32 %v1830_v58, %v1829_v55  ;;  %v1832_v61 = vpop.f32.mrb[26].mxu1  ;;  %v1769_v63 = vpop.f32.mrb[27].mxu0 }
 0x12a   :  { %v1129_v1 = vadd.f32 %v1767_v57, %v2664_v18  ;;  %v1770_v2 = vadd.f32 %v1769_v63, %v1768_v59  ;;  %v1833_v3 = vpop.f32.mrb[27].mxu1 }
 0x12b   :  { %v1834_v4 = vadd.f32 %v1833_v3, %v1832_v61 }
 0x12c   :  { %v2703_v5 = vadd.f32 %v1831_v60, %v1129_v1  ;;  %v1132_v6 = vadd.f32 %v1770_v2, %v2664_v18 }
 0x12e   :  { %v2706_v7 = vadd.f32 %v1834_v4, %v1132_v6  ;;  %v1771_v8 = vpop.f32.mrb[28].mxu0 }
 0x12f   :  { %v1835_v9 = vpop.f32.mrb[28].mxu1  ;;  %v1772_v10 = vpop.f32.mrb[29].mxu0 }
 0x130   :  { %v1773_v11 = vadd.f32 %v1772_v10, %v1771_v8  ;;  %v1836_v12 = vpop.f32.mrb[29].mxu1  ;;  %v1774_v13 = vpop.f32.mrb[30].mxu0 }
 0x131   :  { %v1837_v15 = vadd.f32 %v1836_v12, %v1835_v9  ;;  %v1838_v17 = vpop.f32.mrb[30].mxu1  ;;  %v1775_v19 = vpop.f32.mrb[31].mxu0 }
 0x132   :  { %v1137_v20 = vadd.f32 %v1773_v11, %v2664_v18  ;;  %v1776_v21 = vadd.f32 %v1775_v19, %v1774_v13  ;;  %v1839_v22 = vpop.f32.mrb[31].mxu1 }
 0x133   :  { %v1840_v23 = vadd.f32 %v1839_v22, %v1838_v17 }
 0x134   :  { %v2709_v24 = vadd.f32 %v1837_v15, %v1137_v20  ;;  %v1140_v25 = vadd.f32 %v1776_v21, %v2664_v18 }
 0x136   :  { %v2712_v26 = vadd.f32 %v1840_v23, %v1140_v25  ;;  %v1857_v27 = vpop.f32.mrb[32].mxu0 }
 0x137   :  { %v1921_v28 = vpop.f32.mrb[32].mxu1  ;;  %v1858_v29 = vpop.f32.mrb[33].mxu0 }
 0x138   :  { %v1859_v31 = vadd.f32 %v1858_v29, %v1857_v27  ;;  %v1922_v34 = vpop.f32.mrb[33].mxu1  ;;  %v1860_v36 = vpop.f32.mrb[34].mxu0 }
 0x139   :  { %v1923_v37 = vadd.f32 %v1922_v34, %v1921_v28  ;;  %v1924_v38 = vpop.f32.mrb[34].mxu1  ;;  %v1861_v39 = vpop.f32.mrb[35].mxu0 }
 0x13a   :  { %v1275_v40 = vadd.f32 %v1859_v31, %v2667_v30  ;;  %v1862_v41 = vadd.f32 %v1861_v39, %v1860_v36  ;;  %v1925_v42 = vpop.f32.mrb[35].mxu1 }
 0x13b   :  { %v1926_v43 = vadd.f32 %v1925_v42, %v1924_v38 }
 0x13c   :  { %v1278_v44 = vadd.f32 %v1862_v41, %v2670_v32  ;;  %v2716_v45 = vadd.f32 %v1923_v37, %v1275_v40 }
 0x13e   :  { %v1863_v18 = vpop.f32.mrb[36].mxu0  ;;  %v2718_v47 = vadd.f32 %v1926_v43, %v1278_v44 }
 0x13f   :  { %v1927_v49 = vpop.f32.mrb[36].mxu1  ;;  %v1864_v50 = vpop.f32.mrb[37].mxu0 }
 0x140   :  { %v1865_v52 = vadd.f32 %v1864_v50, %v1863_v18  ;;  %v1928_v54 = vpop.f32.mrb[37].mxu1  ;;  %v1866_v55 = vpop.f32.mrb[38].mxu0 }
 0x141   :  { %v1929_v56 = vadd.f32 %v1928_v54, %v1927_v49  ;;  %v1930_v57 = vpop.f32.mrb[38].mxu1  ;;  %v1867_v58 = vpop.f32.mrb[39].mxu0 }
 0x142   :  { %v1283_v30 = vadd.f32 %v1865_v52, %v2673_v46  ;;  %v1868_v59 = vadd.f32 %v1867_v58, %v1866_v55  ;;  %v1931_v60 = vpop.f32.mrb[39].mxu1 }
 0x143   :  { %v1932_v61 = vadd.f32 %v1931_v60, %v1930_v57 }
 0x144   :  { %v1286_v32 = vadd.f32 %v1868_v59, %v2676_v48  ;;  %v2722_v63 = vadd.f32 %v1929_v56, %v1283_v30 }
 0x146   :  { %v1869_v1 = vpop.f32.mrb[40].mxu0  ;;  %v2724_v2 = vadd.f32 %v1932_v61, %v1286_v32 }
 0x147   :  { %v1933_v3 = vpop.f32.mrb[40].mxu1  ;;  %v1870_v4 = vpop.f32.mrb[41].mxu0 }
 0x148   :  { %v1871_v6 = vadd.f32 %v1870_v4, %v1869_v1  ;;  %v1934_v8 = vpop.f32.mrb[41].mxu1  ;;  %v1872_v9 = vpop.f32.mrb[42].mxu0 }
 0x149   :  { %v1935_v10 = vadd.f32 %v1934_v8, %v1933_v3  ;;  %v1936_v11 = vpop.f32.mrb[42].mxu1  ;;  %v1873_v12 = vpop.f32.mrb[43].mxu0 }
 0x14a   :  { %v1291_v46 = vadd.f32 %v1871_v6, %v2679_v62  ;;  %v1874_v13 = vadd.f32 %v1873_v12, %v1872_v9  ;;  %v1937_v15 = vpop.f32.mrb[43].mxu1 }
 0x14b   :  { %v1938_v17 = vadd.f32 %v1937_v15, %v1936_v11 }
 0x14c   :  { %v1294_v48 = vadd.f32 %v1874_v13, %v2682_v0  ;;  %v2728_v19 = vadd.f32 %v1935_v10, %v1291_v46 }
 0x14e   :  { %v1875_v20 = vpop.f32.mrb[44].mxu0  ;;  %v2730_v21 = vadd.f32 %v1938_v17, %v1294_v48 }
 0x14f   :  { %v1939_v22 = vpop.f32.mrb[44].mxu1  ;;  %v1876_v23 = vpop.f32.mrb[45].mxu0 }
 0x150   :  { %v1877_v25 = vadd.f32 %v1876_v23, %v1875_v20  ;;  %v1940_v27 = vpop.f32.mrb[45].mxu1  ;;  %v1878_v28 = vpop.f32.mrb[46].mxu0 }
 0x151   :  { %v1941_v29 = vadd.f32 %v1940_v27, %v1939_v22  ;;  %v1942_v31 = vpop.f32.mrb[46].mxu1  ;;  %v1879_v34 = vpop.f32.mrb[47].mxu0 }
 0x152   :  { %v1299_v62 = vadd.f32 %v1877_v25, %v2685_v14  ;;  %v1880_v36 = vadd.f32 %v1879_v34, %v1878_v28  ;;  %v1943_v37 = vpop.f32.mrb[47].mxu1 }
 0x153   :  { %v1944_v38 = vadd.f32 %v1943_v37, %v1942_v31 }
 0x154   :  { %v1302_v0 = vadd.f32 %v1880_v36, %v2688_v16  ;;  %v2734_v39 = vadd.f32 %v1941_v29, %v1299_v62 }
 0x156   :  { %v1881_v40 = vpop.f32.mrb[48].mxu0  ;;  %v2736_v41 = vadd.f32 %v1944_v38, %v1302_v0 }
 0x157   :  { %v1945_v42 = vpop.f32.mrb[48].mxu1  ;;  %v1882_v43 = vpop.f32.mrb[49].mxu0 }
 0x158   :  { %v1883_v44 = vadd.f32 %v1882_v43, %v1881_v40  ;;  %v1946_v18 = vpop.f32.mrb[49].mxu1  ;;  %v1884_v49 = vpop.f32.mrb[50].mxu0 }
 0x159   :  { %v1947_v50 = vadd.f32 %v1946_v18, %v1945_v42  ;;  %v1948_v52 = vpop.f32.mrb[50].mxu1  ;;  %v1885_v54 = vpop.f32.mrb[51].mxu0 }
 0x15a   :  { %v1307_v14 = vadd.f32 %v1883_v44, %v2691_v33  ;;  %v1886_v55 = vadd.f32 %v1885_v54, %v1884_v49  ;;  %v1949_v56 = vpop.f32.mrb[51].mxu1 }
 0x15b   :  { %v1950_v57 = vadd.f32 %v1949_v56, %v1948_v52 }
 0x15c   :  { %v1310_v16 = vadd.f32 %v1886_v55, %v2694_v35  ;;  %v1404_v58 = vadd.f32 %v1947_v50, %v1307_v14 }
 0x15e   :  { %v1887_v30 = vpop.f32.mrb[52].mxu0  ;;  %v2740_v59 = vadd.f32 %v1950_v57, %v1310_v16 }
 0x15f   :  { %v1951_v60 = vpop.f32.mrb[52].mxu1  ;;  %v1888_v61 = vpop.f32.mrb[53].mxu0 }
 0x160   :  { %v1889_v32 = vadd.f32 %v1888_v61, %v1887_v30  ;;  %v1952_v1 = vpop.f32.mrb[53].mxu1  ;;  %v1890_v3 = vpop.f32.mrb[54].mxu0 }
 0x161   :  { %v1953_v4 = vadd.f32 %v1952_v1, %v1951_v60  ;;  %v1954_v6 = vpop.f32.mrb[54].mxu1  ;;  %v1891_v8 = vpop.f32.mrb[55].mxu0 }
 0x162   :  { %v1315_v9 = vadd.f32 %v1889_v32, %v2697_v51  ;;  %v1892_v33 = vadd.f32 %v1891_v8, %v1890_v3  ;;  %v1955_v10 = vpop.f32.mrb[55].mxu1 }
 0x163   :  { %v1956_v11 = vadd.f32 %v1955_v10, %v1954_v6 }
 0x164   :  { %v1318_v12 = vadd.f32 %v1892_v33, %v2700_v53  ;;  %v1412_v35 = vadd.f32 %v1953_v4, %v1315_v9 }
 0x166   :  { %v1893_v46 = vpop.f32.mrb[56].mxu0  ;;  %v1415_v13 = vadd.f32 %v1956_v11, %v1318_v12 }
 0x167   :  { %v1957_v15 = vpop.f32.mrb[56].mxu1  ;;  %v1894_v17 = vpop.f32.mrb[57].mxu0 }
 0x168   :  { %v1895_v48 = vadd.f32 %v1894_v17, %v1893_v46  ;;  %v1958_v20 = vpop.f32.mrb[57].mxu1  ;;  %v1896_v22 = vpop.f32.mrb[58].mxu0 }
 0x169   :  { %v1959_v23 = vadd.f32 %v1958_v20, %v1957_v15  ;;  %v1960_v25 = vpop.f32.mrb[58].mxu1  ;;  %v1897_v27 = vpop.f32.mrb[59].mxu0 }
 0x16a   :  { %v1323_v28 = vadd.f32 %v1895_v48, %v2703_v5  ;;  %v1898_v29 = vadd.f32 %v1897_v27, %v1896_v22  ;;  %v1961_v51 = vpop.f32.mrb[59].mxu1 }
 0x16b   :  { %v1962_v31 = vadd.f32 %v1961_v51, %v1960_v25 }
 0x16c   :  { %v1326_v34 = vadd.f32 %v1898_v29, %v2706_v7  ;;  %v1420_v62 = vadd.f32 %v1959_v23, %v1323_v28 }
 0x16e   :  { %v1899_v53 = vpop.f32.mrb[60].mxu0  ;;  %v2746_v36 = vadd.f32 %v1962_v31, %v1326_v34 }
 0x16f   :  { %v1963_v37 = vpop.f32.mrb[60].mxu1  ;;  %v1900_v38 = vpop.f32.mrb[61].mxu0 }
 0x170   :  { %v1901_v0 = vadd.f32 %v1900_v38, %v1899_v53  ;;  %v1964_v40 = vpop.f32.mrb[61].mxu1  ;;  %v1902_v42 = vpop.f32.mrb[62].mxu0 }
 0x171   :  { %v1965_v43 = vadd.f32 %v1964_v40, %v1963_v37  ;;  %v1966_v44 = vpop.f32.mrb[62].mxu1  ;;  %v1903_v18 = vpop.f32.mrb[63].mxu0 }
 0x172   :  { %v1331_v49 = vadd.f32 %v1901_v0, %v2709_v24  ;;  %v1904_v5 = vadd.f32 %v1903_v18, %v1902_v42  ;;  %v1967_v50 = vpop.f32.mrb[63].mxu1 }
 0x173   :  { %v1968_v52 = vadd.f32 %v1967_v50, %v1966_v44 }
 0x174   :  { %v1334_v54 = vadd.f32 %v1904_v5, %v2712_v26  ;;  %v1428_v7 = vadd.f32 %v1965_v43, %v1331_v49 }
 0x176   :  { %v2003_v14 = vpop.f32.mrb[64].mxu0  ;;  %v1431_v55 = vadd.f32 %v1968_v52, %v1334_v54 }
 0x177   :  { %v1477_v56 = vadd.f32 %v2003_v14, %v2722_v63  ;;  %v2011_v57 = vpop.f32.mrb[64].mxu1  ;;  %v1468_v16 = vpop.f32.mrb[65].mxu0 }
 0x178   :  { %v1509_v30 = vadd.f32 %v2011_v57, %v1412_v35  ;;  %v1469_v60 = vadd.f32 %v1468_v16, %v2716_v45  ;;  %v1500_v61 = vpop.f32.mrb[65].mxu1  ;;  %v2004_v32 = vpop.f32.mrb[66].mxu0 }
 0x179   :  { %v1533_v1 = vmax.f32 %v1477_v56, 0.0  ;;  %v1501_v24 = vadd.f32 %v1500_v61, %v1404_v58  ;;  %v1480_v3 = vadd.f32 %v2004_v32, %v2724_v2  ;;  %v2012_v4 = vpop.f32.mrb[66].mxu1  ;;  %v1471_v6 = vpop.f32.mrb[67].mxu0 }
 0x17a   :  { %v1541_v26 = vmax.f32 %v1509_v30, 0.0  ;;  %v1531_v8 = vmax.f32 %v1469_v60, 0.0  ;;  %v1512_v9 = vadd.f32 %v2012_v4, %v1415_v13  ;;  %v1472_v33 = vadd.f32 %v1471_v6, %v2718_v47  ;;  %v1503_v63 = vpop.f32.mrb[67].mxu1 }
 0x17b   :  { %1550 = vst.msk [vmem:[%s2827_s3 + $0x10] sm:$0xff] %vm1547_vm0, %v1533_v1  ;;  %v1539_v45 = vmax.f32 %v1501_v24, 0.0  ;;  %v1534_v10 = vmax.f32 %v1480_v3, 0.0  ;;  %v1504_v11 = vadd.f32 %v1503_v63, %v2740_v59 }
 0x17c   :  { %1558 = vst.msk [vmem:[%s2827_s3 + $0x50] sm:$0xff] %vm1547_vm0, %v1541_v26  ;;  %1548 = vst.msk [vmem:[%s2827_s3] sm:$0xff] %vm1547_vm0, %v1531_v8  ;;  %v1542_v47 = vmax.f32 %v1512_v9, 0.0  ;;  %v1532_v2 = vmax.f32 %v1472_v33, 0.0 }
 0x17d   :  { %1556 = vst.msk [vmem:[%s2827_s3 + $0x40] sm:$0xff] %vm1547_vm0, %v1539_v45  ;;  %1551 = vst.msk [vmem:[%s2827_s3 + $0x18] sm:$0xff] %vm1547_vm0, %v1534_v10  ;;  %v1540_v58 = vmax.f32 %v1504_v11, 0.0 }
 0x17e   :  { %1559 = vst.msk [vmem:[%s2827_s3 + $0x58] sm:$0xff] %vm1547_vm0, %v1542_v47  ;;  %1549 = vst.msk [vmem:[%s2827_s3 + $0x8] sm:$0xff] %vm1547_vm0, %v1532_v2  ;;  %v2007_v59 = vpop.f32.mrb[68].mxu0 }
 0x17f   :  { %1557 = vst.msk [vmem:[%s2827_s3 + $0x48] sm:$0xff] %vm1547_vm0, %v1540_v58  ;;  %v1493_v12 = vadd.f32 %v2007_v59, %v2734_v39  ;;  %v2015_v35 = vpop.f32.mrb[68].mxu1  ;;  %v1484_v46 = vpop.f32.mrb[69].mxu0 }
 0x180   :  { %v1525_v13 = vadd.f32 %v2015_v35, %v1428_v7  ;;  %v1485_v15 = vadd.f32 %v1484_v46, %v2728_v19  ;;  %v1516_v17 = vpop.f32.mrb[69].mxu1  ;;  %v2008_v48 = vpop.f32.mrb[70].mxu0 }
 0x181   :  { %v1537_v20 = vmax.f32 %v1493_v12, 0.0  ;;  %v1517_v22 = vadd.f32 %v1516_v17, %v1420_v62  ;;  %v1496_v23 = vadd.f32 %v2008_v48, %v2736_v41  ;;  %v2016_v25 = vpop.f32.mrb[70].mxu1  ;;  %v1487_v27 = vpop.f32.mrb[71].mxu0 }
 0x182   :  { %v1545_v28 = vmax.f32 %v1525_v13, 0.0  ;;  %v1535_v29 = vmax.f32 %v1485_v15, 0.0  ;;  %v1528_v51 = vadd.f32 %v2016_v25, %v1431_v55  ;;  %v1488_v31 = vadd.f32 %v1487_v27, %v2730_v21  ;;  %v1519_v34 = vpop.f32.mrb[71].mxu1 }
 0x183   :  { %1554 = vst.msk [vmem:[%s2827_s3 + $0x30] sm:$0xff] %vm1547_vm0, %v1537_v20  ;;  %v1543_v19 = vmax.f32 %v1517_v22, 0.0  ;;  %v1538_v39 = vmax.f32 %v1496_v23, 0.0  ;;  %v1520_v53 = vadd.f32 %v1519_v34, %v2746_v36 }
 0x184   :  { %1562 = vst.msk [vmem:[%s2827_s3 + $0x70] sm:$0xff] %vm1547_vm0, %v1545_v28  ;;  %1552 = vst.msk [vmem:[%s2827_s3 + $0x20] sm:$0xff] %vm1547_vm0, %v1535_v29  ;;  %v1546_v21 = vmax.f32 %v1528_v51, 0.0  ;;  %v1536_v41 = vmax.f32 %v1488_v31, 0.0 }
 0x185   :  { %1560 = vst.msk [vmem:[%s2827_s3 + $0x60] sm:$0xff] %vm1547_vm0, %v1543_v19  ;;  %1555 = vst.msk [vmem:[%s2827_s3 + $0x38] sm:$0xff] %vm1547_vm0, %v1538_v39  ;;  %v1544_v62 = vmax.f32 %v1520_v53, 0.0 }
 0x186   :  { %1563 = vst.msk [vmem:[%s2827_s3 + $0x78] sm:$0xff] %vm1547_vm0, %v1546_v21  ;;  %1553 = vst.msk [vmem:[%s2827_s3 + $0x28] sm:$0xff] %vm1547_vm0, %v1536_v41 }
 0x187   :  { %1561 = vst.msk [vmem:[%s2827_s3 + $0x68] sm:$0xff] %vm1547_vm0, %v1544_v62 }

// kernel: transform_forward.36
= control target key start
LH: loop header
LB: loop body
LE: loop exit
PB: predicated region body
PF: predicated region fallthrough
CT: control target
= control target key end

     0   :  { %s2251_s12 = smov 0   ;;  %s2692_s0 = inlined_call_operand.vmem [shape: bf16[512,576], index: 0, kind: input, shape index: {}]   ;;  %s2693_s1 = inlined_call_operand.vmem [shape: bf16[576,32], index: 1, kind: input, shape index: {}]   ;;  %s2694_s2 = inlined_call_operand.vmem [shape: f32[1,32], index: 2, kind: input, shape index: {}]   ;;  %s2695_s3 = inlined_call_operand.vmem [shape: f32[512,32], index: 3, kind: output, shape index: {}]  }
   0x1 LB: > { %s1622_s13 = sadd.s32 4294967295, %s2229_s12   ;;  %p1626_p0 = scmp.ge.s32.totalorder %s2229_s12, 1  ;;  %s2229_s12 = sphi %s2251_s12, %s13_s12  }
   0x2   : > { %p139_p1 = scmp.lt.s32.totalorder %s2229_s12, 3 }
   0x4   : > { %p140_p2 = pnand %p1626_p0, %p139_p1 }
   0x5   : > { %v2075_v0 = vld [vmem:[%s2693_s1 + $0x40] sm:$0xff] (!%p140_p2)   ;;  %s1627_s16 = sshll.u32 (!%p140_p2), %s1622_s13, 5  ;;  %v2077_v2 = vld [vmem:[%s2693_s1 + $0x48] sm:$0xff] (!%p140_p2)   ;;  %v2079_v4 = vld [vmem:[%s2693_s1 + $0x50] sm:$0xff] (!%p140_p2)   ;;  %vm969_vm0 = vcmask (!%p140_p2), 523264   ;;  %vm1533_vm1 = vcmask (!%p140_p2), 261120  }
   0x6   : > { %143 = sbr.rel (%p140_p2) target bundleno = 414 (0x19e), region = 32  ;;  %v2076_v1 = vld [vmem:[%s2693_s1] sm:$0xff] (!%p140_p2)   ;;  %1766 = vmatprep.subr.bf16.mxu0 (!%p140_p2), %v2075_v0  ;;  %2050 = vmatprep.subr.bf16.mxu1 (!%p140_p2), %v2075_v0  ;;  %p165_p3 = scmp.lt.s32.totalorder (!%p140_p2), %s1627_s16, 63  ;;  %v2078_v3 = vld [vmem:[%s2693_s1 + $0x8] sm:$0xff] (!%p140_p2)   ;;  %v2080_v5 = vld [vmem:[%s2693_s1 + $0x10] sm:$0xff] (!%p140_p2)  }
   0x7   : > { %1767 = vmatpush3.bf16.msra.mxu0 (!%p140_p2), %v2076_v1  ;;  %2058 = vmatpush3.bf16.msra.mxu1 (!%p140_p2), %v2076_v1  ;;  %v2081_v6 = vld [vmem:[%s2693_s1 + $0x58] sm:$0xff] (!%p140_p2)   ;;  %v2083_v8 = vld [vmem:[%s2693_s1 + $0x60] sm:$0xff] (!%p140_p2)   ;;  %v2085_v10 = vld [vmem:[%s2693_s1 + $0x68] sm:$0xff] (!%p140_p2)  }
   0x8   : > { %1768 = vmatprep.subr.bf16.mxu0 (!%p140_p2), %v2077_v2  ;;  %2051 = vmatprep.subr.bf16.mxu1 (!%p140_p2), %v2077_v2  ;;  %v2082_v7 = vld [vmem:[%s2693_s1 + $0x18] sm:$0xff] (!%p140_p2)   ;;  %v2084_v9 = vld [vmem:[%s2693_s1 + $0x20] sm:$0xff] (!%p140_p2)   ;;  %v2086_v13 = vld [vmem:[%s2693_s1 + $0x28] sm:$0xff] (!%p140_p2)  }
   0x9   : > { %v2087_v14 = vld [vmem:[%s2693_s1 + $0x70] sm:$0xff] (!%p140_p2)   ;;  %v2089_v16 = vld [vmem:[%s2693_s1 + $0x78] sm:$0xff] (!%p140_p2)   ;;  %v2097_v18 = vld [vmem:[%s2693_s1 + $0xc0] sm:$0xff] (!%p140_p2)  }
   0xa   : > { %v2088_v15 = vld [vmem:[%s2693_s1 + $0x30] sm:$0xff] (!%p140_p2)   ;;  %v2090_v17 = vld [vmem:[%s2693_s1 + $0x38] sm:$0xff] (!%p140_p2)   ;;  %v2100_v19 = vld [vmem:[%s2693_s1 + $0x100] sm:$0xff] (!%p140_p2)  }
   0xb   : > { %1769 = vmatpush3.bf16.msra.mxu0 (!%p140_p2), %v2078_v3  ;;  %2059 = vmatpush3.bf16.msra.mxu1 (!%p140_p2), %v2078_v3  ;;  %v2098_v22 = vld [vmem:[%s2693_s1 + $0x80] sm:$0xff] (!%p140_p2)   ;;  %v2099_v23 = vld [vmem:[%s2693_s1 + $0xc8] sm:$0xff] (!%p140_p2)   ;;  %v2108_v28 = vld [vmem:[%s2693_s1 + $0xd0] sm:$0xff] (!%p140_p2)  }
   0xc   : > { %1770 = vmatprep.subr.bf16.mxu0 (!%p140_p2), %v2079_v4  ;;  %2052 = vmatprep.subr.bf16.mxu1 (!%p140_p2), %v2079_v4  ;;  %v2101_v26 = vld [vmem:[%s2693_s1 + $0x88] sm:$0xff] (!%p140_p2)   ;;  %v2109_v30 = vld [vmem:[%s2693_s1 + $0x90] sm:$0xff] (!%p140_p2)   ;;  %v2110_v31 = vld [vmem:[%s2693_s1 + $0xd8] sm:$0xff] (!%p140_p2)  }
   0xd   : > { %s2697_s16 = smov (!%p165_p3, %s1627_s16), 63  ;;  %v2111_v34 = vld [vmem:[%s2693_s1 + $0x98] sm:$0xff]   ;;  %v2131_v35 = vld [vmem:[%s2693_s1 + $0x108] sm:$0xff]   ;;  %v2118_v37 = vld [vmem:[%s2693_s1 + $0xe0] sm:$0xff]  }
   0xe   : > { %s2066_s29 = smul.u32 20, %s2697_s16  ;;  %v2119_v39 = vld [vmem:[%s2693_s1 + $0xa0] sm:$0xff]   ;;  %v2120_v40 = vld [vmem:[%s2693_s1 + $0xe8] sm:$0xff]   ;;  %v2128_v46 = vld [vmem:[%s2693_s1 + $0xf0] sm:$0xff]   ;;  %s1630_s19 = sshll.u32 %s2697_s16, 3 }
   0xf   : > { %1771 = vmatpush3.bf16.msra.mxu0 %v2080_v5  ;;  %2060 = vmatpush3.bf16.msra.mxu1 %v2080_v5  ;;  %v2121_v43 = vld [vmem:[%s2693_s1 + $0xa8] sm:$0xff]   ;;  %v2151_v47 = vld [vmem:[%s2693_s1 + $0x110] sm:$0xff]   ;;  %v2130_v49 = vld [vmem:[%s2693_s1 + $0xf8] sm:$0xff]   ;;  %s2563_s22 = scalar_lea.vmem %s2695_s3, %s1630_s19 }
  0x10   : > { %1772 = vmatprep.subr.bf16.mxu0 %v2081_v6  ;;  %2053 = vmatprep.subr.bf16.mxu1 %v2081_v6  ;;  %s2292_s9 = scalar_lea.vmem %s2692_s0, %s2066_s29  ;;  %v2129_v48 = vld [vmem:[%s2693_s1 + $0xb0] sm:$0xff]   ;;  %v2132_v52 = vld [vmem:[%s2693_s1 + $0xb8] sm:$0xff]  }
  0x11   : > { %v2093_v11 = vld [vmem:[%s2292_s9 + $0x4] ss:$20 sps:$4 sm:$0xff]   ;;  %v2091_v20 = vld [vmem:[%s2292_s9] ss:$20 sps:$4 sm:$0xff]   ;;  %v2106_v27 = vld [vmem:[%s2292_s9 + $0x28] ss:$20 sps:$4 sm:$0xff]  }
  0x12   : > { %v2096_v12 = vld [vmem:[%s2292_s9 + $0x1e4] ss:$20 sps:$4 sm:$0xff]   ;;  %1050 = vmatprep.mubr.bf16.mxu0 %v2093_v11  ;;  %v2094_v21 = vld [vmem:[%s2292_s9 + $0x1e0] ss:$20 sps:$4 sm:$0xff]   ;;  %v2107_v29 = vld [vmem:[%s2292_s9 + $0x208] ss:$20 sps:$4 sm:$0xff]  }
  0x13   : > { %1773 = vmatpush3.bf16.msra.mxu0 %v2082_v7  ;;  %2061 = vmatpush3.bf16.msra.mxu1 %v2082_v7  ;;  %v2102_v24 = vld [vmem:[%s2292_s9 + $0x2c] ss:$20 sps:$4 sm:$0xff]   ;;  %v2112_v32 = vld [vmem:[%s2292_s9 + $0x54] ss:$20 sps:$4 sm:$0xff]   ;;  %v2116_v36 = vld [vmem:[%s2292_s9 + $0x50] ss:$20 sps:$4 sm:$0xff]  }
  0x14   : > { %1774 = vmatprep.subr.bf16.mxu0 %v2083_v8  ;;  %2054 = vmatprep.subr.bf16.mxu1 %v2083_v8  ;;  %v2104_v25 = vld [vmem:[%s2292_s9 + $0x20c] ss:$20 sps:$4 sm:$0xff]   ;;  %v2114_v33 = vld [vmem:[%s2292_s9 + $0x234] ss:$20 sps:$4 sm:$0xff]   ;;  %v2117_v38 = vld [vmem:[%s2292_s9 + $0x230] ss:$20 sps:$4 sm:$0xff]  }
  0x15   : > { %1146 = vmatprep.mubr.bf16.mxu1 %v2096_v12  ;;  %v2122_v41 = vld [vmem:[%s2292_s9 + $0x7c] ss:$20 sps:$4 sm:$0xff]   ;;  %v2126_v44 = vld [vmem:[%s2292_s9 + $0x78] ss:$20 sps:$4 sm:$0xff]   ;;  %v2138_v54 = vld [vmem:[%s2292_s9 + $0xa0] ss:$20 sps:$4 sm:$0xff]  }
  0x16   : > { %v2124_v42 = vld [vmem:[%s2292_s9 + $0x25c] ss:$20 sps:$4 sm:$0xff]   ;;  %v2127_v45 = vld [vmem:[%s2292_s9 + $0x258] ss:$20 sps:$4 sm:$0xff]   ;;  %v2141_v57 = vld [vmem:[%s2292_s9 + $0x34] ss:$20 sps:$4 sm:$0xff]  }
  0x17   : > { %1775 = vmatpush3.bf16.msra.mxu0 %v2084_v9  ;;  %2062 = vmatpush3.bf16.msra.mxu1 %v2084_v9  ;;  %v2133_v50 = vld [vmem:[%s2292_s9 + $0xa4] ss:$20 sps:$4 sm:$0xff]   ;;  %v2137_v51 = vld [vmem:[%s2292_s9 + $0xc] ss:$20 sps:$4 sm:$0xff]   ;;  %v2135_v53 = vld [vmem:[%s2292_s9 + $0x8] ss:$20 sps:$4 sm:$0xff]  }
  0x18   : > { %1776 = vmatprep.subr.bf16.mxu0 %v2085_v10  ;;  %2055 = vmatprep.subr.bf16.mxu1 %v2085_v10  ;;  %v2139_v55 = vld [vmem:[%s2292_s9 + $0xcc] ss:$20 sps:$4 sm:$0xff]   ;;  %v2170_v56 = vld [vmem:[%s2693_s1 + $0x118] sm:$0xff]   ;;  %v2144_v59 = vld [vmem:[%s2292_s9 + $0x30] ss:$20 sps:$4 sm:$0xff]  }
  0x19   : > { %v2143_v58 = vld [vmem:[%s2292_s9 + $0xc8] ss:$20 sps:$4 sm:$0xff]   ;;  %v2149_v62 = vld [vmem:[%s2292_s9 + $0xf0] ss:$20 sps:$4 sm:$0xff]   ;;  %v2150_v63 = vld [vmem:[%s2292_s9 + $0x58] ss:$20 sps:$4 sm:$0xff]  }
  0x1a   : > { %v2145_v60 = vld [vmem:[%s2292_s9 + $0xf4] ss:$20 sps:$4 sm:$0xff]   ;;  %v2147_v61 = vld [vmem:[%s2292_s9 + $0x5c] ss:$20 sps:$4 sm:$0xff]   ;;  %v2154_v1 = vld [vmem:[%s2292_s9 + $0x84] ss:$20 sps:$4 sm:$0xff]  }
  0x1b   : > { %1777 = vmatpush3.bf16.msra.mxu0 %v2086_v13  ;;  %2063 = vmatpush3.bf16.msra.mxu1 %v2086_v13  ;;  %v2152_v0 = vld [vmem:[%s2292_s9 + $0x11c] ss:$20 sps:$4 sm:$0xff]   ;;  %v2156_v2 = vld [vmem:[%s2292_s9 + $0x118] ss:$20 sps:$4 sm:$0xff]   ;;  %v2157_v3 = vld [vmem:[%s2292_s9 + $0x80] ss:$20 sps:$4 sm:$0xff]  }
  0x1c   : > { %1778 = vmatprep.subr.bf16.mxu0 %v2087_v14  ;;  %2056 = vmatprep.subr.bf16.mxu1 %v2087_v14  ;;  %v2158_v4 = vld [vmem:[%s2292_s9 + $0x144] ss:$20 sps:$4 sm:$0xff]   ;;  %v2160_v5 = vld [vmem:[%s2292_s9 + $0xac] ss:$20 sps:$4 sm:$0xff]   ;;  %v2163_v7 = vld [vmem:[%s2292_s9 + $0xa8] ss:$20 sps:$4 sm:$0xff]  }
  0x1d   : > { %v2162_v6 = vld [vmem:[%s2292_s9 + $0x140] ss:$20 sps:$4 sm:$0xff]   ;;  %v2168_v10 = vld [vmem:[%s2292_s9 + $0x168] ss:$20 sps:$4 sm:$0xff]   ;;  %v2169_v11 = vld [vmem:[%s2292_s9 + $0xd0] ss:$20 sps:$4 sm:$0xff]  }
  0x1e   : > { %v2164_v8 = vld [vmem:[%s2292_s9 + $0x16c] ss:$20 sps:$4 sm:$0xff]   ;;  %v2166_v9 = vld [vmem:[%s2292_s9 + $0xd4] ss:$20 sps:$4 sm:$0xff]   ;;  %v2173_v13 = vld [vmem:[%s2292_s9 + $0xfc] ss:$20 sps:$4 sm:$0xff]  }
  0x1f   : > { %1779 = vmatpush3.bf16.msra.mxu0 %v2088_v15  ;;  %2064 = vmatpush3.bf16.msra.mxu1 %v2088_v15  ;;  %v2171_v12 = vld [vmem:[%s2292_s9 + $0x194] ss:$20 sps:$4 sm:$0xff]   ;;  %v2175_v14 = vld [vmem:[%s2292_s9 + $0x190] ss:$20 sps:$4 sm:$0xff]   ;;  %v2176_v15 = vld [vmem:[%s2292_s9 + $0xf8] ss:$20 sps:$4 sm:$0xff]  }
  0x20   : > { %1780 = vmatprep.subr.bf16.mxu0 %v2089_v16  ;;  %2057 = vmatprep.subr.bf16.mxu1 %v2089_v16  ;;  %v2177_v16 = vld [vmem:[%s2292_s9 + $0x1bc] ss:$20 sps:$4 sm:$0xff]  }
  0x23   : > { %1781 = vmatpush3.bf16.msra.mxu0 %v2090_v17  ;;  %2065 = vmatpush3.bf16.msra.mxu1 %v2090_v17  ;;  %v2179_v17 = vld [vmem:[%s2292_s9 + $0x124] ss:$20 sps:$4 sm:$0xff]  }
  0x24   : > { %1878 = vmatprep.subr.bf16.mxu1 %v2097_v18  ;;  %2010 = vmatprep.subr.bf16.mxu0 %v2100_v19  ;;  %v2181_v18 = vld [vmem:[%s2292_s9 + $0x1b8] ss:$20 sps:$4 sm:$0xff]  }
  0x26   : > { %1051 = vmatmul.mubr.bf16.vlgmr.msra.gmra.mrb[0].mxu0 %v2091_v20  ;;  %1147 = vmatmul.mubr.bf16.vlgmr.msra.gmra.mrb[0].mxu1 %v2094_v21  ;;  %v2183_v20 = vld [vmem:[%s2292_s9 + $0x14c] ss:$20 sps:$4 sm:$0xff]   ;;  %v2185_v21 = vld [vmem:[%s2292_s9 + $0x10] ss:$20 sps:$4 sm:$0xff]  }
  0x27   : > { %1879 = vmatpush3.bf16.msra.mxu1 %v2098_v22  ;;  %2011 = vmatpush3.bf16.msra.mxu0 %v2100_v19  ;;  %v2182_v19 = vld [vmem:[%s2292_s9 + $0x120] ss:$20 sps:$4 sm:$0xff]   ;;  %v2186_v22 = vld [vmem:[%s2292_s9 + $0x148] ss:$20 sps:$4 sm:$0xff]  }
  0x28   : > { %1880 = vmatprep.subr.bf16.mxu1 %v2099_v23  ;;  %1058 = vmatprep.mubr.bf16.mxu0 %v2102_v24  ;;  %v2187_v23 = vld [vmem:[%s2292_s9 + $0x38] ss:$20 sps:$4 sm:$0xff]   ;;  %v2188_v24 = vld [vmem:[%s2292_s9 + $0x174] ss:$20 sps:$4 sm:$0xff]  }
  0x29   : > { %1154 = vmatprep.mubr.bf16.mxu1 %v2104_v25  ;;  %2012 = vmatprep.subr.bf16.mxu0 %v2131_v35  ;;  %v2190_v25 = vld [vmem:[%s2292_s9 + $0x60] ss:$20 sps:$4 sm:$0xff]  }
  0x2b   : > { %1881 = vmatpush3.bf16.msra.mxu1 %v2101_v26  ;;  %2013 = vmatpush3.bf16.msra.mxu0 %v2131_v35  ;;  %v2191_v26 = vld [vmem:[%s2292_s9 + $0x170] ss:$20 sps:$4 sm:$0xff]   ;;  %v2202_v35 = vld [vmem:[%s2292_s9 + $0x128] ss:$20 sps:$4 sm:$0xff]  }
  0x2c   : > { %1882 = vmatprep.subr.bf16.mxu1 %v2108_v28  ;;  %2014 = vmatprep.subr.bf16.mxu0 %v2151_v47  ;;  %v2193_v28 = vld [vmem:[%s2292_s9 + $0x19c] ss:$20 sps:$4 sm:$0xff]  }
  0x2e   : > { %1059 = vmatmul.mubr.bf16.gmra.mrb[4].mxu0 %v2106_v27  ;;  %1155 = vmatmul.mubr.bf16.gmra.mrb[4].mxu1 %v2107_v29  ;;  %v2192_v27 = vld [vmem:[%s2292_s9 + $0x88] ss:$20 sps:$4 sm:$0xff]   ;;  %v2195_v29 = vld [vmem:[%s2292_s9 + $0xb0] ss:$20 sps:$4 sm:$0xff]  }
  0x2f   : > { %1883 = vmatpush3.bf16.msra.mxu1 %v2109_v30  ;;  %1066 = vmatprep.mubr.bf16.mxu0 %v2112_v32  ;;  %v2196_v30 = vld [vmem:[%s2292_s9 + $0x198] ss:$20 sps:$4 sm:$0xff]  }
  0x30   : > { %1884 = vmatprep.subr.bf16.mxu1 %v2110_v31  ;;  %1162 = vmatprep.mubr.bf16.mxu1 %v2114_v33  ;;  %v2197_v31 = vld [vmem:[%s2292_s9 + $0xd8] ss:$20 sps:$4 sm:$0xff]   ;;  %v2200_v33 = vld [vmem:[%s2292_s9 + $0x100] ss:$20 sps:$4 sm:$0xff]  }
  0x31   : > { %2015 = vmatpush3.bf16.msra.mxu0 %v2151_v47  ;;  %v2198_v32 = vld [vmem:[%s2292_s9 + $0x1c4] ss:$20 sps:$4 sm:$0xff]  }
  0x32   : > { %2016 = vmatprep.subr.bf16.mxu0 %v2170_v56  ;;  %v2217_v47 = vld [vmem:[%s2292_s9 + $0x218] ss:$20 sps:$4 sm:$0xff]  }
  0x33   : > { %1885 = vmatpush3.bf16.msra.mxu1 %v2111_v34  ;;  %v2201_v34 = vld [vmem:[%s2292_s9 + $0x1c0] ss:$20 sps:$4 sm:$0xff]  }
  0x34   : > { %1886 = vmatprep.subr.bf16.mxu1 %v2118_v37  ;;  %v2205_v37 = vld [vmem:[%s2292_s9 + $0x150] ss:$20 sps:$4 sm:$0xff]  }
  0x35   : > { %2017 = vmatpush3.bf16.msra.mxu0 %v2170_v56 }
  0x36   : > { %1067 = vmatmul.mubr.bf16.gmra.mrb[8].mxu0 %v2116_v36  ;;  %1163 = vmatmul.mubr.bf16.gmra.mrb[8].mxu1 %v2117_v38  ;;  %v2203_v36 = vld [vmem:[%s2292_s9 + $0x1ec] ss:$20 sps:$4 sm:$0xff]   ;;  %v2206_v38 = vld [vmem:[%s2292_s9 + $0x1e8] ss:$20 sps:$4 sm:$0xff]  }
  0x37   : > { %1887 = vmatpush3.bf16.msra.mxu1 %v2119_v39  ;;  %1074 = vmatprep.mubr.bf16.mxu0 %v2122_v41  ;;  %v2207_v39 = vld [vmem:[%s2292_s9 + $0x178] ss:$20 sps:$4 sm:$0xff]   ;;  %v2210_v41 = vld [vmem:[%s2292_s9 + $0x1a0] ss:$20 sps:$4 sm:$0xff]  }
  0x38   : > { %1888 = vmatprep.subr.bf16.mxu1 %v2120_v40  ;;  %1170 = vmatprep.mubr.bf16.mxu1 %v2124_v42  ;;  %v2208_v40 = vld [vmem:[%s2292_s9 + $0x214] ss:$20 sps:$4 sm:$0xff]   ;;  %v2211_v42 = vld [vmem:[%s2292_s9 + $0x210] ss:$20 sps:$4 sm:$0xff]  }
  0x3b   : > { %1889 = vmatpush3.bf16.msra.mxu1 %v2121_v43  ;;  %v2212_v43 = vld [vmem:[%s2292_s9 + $0x1c8] ss:$20 sps:$4 sm:$0xff]  }
  0x3c   : > { %1890 = vmatprep.subr.bf16.mxu1 %v2128_v46  ;;  %v2216_v46 = vld [vmem:[%s2292_s9 + $0x238] ss:$20 sps:$4 sm:$0xff]  }
  0x3e   : > { %1075 = vmatmul.mubr.bf16.gmra.mrb[12].mxu0 %v2126_v44  ;;  %1171 = vmatmul.mubr.bf16.gmra.mrb[12].mxu1 %v2127_v45  ;;  %v2213_v44 = vld [vmem:[%s2292_s9 + $0x23c] ss:$20 sps:$4 sm:$0xff]  }
  0x3f   : > { %1891 = vmatpush3.bf16.msra.mxu1 %v2129_v48  ;;  %1082 = vmatprep.mubr.bf16.mxu0 %v2133_v50  ;;  %v2215_v45 = vld [vmem:[%s2292_s9 + $0x1f0] ss:$20 sps:$4 sm:$0xff]   ;;  %v2221_v50 = vld [vmem:[%s2292_s9 + $0x260] ss:$20 sps:$4 sm:$0xff]  }
  0x40   : > { %1892 = vmatprep.subr.bf16.mxu1 %v2130_v49  ;;  %1211 = vmatprep.mubr.bf16.mxu1 %v2137_v51  ;;  %v2218_v48 = vld [vmem:[%s2292_s9 + $0x264] ss:$20 sps:$4 sm:$0xff]   ;;  %v2220_v49 = vld [vmem:[%s2292_s9 + $0x240] ss:$20 sps:$4 sm:$0xff]   ;;  %v2222_v51 = vld [vmem:[%s2292_s9 + $0x268] ss:$20 sps:$4 sm:$0xff]  }
  0x43   : > { %1893 = vmatpush3.bf16.msra.mxu1 %v2132_v52 }
  0x46   : > { %1083 = vmatmul.mubr.bf16.gmra.mrb[16].mxu0 %v2138_v54  ;;  %1212 = vmatmul.mubr.bf16.vlgmr.msra.gmra.mrb[16].mxu1 %v2135_v53 }
  0x47   : > { %1090 = vmatprep.mubr.bf16.mxu0 %v2139_v55  ;;  %1219 = vmatprep.mubr.bf16.mxu1 %v2141_v57 }
  0x4e   : > { %1091 = vmatmul.mubr.bf16.gmra.mrb[20].mxu0 %v2143_v58  ;;  %1220 = vmatmul.mubr.bf16.gmra.mrb[20].mxu1 %v2144_v59 }
  0x4f   : > { %1098 = vmatprep.mubr.bf16.mxu0 %v2145_v60  ;;  %1227 = vmatprep.mubr.bf16.mxu1 %v2147_v61 }
  0x56   : > { %1099 = vmatmul.mubr.bf16.gmra.mrb[24].mxu0 %v2149_v62  ;;  %1228 = vmatmul.mubr.bf16.gmra.mrb[24].mxu1 %v2150_v63 }
  0x57   : > { %1106 = vmatprep.mubr.bf16.mxu0 %v2152_v0  ;;  %1235 = vmatprep.mubr.bf16.mxu1 %v2154_v1 }
  0x5e   : > { %1107 = vmatmul.mubr.bf16.gmra.mrb[28].mxu0 %v2156_v2  ;;  %1236 = vmatmul.mubr.bf16.gmra.mrb[28].mxu1 %v2157_v3 }
  0x5f   : > { %1114 = vmatprep.mubr.bf16.mxu0 %v2158_v4  ;;  %1243 = vmatprep.mubr.bf16.mxu1 %v2160_v5 }
  0x66   : > { %1115 = vmatmul.mubr.bf16.gmra.mrb[32].mxu0 %v2162_v6  ;;  %1244 = vmatmul.mubr.bf16.gmra.mrb[32].mxu1 %v2163_v7 }
  0x67   : > { %1122 = vmatprep.mubr.bf16.mxu0 %v2164_v8  ;;  %1251 = vmatprep.mubr.bf16.mxu1 %v2166_v9 }
  0x6e   : > { %1123 = vmatmul.mubr.bf16.gmra.mrb[36].mxu0 %v2168_v10  ;;  %1252 = vmatmul.mubr.bf16.gmra.mrb[36].mxu1 %v2169_v11 }
  0x6f   : > { %1130 = vmatprep.mubr.bf16.mxu0 %v2171_v12  ;;  %1259 = vmatprep.mubr.bf16.mxu1 %v2173_v13 }
  0x76   : > { %1131 = vmatmul.mubr.bf16.gmra.mrb[40].mxu0 %v2175_v14  ;;  %1260 = vmatmul.mubr.bf16.gmra.mrb[40].mxu1 %v2176_v15 }
  0x77   : > { %1138 = vmatprep.mubr.bf16.mxu0 %v2177_v16  ;;  %1267 = vmatprep.mubr.bf16.mxu1 %v2179_v17 }
  0x7e   : > { %1139 = vmatmul.mubr.bf16.gmra.mrb[44].mxu0 %v2181_v18  ;;  %1268 = vmatmul.mubr.bf16.gmra.mrb[44].mxu1 %v2182_v19 }
  0x7f   : > { %1275 = vmatprep.mubr.bf16.mxu1 %v2183_v20  ;;  %2018 = vmatprep.mubr.msk.bf16.mxu0 %vm969_vm0, %v2185_v21 }
  0x86   : > { %1276 = vmatmul.mubr.bf16.gmra.mrb[48].mxu1 %v2186_v22  ;;  %2019 = vmatmul.mubr.msk.bf16.vlgmr.msra.gmra.mrb[48].mxu0 %vm969_vm0, %v2187_v23 }
  0x87   : > { %1283 = vmatprep.mubr.bf16.mxu1 %v2188_v24  ;;  %2022 = vmatprep.mubr.msk.bf16.mxu0 %vm969_vm0, %v2190_v25 }
  0x8e   : > { %1284 = vmatmul.mubr.bf16.gmra.mrb[52].mxu1 %v2191_v26  ;;  %2023 = vmatmul.mubr.msk.bf16.gmra.mrb[52].mxu0 %vm969_vm0, %v2192_v27 }
  0x8f   : > { %1291 = vmatprep.mubr.bf16.mxu1 %v2193_v28  ;;  %2026 = vmatprep.mubr.msk.bf16.mxu0 %vm969_vm0, %v2195_v29 }
  0x96   : > { %1292 = vmatmul.mubr.bf16.gmra.mrb[56].mxu1 %v2196_v30  ;;  %2027 = vmatmul.mubr.msk.bf16.gmra.mrb[56].mxu0 %vm969_vm0, %v2197_v31 }
  0x97   : > { %1299 = vmatprep.mubr.bf16.mxu1 %v2198_v32  ;;  %2030 = vmatprep.mubr.msk.bf16.mxu0 %vm969_vm0, %v2200_v33 }
  0x9e   : > { %1300 = vmatmul.mubr.bf16.gmra.mrb[60].mxu1 %v2201_v34  ;;  %2031 = vmatmul.mubr.msk.bf16.gmra.mrb[60].mxu0 %vm969_vm0, %v2202_v35 }
  0x9f   : > { %1307 = vmatprep.mubr.bf16.mxu1 %v2203_v36  ;;  %2034 = vmatprep.mubr.msk.bf16.mxu0 %vm969_vm0, %v2205_v37 }
  0xa6   : > { %1308 = vmatmul.mubr.bf16.gmra.mrb[64].mxu1 %v2206_v38  ;;  %2035 = vmatmul.mubr.msk.bf16.gmra.mrb[64].mxu0 %vm969_vm0, %v2207_v39  ;;  %v2490_v38 = vld [vmem:[%s2694_s2] ss:$0 sm:$0xff] }
  0xa7   : > { %1315 = vmatprep.mubr.bf16.mxu1 %v2208_v40  ;;  %2038 = vmatprep.mubr.msk.bf16.mxu0 %vm969_vm0, %v2210_v41 }
  0xae   : > { %1316 = vmatmul.mubr.bf16.gmra.mrb[68].mxu1 %v2211_v42  ;;  %2039 = vmatmul.mubr.msk.bf16.gmra.mrb[68].mxu0 %vm969_vm0, %v2212_v43 }
  0xaf   : > { %1323 = vmatprep.mubr.bf16.mxu1 %v2213_v44  ;;  %2042 = vmatprep.mubr.msk.bf16.mxu0 %vm969_vm0, %v2215_v45 }
  0xb6   : > { %1324 = vmatmul.mubr.bf16.gmra.mrb[72].mxu1 %v2216_v46  ;;  %2043 = vmatmul.mubr.msk.bf16.gmra.mrb[72].mxu0 %vm969_vm0, %v2217_v47 }
  0xb7   : > { %1331 = vmatprep.mubr.bf16.mxu1 %v2218_v48  ;;  %2046 = vmatprep.mubr.msk.bf16.mxu0 %vm969_vm0, %v2220_v49 }
  0xbe   : > { %1332 = vmatmul.mubr.bf16.gmra.mrb[76].mxu1 %v2221_v50  ;;  %2047 = vmatmul.mubr.msk.bf16.gmra.mrb[76].mxu0 %vm969_vm0, %v2222_v51 }
  0xf9   : > { %v1854_v52 = vpop.f32.mrb[0].mxu1  ;;  %v1782_v53 = vpop.f32.mrb[0].mxu0 }
  0xfa   : > { %v1855_v54 = vpop.f32.mrb[1].mxu1  ;;  %v1783_v55 = vpop.f32.mrb[1].mxu0 }
  0xfb   : > { %v2471_v56 = vadd.f32 %v1855_v54, %v1854_v52  ;;  %v1857_v57 = vpop.f32.mrb[2].mxu1  ;;  %v1784_v58 = vadd.f32 %v1783_v55, %v1782_v53  ;;  %v1785_v59 = vpop.f32.mrb[2].mxu0 }
  0xfc   : > { %v1858_v60 = vpop.f32.mrb[3].mxu1  ;;  %v1786_v61 = vpop.f32.mrb[3].mxu0 }
  0xfd   : > { %v2473_v62 = vadd.f32 %v1858_v60, %v1857_v57  ;;  %v1787_v63 = vadd.f32 %v1786_v61, %v1785_v59  ;;  %v1053_v41 = vadd.f32 %v1784_v58, %v2490_v38 }
  0xff   : > { %v1056_v48 = vadd.f32 %v1787_v63, %v2490_v38 }
 0x101   : > { %v1860_v0 = vpop.f32.mrb[4].mxu1  ;;  %v1788_v1 = vpop.f32.mrb[4].mxu0 }
 0x102   : > { %v1861_v2 = vpop.f32.mrb[5].mxu1  ;;  %v1789_v3 = vpop.f32.mrb[5].mxu0 }
 0x103   : > { %v2475_v4 = vadd.f32 %v1861_v2, %v1860_v0  ;;  %v1863_v5 = vpop.f32.mrb[6].mxu1  ;;  %v1790_v6 = vadd.f32 %v1789_v3, %v1788_v1  ;;  %v1791_v7 = vpop.f32.mrb[6].mxu0 }
 0x104   : > { %v1864_v8 = vpop.f32.mrb[7].mxu1  ;;  %v1792_v9 = vpop.f32.mrb[7].mxu0 }
 0x105   : > { %v2477_v10 = vadd.f32 %v1864_v8, %v1863_v5  ;;  %v1793_v11 = vadd.f32 %v1792_v9, %v1791_v7  ;;  %v1061_v58 = vadd.f32 %v1790_v6, %v2490_v38 }
 0x107   : > { %v1064_v63 = vadd.f32 %v1793_v11, %v2490_v38 }
 0x109   : > { %v1866_v12 = vpop.f32.mrb[8].mxu1  ;;  %v1794_v13 = vpop.f32.mrb[8].mxu0 }
 0x10a   : > { %v1867_v14 = vpop.f32.mrb[9].mxu1  ;;  %v1795_v15 = vpop.f32.mrb[9].mxu0 }
 0x10b   : > { %v2479_v16 = vadd.f32 %v1867_v14, %v1866_v12  ;;  %v1869_v17 = vpop.f32.mrb[10].mxu1  ;;  %v1796_v18 = vadd.f32 %v1795_v15, %v1794_v13  ;;  %v1797_v19 = vpop.f32.mrb[10].mxu0 }
 0x10c   : > { %v1870_v20 = vpop.f32.mrb[11].mxu1  ;;  %v1798_v21 = vpop.f32.mrb[11].mxu0 }
 0x10d   : > { %v2481_v22 = vadd.f32 %v1870_v20, %v1869_v17  ;;  %v1799_v23 = vadd.f32 %v1798_v21, %v1797_v19  ;;  %v1069_v6 = vadd.f32 %v1796_v18, %v2490_v38 }
 0x10f   : > { %v1072_v11 = vadd.f32 %v1799_v23, %v2490_v38 }
 0x111   : > { %v1872_v24 = vpop.f32.mrb[12].mxu1  ;;  %v1800_v25 = vpop.f32.mrb[12].mxu0 }
 0x112   : > { %v1873_v26 = vpop.f32.mrb[13].mxu1  ;;  %v1801_v27 = vpop.f32.mrb[13].mxu0 }
 0x113   : > { %v2483_v28 = vadd.f32 %v1873_v26, %v1872_v24  ;;  %v1875_v29 = vpop.f32.mrb[14].mxu1  ;;  %v1802_v30 = vadd.f32 %v1801_v27, %v1800_v25  ;;  %v1803_v31 = vpop.f32.mrb[14].mxu0 }
 0x114   : > { %v1876_v32 = vpop.f32.mrb[15].mxu1  ;;  %v1804_v33 = vpop.f32.mrb[15].mxu0 }
 0x115   : > { %v2485_v34 = vadd.f32 %v1876_v32, %v1875_v29  ;;  %v1805_v35 = vadd.f32 %v1804_v33, %v1803_v31  ;;  %v1077_v18 = vadd.f32 %v1802_v30, %v2490_v38 }
 0x117   : > { %v1080_v23 = vadd.f32 %v1805_v35, %v2490_v38 }
 0x119   : > { %v1894_v36 = vpop.f32.mrb[16].mxu1  ;;  %v1806_v37 = vpop.f32.mrb[16].mxu0 }
 0x11a   : > { %v1895_v39 = vpop.f32.mrb[17].mxu1  ;;  %v1807_v40 = vpop.f32.mrb[17].mxu0 }
 0x11b   : > { %v1896_v42 = vadd.f32 %v1895_v39, %v1894_v36  ;;  %v1897_v43 = vpop.f32.mrb[18].mxu1  ;;  %v1808_v44 = vadd.f32 %v1807_v40, %v1806_v37  ;;  %v1809_v45 = vpop.f32.mrb[18].mxu0 }
 0x11c   : > { %v1898_v46 = vpop.f32.mrb[19].mxu1  ;;  %v1810_v47 = vpop.f32.mrb[19].mxu0 }
 0x11d   : > { %v1899_v49 = vadd.f32 %v1898_v46, %v1897_v43  ;;  %v1811_v50 = vadd.f32 %v1810_v47, %v1809_v45  ;;  %v2494_v51 = vadd.f32 %v1896_v42, %v1053_v41  ;;  %v1085_v30 = vadd.f32 %v1808_v44, %v2490_v38 }
 0x11f   : > { %v2496_v52 = vadd.f32 %v1899_v49, %v1056_v48  ;;  %v1088_v35 = vadd.f32 %v1811_v50, %v2490_v38 }
 0x121   : > { %v1900_v53 = vpop.f32.mrb[20].mxu1  ;;  %v1812_v54 = vpop.f32.mrb[20].mxu0 }
 0x122   : > { %v1901_v55 = vpop.f32.mrb[21].mxu1  ;;  %v1813_v57 = vpop.f32.mrb[21].mxu0 }
 0x123   : > { %v1902_v59 = vadd.f32 %v1901_v55, %v1900_v53  ;;  %v1903_v60 = vpop.f32.mrb[22].mxu1  ;;  %v1814_v61 = vadd.f32 %v1813_v57, %v1812_v54  ;;  %v1815_v0 = vpop.f32.mrb[22].mxu0 }
 0x124   : > { %v1904_v1 = vpop.f32.mrb[23].mxu1  ;;  %v1816_v2 = vpop.f32.mrb[23].mxu0 }
 0x125   : > { %v1905_v3 = vadd.f32 %v1904_v1, %v1903_v60  ;;  %v1817_v5 = vadd.f32 %v1816_v2, %v1815_v0  ;;  %v2500_v7 = vadd.f32 %v1902_v59, %v1061_v58 }
 0x127   : > { %v2502_v8 = vadd.f32 %v1905_v3, %v1064_v63 }
 0x129   : > { %v1906_v9 = vpop.f32.mrb[24].mxu1  ;;  %v1818_v12 = vpop.f32.mrb[24].mxu0 }
 0x12a   : > { %v1907_v13 = vpop.f32.mrb[25].mxu1  ;;  %v1819_v14 = vpop.f32.mrb[25].mxu0 }
 0x12b   : > { %v1908_v15 = vadd.f32 %v1907_v13, %v1906_v9  ;;  %v1909_v17 = vpop.f32.mrb[26].mxu1  ;;  %v1820_v19 = vadd.f32 %v1819_v14, %v1818_v12  ;;  %v1821_v20 = vpop.f32.mrb[26].mxu0 }
 0x12c   : > { %v1910_v21 = vpop.f32.mrb[27].mxu1  ;;  %v1822_v24 = vpop.f32.mrb[27].mxu0 }
 0x12d   : > { %v1911_v25 = vadd.f32 %v1910_v21, %v1909_v17  ;;  %v1823_v26 = vadd.f32 %v1822_v24, %v1821_v20  ;;  %v2506_v27 = vadd.f32 %v1908_v15, %v1069_v6  ;;  %v1093_v6 = vadd.f32 %v1814_v61, %v2490_v38 }
 0x12f   : > { %v2508_v29 = vadd.f32 %v1911_v25, %v1072_v11  ;;  %v1096_v11 = vadd.f32 %v1817_v5, %v2490_v38 }
 0x131   : > { %v1912_v31 = vpop.f32.mrb[28].mxu1  ;;  %v1824_v32 = vpop.f32.mrb[28].mxu0 }
 0x132   : > { %v1913_v33 = vpop.f32.mrb[29].mxu1  ;;  %v1825_v36 = vpop.f32.mrb[29].mxu0 }
 0x133   : > { %v1914_v37 = vadd.f32 %v1913_v33, %v1912_v31  ;;  %v1915_v39 = vpop.f32.mrb[30].mxu1  ;;  %v1826_v40 = vadd.f32 %v1825_v36, %v1824_v32  ;;  %v1827_v41 = vpop.f32.mrb[30].mxu0 }
 0x134   : > { %v1916_v42 = vpop.f32.mrb[31].mxu1  ;;  %v1828_v43 = vpop.f32.mrb[31].mxu0 }
 0x135   : > { %v1917_v45 = vadd.f32 %v1916_v42, %v1915_v39  ;;  %v1829_v46 = vadd.f32 %v1828_v43, %v1827_v41  ;;  %v2512_v47 = vadd.f32 %v1914_v37, %v1077_v18  ;;  %v1101_v39 = vadd.f32 %v1820_v19, %v2490_v38 }
 0x137   : > { %v2514_v48 = vadd.f32 %v1917_v45, %v1080_v23 }
 0x139   : > { %v1918_v49 = vpop.f32.mrb[32].mxu1  ;;  %v1830_v53 = vpop.f32.mrb[32].mxu0 }
 0x13a   : > { %v1919_v54 = vpop.f32.mrb[33].mxu1  ;;  %v1831_v55 = vpop.f32.mrb[33].mxu0 }
 0x13b   : > { %v1920_v57 = vadd.f32 %v1919_v54, %v1918_v49  ;;  %v1921_v58 = vpop.f32.mrb[34].mxu1  ;;  %v2517_v59 = vadd.f32 %v1831_v55, %v1830_v53  ;;  %v1833_v60 = vpop.f32.mrb[34].mxu0  ;;  %v1104_v49 = vadd.f32 %v1823_v26, %v2490_v38 }
 0x13c   : > { %v1922_v0 = vpop.f32.mrb[35].mxu1  ;;  %v1834_v1 = vpop.f32.mrb[35].mxu0 }
 0x13d   : > { %v1923_v2 = vadd.f32 %v1922_v0, %v1921_v58  ;;  %v2520_v63 = vadd.f32 %v1834_v1, %v1833_v60  ;;  %v2522_v3 = vadd.f32 %v1920_v57, %v1085_v30  ;;  %v1109_v0 = vadd.f32 %v1826_v40, %v2490_v38 }
 0x13f   : > { %v2524_v9 = vadd.f32 %v1923_v2, %v1088_v35 }
 0x141   : > { %v1924_v12 = vpop.f32.mrb[36].mxu1  ;;  %v1836_v13 = vpop.f32.mrb[36].mxu0 }
 0x142   : > { %v1925_v14 = vpop.f32.mrb[37].mxu1  ;;  %v1837_v44 = vpop.f32.mrb[37].mxu0 }
 0x143   : > { %v1926_v15 = vadd.f32 %v1925_v14, %v1924_v12  ;;  %v1927_v17 = vpop.f32.mrb[38].mxu1  ;;  %v2527_v20 = vadd.f32 %v1837_v44, %v1836_v13  ;;  %v1839_v21 = vpop.f32.mrb[38].mxu0  ;;  %v1112_v14 = vadd.f32 %v1829_v46, %v2490_v38 }
 0x144   : > { %v1928_v24 = vpop.f32.mrb[39].mxu1  ;;  %v1840_v50 = vpop.f32.mrb[39].mxu0 }
 0x145   : > { %v1929_v25 = vadd.f32 %v1928_v24, %v1927_v17  ;;  %v2530_v31 = vadd.f32 %v1840_v50, %v1839_v21  ;;  %v2532_v32 = vadd.f32 %v1926_v15, %v1093_v6 }
 0x147   : > { %v2534_v33 = vadd.f32 %v1929_v25, %v1096_v11  ;;  %v1117_v25 = vadd.f32 %v2517_v59, %v2490_v38 }
 0x149   : > { %v1930_v36 = vpop.f32.mrb[40].mxu1  ;;  %v1842_v18 = vpop.f32.mrb[40].mxu0 }
 0x14a   : > { %v1931_v37 = vpop.f32.mrb[41].mxu1  ;;  %v1843_v61 = vpop.f32.mrb[41].mxu0 }
 0x14b   : > { %v1932_v41 = vadd.f32 %v1931_v37, %v1930_v36  ;;  %v1933_v42 = vpop.f32.mrb[42].mxu1  ;;  %v2537_v43 = vadd.f32 %v1843_v61, %v1842_v18  ;;  %v1845_v23 = vpop.f32.mrb[42].mxu0 }
 0x14c   : > { %v1934_v45 = vpop.f32.mrb[43].mxu1  ;;  %v1846_v5 = vpop.f32.mrb[43].mxu0 }
 0x14d   : > { %v1935_v53 = vadd.f32 %v1934_v45, %v1933_v42  ;;  %v2540_v54 = vadd.f32 %v1846_v5, %v1845_v23  ;;  %v2542_v55 = vadd.f32 %v1932_v41, %v1101_v39 }
 0x14f   : > { %v2544_v30 = vadd.f32 %v1935_v53, %v1104_v49 }
 0x151   : > { %v1936_v57 = vpop.f32.mrb[44].mxu1  ;;  %v1848_v58 = vpop.f32.mrb[44].mxu0 }
 0x152   : > { %v1937_v19 = vpop.f32.mrb[45].mxu1  ;;  %v1849_v60 = vpop.f32.mrb[45].mxu0 }
 0x153   : > { %v1938_v1 = vadd.f32 %v1937_v19, %v1936_v57  ;;  %v1939_v35 = vpop.f32.mrb[46].mxu1  ;;  %v2547_v2 = vadd.f32 %v1849_v60, %v1848_v58  ;;  %v1851_v12 = vpop.f32.mrb[46].mxu0  ;;  %v1125_v19 = vadd.f32 %v2527_v20, %v2490_v38 }
 0x154   : > { %v1940_v26 = vpop.f32.mrb[47].mxu1  ;;  %v1852_v13 = vpop.f32.mrb[47].mxu0 }
 0x155   : > { %v1941_v44 = vadd.f32 %v1940_v26, %v1939_v35  ;;  %v2550_v6 = vadd.f32 %v1852_v13, %v1851_v12  ;;  %v2552_v15 = vadd.f32 %v1938_v1, %v1109_v0  ;;  %v1128_v12 = vadd.f32 %v2530_v31, %v2490_v38 }
 0x157   : > { %v2554_v17 = vadd.f32 %v1941_v44, %v1112_v14 }
 0x159   : > { %v1942_v21 = vpop.f32.mrb[48].mxu1  ;;  %v2020_v24 = vpop.f32.mrb[48].mxu0 }
 0x15a   : > { %v1383_v40 = vadd.f32 %v2020_v24, %v2500_v7  ;;  %v1943_v50 = vpop.f32.mrb[49].mxu1  ;;  %v1374_v11 = vpop.f32.mrb[49].mxu0  ;;  %v1120_v7 = vadd.f32 %v2520_v63, %v2490_v38 }
 0x15b   : > { %v1944_v46 = vadd.f32 %v1943_v50, %v1942_v21  ;;  %v1375_v36 = vadd.f32 %v1374_v11, %v2494_v51  ;;  %v1945_v18 = vpop.f32.mrb[50].mxu1  ;;  %v2021_v37 = vpop.f32.mrb[50].mxu0 }
 0x15c   : > { %v1503_v61 = vmax.f32 %v1383_v40, 0.0  ;;  %v1386_v59 = vadd.f32 %v2021_v37, %v2502_v8  ;;  %v1946_v39 = vpop.f32.mrb[51].mxu1  ;;  %v1377_v41 = vpop.f32.mrb[51].mxu0 }
 0x15d   : > { %v1501_v42 = vmax.f32 %v1375_v36, 0.0  ;;  %v1947_v23 = vadd.f32 %v1946_v39, %v1945_v18  ;;  %v1378_v45 = vadd.f32 %v1377_v41, %v2496_v52  ;;  %v2570_v5 = vadd.f32 %v1944_v46, %v1117_v25 }
 0x15e   : > { %1536 = vst.msk [vmem:[%s2563_s22 + $0x10] sm:$0xff] %vm1533_vm1, %v1503_v61  ;;  %v1504_v51 = vmax.f32 %v1386_v59, 0.0  ;;  %v1133_v46 = vadd.f32 %v2537_v43, %v2490_v38  ;;  %v1136_v61 = vadd.f32 %v2540_v54, %v2490_v38 }
 0x15f   : > { %1534 = vst.msk [vmem:[%s2563_s22] sm:$0xff] %vm1533_vm1, %v1501_v42  ;;  %v1502_v49 = vmax.f32 %v1378_v45, 0.0  ;;  %v2576_v53 = vadd.f32 %v1947_v23, %v1120_v7 }
 0x160   : > { %1537 = vst.msk [vmem:[%s2563_s22 + $0x18] sm:$0xff] %vm1533_vm1, %v1504_v51 }
 0x161   : > { %1535 = vst.msk [vmem:[%s2563_s22 + $0x8] sm:$0xff] %vm1533_vm1, %v1502_v49  ;;  %v1948_v8 = vpop.f32.mrb[52].mxu1  ;;  %v2024_v63 = vpop.f32.mrb[52].mxu0 }
 0x162   : > { %v1399_v57 = vadd.f32 %v2024_v63, %v2512_v47  ;;  %v1949_v58 = vpop.f32.mrb[53].mxu1  ;;  %v1390_v52 = vpop.f32.mrb[53].mxu0 }
 0x163   : > { %v1950_v60 = vadd.f32 %v1949_v58, %v1948_v8  ;;  %v1391_v0 = vadd.f32 %v1390_v52, %v2506_v27  ;;  %v1951_v1 = vpop.f32.mrb[54].mxu1  ;;  %v2025_v35 = vpop.f32.mrb[54].mxu0 }
 0x164   : > { %v1507_v26 = vmax.f32 %v1399_v57, 0.0  ;;  %v1402_v47 = vadd.f32 %v2025_v35, %v2514_v48  ;;  %v1952_v13 = vpop.f32.mrb[55].mxu1  ;;  %v1393_v14 = vpop.f32.mrb[55].mxu0  ;;  %v1141_v57 = vadd.f32 %v2547_v2, %v2490_v38 }
 0x165   : > { %v1505_v44 = vmax.f32 %v1391_v0, 0.0  ;;  %v1953_v21 = vadd.f32 %v1952_v13, %v1951_v1  ;;  %v1394_v20 = vadd.f32 %v1393_v14, %v2508_v29  ;;  %v1286_v24 = vadd.f32 %v1950_v60, %v1125_v19 }
 0x166   : > { %1540 = vst.msk [vmem:[%s2563_s22 + $0x30] sm:$0xff] %vm1533_vm1, %v1507_v26  ;;  %v1508_v27 = vmax.f32 %v1402_v47, 0.0  ;;  %v1144_v0 = vadd.f32 %v2550_v6, %v2490_v38 }
 0x167   : > { %1538 = vst.msk [vmem:[%s2563_s22 + $0x20] sm:$0xff] %vm1533_vm1, %v1505_v44  ;;  %v1506_v40 = vmax.f32 %v1394_v20, 0.0  ;;  %v2594_v50 = vadd.f32 %v1953_v21, %v1128_v12 }
 0x168   : > { %1541 = vst.msk [vmem:[%s2563_s22 + $0x38] sm:$0xff] %vm1533_vm1, %v1508_v27 }
 0x169   : > { %1539 = vst.msk [vmem:[%s2563_s22 + $0x28] sm:$0xff] %vm1533_vm1, %v1506_v40  ;;  %v1954_v48 = vpop.f32.mrb[56].mxu1  ;;  %v2028_v31 = vpop.f32.mrb[56].mxu0 }
 0x16a   : > { %v1415_v11 = vadd.f32 %v2028_v31, %v2532_v32  ;;  %v1955_v25 = vpop.f32.mrb[57].mxu1  ;;  %v1406_v29 = vpop.f32.mrb[57].mxu0 }
 0x16b   : > { %v1956_v36 = vadd.f32 %v1955_v25, %v1954_v48  ;;  %v1407_v18 = vadd.f32 %v1406_v29, %v2522_v3  ;;  %v1957_v37 = vpop.f32.mrb[58].mxu1  ;;  %v2029_v7 = vpop.f32.mrb[58].mxu0  ;;  %v1152_v25 = vadd.f32 %v2473_v62, %v2490_v38 }
 0x16c   : > { %v1511_v59 = vmax.f32 %v1415_v11, 0.0  ;;  %v1418_v32 = vadd.f32 %v2029_v7, %v2534_v33  ;;  %v1958_v39 = vpop.f32.mrb[59].mxu1  ;;  %v1409_v41 = vpop.f32.mrb[59].mxu0 }
 0x16d   : > { %v1509_v42 = vmax.f32 %v1407_v18, 0.0  ;;  %v1959_v23 = vadd.f32 %v1958_v39, %v1957_v37  ;;  %v1410_v43 = vadd.f32 %v1409_v41, %v2524_v9  ;;  %v2608_v45 = vadd.f32 %v1956_v36, %v1133_v46 }
 0x16e   : > { %1544 = vst.msk [vmem:[%s2563_s22 + $0x50] sm:$0xff] %vm1533_vm1, %v1511_v59  ;;  %v1512_v3 = vmax.f32 %v1418_v32, 0.0 }
 0x16f   : > { %1542 = vst.msk [vmem:[%s2563_s22 + $0x40] sm:$0xff] %vm1533_vm1, %v1509_v42  ;;  %v1510_v51 = vmax.f32 %v1410_v43, 0.0  ;;  %v2614_v49 = vadd.f32 %v1959_v23, %v1136_v61 }
 0x170   : > { %1545 = vst.msk [vmem:[%s2563_s22 + $0x58] sm:$0xff] %vm1533_vm1, %v1512_v3 }
 0x171   : > { %1543 = vst.msk [vmem:[%s2563_s22 + $0x48] sm:$0xff] %vm1533_vm1, %v1510_v51  ;;  %v1960_v33 = vpop.f32.mrb[60].mxu1  ;;  %v2032_v54 = vpop.f32.mrb[60].mxu0  ;;  %v1160_v51 = vadd.f32 %v2477_v10, %v2490_v38 }
 0x172   : > { %v1431_v8 = vadd.f32 %v2032_v54, %v2552_v15  ;;  %v1961_v63 = vpop.f32.mrb[61].mxu1  ;;  %v1422_v9 = vpop.f32.mrb[61].mxu0 }
 0x173   : > { %v1962_v58 = vadd.f32 %v1961_v63, %v1960_v33  ;;  %v1423_v52 = vadd.f32 %v1422_v9, %v2542_v55  ;;  %v1963_v19 = vpop.f32.mrb[62].mxu1  ;;  %v2033_v60 = vpop.f32.mrb[62].mxu0 }
 0x174   : > { %v1515_v1 = vmax.f32 %v1431_v8, 0.0  ;;  %v1434_v15 = vadd.f32 %v2033_v60, %v2554_v17  ;;  %v1964_v35 = vpop.f32.mrb[63].mxu1  ;;  %v1425_v12 = vpop.f32.mrb[63].mxu0 }
 0x175   : > { %v1513_v26 = vmax.f32 %v1423_v52, 0.0  ;;  %v1965_v47 = vadd.f32 %v1964_v35, %v1963_v19  ;;  %v1426_v2 = vadd.f32 %v1425_v12, %v2544_v30  ;;  %v1302_v13 = vadd.f32 %v1962_v58, %v1141_v57 }
 0x176   : > { %1548 = vst.msk [vmem:[%s2563_s22 + $0x70] sm:$0xff] %vm1533_vm1, %v1515_v1  ;;  %v1516_v55 = vmax.f32 %v1434_v15, 0.0  ;;  %v1149_v30 = vadd.f32 %v2471_v56, %v2490_v38 }
 0x177   : > { %1546 = vst.msk [vmem:[%s2563_s22 + $0x60] sm:$0xff] %vm1533_vm1, %v1513_v26  ;;  %v1514_v14 = vmax.f32 %v1426_v2, 0.0  ;;  %v1305_v44 = vadd.f32 %v1965_v47, %v1144_v0  ;;  %v1168_v2 = vadd.f32 %v2481_v22, %v2490_v38 }
 0x178   : > { %1549 = vst.msk [vmem:[%s2563_s22 + $0x78] sm:$0xff] %vm1533_vm1, %v1516_v55 }
 0x179   : > { %1547 = vst.msk [vmem:[%s2563_s22 + $0x68] sm:$0xff] %vm1533_vm1, %v1514_v14  ;;  %v1966_v6 = vpop.f32.mrb[64].mxu1  ;;  %v2036_v17 = vpop.f32.mrb[64].mxu0 }
 0x17a   : > { %v1447_v21 = vadd.f32 %v2036_v17, %v1286_v24  ;;  %v1967_v20 = vpop.f32.mrb[65].mxu1  ;;  %v1438_v27 = vpop.f32.mrb[65].mxu0 }
 0x17b   : > { %v1968_v40 = vadd.f32 %v1967_v20, %v1966_v6  ;;  %v1439_v48 = vadd.f32 %v1438_v27, %v2570_v5  ;;  %v1969_v31 = vpop.f32.mrb[66].mxu1  ;;  %v2037_v11 = vpop.f32.mrb[66].mxu0 }
 0x17c   : > { %v1519_v29 = vmax.f32 %v1447_v21, 0.0  ;;  %v1450_v24 = vadd.f32 %v2037_v11, %v2594_v50  ;;  %v1970_v46 = vpop.f32.mrb[67].mxu1  ;;  %v1441_v36 = vpop.f32.mrb[67].mxu0  ;;  %v1173_v11 = vadd.f32 %v2483_v28, %v2490_v38 }
 0x17d   : > { %v1517_v18 = vmax.f32 %v1439_v48, 0.0  ;;  %v1971_v37 = vadd.f32 %v1970_v46, %v1969_v31  ;;  %v1442_v56 = vadd.f32 %v1441_v36, %v2576_v53  ;;  %v1310_v7 = vadd.f32 %v1968_v40, %v1149_v30 }
 0x17e   : > { %1552 = vst.msk [vmem:[%s2563_s22 + $0x90] sm:$0xff] %vm1533_vm1, %v1519_v29  ;;  %v1520_v5 = vmax.f32 %v1450_v24, 0.0  ;;  %v1157_v53 = vadd.f32 %v2475_v4, %v2490_v38  ;;  %v1176_v36 = vadd.f32 %v2485_v34, %v2490_v38 }
 0x17f   : > { %1550 = vst.msk [vmem:[%s2563_s22 + $0x80] sm:$0xff] %vm1533_vm1, %v1517_v18  ;;  %v1518_v61 = vmax.f32 %v1442_v56, 0.0  ;;  %v1313_v59 = vadd.f32 %v1971_v37, %v1152_v25 }
 0x180   : > { %1553 = vst.msk [vmem:[%s2563_s22 + $0x98] sm:$0xff] %vm1533_vm1, %v1520_v5 }
 0x181   : > { %1551 = vst.msk [vmem:[%s2563_s22 + $0x88] sm:$0xff] %vm1533_vm1, %v1518_v61  ;;  %v1972_v62 = vpop.f32.mrb[68].mxu1  ;;  %v2040_v50 = vpop.f32.mrb[68].mxu0 }
 0x182   : > { %v1463_v32 = vadd.f32 %v2040_v50, %v1302_v13  ;;  %v1973_v39 = vpop.f32.mrb[69].mxu1  ;;  %v1454_v41 = vpop.f32.mrb[69].mxu0 }
 0x183   : > { %v1974_v42 = vadd.f32 %v1973_v39, %v1972_v62  ;;  %v1455_v23 = vadd.f32 %v1454_v41, %v2608_v45  ;;  %v1975_v43 = vpop.f32.mrb[70].mxu1  ;;  %v2041_v3 = vpop.f32.mrb[70].mxu0 }
 0x184   : > { %v1523_v33 = vmax.f32 %v1463_v32, 0.0  ;;  %v1466_v54 = vadd.f32 %v2041_v3, %v1305_v44  ;;  %v1976_v8 = vpop.f32.mrb[71].mxu1  ;;  %v1457_v63 = vpop.f32.mrb[71].mxu0 }
 0x185   : > { %v1521_v9 = vmax.f32 %v1455_v23, 0.0  ;;  %v1977_v57 = vadd.f32 %v1976_v8, %v1975_v43  ;;  %v1458_v58 = vadd.f32 %v1457_v63, %v2614_v49  ;;  %v1318_v4 = vadd.f32 %v1974_v42, %v1157_v53 }
 0x186   : > { %1556 = vst.msk [vmem:[%s2563_s22 + $0xb0] sm:$0xff] %vm1533_vm1, %v1523_v33  ;;  %v1524_v52 = vmax.f32 %v1466_v54, 0.0  ;;  %v1165_v49 = vadd.f32 %v2479_v16, %v2490_v38 }
 0x187   : > { %1554 = vst.msk [vmem:[%s2563_s22 + $0xa0] sm:$0xff] %vm1533_vm1, %v1521_v9  ;;  %v1522_v45 = vmax.f32 %v1458_v58, 0.0  ;;  %v1321_v19 = vadd.f32 %v1977_v57, %v1160_v51 }
 0x188   : > { %1557 = vst.msk [vmem:[%s2563_s22 + $0xb8] sm:$0xff] %vm1533_vm1, %v1524_v52 }
 0x189   : > { %1555 = vst.msk [vmem:[%s2563_s22 + $0xa8] sm:$0xff] %vm1533_vm1, %v1522_v45  ;;  %v1978_v10 = vpop.f32.mrb[72].mxu1  ;;  %v2044_v60 = vpop.f32.mrb[72].mxu0 }
 0x18a   : > { %v1479_v0 = vadd.f32 %v2044_v60, %v1318_v4  ;;  %v1979_v1 = vpop.f32.mrb[73].mxu1  ;;  %v1470_v15 = vpop.f32.mrb[73].mxu0 }
 0x18b   : > { %v1980_v35 = vadd.f32 %v1979_v1, %v1978_v10  ;;  %v1471_v12 = vadd.f32 %v1470_v15, %v1310_v7  ;;  %v1981_v26 = vpop.f32.mrb[74].mxu1  ;;  %v2045_v47 = vpop.f32.mrb[74].mxu0 }
 0x18c   : > { %v1527_v13 = vmax.f32 %v1479_v0, 0.0  ;;  %v1482_v55 = vadd.f32 %v2045_v47, %v1321_v19  ;;  %v1982_v14 = vpop.f32.mrb[75].mxu1  ;;  %v1473_v44 = vpop.f32.mrb[75].mxu0 }
 0x18d   : > { %v1525_v6 = vmax.f32 %v1471_v12, 0.0  ;;  %v1983_v17 = vadd.f32 %v1982_v14, %v1981_v26  ;;  %v1474_v21 = vadd.f32 %v1473_v44, %v1313_v59  ;;  %v1326_v20 = vadd.f32 %v1980_v35, %v1165_v49 }
 0x18e   : > { %1560 = vst.msk [vmem:[%s2563_s22 + $0xd0] sm:$0xff] %vm1533_vm1, %v1527_v13  ;;  %v1528_v16 = vmax.f32 %v1482_v55, 0.0 }
 0x18f   : > { %1558 = vst.msk [vmem:[%s2563_s22 + $0xc0] sm:$0xff] %vm1533_vm1, %v1525_v6  ;;  %v1526_v27 = vmax.f32 %v1474_v21, 0.0  ;;  %v1329_v30 = vadd.f32 %v1983_v17, %v1168_v2 }
 0x190   : > { %1561 = vst.msk [vmem:[%s2563_s22 + $0xd8] sm:$0xff] %vm1533_vm1, %v1528_v16 }
 0x191   : > { %1559 = vst.msk [vmem:[%s2563_s22 + $0xc8] sm:$0xff] %vm1533_vm1, %v1526_v27  ;;  %v1984_v22 = vpop.f32.mrb[76].mxu1  ;;  %v2048_v40 = vpop.f32.mrb[76].mxu0 }
 0x192   : > { %v1985_v48 = vpop.f32.mrb[77].mxu1  ;;  %v1486_v31 = vpop.f32.mrb[77].mxu0 }
 0x193   : > { %v1986_v25 = vadd.f32 %v1985_v48, %v1984_v22  ;;  %v1487_v29 = vadd.f32 %v1486_v31, %v1326_v20  ;;  %v1987_v24 = vpop.f32.mrb[78].mxu1  ;;  %v2049_v46 = vpop.f32.mrb[78].mxu0 }
 0x194   : > { %v1988_v18 = vpop.f32.mrb[79].mxu1  ;;  %v1489_v37 = vpop.f32.mrb[79].mxu0 }
 0x195   : > { %v1334_v56 = vadd.f32 %v1986_v25, %v1173_v11  ;;  %v1529_v7 = vmax.f32 %v1487_v29, 0.0  ;;  %v1989_v5 = vadd.f32 %v1988_v18, %v1987_v24  ;;  %v1490_v61 = vadd.f32 %v1489_v37, %v1329_v30 }
 0x197   : > { %v1495_v59 = vadd.f32 %v2048_v40, %v1334_v56  ;;  %1562 = vst.msk [vmem:[%s2563_s22 + $0xe0] sm:$0xff] %vm1533_vm1, %v1529_v7  ;;  %v1337_v28 = vadd.f32 %v1989_v5, %v1176_v36  ;;  %v1530_v62 = vmax.f32 %v1490_v61, 0.0 }
 0x199   : > { %v1531_v50 = vmax.f32 %v1495_v59, 0.0  ;;  %v1498_v32 = vadd.f32 %v2049_v46, %v1337_v28  ;;  %1563 = vst.msk [vmem:[%s2563_s22 + $0xe8] sm:$0xff] %vm1533_vm1, %v1530_v62 }
 0x19b   : > { %1564 = vst.msk [vmem:[%s2563_s22 + $0xf0] sm:$0xff] %vm1533_vm1, %v1531_v50  ;;  %v1532_v39 = vmax.f32 %v1498_v32, 0.0 }
 0x19d   : > { %1565 = vst.msk [vmem:[%s2563_s22 + $0xf8] sm:$0xff] %vm1533_vm1, %v1532_v39 }
 0x19e PF: > { %s13_s12 = sadd.s32 1, %s2229_s12  }
 0x19f   : > { %p10_p4 = scmp.ge.s32.totalorder %s13_s12, 4  }
 0x1a1   :  { %12 = sbr.rel (!%p10_p4) target bundleno = 1 (0x1), region = 62 }

// kernel: transform_forward.37
= control target key start
LH: loop header
LB: loop body
LE: loop exit
PB: predicated region body
PF: predicated region fallthrough
CT: control target
= control target key end

     0   :  { %s8186_s12 = smov 0   ;;  %s10098_s0 = inlined_call_operand.vmem [shape: bf16[512,2592], index: 0, kind: input, shape index: {}]   ;;  %s10099_s1 = inlined_call_operand.vmem [shape: bf16[2592,3], index: 1, kind: input, shape index: {}]   ;;  %s10100_s2 = inlined_call_operand.vmem [shape: f32[1,3], index: 2, kind: input, shape index: {}]   ;;  %s10101_s3 = inlined_call_operand.vmem [shape: f32[512,3], index: 3, kind: output, shape index: {}]  }
   0x1 LB: > { %s5614_s13 = sadd.s32 4294967295, %s8164_s12   ;;  %p5618_p0 = scmp.ge.s32.totalorder %s8164_s12, 1  ;;  %s8164_s12 = sphi %s8186_s12, %s13_s12  }
   0x2   : > { %p139_p1 = scmp.lt.s32.totalorder %s8164_s12, 3 }
   0x4   : > { %p140_p2 = pnand %p5618_p0, %p139_p1 }
   0x5   : > { %v7371_v0 = vld [vmem:[%s10099_s1 + $0x40] sm:$0xff] (!%p140_p2)   ;;  %s5619_s16 = sshll.u32 (!%p140_p2), %s5614_s13, 5  ;;  %v7373_v2 = vld [vmem:[%s10099_s1 + $0x48] sm:$0xff] (!%p140_p2)   ;;  %v7375_v4 = vld [vmem:[%s10099_s1 + $0x50] sm:$0xff] (!%p140_p2)   ;;  %vm3513_vm0 = vcmask (!%p140_p2), 261120   ;;  %vm5525_vm1 = vcmask (!%p140_p2), 23552  }
   0x6   : > { %143 = sbr.rel (%p140_p2) target bundleno = 958 (0x3be), region = 32  ;;  %v7372_v1 = vld [vmem:[%s10099_s1] sm:$0xff] (!%p140_p2)   ;;  %6172 = vmatprep.subr.bf16.mxu0 (!%p140_p2), %v7371_v0  ;;  %7346 = vmatprep.subr.bf16.mxu1 (!%p140_p2), %v7371_v0  ;;  %p165_p3 = scmp.lt.s32.totalorder (!%p140_p2), %s5619_s16, 63  ;;  %v7374_v3 = vld [vmem:[%s10099_s1 + $0x8] sm:$0xff] (!%p140_p2)   ;;  %v7376_v5 = vld [vmem:[%s10099_s1 + $0x10] sm:$0xff] (!%p140_p2)  }
   0x7   : > { %6173 = vmatpush3.bf16.msra.mxu0 (!%p140_p2), %v7372_v1  ;;  %7354 = vmatpush3.bf16.msra.mxu1 (!%p140_p2), %v7372_v1  ;;  %v7377_v6 = vld [vmem:[%s10099_s1 + $0x58] sm:$0xff] (!%p140_p2)   ;;  %v7379_v8 = vld [vmem:[%s10099_s1 + $0x60] sm:$0xff] (!%p140_p2)   ;;  %v7381_v10 = vld [vmem:[%s10099_s1 + $0x68] sm:$0xff] (!%p140_p2)  }
   0x8   : > { %6174 = vmatprep.subr.bf16.mxu0 (!%p140_p2), %v7373_v2  ;;  %7347 = vmatprep.subr.bf16.mxu1 (!%p140_p2), %v7373_v2  ;;  %v7378_v7 = vld [vmem:[%s10099_s1 + $0x18] sm:$0xff] (!%p140_p2)   ;;  %v7380_v9 = vld [vmem:[%s10099_s1 + $0x20] sm:$0xff] (!%p140_p2)   ;;  %v7382_v13 = vld [vmem:[%s10099_s1 + $0x28] sm:$0xff] (!%p140_p2)  }
   0x9   : > { %v7383_v14 = vld [vmem:[%s10099_s1 + $0x70] sm:$0xff] (!%p140_p2)   ;;  %v7385_v16 = vld [vmem:[%s10099_s1 + $0x78] sm:$0xff] (!%p140_p2)   ;;  %v7393_v18 = vld [vmem:[%s10099_s1 + $0xc0] sm:$0xff] (!%p140_p2)  }
   0xa   : > { %v7384_v15 = vld [vmem:[%s10099_s1 + $0x30] sm:$0xff] (!%p140_p2)   ;;  %v7386_v17 = vld [vmem:[%s10099_s1 + $0x38] sm:$0xff] (!%p140_p2)   ;;  %v7396_v21 = vld [vmem:[%s10099_s1 + $0x140] sm:$0xff] (!%p140_p2)  }
   0xb   : > { %6175 = vmatpush3.bf16.msra.mxu0 (!%p140_p2), %v7374_v3  ;;  %7355 = vmatpush3.bf16.msra.mxu1 (!%p140_p2), %v7374_v3  ;;  %v7394_v22 = vld [vmem:[%s10099_s1 + $0x80] sm:$0xff] (!%p140_p2)   ;;  %v7395_v23 = vld [vmem:[%s10099_s1 + $0xc8] sm:$0xff] (!%p140_p2)   ;;  %v7405_v31 = vld [vmem:[%s10099_s1 + $0xd0] sm:$0xff] (!%p140_p2)  }
   0xc   : > { %6176 = vmatprep.subr.bf16.mxu0 (!%p140_p2), %v7375_v4  ;;  %7348 = vmatprep.subr.bf16.mxu1 (!%p140_p2), %v7375_v4  ;;  %v7398_v24 = vld [vmem:[%s10099_s1 + $0x100] sm:$0xff] (!%p140_p2)   ;;  %v7397_v27 = vld [vmem:[%s10099_s1 + $0x88] sm:$0xff] (!%p140_p2)   ;;  %v7406_v32 = vld [vmem:[%s10099_s1 + $0x90] sm:$0xff] (!%p140_p2)  }
   0xd   : > { %s10103_s16 = smov (!%p165_p3, %s5619_s16), 63  ;;  %v7416_v28 = vld [vmem:[%s10099_s1 + $0x148] sm:$0xff]   ;;  %v7407_v34 = vld [vmem:[%s10099_s1 + $0xd8] sm:$0xff]   ;;  %v7415_v40 = vld [vmem:[%s10099_s1 + $0xe0] sm:$0xff]  }
   0xe   : > { %s7362_s29 = smul.u32 84, %s10103_s16  ;;  %v7418_v33 = vld [vmem:[%s10099_s1 + $0x108] sm:$0xff]   ;;  %v7408_v37 = vld [vmem:[%s10099_s1 + $0x98] sm:$0xff]   ;;  %v7417_v41 = vld [vmem:[%s10099_s1 + $0xa0] sm:$0xff]  }
   0xf   : > { %6177 = vmatpush3.bf16.msra.mxu0 %v7376_v5  ;;  %7356 = vmatpush3.bf16.msra.mxu1 %v7376_v5  ;;  %v7419_v42 = vld [vmem:[%s10099_s1 + $0xe8] sm:$0xff]   ;;  %v7430_v43 = vld [vmem:[%s10099_s1 + $0x150] sm:$0xff]   ;;  %v7429_v52 = vld [vmem:[%s10099_s1 + $0xf8] sm:$0xff]  }
  0x10   : > { %6178 = vmatprep.subr.bf16.mxu0 %v7377_v6  ;;  %7349 = vmatprep.subr.bf16.mxu1 %v7377_v6  ;;  %s8227_s9 = scalar_lea.vmem %s10098_s0, %s7362_s29  ;;  %v7432_v46 = vld [vmem:[%s10099_s1 + $0x110] sm:$0xff]   ;;  %v7420_v47 = vld [vmem:[%s10099_s1 + $0xa8] sm:$0xff]   ;;  %v7447_v55 = vld [vmem:[%s10099_s1 + $0x158] sm:$0xff]  }
  0x11   : > { %v7389_v11 = vld [vmem:[%s8227_s9 + $0x4] ss:$84 sps:$4 sm:$0xff]   ;;  %v7387_v19 = vld [vmem:[%s8227_s9] ss:$84 sps:$4 sm:$0xff]   ;;  %v7403_v29 = vld [vmem:[%s8227_s9 + $0xa8] ss:$84 sps:$4 sm:$0xff]  }
  0x12   : > { %v7392_v12 = vld [vmem:[%s8227_s9 + $0x7e4] ss:$84 sps:$4 sm:$0xff]   ;;  %3594 = vmatprep.mubr.bf16.mxu0 %v7389_v11  ;;  %v7390_v20 = vld [vmem:[%s8227_s9 + $0x7e0] ss:$84 sps:$4 sm:$0xff]   ;;  %v7404_v30 = vld [vmem:[%s8227_s9 + $0x888] ss:$84 sps:$4 sm:$0xff]  }
  0x13   : > { %6179 = vmatpush3.bf16.msra.mxu0 %v7378_v7  ;;  %7357 = vmatpush3.bf16.msra.mxu1 %v7378_v7  ;;  %v7399_v25 = vld [vmem:[%s8227_s9 + $0xac] ss:$84 sps:$4 sm:$0xff]   ;;  %v7409_v35 = vld [vmem:[%s8227_s9 + $0x154] ss:$84 sps:$4 sm:$0xff]   ;;  %v7413_v38 = vld [vmem:[%s8227_s9 + $0x150] ss:$84 sps:$4 sm:$0xff]  }
  0x14   : > { %6180 = vmatprep.subr.bf16.mxu0 %v7379_v8  ;;  %7350 = vmatprep.subr.bf16.mxu1 %v7379_v8  ;;  %v7401_v26 = vld [vmem:[%s8227_s9 + $0x88c] ss:$84 sps:$4 sm:$0xff]   ;;  %v7411_v36 = vld [vmem:[%s8227_s9 + $0x934] ss:$84 sps:$4 sm:$0xff]   ;;  %v7414_v39 = vld [vmem:[%s8227_s9 + $0x930] ss:$84 sps:$4 sm:$0xff]  }
  0x15   : > { %3690 = vmatprep.mubr.bf16.mxu1 %v7392_v12  ;;  %v7421_v44 = vld [vmem:[%s8227_s9 + $0x1fc] ss:$84 sps:$4 sm:$0xff]   ;;  %v7425_v49 = vld [vmem:[%s8227_s9 + $0x1f8] ss:$84 sps:$4 sm:$0xff]   ;;  %v7438_v59 = vld [vmem:[%s8227_s9 + $0x2a0] ss:$84 sps:$4 sm:$0xff]  }
  0x16   : > { %v7423_v45 = vld [vmem:[%s8227_s9 + $0x9dc] ss:$84 sps:$4 sm:$0xff]   ;;  %v7426_v50 = vld [vmem:[%s8227_s9 + $0x9d8] ss:$84 sps:$4 sm:$0xff]   ;;  %v7439_v60 = vld [vmem:[%s10099_s1 + $0x1c0] sm:$0xff]  }
  0x17   : > { %6181 = vmatpush3.bf16.msra.mxu0 %v7380_v9  ;;  %7358 = vmatpush3.bf16.msra.mxu1 %v7380_v9  ;;  %v7427_v48 = vld [vmem:[%s10099_s1 + $0xf0] sm:$0xff]   ;;  %v7433_v53 = vld [vmem:[%s8227_s9 + $0x2a4] ss:$84 sps:$4 sm:$0xff]   ;;  %v7437_v54 = vld [vmem:[%s8227_s9 + $0xc] ss:$84 sps:$4 sm:$0xff]  }
  0x18   : > { %6182 = vmatprep.subr.bf16.mxu0 %v7381_v10  ;;  %7351 = vmatprep.subr.bf16.mxu1 %v7381_v10  ;;  %v7428_v51 = vld [vmem:[%s10099_s1 + $0xb0] sm:$0xff]   ;;  %v7448_v56 = vld [vmem:[%s10099_s1 + $0x118] sm:$0xff]   ;;  %v7440_v61 = vld [vmem:[%s10099_s1 + $0x180] sm:$0xff]  }
  0x19   : > { %v7431_v57 = vld [vmem:[%s10099_s1 + $0xb8] sm:$0xff]   ;;  %v7441_v62 = vld [vmem:[%s8227_s9 + $0x34c] ss:$84 sps:$4 sm:$0xff]   ;;  %v7443_v63 = vld [vmem:[%s8227_s9 + $0xb4] ss:$84 sps:$4 sm:$0xff]  }
  0x1a   : > { %v7435_v58 = vld [vmem:[%s8227_s9 + $0x8] ss:$84 sps:$4 sm:$0xff]   ;;  %v7457_v0 = vld [vmem:[%s10099_s1 + $0x160] sm:$0xff]   ;;  %v7472_v9 = vld [vmem:[%s10099_s1 + $0x1d0] sm:$0xff]  }
  0x1b   : > { %6183 = vmatpush3.bf16.msra.mxu0 %v7382_v13  ;;  %7359 = vmatpush3.bf16.msra.mxu1 %v7382_v13  ;;  %v7455_v1 = vld [vmem:[%s10099_s1 + $0x1c8] sm:$0xff]   ;;  %v7458_v2 = vld [vmem:[%s10099_s1 + $0x120] sm:$0xff]   ;;  %v7451_v7 = vld [vmem:[%s8227_s9 + $0x15c] ss:$84 sps:$4 sm:$0xff]  }
  0x1c   : > { %6184 = vmatprep.subr.bf16.mxu0 %v7383_v14  ;;  %7352 = vmatprep.subr.bf16.mxu1 %v7383_v14  ;;  %v7456_v3 = vld [vmem:[%s10099_s1 + $0x188] sm:$0xff]   ;;  %v7446_v5 = vld [vmem:[%s8227_s9 + $0xb0] ss:$84 sps:$4 sm:$0xff]  }
  0x1d   : > { %v7445_v4 = vld [vmem:[%s8227_s9 + $0x348] ss:$84 sps:$4 sm:$0xff]   ;;  %v7474_v11 = vld [vmem:[%s10099_s1 + $0x190] sm:$0xff]   ;;  %v7454_v13 = vld [vmem:[%s8227_s9 + $0x158] ss:$84 sps:$4 sm:$0xff]  }
  0x1e   : > { %v7449_v6 = vld [vmem:[%s8227_s9 + $0x3f4] ss:$84 sps:$4 sm:$0xff]   ;;  %v7453_v12 = vld [vmem:[%s8227_s9 + $0x3f0] ss:$84 sps:$4 sm:$0xff]  }
  0x1f   : > { %6185 = vmatpush3.bf16.msra.mxu0 %v7384_v15  ;;  %7360 = vmatpush3.bf16.msra.mxu1 %v7384_v15  ;;  %v7471_v8 = vld [vmem:[%s10099_s1 + $0x168] sm:$0xff]   ;;  %v7459_v14 = vld [vmem:[%s8227_s9 + $0x49c] ss:$84 sps:$4 sm:$0xff]  }
  0x20   : > { %6186 = vmatprep.subr.bf16.mxu0 %v7385_v16  ;;  %7353 = vmatprep.subr.bf16.mxu1 %v7385_v16  ;;  %v7473_v10 = vld [vmem:[%s10099_s1 + $0x128] sm:$0xff]   ;;  %v7481_v15 = vld [vmem:[%s10099_s1 + $0x170] sm:$0xff]  }
  0x21   : > { %v7482_v16 = vld [vmem:[%s10099_s1 + $0x130] sm:$0xff]  }
  0x23   : > { %6187 = vmatpush3.bf16.msra.mxu0 %v7386_v17  ;;  %7361 = vmatpush3.bf16.msra.mxu1 %v7386_v17  ;;  %v7461_v17 = vld [vmem:[%s8227_s9 + $0x204] ss:$84 sps:$4 sm:$0xff]  }
  0x24   : > { %6284 = vmatprep.subr.bf16.mxu1 %v7393_v18  ;;  %6396 = vmatprep.subr.bf16.mxu0 %v7396_v21  ;;  %v7489_v18 = vld [vmem:[%s10099_s1 + $0x1d8] sm:$0xff]   ;;  %v7464_v21 = vld [vmem:[%s8227_s9 + $0x200] ss:$84 sps:$4 sm:$0xff]  }
  0x26   : > { %3595 = vmatmul.mubr.bf16.vlgmr.msra.gmra.mrb[0].mxu0 %v7387_v19  ;;  %3691 = vmatmul.mubr.bf16.vlgmr.msra.gmra.mrb[0].mxu1 %v7390_v20  ;;  %v7490_v19 = vld [vmem:[%s10099_s1 + $0x198] sm:$0xff]  }
  0x27   : > { %6285 = vmatpush3.bf16.msra.mxu1 %v7394_v22  ;;  %6397 = vmatpush3.bf16.msra.mxu0 %v7398_v24  ;;  %v7463_v20 = vld [vmem:[%s8227_s9 + $0x498] ss:$84 sps:$4 sm:$0xff]  }
  0x28   : > { %6286 = vmatprep.subr.bf16.mxu1 %v7395_v23  ;;  %3602 = vmatprep.mubr.bf16.mxu0 %v7399_v25  ;;  %v7465_v22 = vld [vmem:[%s8227_s9 + $0x544] ss:$84 sps:$4 sm:$0xff]   ;;  %v7467_v23 = vld [vmem:[%s8227_s9 + $0x2ac] ss:$84 sps:$4 sm:$0xff]  }
  0x29   : > { %3698 = vmatprep.mubr.bf16.mxu1 %v7401_v26  ;;  %6398 = vmatprep.subr.bf16.mxu0 %v7416_v28  ;;  %v7497_v24 = vld [vmem:[%s10099_s1 + $0x178] sm:$0xff]   ;;  %v7505_v26 = vld [vmem:[%s10099_s1 + $0x1e0] sm:$0xff]  }
  0x2a   : > { %v7498_v25 = vld [vmem:[%s10099_s1 + $0x138] sm:$0xff]  }
  0x2b   : > { %6287 = vmatpush3.bf16.msra.mxu1 %v7397_v27  ;;  %6399 = vmatpush3.bf16.msra.mxu0 %v7418_v33  ;;  %v7469_v27 = vld [vmem:[%s8227_s9 + $0x540] ss:$84 sps:$4 sm:$0xff]   ;;  %v7470_v28 = vld [vmem:[%s8227_s9 + $0x2a8] ss:$84 sps:$4 sm:$0xff]  }
  0x2c   : > { %6288 = vmatprep.subr.bf16.mxu1 %v7405_v31  ;;  %6400 = vmatprep.subr.bf16.mxu0 %v7430_v43  ;;  %v7475_v31 = vld [vmem:[%s8227_s9 + $0x5ec] ss:$84 sps:$4 sm:$0xff]   ;;  %v7479_v33 = vld [vmem:[%s8227_s9 + $0x5e8] ss:$84 sps:$4 sm:$0xff]   ;;  %v7537_v43 = vld [vmem:[%s10099_s1 + $0x1f0] sm:$0xff]  }
  0x2e   : > { %3603 = vmatmul.mubr.bf16.gmra.mrb[4].mxu0 %v7403_v29  ;;  %3699 = vmatmul.mubr.bf16.gmra.mrb[4].mxu1 %v7404_v30  ;;  %v7506_v29 = vld [vmem:[%s10099_s1 + $0x1a0] sm:$0xff]  }
  0x2f   : > { %6289 = vmatpush3.bf16.msra.mxu1 %v7406_v32  ;;  %3610 = vmatprep.mubr.bf16.mxu0 %v7409_v35  ;;  %v7507_v30 = vld [vmem:[%s10099_s1 + $0x240] sm:$0xff]   ;;  %v7477_v32 = vld [vmem:[%s8227_s9 + $0x354] ss:$84 sps:$4 sm:$0xff]  }
  0x30   : > { %6290 = vmatprep.subr.bf16.mxu1 %v7407_v34  ;;  %3706 = vmatprep.mubr.bf16.mxu1 %v7411_v36  ;;  %v7480_v34 = vld [vmem:[%s8227_s9 + $0x350] ss:$84 sps:$4 sm:$0xff]   ;;  %v7521_v35 = vld [vmem:[%s10099_s1 + $0x1e8] sm:$0xff]  }
  0x31   : > { %6401 = vmatpush3.bf16.msra.mxu0 %v7432_v46  ;;  %v7522_v36 = vld [vmem:[%s10099_s1 + $0x1a8] sm:$0xff]   ;;  %v7496_v46 = vld [vmem:[%s8227_s9 + $0x4a0] ss:$84 sps:$4 sm:$0xff]  }
  0x32   : > { %6402 = vmatprep.subr.bf16.mxu0 %v7447_v55  ;;  %v7511_v55 = vld [vmem:[%s8227_s9 + $0xbc] ss:$84 sps:$4 sm:$0xff]  }
  0x33   : > { %6291 = vmatpush3.bf16.msra.mxu1 %v7408_v37  ;;  %v7483_v37 = vld [vmem:[%s8227_s9 + $0x694] ss:$84 sps:$4 sm:$0xff]  }
  0x34   : > { %6292 = vmatprep.subr.bf16.mxu1 %v7415_v40  ;;  %v7488_v40 = vld [vmem:[%s8227_s9 + $0x3f8] ss:$84 sps:$4 sm:$0xff]  }
  0x35   : > { %6403 = vmatpush3.bf16.msra.mxu0 %v7448_v56  ;;  %v7523_v56 = vld [vmem:[%s10099_s1 + $0x248] sm:$0xff]  }
  0x36   : > { %3611 = vmatmul.mubr.bf16.gmra.mrb[8].mxu0 %v7413_v38  ;;  %3707 = vmatmul.mubr.bf16.gmra.mrb[8].mxu1 %v7414_v39  ;;  %v7485_v38 = vld [vmem:[%s8227_s9 + $0x3fc] ss:$84 sps:$4 sm:$0xff]  }
  0x37   : > { %6293 = vmatpush3.bf16.msra.mxu1 %v7417_v41  ;;  %3618 = vmatprep.mubr.bf16.mxu0 %v7421_v44  ;;  %v7487_v39 = vld [vmem:[%s8227_s9 + $0x690] ss:$84 sps:$4 sm:$0xff]  }
  0x38   : > { %6294 = vmatprep.subr.bf16.mxu1 %v7419_v42  ;;  %3714 = vmatprep.mubr.bf16.mxu1 %v7423_v45  ;;  %v7491_v41 = vld [vmem:[%s8227_s9 + $0x73c] ss:$84 sps:$4 sm:$0xff]   ;;  %v7493_v42 = vld [vmem:[%s8227_s9 + $0x4a4] ss:$84 sps:$4 sm:$0xff]  }
  0x39   : > { %6404 = vmatprep.subr.bf16.mxu0 %v7457_v0  ;;  %v7538_v44 = vld [vmem:[%s10099_s1 + $0x1b0] sm:$0xff]   ;;  %v7495_v45 = vld [vmem:[%s8227_s9 + $0x738] ss:$84 sps:$4 sm:$0xff]  }
  0x3a   : > { %6405 = vmatpush3.bf16.msra.mxu0 %v7458_v2  ;;  %v7540_v0 = vld [vmem:[%s10099_s1 + $0x210] sm:$0xff]   ;;  %v7519_v2 = vld [vmem:[%s8227_s9 + $0x698] ss:$84 sps:$4 sm:$0xff]  }
  0x3b   : > { %6295 = vmatpush3.bf16.msra.mxu1 %v7420_v47  ;;  %6406 = vmatprep.subr.bf16.mxu0 %v7471_v8  ;;  %v7499_v47 = vld [vmem:[%s8227_s9 + $0x54c] ss:$84 sps:$4 sm:$0xff]  }
  0x3c   : > { %6296 = vmatprep.subr.bf16.mxu1 %v7427_v48  ;;  %v7503_v48 = vld [vmem:[%s8227_s9 + $0x14] ss:$84 sps:$4 sm:$0xff]   ;;  %v7572_v8 = vld [vmem:[%s10099_s1 + $0x220] sm:$0xff]  }
  0x3e   : > { %3619 = vmatmul.mubr.bf16.gmra.mrb[12].mxu0 %v7425_v49  ;;  %3715 = vmatmul.mubr.bf16.gmra.mrb[12].mxu1 %v7426_v50  ;;  %v7553_v49 = vld [vmem:[%s10099_s1 + $0x1f8] sm:$0xff]  }
  0x3f   : > { %6297 = vmatpush3.bf16.msra.mxu1 %v7428_v51  ;;  %3626 = vmatprep.mubr.bf16.mxu0 %v7433_v53  ;;  %v7554_v50 = vld [vmem:[%s10099_s1 + $0x1b8] sm:$0xff]   ;;  %v7501_v51 = vld [vmem:[%s8227_s9 + $0x10] ss:$84 sps:$4 sm:$0xff]  }
  0x40   : > { %6298 = vmatprep.subr.bf16.mxu1 %v7429_v52  ;;  %3755 = vmatprep.mubr.bf16.mxu1 %v7437_v54  ;;  %v7504_v52 = vld [vmem:[%s8227_s9 + $0x548] ss:$84 sps:$4 sm:$0xff]   ;;  %v7508_v53 = vld [vmem:[%s10099_s1 + $0x200] sm:$0xff]  }
  0x41   : > { %6407 = vmatpush3.bf16.msra.mxu0 %v7473_v10  ;;  %v7509_v54 = vld [vmem:[%s8227_s9 + $0x5f4] ss:$84 sps:$4 sm:$0xff]  }
  0x42   : > { %6408 = vmatprep.subr.bf16.mxu0 %v7481_v15  ;;  %v7529_v10 = vld [vmem:[%s8227_s9 + $0x740] ss:$84 sps:$4 sm:$0xff]  }
  0x43   : > { %6299 = vmatpush3.bf16.msra.mxu1 %v7431_v57  ;;  %v7569_v57 = vld [vmem:[%s10099_s1 + $0x2c0] sm:$0xff]   ;;  %v7533_v15 = vld [vmem:[%s8227_s9 + $0x2b4] ss:$84 sps:$4 sm:$0xff]  }
  0x44   : > { %6508 = vmatprep.subr.bf16.mxu1 %v7439_v60  ;;  %v7513_v60 = vld [vmem:[%s8227_s9 + $0x5f0] ss:$84 sps:$4 sm:$0xff]  }
  0x45   : > { %6409 = vmatpush3.bf16.msra.mxu0 %v7482_v16  ;;  %v7604_v16 = vld [vmem:[%s10099_s1 + $0x230] sm:$0xff]  }
  0x46   : > { %3627 = vmatmul.mubr.bf16.gmra.mrb[16].mxu0 %v7438_v59  ;;  %3756 = vmatmul.mubr.bf16.vlgmr.msra.gmra.mrb[16].mxu1 %v7435_v58  ;;  %v7524_v58 = vld [vmem:[%s10099_s1 + $0x208] sm:$0xff]   ;;  %v7539_v59 = vld [vmem:[%s10099_s1 + $0x250] sm:$0xff]  }
  0x47   : > { %6509 = vmatpush3.bf16.msra.mxu1 %v7440_v61  ;;  %3634 = vmatprep.mubr.bf16.mxu0 %v7441_v62  ;;  %v7514_v61 = vld [vmem:[%s8227_s9 + $0xb8] ss:$84 sps:$4 sm:$0xff]   ;;  %v7515_v62 = vld [vmem:[%s8227_s9 + $0x69c] ss:$84 sps:$4 sm:$0xff]  }
  0x48   : > { %3763 = vmatprep.mubr.bf16.mxu1 %v7443_v63  ;;  %6510 = vmatprep.subr.bf16.mxu1 %v7455_v1  ;;  %v7517_v63 = vld [vmem:[%s8227_s9 + $0x164] ss:$84 sps:$4 sm:$0xff]  }
  0x49   : > { %6410 = vmatprep.subr.bf16.mxu0 %v7497_v24  ;;  %v7555_v1 = vld [vmem:[%s10099_s1 + $0x258] sm:$0xff]  }
  0x4a   : > { %6411 = vmatpush3.bf16.msra.mxu0 %v7498_v25  ;;  %v7546_v24 = vld [vmem:[%s8227_s9 + $0x358] ss:$84 sps:$4 sm:$0xff]   ;;  %v7547_v25 = vld [vmem:[%s8227_s9 + $0x93c] ss:$84 sps:$4 sm:$0xff]  }
  0x4b   : > { %6511 = vmatpush3.bf16.msra.mxu1 %v7456_v3  ;;  %6620 = vmatprep.subr.bf16.mxu0 %v7507_v30  ;;  %v7556_v3 = vld [vmem:[%s10099_s1 + $0x218] sm:$0xff]  }
  0x4c   : > { %6512 = vmatprep.subr.bf16.mxu1 %v7472_v9  ;;  %v7587_v9 = vld [vmem:[%s10099_s1 + $0x268] sm:$0xff]   ;;  %v7557_v30 = vld [vmem:[%s8227_s9 + $0x9e4] ss:$84 sps:$4 sm:$0xff]  }
  0x4e   : > { %3635 = vmatmul.mubr.bf16.gmra.mrb[20].mxu0 %v7445_v4  ;;  %3764 = vmatmul.mubr.bf16.gmra.mrb[20].mxu1 %v7446_v5  ;;  %v7571_v4 = vld [vmem:[%s10099_s1 + $0x260] sm:$0xff]  }
  0x4f   : > { %3642 = vmatprep.mubr.bf16.mxu0 %v7449_v6  ;;  %3771 = vmatprep.mubr.bf16.mxu1 %v7451_v7  ;;  %v7520_v5 = vld [vmem:[%s8227_s9 + $0x160] ss:$84 sps:$4 sm:$0xff]   ;;  %v7525_v6 = vld [vmem:[%s8227_s9 + $0x744] ss:$84 sps:$4 sm:$0xff]  }
  0x50   : > { %6513 = vmatpush3.bf16.msra.mxu1 %v7474_v11  ;;  %v7527_v7 = vld [vmem:[%s8227_s9 + $0x20c] ss:$84 sps:$4 sm:$0xff]   ;;  %v7530_v11 = vld [vmem:[%s8227_s9 + $0x208] ss:$84 sps:$4 sm:$0xff]  }
  0x51   : > { %6514 = vmatprep.subr.bf16.mxu1 %v7489_v18  ;;  %v7536_v18 = vld [vmem:[%s8227_s9 + $0x2b0] ss:$84 sps:$4 sm:$0xff]  }
  0x54   : > { %6515 = vmatpush3.bf16.msra.mxu1 %v7490_v19  ;;  %v7541_v19 = vld [vmem:[%s8227_s9 + $0x894] ss:$84 sps:$4 sm:$0xff]  }
  0x55   : > { %6516 = vmatprep.subr.bf16.mxu1 %v7505_v26  ;;  %v7549_v26 = vld [vmem:[%s8227_s9 + $0x404] ss:$84 sps:$4 sm:$0xff]  }
  0x56   : > { %3643 = vmatmul.mubr.bf16.gmra.mrb[24].mxu0 %v7453_v12  ;;  %3772 = vmatmul.mubr.bf16.gmra.mrb[24].mxu1 %v7454_v13  ;;  %v7588_v12 = vld [vmem:[%s10099_s1 + $0x228] sm:$0xff]   ;;  %v7603_v13 = vld [vmem:[%s10099_s1 + $0x270] sm:$0xff]  }
  0x57   : > { %3650 = vmatprep.mubr.bf16.mxu0 %v7459_v14  ;;  %3779 = vmatprep.mubr.bf16.mxu1 %v7461_v17  ;;  %v7531_v14 = vld [vmem:[%s8227_s9 + $0x7ec] ss:$84 sps:$4 sm:$0xff]   ;;  %v7535_v17 = vld [vmem:[%s8227_s9 + $0x7e8] ss:$84 sps:$4 sm:$0xff]  }
  0x58   : > { %6517 = vmatpush3.bf16.msra.mxu1 %v7506_v29  ;;  %v7552_v29 = vld [vmem:[%s8227_s9 + $0x400] ss:$84 sps:$4 sm:$0xff]  }
  0x59   : > { %6518 = vmatprep.subr.bf16.mxu1 %v7521_v35  ;;  %v7567_v35 = vld [vmem:[%s8227_s9 + $0x1c] ss:$84 sps:$4 sm:$0xff]  }
  0x5c   : > { %6519 = vmatpush3.bf16.msra.mxu1 %v7522_v36  ;;  %v7565_v36 = vld [vmem:[%s8227_s9 + $0x18] ss:$84 sps:$4 sm:$0xff]  }
  0x5d   : > { %6520 = vmatprep.subr.bf16.mxu1 %v7537_v43  ;;  %v7601_v43 = vld [vmem:[%s10099_s1 + $0x2d0] sm:$0xff]  }
  0x5e   : > { %3651 = vmatmul.mubr.bf16.gmra.mrb[28].mxu0 %v7463_v20  ;;  %3780 = vmatmul.mubr.bf16.gmra.mrb[28].mxu1 %v7464_v21  ;;  %v7543_v20 = vld [vmem:[%s8227_s9 + $0x35c] ss:$84 sps:$4 sm:$0xff]  }
  0x5f   : > { %3658 = vmatprep.mubr.bf16.mxu0 %v7465_v22  ;;  %3787 = vmatprep.mubr.bf16.mxu1 %v7467_v23  ;;  %v7619_v21 = vld [vmem:[%s10099_s1 + $0x278] sm:$0xff]   ;;  %v7545_v23 = vld [vmem:[%s8227_s9 + $0x890] ss:$84 sps:$4 sm:$0xff]  }
  0x60   : > { %6521 = vmatpush3.bf16.msra.mxu1 %v7538_v44  ;;  %v7620_v22 = vld [vmem:[%s10099_s1 + $0x238] sm:$0xff]  }
  0x61   : > { %6522 = vmatprep.subr.bf16.mxu1 %v7553_v49  ;;  %v7577_v44 = vld [vmem:[%s8227_s9 + $0x5f8] ss:$84 sps:$4 sm:$0xff]  }
  0x62   : > { %v7617_v49 = vld [vmem:[%s10099_s1 + $0x2d8] sm:$0xff]  }
  0x64   : > { %6523 = vmatpush3.bf16.msra.mxu1 %v7554_v50  ;;  %v7583_v50 = vld [vmem:[%s8227_s9 + $0x6a0] ss:$84 sps:$4 sm:$0xff]  }
  0x65   : > { %6732 = vmatprep.subr.bf16.mxu1 %v7569_v57  ;;  %v7649_v57 = vld [vmem:[%s10099_s1 + $0x2e8] sm:$0xff]  }
  0x66   : > { %3659 = vmatmul.mubr.bf16.gmra.mrb[32].mxu0 %v7469_v27  ;;  %3788 = vmatmul.mubr.bf16.gmra.mrb[32].mxu1 %v7470_v28  ;;  %v7635_v27 = vld [vmem:[%s10099_s1 + $0x340] sm:$0xff]   ;;  %v7551_v28 = vld [vmem:[%s8227_s9 + $0x938] ss:$84 sps:$4 sm:$0xff]  }
  0x67   : > { %3666 = vmatprep.mubr.bf16.mxu0 %v7475_v31  ;;  %3795 = vmatprep.mubr.bf16.mxu1 %v7477_v32  ;;  %v7559_v31 = vld [vmem:[%s8227_s9 + $0x4ac] ss:$84 sps:$4 sm:$0xff]  }
  0x68   : > { %v7561_v32 = vld [vmem:[%s8227_s9 + $0x9e0] ss:$84 sps:$4 sm:$0xff]  }
  0x6e   : > { %3667 = vmatmul.mubr.bf16.gmra.mrb[36].mxu0 %v7479_v33  ;;  %3796 = vmatmul.mubr.bf16.gmra.mrb[36].mxu1 %v7480_v34  ;;  %v7562_v33 = vld [vmem:[%s8227_s9 + $0x4a8] ss:$84 sps:$4 sm:$0xff]  }
  0x6f   : > { %3674 = vmatprep.mubr.bf16.mxu0 %v7483_v37  ;;  %3803 = vmatprep.mubr.bf16.mxu1 %v7485_v38  ;;  %v7563_v34 = vld [vmem:[%s8227_s9 + $0x554] ss:$84 sps:$4 sm:$0xff]   ;;  %v7568_v37 = vld [vmem:[%s8227_s9 + $0x550] ss:$84 sps:$4 sm:$0xff]  }
  0x70   : > { %v7570_v38 = vld [vmem:[%s10099_s1 + $0x280] sm:$0xff]  }
  0x76   : > { %3675 = vmatmul.mubr.bf16.gmra.mrb[40].mxu0 %v7487_v39  ;;  %3804 = vmatmul.mubr.bf16.gmra.mrb[40].mxu1 %v7488_v40  ;;  %v7573_v39 = vld [vmem:[%s8227_s9 + $0x5fc] ss:$84 sps:$4 sm:$0xff]   ;;  %v7575_v40 = vld [vmem:[%s8227_s9 + $0xc4] ss:$84 sps:$4 sm:$0xff]  }
  0x77   : > { %3682 = vmatprep.mubr.bf16.mxu0 %v7491_v41  ;;  %3811 = vmatprep.mubr.bf16.mxu1 %v7493_v42  ;;  %v7585_v41 = vld [vmem:[%s10099_s1 + $0x2c8] sm:$0xff]  }
  0x78   : > { %v7586_v42 = vld [vmem:[%s10099_s1 + $0x288] sm:$0xff]  }
  0x7e   : > { %3683 = vmatmul.mubr.bf16.gmra.mrb[44].mxu0 %v7495_v45  ;;  %3812 = vmatmul.mubr.bf16.gmra.mrb[44].mxu1 %v7496_v46  ;;  %v7578_v45 = vld [vmem:[%s8227_s9 + $0xc0] ss:$84 sps:$4 sm:$0xff]   ;;  %v7579_v46 = vld [vmem:[%s8227_s9 + $0x6a4] ss:$84 sps:$4 sm:$0xff]  }
  0x7f   : > { %3819 = vmatprep.mubr.bf16.mxu1 %v7499_v47  ;;  %3916 = vmatprep.mubr.bf16.mxu0 %v7503_v48  ;;  %v7581_v47 = vld [vmem:[%s8227_s9 + $0x16c] ss:$84 sps:$4 sm:$0xff]   ;;  %v7602_v48 = vld [vmem:[%s10099_s1 + $0x290] sm:$0xff]  }
  0x86   : > { %3820 = vmatmul.mubr.bf16.gmra.mrb[48].mxu1 %v7504_v52  ;;  %3917 = vmatmul.mubr.bf16.vlgmr.msra.gmra.mrb[48].mxu0 %v7501_v51  ;;  %v7584_v51 = vld [vmem:[%s8227_s9 + $0x168] ss:$84 sps:$4 sm:$0xff]  }
  0x87   : > { %6621 = vmatpush3.bf16.msra.mxu0 %v7508_v53  ;;  %3827 = vmatprep.mubr.bf16.mxu1 %v7509_v54  ;;  %v7618_v52 = vld [vmem:[%s10099_s1 + $0x298] sm:$0xff]   ;;  %v7633_v53 = vld [vmem:[%s10099_s1 + $0x2e0] sm:$0xff]  }
  0x88   : > { %3924 = vmatprep.mubr.bf16.mxu0 %v7511_v55  ;;  %6622 = vmatprep.subr.bf16.mxu0 %v7523_v56  ;;  %v7589_v54 = vld [vmem:[%s8227_s9 + $0x74c] ss:$84 sps:$4 sm:$0xff]   ;;  %v7591_v55 = vld [vmem:[%s8227_s9 + $0x214] ss:$84 sps:$4 sm:$0xff]  }
  0x89   : > { %v7634_v56 = vld [vmem:[%s10099_s1 + $0x2a0] sm:$0xff]  }
  0x8b   : > { %6623 = vmatpush3.bf16.msra.mxu0 %v7524_v58  ;;  %v7593_v58 = vld [vmem:[%s8227_s9 + $0x748] ss:$84 sps:$4 sm:$0xff]  }
  0x8c   : > { %6624 = vmatprep.subr.bf16.mxu0 %v7539_v59  ;;  %v7594_v59 = vld [vmem:[%s8227_s9 + $0x210] ss:$84 sps:$4 sm:$0xff]  }
  0x8e   : > { %3828 = vmatmul.mubr.bf16.gmra.mrb[52].mxu1 %v7513_v60  ;;  %3925 = vmatmul.mubr.bf16.gmra.mrb[52].mxu0 %v7514_v61  ;;  %v7650_v60 = vld [vmem:[%s10099_s1 + $0x2a8] sm:$0xff]   ;;  %v7665_v61 = vld [vmem:[%s10099_s1 + $0x2f0] sm:$0xff]  }
  0x8f   : > { %3835 = vmatprep.mubr.bf16.mxu1 %v7515_v62  ;;  %3932 = vmatprep.mubr.bf16.mxu0 %v7517_v63  ;;  %v7595_v62 = vld [vmem:[%s8227_s9 + $0x7f4] ss:$84 sps:$4 sm:$0xff]   ;;  %v7597_v63 = vld [vmem:[%s8227_s9 + $0x2bc] ss:$84 sps:$4 sm:$0xff]  }
  0x90   : > { %6625 = vmatpush3.bf16.msra.mxu0 %v7540_v0  ;;  %v7666_v0 = vld [vmem:[%s10099_s1 + $0x2b0] sm:$0xff]  }
  0x91   : > { %6626 = vmatprep.subr.bf16.mxu0 %v7555_v1  ;;  %v7681_v1 = vld [vmem:[%s10099_s1 + $0x2f8] sm:$0xff]  }
  0x94   : > { %6627 = vmatpush3.bf16.msra.mxu0 %v7556_v3  ;;  %v7697_v3 = vld [vmem:[%s10099_s1 + $0x3c0] sm:$0xff]  }
  0x95   : > { %6628 = vmatprep.subr.bf16.mxu0 %v7571_v4  ;;  %v7599_v4 = vld [vmem:[%s8227_s9 + $0x7f0] ss:$84 sps:$4 sm:$0xff]  }
  0x96   : > { %3836 = vmatmul.mubr.bf16.gmra.mrb[56].mxu1 %v7519_v2  ;;  %3933 = vmatmul.mubr.bf16.gmra.mrb[56].mxu0 %v7520_v5  ;;  %v7682_v2 = vld [vmem:[%s10099_s1 + $0x2b8] sm:$0xff]  }
  0x97   : > { %3843 = vmatprep.mubr.bf16.mxu1 %v7525_v6  ;;  %3940 = vmatprep.mubr.bf16.mxu0 %v7527_v7  ;;  %v7600_v5 = vld [vmem:[%s8227_s9 + $0x2b8] ss:$84 sps:$4 sm:$0xff]   ;;  %v7605_v6 = vld [vmem:[%s8227_s9 + $0x89c] ss:$84 sps:$4 sm:$0xff]  }
  0x98   : > { %6629 = vmatpush3.bf16.msra.mxu0 %v7572_v8  ;;  %v7607_v7 = vld [vmem:[%s8227_s9 + $0x364] ss:$84 sps:$4 sm:$0xff]  }
  0x99   : > { %6630 = vmatprep.subr.bf16.mxu0 %v7587_v9  ;;  %v7609_v8 = vld [vmem:[%s8227_s9 + $0x898] ss:$84 sps:$4 sm:$0xff]   ;;  %v7610_v9 = vld [vmem:[%s8227_s9 + $0x360] ss:$84 sps:$4 sm:$0xff]  }
  0x9c   : > { %6631 = vmatpush3.bf16.msra.mxu0 %v7588_v12  ;;  %v7615_v12 = vld [vmem:[%s8227_s9 + $0x940] ss:$84 sps:$4 sm:$0xff]  }
  0x9d   : > { %6632 = vmatprep.subr.bf16.mxu0 %v7603_v13  ;;  %v7616_v13 = vld [vmem:[%s8227_s9 + $0x408] ss:$84 sps:$4 sm:$0xff]  }
  0x9e   : > { %3844 = vmatmul.mubr.bf16.gmra.mrb[60].mxu1 %v7529_v10  ;;  %3941 = vmatmul.mubr.bf16.gmra.mrb[60].mxu0 %v7530_v11  ;;  %v7611_v10 = vld [vmem:[%s8227_s9 + $0x944] ss:$84 sps:$4 sm:$0xff]   ;;  %v7613_v11 = vld [vmem:[%s8227_s9 + $0x40c] ss:$84 sps:$4 sm:$0xff]  }
  0x9f   : > { %3851 = vmatprep.mubr.bf16.mxu1 %v7531_v14  ;;  %3948 = vmatprep.mubr.bf16.mxu0 %v7533_v15  ;;  %v7621_v14 = vld [vmem:[%s8227_s9 + $0x9ec] ss:$84 sps:$4 sm:$0xff]   ;;  %v7623_v15 = vld [vmem:[%s8227_s9 + $0x4b4] ss:$84 sps:$4 sm:$0xff]  }
  0xa0   : > { %6633 = vmatpush3.bf16.msra.mxu0 %v7604_v16  ;;  %v7625_v16 = vld [vmem:[%s8227_s9 + $0x9e8] ss:$84 sps:$4 sm:$0xff]  }
  0xa1   : > { %6634 = vmatprep.subr.bf16.mxu0 %v7619_v21 }
  0xa4   : > { %6635 = vmatpush3.bf16.msra.mxu0 %v7620_v22 }
  0xa5   : > { %6844 = vmatprep.subr.bf16.mxu0 %v7635_v27  ;;  %v7631_v27 = vld [vmem:[%s8227_s9 + $0x24] ss:$84 sps:$4 sm:$0xff]  }
  0xa6   : > { %3852 = vmatmul.mubr.bf16.gmra.mrb[64].mxu1 %v7535_v17  ;;  %3949 = vmatmul.mubr.bf16.gmra.mrb[64].mxu0 %v7536_v18  ;;  %v7626_v17 = vld [vmem:[%s8227_s9 + $0x4b0] ss:$84 sps:$4 sm:$0xff]  }
  0xa7   : > { %3859 = vmatprep.mubr.bf16.mxu1 %v7541_v19  ;;  %3956 = vmatprep.mubr.bf16.mxu0 %v7543_v20 }
  0xae   : > { %3860 = vmatmul.mubr.bf16.gmra.mrb[68].mxu1 %v7545_v23  ;;  %3957 = vmatmul.mubr.bf16.gmra.mrb[68].mxu0 %v7546_v24 }
  0xaf   : > { %3867 = vmatprep.mubr.bf16.mxu1 %v7547_v25  ;;  %3964 = vmatprep.mubr.bf16.mxu0 %v7549_v26  ;;  %v7627_v26 = vld [vmem:[%s8227_s9 + $0x55c] ss:$84 sps:$4 sm:$0xff]  }
  0xb6   : > { %3868 = vmatmul.mubr.bf16.gmra.mrb[72].mxu1 %v7551_v28  ;;  %3965 = vmatmul.mubr.bf16.gmra.mrb[72].mxu0 %v7552_v29 }
  0xb7   : > { %3875 = vmatprep.mubr.bf16.mxu1 %v7557_v30  ;;  %3972 = vmatprep.mubr.bf16.mxu0 %v7559_v31 }
  0xbe   : > { %3876 = vmatmul.mubr.bf16.gmra.mrb[76].mxu1 %v7561_v32  ;;  %3973 = vmatmul.mubr.bf16.gmra.mrb[76].mxu0 %v7562_v33  ;;  %v7629_v32 = vld [vmem:[%s8227_s9 + $0x20] ss:$84 sps:$4 sm:$0xff]   ;;  %v7632_v33 = vld [vmem:[%s8227_s9 + $0x558] ss:$84 sps:$4 sm:$0xff]  }
  0xbf   : > { %3980 = vmatprep.mubr.bf16.mxu0 %v7563_v34  ;;  %4077 = vmatprep.mubr.bf16.mxu1 %v7567_v35 }
  0xc6   : > { %3981 = vmatmul.mubr.bf16.gmra.mrb[80].mxu0 %v7568_v37  ;;  %4078 = vmatmul.mubr.bf16.vlgmr.msra.gmra.mrb[80].mxu1 %v7565_v36 }
  0xc7   : > { %6733 = vmatpush3.bf16.msra.mxu1 %v7570_v38  ;;  %3988 = vmatprep.mubr.bf16.mxu0 %v7573_v39 }
  0xc8   : > { %4085 = vmatprep.mubr.bf16.mxu1 %v7575_v40  ;;  %6734 = vmatprep.subr.bf16.mxu1 %v7585_v41 }
  0xcb   : > { %6735 = vmatpush3.bf16.msra.mxu1 %v7586_v42  ;;  %v7636_v42 = vld [vmem:[%s10099_s1 + $0x300] sm:$0xff]  }
  0xcc   : > { %6736 = vmatprep.subr.bf16.mxu1 %v7601_v43  ;;  %v7637_v43 = vld [vmem:[%s8227_s9 + $0x604] ss:$84 sps:$4 sm:$0xff]  }
  0xce   : > { %3989 = vmatmul.mubr.bf16.gmra.mrb[84].mxu0 %v7577_v44  ;;  %4086 = vmatmul.mubr.bf16.gmra.mrb[84].mxu1 %v7578_v45 }
  0xcf   : > { %3996 = vmatprep.mubr.bf16.mxu0 %v7579_v46  ;;  %4093 = vmatprep.mubr.bf16.mxu1 %v7581_v47  ;;  %v7639_v46 = vld [vmem:[%s8227_s9 + $0xcc] ss:$84 sps:$4 sm:$0xff]  }
  0xd0   : > { %6737 = vmatpush3.bf16.msra.mxu1 %v7602_v48  ;;  %v7651_v47 = vld [vmem:[%s10099_s1 + $0x348] sm:$0xff]  }
  0xd1   : > { %6738 = vmatprep.subr.bf16.mxu1 %v7617_v49 }
  0xd4   : > { %6739 = vmatpush3.bf16.msra.mxu1 %v7618_v52  ;;  %v7641_v52 = vld [vmem:[%s8227_s9 + $0x600] ss:$84 sps:$4 sm:$0xff]  }
  0xd5   : > { %6740 = vmatprep.subr.bf16.mxu1 %v7633_v53  ;;  %v7642_v53 = vld [vmem:[%s8227_s9 + $0xc8] ss:$84 sps:$4 sm:$0xff]  }
  0xd6   : > { %3997 = vmatmul.mubr.bf16.gmra.mrb[88].mxu0 %v7583_v50  ;;  %4094 = vmatmul.mubr.bf16.gmra.mrb[88].mxu1 %v7584_v51  ;;  %v7652_v50 = vld [vmem:[%s10099_s1 + $0x308] sm:$0xff]   ;;  %v7667_v51 = vld [vmem:[%s10099_s1 + $0x350] sm:$0xff]  }
  0xd7   : > { %4004 = vmatprep.mubr.bf16.mxu0 %v7589_v54  ;;  %4101 = vmatprep.mubr.bf16.mxu1 %v7591_v55 }
  0xd8   : > { %6741 = vmatpush3.bf16.msra.mxu1 %v7634_v56 }
  0xd9   : > { %6742 = vmatprep.subr.bf16.mxu1 %v7649_v57 }
  0xdc   : > { %6743 = vmatpush3.bf16.msra.mxu1 %v7650_v60 }
  0xdd   : > { %6744 = vmatprep.subr.bf16.mxu1 %v7665_v61 }
  0xde   : > { %4005 = vmatmul.mubr.bf16.gmra.mrb[92].mxu0 %v7593_v58  ;;  %4102 = vmatmul.mubr.bf16.gmra.mrb[92].mxu1 %v7594_v59 }
  0xdf   : > { %4012 = vmatprep.mubr.bf16.mxu0 %v7595_v62  ;;  %4109 = vmatprep.mubr.bf16.mxu1 %v7597_v63  ;;  %v7643_v62 = vld [vmem:[%s8227_s9 + $0x6ac] ss:$84 sps:$4 sm:$0xff]   ;;  %v7645_v63 = vld [vmem:[%s8227_s9 + $0x174] ss:$84 sps:$4 sm:$0xff]  }
  0xe0   : > { %6745 = vmatpush3.bf16.msra.mxu1 %v7666_v0 }
  0xe1   : > { %6746 = vmatprep.subr.bf16.mxu1 %v7681_v1 }
  0xe4   : > { %6747 = vmatpush3.bf16.msra.mxu1 %v7682_v2  ;;  %v7668_v2 = vld [vmem:[%s10099_s1 + $0x310] sm:$0xff]  }
  0xe5   : > { %6956 = vmatprep.subr.bf16.mxu1 %v7697_v3 }
  0xe6   : > { %4013 = vmatmul.mubr.bf16.gmra.mrb[96].mxu0 %v7599_v4  ;;  %4110 = vmatmul.mubr.bf16.gmra.mrb[96].mxu1 %v7600_v5  ;;  %v7683_v5 = vld [vmem:[%s10099_s1 + $0x358] sm:$0xff]  }
  0xe7   : > { %4020 = vmatprep.mubr.bf16.mxu0 %v7605_v6  ;;  %4117 = vmatprep.mubr.bf16.mxu1 %v7607_v7  ;;  %v7684_v6 = vld [vmem:[%s10099_s1 + $0x318] sm:$0xff]   ;;  %v7699_v7 = vld [vmem:[%s10099_s1 + $0x360] sm:$0xff]  }
  0xee   : > { %4021 = vmatmul.mubr.bf16.gmra.mrb[100].mxu0 %v7609_v8  ;;  %4118 = vmatmul.mubr.bf16.gmra.mrb[100].mxu1 %v7610_v9  ;;  %v7647_v8 = vld [vmem:[%s8227_s9 + $0x6a8] ss:$84 sps:$4 sm:$0xff]   ;;  %v7648_v9 = vld [vmem:[%s8227_s9 + $0x170] ss:$84 sps:$4 sm:$0xff]  }
  0xef   : > { %4028 = vmatprep.mubr.bf16.mxu0 %v7611_v10  ;;  %4125 = vmatprep.mubr.bf16.mxu1 %v7613_v11 }
  0xf6   : > { %4029 = vmatmul.mubr.bf16.gmra.mrb[104].mxu0 %v7615_v12  ;;  %4126 = vmatmul.mubr.bf16.gmra.mrb[104].mxu1 %v7616_v13 }
  0xf7   : > { %4036 = vmatprep.mubr.bf16.mxu0 %v7621_v14  ;;  %4133 = vmatprep.mubr.bf16.mxu1 %v7623_v15 }
  0xf9   : > { %v6260_v18 = vpop.f32.mrb[0].mxu1  ;;  %v6188_v19 = vpop.f32.mrb[0].mxu0 }
  0xfa   : > { %v6261_v20 = vpop.f32.mrb[1].mxu1  ;;  %v6189_v21 = vpop.f32.mrb[1].mxu0 }
  0xfb   : > { %v8608_v22 = vadd.f32 %v6261_v20, %v6260_v18  ;;  %v6263_v23 = vpop.f32.mrb[2].mxu1  ;;  %v8610_v24 = vadd.f32 %v6189_v21, %v6188_v19  ;;  %v6191_v25 = vpop.f32.mrb[2].mxu0  ;;  %v7653_v18 = vld [vmem:[%s8227_s9 + $0x754] ss:$84 sps:$4 sm:$0xff]   ;;  %v7655_v19 = vld [vmem:[%s8227_s9 + $0x21c] ss:$84 sps:$4 sm:$0xff]  }
  0xfc   : > { %v6264_v28 = vpop.f32.mrb[3].mxu1  ;;  %v6192_v29 = vpop.f32.mrb[3].mxu0 }
  0xfd   : > { %v8614_v30 = vadd.f32 %v6264_v28, %v6263_v23  ;;  %v8616_v31 = vadd.f32 %v6192_v29, %v6191_v25  ;;  %v7700_v23 = vld [vmem:[%s10099_s1 + $0x320] sm:$0xff]   ;;  %v7715_v25 = vld [vmem:[%s10099_s1 + $0x368] sm:$0xff]   ;;  %v7731_v29 = vld [vmem:[%s10099_s1 + $0x370] sm:$0xff]  }
  0xfe   : > { %4037 = vmatmul.mubr.bf16.gmra.mrb[108].mxu0 %v7625_v16  ;;  %4134 = vmatmul.mubr.bf16.gmra.mrb[108].mxu1 %v7626_v17  ;;  %v7716_v28 = vld [vmem:[%s10099_s1 + $0x328] sm:$0xff]  }
  0xff   : > { %4141 = vmatprep.mubr.bf16.mxu1 %v7627_v26  ;;  %4238 = vmatprep.mubr.bf16.mxu0 %v7631_v27 }
 0x101   : > { %v6266_v34 = vpop.f32.mrb[4].mxu1  ;;  %v6194_v35 = vpop.f32.mrb[4].mxu0 }
 0x102   : > { %v6267_v36 = vpop.f32.mrb[5].mxu1  ;;  %v6195_v37 = vpop.f32.mrb[5].mxu0 }
 0x103   : > { %v8620_v38 = vadd.f32 %v6267_v36, %v6266_v34  ;;  %v6269_v39 = vpop.f32.mrb[6].mxu1  ;;  %v8622_v40 = vadd.f32 %v6195_v37, %v6194_v35  ;;  %v6197_v41 = vpop.f32.mrb[6].mxu0  ;;  %v7658_v34 = vld [vmem:[%s8227_s9 + $0x218] ss:$84 sps:$4 sm:$0xff]  }
 0x104   : > { %v6270_v44 = vpop.f32.mrb[7].mxu1  ;;  %v6198_v45 = vpop.f32.mrb[7].mxu0 }
 0x105   : > { %v8632_v48 = vadd.f32 %v6270_v44, %v6269_v39  ;;  %v8634_v49 = vadd.f32 %v6198_v45, %v6197_v41 }
 0x106   : > { %4142 = vmatmul.mubr.bf16.gmra.mrb[112].mxu1 %v7632_v33  ;;  %4239 = vmatmul.mubr.bf16.vlgmr.msra.gmra.mrb[112].mxu0 %v7629_v32  ;;  %v8693_v32 = vld [vmem:[%s10100_s2] ss:$0 sm:$0xff]  ;;  %v7657_v33 = vld [vmem:[%s8227_s9 + $0x750] ss:$84 sps:$4 sm:$0xff]  }
 0x107   : > { %6845 = vmatpush3.bf16.msra.mxu0 %v7636_v42  ;;  %4149 = vmatprep.mubr.bf16.mxu1 %v7637_v43  ;;  %v3597_v41 = vadd.f32 %v8610_v24, %v8693_v32 }
 0x108   : > { %4246 = vmatprep.mubr.bf16.mxu0 %v7639_v46  ;;  %6846 = vmatprep.subr.bf16.mxu0 %v7651_v47  ;;  %v7659_v46 = vld [vmem:[%s8227_s9 + $0x7fc] ss:$84 sps:$4 sm:$0xff]   ;;  %v7661_v47 = vld [vmem:[%s8227_s9 + $0x2c4] ss:$84 sps:$4 sm:$0xff]  }
 0x109   : > { %v6272_v54 = vpop.f32.mrb[8].mxu1  ;;  %v6200_v55 = vpop.f32.mrb[8].mxu0 }
 0x10a   : > { %v6273_v56 = vpop.f32.mrb[9].mxu1  ;;  %v6201_v57 = vpop.f32.mrb[9].mxu0 }
 0x10b   : > { %v8644_v58 = vadd.f32 %v6273_v56, %v6272_v54  ;;  %v6275_v59 = vpop.f32.mrb[10].mxu1  ;;  %v8646_v60 = vadd.f32 %v6201_v57, %v6200_v55  ;;  %v6203_v61 = vpop.f32.mrb[10].mxu0  ;;  %6847 = vmatpush3.bf16.msra.mxu0 %v7652_v50  ;;  %v7747_v56 = vld [vmem:[%s10099_s1 + $0x378] sm:$0xff]  }
 0x10c   : > { %v6276_v0 = vpop.f32.mrb[11].mxu1  ;;  %v6204_v1 = vpop.f32.mrb[11].mxu0  ;;  %6848 = vmatprep.subr.bf16.mxu0 %v7667_v51  ;;  %v7748_v57 = vld [vmem:[%s10099_s1 + $0x338] sm:$0xff]  }
 0x10d   : > { %v8653_v3 = vadd.f32 %v6276_v0, %v6275_v59  ;;  %v8655_v4 = vadd.f32 %v6204_v1, %v6203_v61  ;;  %v7663_v61 = vld [vmem:[%s8227_s9 + $0x7f8] ss:$84 sps:$4 sm:$0xff]  }
 0x10e   : > { %4150 = vmatmul.mubr.bf16.gmra.mrb[116].mxu1 %v7641_v52  ;;  %4247 = vmatmul.mubr.bf16.gmra.mrb[116].mxu0 %v7642_v53  ;;  %v7732_v52 = vld [vmem:[%s10099_s1 + $0x330] sm:$0xff]   ;;  %v3600_v53 = vadd.f32 %v8616_v31, %v8693_v32  ;;  %v7763_v31 = vld [vmem:[%s10099_s1 + $0x440] sm:$0xff]  }
 0x10f   : > { %4157 = vmatprep.mubr.bf16.mxu1 %v7643_v62  ;;  %4254 = vmatprep.mubr.bf16.mxu0 %v7645_v63  ;;  %v7664_v62 = vld [vmem:[%s8227_s9 + $0x2c0] ss:$84 sps:$4 sm:$0xff]  }
 0x110   : > { %6849 = vmatpush3.bf16.msra.mxu0 %v7668_v2 }
 0x111   : > { %v6278_v10 = vpop.f32.mrb[12].mxu1  ;;  %v6206_v11 = vpop.f32.mrb[12].mxu0  ;;  %6850 = vmatprep.subr.bf16.mxu0 %v7683_v5  ;;  %v3605_v5 = vadd.f32 %v8622_v40, %v8693_v32 }
 0x112   : > { %v6279_v12 = vpop.f32.mrb[13].mxu1  ;;  %v6207_v13 = vpop.f32.mrb[13].mxu0 }
 0x113   : > { %v8668_v14 = vadd.f32 %v6279_v12, %v6278_v10  ;;  %v6281_v15 = vpop.f32.mrb[14].mxu1  ;;  %v8670_v16 = vadd.f32 %v6207_v13, %v6206_v11  ;;  %v6209_v17 = vpop.f32.mrb[14].mxu0  ;;  %v7669_v10 = vld [vmem:[%s8227_s9 + $0x8a4] ss:$84 sps:$4 sm:$0xff]   ;;  %v7671_v11 = vld [vmem:[%s8227_s9 + $0x36c] ss:$84 sps:$4 sm:$0xff]  }
 0x114   : > { %v6282_v20 = vpop.f32.mrb[15].mxu1  ;;  %v6210_v21 = vpop.f32.mrb[15].mxu0  ;;  %6851 = vmatpush3.bf16.msra.mxu0 %v7684_v6 }
 0x115   : > { %v8680_v26 = vadd.f32 %v6282_v20, %v6281_v15  ;;  %v8682_v27 = vadd.f32 %v6210_v21, %v6209_v17  ;;  %6852 = vmatprep.subr.bf16.mxu0 %v7699_v7  ;;  %v3608_v15 = vadd.f32 %v8634_v49, %v8693_v32  ;;  %v7673_v20 = vld [vmem:[%s8227_s9 + $0x8a0] ss:$84 sps:$4 sm:$0xff]   ;;  %v7674_v21 = vld [vmem:[%s8227_s9 + $0x368] ss:$84 sps:$4 sm:$0xff]  }
 0x116   : > { %4158 = vmatmul.mubr.bf16.gmra.mrb[120].mxu1 %v7647_v8  ;;  %4255 = vmatmul.mubr.bf16.gmra.mrb[120].mxu0 %v7648_v9 }
 0x117   : > { %4165 = vmatprep.mubr.bf16.mxu1 %v7653_v18  ;;  %4262 = vmatprep.mubr.bf16.mxu0 %v7655_v19 }
 0x118   : > { %6853 = vmatpush3.bf16.msra.mxu0 %v7700_v23 }
 0x119   : > { %v6300_v35 = vpop.f32.mrb[16].mxu1  ;;  %v6212_v36 = vpop.f32.mrb[16].mxu0  ;;  %6854 = vmatprep.subr.bf16.mxu0 %v7715_v25 }
 0x11a   : > { %v6301_v37 = vpop.f32.mrb[17].mxu1  ;;  %v6213_v39 = vpop.f32.mrb[17].mxu0 }
 0x11b   : > { %v6302_v42 = vadd.f32 %v6301_v37, %v6300_v35  ;;  %v6303_v43 = vpop.f32.mrb[18].mxu1  ;;  %v8699_v44 = vadd.f32 %v6213_v39, %v6212_v36  ;;  %v6215_v45 = vpop.f32.mrb[18].mxu0  ;;  %v7675_v37 = vld [vmem:[%s8227_s9 + $0x94c] ss:$84 sps:$4 sm:$0xff]   ;;  %v7677_v39 = vld [vmem:[%s8227_s9 + $0x414] ss:$84 sps:$4 sm:$0xff]  }
 0x11c   : > { %v6304_v50 = vpop.f32.mrb[19].mxu1  ;;  %v6216_v51 = vpop.f32.mrb[19].mxu0  ;;  %6855 = vmatpush3.bf16.msra.mxu0 %v7716_v28 }
 0x11d   : > { %v8708_v24 = vadd.f32 %v6302_v42, %v3597_v41  ;;  %v6305_v54 = vadd.f32 %v6304_v50, %v6303_v43  ;;  %v8710_v55 = vadd.f32 %v6216_v51, %v6215_v45  ;;  %6856 = vmatprep.subr.bf16.mxu0 %v7731_v29  ;;  %v3613_v29 = vadd.f32 %v8646_v60, %v8693_v32  ;;  %v7679_v50 = vld [vmem:[%s8227_s9 + $0x948] ss:$84 sps:$4 sm:$0xff]   ;;  %v7680_v51 = vld [vmem:[%s8227_s9 + $0x410] ss:$84 sps:$4 sm:$0xff]  }
 0x11e   : > { %4166 = vmatmul.mubr.bf16.gmra.mrb[124].mxu1 %v7657_v33  ;;  %4263 = vmatmul.mubr.bf16.gmra.mrb[124].mxu0 %v7658_v34  ;;  %v3616_v43 = vadd.f32 %v8655_v4, %v8693_v32  ;;  %v3621_v4 = vadd.f32 %v8670_v16, %v8693_v32 }
 0x11f   : > { %v8718_v59 = vadd.f32 %v6305_v54, %v3600_v53  ;;  %4173 = vmatprep.mubr.bf16.mxu1 %v7659_v46  ;;  %4270 = vmatprep.mubr.bf16.mxu0 %v7661_v47 }
 0x120   : > { %6857 = vmatpush3.bf16.msra.mxu0 %v7732_v52 }
 0x121   : > { %v6306_v63 = vpop.f32.mrb[20].mxu1  ;;  %v6218_v0 = vpop.f32.mrb[20].mxu0  ;;  %6858 = vmatprep.subr.bf16.mxu0 %v7747_v56 }
 0x122   : > { %v6307_v1 = vpop.f32.mrb[21].mxu1  ;;  %v6219_v2 = vpop.f32.mrb[21].mxu0 }
 0x123   : > { %v6308_v6 = vadd.f32 %v6307_v1, %v6306_v63  ;;  %v6309_v7 = vpop.f32.mrb[22].mxu1  ;;  %v8727_v8 = vadd.f32 %v6219_v2, %v6218_v0  ;;  %v6221_v9 = vpop.f32.mrb[22].mxu0  ;;  %v7685_v63 = vld [vmem:[%s8227_s9 + $0x9f4] ss:$84 sps:$4 sm:$0xff]   ;;  %v7687_v0 = vld [vmem:[%s8227_s9 + $0x4bc] ss:$84 sps:$4 sm:$0xff]  }
 0x124   : > { %v6310_v12 = vpop.f32.mrb[23].mxu1  ;;  %v6222_v13 = vpop.f32.mrb[23].mxu0  ;;  %6859 = vmatpush3.bf16.msra.mxu0 %v7748_v57 }
 0x125   : > { %v8733_v17 = vadd.f32 %v6308_v6, %v3605_v5  ;;  %v6311_v18 = vadd.f32 %v6310_v12, %v6309_v7  ;;  %v8735_v19 = vadd.f32 %v6222_v13, %v6221_v9  ;;  %7068 = vmatprep.subr.bf16.mxu0 %v7763_v31  ;;  %v3624_v5 = vadd.f32 %v8682_v27, %v8693_v32 }
 0x126   : > { %4174 = vmatmul.mubr.bf16.gmra.mrb[128].mxu1 %v7663_v61  ;;  %4271 = vmatmul.mubr.bf16.gmra.mrb[128].mxu0 %v7664_v62  ;;  %v3629_v27 = vadd.f32 %v8699_v44, %v8693_v32 }
 0x127   : > { %v8737_v40 = vadd.f32 %v6311_v18, %v3608_v15  ;;  %4181 = vmatprep.mubr.bf16.mxu1 %v7669_v10  ;;  %4278 = vmatprep.mubr.bf16.mxu0 %v7671_v11  ;;  %v7689_v10 = vld [vmem:[%s8227_s9 + $0x9f0] ss:$84 sps:$4 sm:$0xff]   ;;  %v7690_v11 = vld [vmem:[%s8227_s9 + $0x4b8] ss:$84 sps:$4 sm:$0xff]  }
 0x129   : > { %v6312_v23 = vpop.f32.mrb[24].mxu1  ;;  %v6224_v25 = vpop.f32.mrb[24].mxu0 }
 0x12a   : > { %v6313_v28 = vpop.f32.mrb[25].mxu1  ;;  %v6225_v49 = vpop.f32.mrb[25].mxu0 }
 0x12b   : > { %v6314_v33 = vadd.f32 %v6313_v28, %v6312_v23  ;;  %v6315_v34 = vpop.f32.mrb[26].mxu1  ;;  %v8743_v35 = vadd.f32 %v6225_v49, %v6224_v25  ;;  %v6227_v36 = vpop.f32.mrb[26].mxu0  ;;  %v7691_v28 = vld [vmem:[%s8227_s9 + $0x564] ss:$84 sps:$4 sm:$0xff]   ;;  %v7695_v49 = vld [vmem:[%s8227_s9 + $0x2c] ss:$84 sps:$4 sm:$0xff]  }
 0x12c   : > { %v6316_v41 = vpop.f32.mrb[27].mxu1  ;;  %v6228_v42 = vpop.f32.mrb[27].mxu0 }
 0x12d   : > { %v8749_v45 = vadd.f32 %v6314_v33, %v3613_v29  ;;  %v6317_v46 = vadd.f32 %v6316_v41, %v6315_v34  ;;  %v8751_v47 = vadd.f32 %v6228_v42, %v6227_v36  ;;  %v3632_v34 = vadd.f32 %v8710_v55, %v8693_v32  ;;  %v7693_v41 = vld [vmem:[%s8227_s9 + $0x28] ss:$84 sps:$4 sm:$0xff]   ;;  %v7696_v42 = vld [vmem:[%s8227_s9 + $0x560] ss:$84 sps:$4 sm:$0xff]  }
 0x12e   : > { %4182 = vmatmul.mubr.bf16.gmra.mrb[132].mxu1 %v7673_v20  ;;  %4279 = vmatmul.mubr.bf16.gmra.mrb[132].mxu0 %v7674_v21  ;;  %v3637_v55 = vadd.f32 %v8727_v8, %v8693_v32  ;;  %v3640_v8 = vadd.f32 %v8735_v19, %v8693_v32  ;;  %v7729_v19 = vld [vmem:[%s10099_s1 + $0x3d0] sm:$0xff]  }
 0x12f   : > { %v8753_v60 = vadd.f32 %v6317_v46, %v3616_v43  ;;  %4189 = vmatprep.mubr.bf16.mxu1 %v7675_v37  ;;  %4286 = vmatprep.mubr.bf16.mxu0 %v7677_v39 }
 0x131   : > { %v6318_v52 = vpop.f32.mrb[28].mxu1  ;;  %v6230_v53 = vpop.f32.mrb[28].mxu0 }
 0x132   : > { %v6319_v54 = vpop.f32.mrb[29].mxu1  ;;  %v6231_v56 = vpop.f32.mrb[29].mxu0 }
 0x133   : > { %v6320_v57 = vadd.f32 %v6319_v54, %v6318_v52  ;;  %v6321_v31 = vpop.f32.mrb[30].mxu1  ;;  %v8759_v61 = vadd.f32 %v6231_v56, %v6230_v53  ;;  %v6233_v62 = vpop.f32.mrb[30].mxu0 }
 0x134   : > { %v6322_v1 = vpop.f32.mrb[31].mxu1  ;;  %v6234_v2 = vpop.f32.mrb[31].mxu0 }
 0x135   : > { %v8765_v6 = vadd.f32 %v6320_v57, %v3621_v4  ;;  %v6323_v7 = vadd.f32 %v6322_v1, %v6321_v31  ;;  %v8767_v9 = vadd.f32 %v6234_v2, %v6233_v62  ;;  %v7698_v4 = vld [vmem:[%s10099_s1 + $0x380] sm:$0xff]  }
 0x136   : > { %4190 = vmatmul.mubr.bf16.gmra.mrb[136].mxu1 %v7679_v50  ;;  %4287 = vmatmul.mubr.bf16.gmra.mrb[136].mxu0 %v7680_v51  ;;  %v7701_v57 = vld [vmem:[%s8227_s9 + $0x60c] ss:$84 sps:$4 sm:$0xff]  }
 0x137   : > { %v8769_v16 = vadd.f32 %v6323_v7, %v3624_v5  ;;  %4197 = vmatprep.mubr.bf16.mxu1 %v7685_v63  ;;  %4294 = vmatprep.mubr.bf16.mxu0 %v7687_v0  ;;  %v7703_v63 = vld [vmem:[%s8227_s9 + $0xd4] ss:$84 sps:$4 sm:$0xff]  }
 0x138   : > { %v7713_v0 = vld [vmem:[%s10099_s1 + $0x3c8] sm:$0xff]  }
 0x139   : > { %v6324_v12 = vpop.f32.mrb[32].mxu1  ;;  %v6236_v13 = vpop.f32.mrb[32].mxu0 }
 0x13a   : > { %v6325_v15 = vpop.f32.mrb[33].mxu1  ;;  %v6237_v18 = vpop.f32.mrb[33].mxu0 }
 0x13b   : > { %v6326_v20 = vadd.f32 %v6325_v15, %v6324_v12  ;;  %v6327_v21 = vpop.f32.mrb[34].mxu1  ;;  %v8775_v23 = vadd.f32 %v6237_v18, %v6236_v13  ;;  %v6239_v25 = vpop.f32.mrb[34].mxu0  ;;  %v7706_v12 = vld [vmem:[%s8227_s9 + $0xd0] ss:$84 sps:$4 sm:$0xff]  }
 0x13c   : > { %v6328_v29 = vpop.f32.mrb[35].mxu1  ;;  %v6240_v33 = vpop.f32.mrb[35].mxu0 }
 0x13d   : > { %v8781_v36 = vadd.f32 %v6326_v20, %v3629_v27  ;;  %v6329_v37 = vadd.f32 %v6328_v29, %v6327_v21  ;;  %v8783_v39 = vadd.f32 %v6240_v33, %v6239_v25  ;;  %v3645_v20 = vadd.f32 %v8743_v35, %v8693_v32  ;;  %v7707_v29 = vld [vmem:[%s8227_s9 + $0x6b4] ss:$84 sps:$4 sm:$0xff]   ;;  %v7709_v33 = vld [vmem:[%s8227_s9 + $0x17c] ss:$84 sps:$4 sm:$0xff]  }
 0x13e   : > { %4198 = vmatmul.mubr.bf16.gmra.mrb[140].mxu1 %v7689_v10  ;;  %4295 = vmatmul.mubr.bf16.gmra.mrb[140].mxu0 %v7690_v11  ;;  %v7714_v10 = vld [vmem:[%s10099_s1 + $0x388] sm:$0xff]   ;;  %v3648_v35 = vadd.f32 %v8751_v47, %v8693_v32  ;;  %v7761_v47 = vld [vmem:[%s10099_s1 + $0x3e0] sm:$0xff]  }
 0x13f   : > { %v8785_v44 = vadd.f32 %v6329_v37, %v3632_v34  ;;  %4302 = vmatprep.mubr.bf16.mxu0 %v7691_v28  ;;  %4399 = vmatprep.mubr.bf16.mxu1 %v7695_v49  ;;  %v7705_v11 = vld [vmem:[%s8227_s9 + $0x608] ss:$84 sps:$4 sm:$0xff]  }
 0x141   : > { %v6330_v43 = vpop.f32.mrb[36].mxu1  ;;  %v6242_v46 = vpop.f32.mrb[36].mxu0 }
 0x142   : > { %v6331_v50 = vpop.f32.mrb[37].mxu1  ;;  %v6243_v51 = vpop.f32.mrb[37].mxu0 }
 0x143   : > { %v6332_v52 = vadd.f32 %v6331_v50, %v6330_v43  ;;  %v6333_v53 = vpop.f32.mrb[38].mxu1  ;;  %v8791_v54 = vadd.f32 %v6243_v51, %v6242_v46  ;;  %v6245_v56 = vpop.f32.mrb[38].mxu0  ;;  %v7745_v50 = vld [vmem:[%s10099_s1 + $0x3d8] sm:$0xff]  }
 0x144   : > { %v6334_v31 = vpop.f32.mrb[39].mxu1  ;;  %v6246_v62 = vpop.f32.mrb[39].mxu0  ;;  %v7746_v51 = vld [vmem:[%s10099_s1 + $0x398] sm:$0xff]  }
 0x145   : > { %v8803_v1 = vadd.f32 %v6332_v52, %v3637_v55  ;;  %v6335_v2 = vadd.f32 %v6334_v31, %v6333_v53  ;;  %v8805_v5 = vadd.f32 %v6246_v62, %v6245_v56  ;;  %v7711_v52 = vld [vmem:[%s8227_s9 + $0x6b0] ss:$84 sps:$4 sm:$0xff]   ;;  %v7712_v53 = vld [vmem:[%s8227_s9 + $0x178] ss:$84 sps:$4 sm:$0xff]   ;;  %v3653_v62 = vadd.f32 %v8759_v61, %v8693_v32 }
 0x146   : > { %4303 = vmatmul.mubr.bf16.gmra.mrb[144].mxu0 %v7696_v42  ;;  %4400 = vmatmul.mubr.bf16.vlgmr.msra.gmra.mrb[144].mxu1 %v7693_v41  ;;  %v7730_v41 = vld [vmem:[%s10099_s1 + $0x390] sm:$0xff]   ;;  %v7777_v61 = vld [vmem:[%s10099_s1 + $0x3e8] sm:$0xff]  }
 0x147   : > { %v8807_v7 = vadd.f32 %v6335_v2, %v3640_v8  ;;  %6957 = vmatpush3.bf16.msra.mxu1 %v7698_v4  ;;  %4310 = vmatprep.mubr.bf16.mxu0 %v7701_v57 }
 0x148   : > { %4407 = vmatprep.mubr.bf16.mxu1 %v7703_v63  ;;  %6958 = vmatprep.subr.bf16.mxu1 %v7713_v0 }
 0x149   : > { %v6336_v13 = vpop.f32.mrb[40].mxu1  ;;  %v6248_v15 = vpop.f32.mrb[40].mxu0 }
 0x14a   : > { %v6337_v18 = vpop.f32.mrb[41].mxu1  ;;  %v6249_v27 = vpop.f32.mrb[41].mxu0 }
 0x14b   : > { %v6338_v21 = vadd.f32 %v6337_v18, %v6336_v13  ;;  %v6339_v25 = vpop.f32.mrb[42].mxu1  ;;  %v8819_v28 = vadd.f32 %v6249_v27, %v6248_v15  ;;  %v6251_v49 = vpop.f32.mrb[42].mxu0  ;;  %6959 = vmatpush3.bf16.msra.mxu1 %v7714_v10  ;;  %v7717_v10 = vld [vmem:[%s8227_s9 + $0x75c] ss:$84 sps:$4 sm:$0xff]   ;;  %v7762_v13 = vld [vmem:[%s10099_s1 + $0x3a0] sm:$0xff]   ;;  %v3656_v15 = vadd.f32 %v8767_v9, %v8693_v32 }
 0x14c   : > { %v6340_v34 = vpop.f32.mrb[43].mxu1  ;;  %v6252_v37 = vpop.f32.mrb[43].mxu0  ;;  %6960 = vmatprep.subr.bf16.mxu1 %v7729_v19  ;;  %v7719_v19 = vld [vmem:[%s8227_s9 + $0x224] ss:$84 sps:$4 sm:$0xff]   ;;  %v7793_v9 = vld [vmem:[%s10099_s1 + $0x3f0] sm:$0xff]  }
 0x14d   : > { %v8828_v42 = vadd.f32 %v6338_v21, %v3645_v20  ;;  %v6341_v43 = vadd.f32 %v6340_v34, %v6339_v25  ;;  %v8830_v46 = vadd.f32 %v6252_v37, %v6251_v49  ;;  %v7778_v25 = vld [vmem:[%s10099_s1 + $0x3a8] sm:$0xff]  }
 0x14e   : > { %4311 = vmatmul.mubr.bf16.gmra.mrb[148].mxu0 %v7705_v11  ;;  %4408 = vmatmul.mubr.bf16.gmra.mrb[148].mxu1 %v7706_v12  ;;  %v7721_v49 = vld [vmem:[%s8227_s9 + $0x758] ss:$84 sps:$4 sm:$0xff]  }
 0x14f   : > { %v8838_v55 = vadd.f32 %v6341_v43, %v3648_v35  ;;  %4318 = vmatprep.mubr.bf16.mxu0 %v7707_v29  ;;  %4415 = vmatprep.mubr.bf16.mxu1 %v7709_v33  ;;  %v7722_v29 = vld [vmem:[%s8227_s9 + $0x220] ss:$84 sps:$4 sm:$0xff]   ;;  %v3661_v35 = vadd.f32 %v8775_v23, %v8693_v32 }
 0x150   : > { %6961 = vmatpush3.bf16.msra.mxu1 %v7730_v41 }
 0x151   : > { %v6342_v56 = vpop.f32.mrb[44].mxu1  ;;  %v6254_v4 = vpop.f32.mrb[44].mxu0  ;;  %6962 = vmatprep.subr.bf16.mxu1 %v7745_v50 }
 0x152   : > { %v6343_v57 = vpop.f32.mrb[45].mxu1  ;;  %v6255_v31 = vpop.f32.mrb[45].mxu0 }
 0x153   : > { %v6344_v63 = vadd.f32 %v6343_v57, %v6342_v56  ;;  %v6345_v0 = vpop.f32.mrb[46].mxu1  ;;  %v8847_v8 = vadd.f32 %v6255_v31, %v6254_v4  ;;  %v6257_v2 = vpop.f32.mrb[46].mxu0  ;;  %v3664_v56 = vadd.f32 %v8783_v39, %v8693_v32  ;;  %v7794_v31 = vld [vmem:[%s10099_s1 + $0x3b0] sm:$0xff]   ;;  %v7809_v39 = vld [vmem:[%s10099_s1 + $0x3f8] sm:$0xff]  }
 0x154   : > { %v6346_v11 = vpop.f32.mrb[47].mxu1  ;;  %v6258_v12 = vpop.f32.mrb[47].mxu0  ;;  %6963 = vmatpush3.bf16.msra.mxu1 %v7746_v51 }
 0x155   : > { %v8859_v18 = vadd.f32 %v6344_v63, %v3653_v62  ;;  %v6347_v27 = vadd.f32 %v6346_v11, %v6345_v0  ;;  %v8861_v20 = vadd.f32 %v6258_v12, %v6257_v2  ;;  %6964 = vmatprep.subr.bf16.mxu1 %v7761_v47  ;;  %v7810_v2 = vld [vmem:[%s10099_s1 + $0x3b8] sm:$0xff]   ;;  %v7727_v11 = vld [vmem:[%s8227_s9 + $0x800] ss:$84 sps:$4 sm:$0xff]  }
 0x156   : > { %4319 = vmatmul.mubr.bf16.gmra.mrb[152].mxu0 %v7711_v52  ;;  %4416 = vmatmul.mubr.bf16.gmra.mrb[152].mxu1 %v7712_v53  ;;  %v7723_v52 = vld [vmem:[%s8227_s9 + $0x804] ss:$84 sps:$4 sm:$0xff]   ;;  %v7725_v53 = vld [vmem:[%s8227_s9 + $0x2cc] ss:$84 sps:$4 sm:$0xff]   ;;  %v7728_v12 = vld [vmem:[%s8227_s9 + $0x2c8] ss:$84 sps:$4 sm:$0xff]  }
 0x157   : > { %v8863_v21 = vadd.f32 %v6347_v27, %v3656_v15  ;;  %4326 = vmatprep.mubr.bf16.mxu0 %v7717_v10  ;;  %4423 = vmatprep.mubr.bf16.mxu1 %v7719_v19 }
 0x158   : > { %6965 = vmatpush3.bf16.msra.mxu1 %v7762_v13 }
 0x159   : > { %v6348_v33 = vpop.f32.mrb[48].mxu1  ;;  %v6412_v34 = vpop.f32.mrb[48].mxu0  ;;  %6966 = vmatprep.subr.bf16.mxu1 %v7777_v61 }
 0x15a   : > { %v6349_v37 = vpop.f32.mrb[49].mxu1  ;;  %v6413_v41 = vpop.f32.mrb[49].mxu0 }
 0x15b   : > { %v6350_v43 = vadd.f32 %v6349_v37, %v6348_v33  ;;  %v6414_v50 = vadd.f32 %v6413_v41, %v6412_v34  ;;  %v6351_v51 = vpop.f32.mrb[50].mxu1  ;;  %v6415_v47 = vpop.f32.mrb[50].mxu0  ;;  %v7733_v33 = vld [vmem:[%s8227_s9 + $0x8ac] ss:$84 sps:$4 sm:$0xff]   ;;  %v7735_v34 = vld [vmem:[%s8227_s9 + $0x374] ss:$84 sps:$4 sm:$0xff]   ;;  %v3672_v37 = vadd.f32 %v8805_v5, %v8693_v32 }
 0x15c   : > { %v6352_v4 = vpop.f32.mrb[51].mxu1  ;;  %v6416_v57 = vpop.f32.mrb[51].mxu0  ;;  %6967 = vmatpush3.bf16.msra.mxu1 %v7778_v25  ;;  %v3669_v25 = vadd.f32 %v8791_v54, %v8693_v32 }
 0x15d   : > { %v6353_v62 = vadd.f32 %v6352_v4, %v6351_v51  ;;  %v6417_v23 = vadd.f32 %v6416_v57, %v6415_v47  ;;  %v8882_v63 = vadd.f32 %v6350_v43, %v3661_v35  ;;  %v8885_v0 = vadd.f32 %v6414_v50, %v8708_v24  ;;  %6968 = vmatprep.subr.bf16.mxu1 %v7793_v9  ;;  %v7825_v24 = vld [vmem:[%s10099_s1 + $0x4c0] sm:$0xff]  }
 0x15e   : > { %4327 = vmatmul.mubr.bf16.gmra.mrb[156].mxu0 %v7721_v49  ;;  %4424 = vmatmul.mubr.bf16.gmra.mrb[156].mxu1 %v7722_v29 }
 0x15f   : > { %4334 = vmatprep.mubr.bf16.mxu0 %v7723_v52  ;;  %4431 = vmatprep.mubr.bf16.mxu1 %v7725_v53  ;;  %v8893_v10 = vadd.f32 %v6353_v62, %v3664_v56  ;;  %v8896_v19 = vadd.f32 %v6417_v23, %v8718_v59  ;;  %v7737_v52 = vld [vmem:[%s8227_s9 + $0x8a8] ss:$84 sps:$4 sm:$0xff]   ;;  %v7738_v53 = vld [vmem:[%s8227_s9 + $0x370] ss:$84 sps:$4 sm:$0xff]  }
 0x160   : > { %6969 = vmatpush3.bf16.msra.mxu1 %v7794_v31 }
 0x161   : > { %v6354_v13 = vpop.f32.mrb[52].mxu1  ;;  %v6418_v61 = vpop.f32.mrb[52].mxu0  ;;  %6970 = vmatprep.subr.bf16.mxu1 %v7809_v39 }
 0x162   : > { %v6355_v15 = vpop.f32.mrb[53].mxu1  ;;  %v6419_v27 = vpop.f32.mrb[53].mxu0 }
 0x163   : > { %v6356_v9 = vadd.f32 %v6355_v15, %v6354_v13  ;;  %v6420_v49 = vadd.f32 %v6419_v27, %v6418_v61  ;;  %v6357_v59 = vpop.f32.mrb[54].mxu1  ;;  %v6421_v29 = vpop.f32.mrb[54].mxu0 }
 0x164   : > { %v6358_v41 = vpop.f32.mrb[55].mxu1  ;;  %v6422_v35 = vpop.f32.mrb[55].mxu0  ;;  %6971 = vmatpush3.bf16.msra.mxu1 %v7810_v2 }
 0x165   : > { %v6359_v43 = vadd.f32 %v6358_v41, %v6357_v59  ;;  %v6423_v50 = vadd.f32 %v6422_v35, %v6421_v29  ;;  %v8909_v51 = vadd.f32 %v6356_v9, %v3669_v25  ;;  %v8912_v54 = vadd.f32 %v6420_v49, %v8733_v17  ;;  %7180 = vmatprep.subr.bf16.mxu1 %v7825_v24  ;;  %v7739_v24 = vld [vmem:[%s8227_s9 + $0x954] ss:$84 sps:$4 sm:$0xff]  }
 0x166   : > { %4335 = vmatmul.mubr.bf16.gmra.mrb[160].mxu0 %v7727_v11  ;;  %4432 = vmatmul.mubr.bf16.gmra.mrb[160].mxu1 %v7728_v12  ;;  %v3677_v17 = vadd.f32 %v8819_v28, %v8693_v32  ;;  %v7741_v11 = vld [vmem:[%s8227_s9 + $0x41c] ss:$84 sps:$4 sm:$0xff]   ;;  %v3680_v12 = vadd.f32 %v8830_v46, %v8693_v32 }
 0x167   : > { %4342 = vmatprep.mubr.bf16.mxu0 %v7733_v33  ;;  %4439 = vmatprep.mubr.bf16.mxu1 %v7735_v34  ;;  %v8914_v47 = vadd.f32 %v6359_v43, %v3672_v37  ;;  %v8917_v5 = vadd.f32 %v6423_v50, %v8737_v40  ;;  %v7743_v33 = vld [vmem:[%s8227_s9 + $0x950] ss:$84 sps:$4 sm:$0xff]   ;;  %v7744_v34 = vld [vmem:[%s8227_s9 + $0x418] ss:$84 sps:$4 sm:$0xff]  }
 0x168   : > { %v7749_v50 = vld [vmem:[%s8227_s9 + $0x9fc] ss:$84 sps:$4 sm:$0xff]  }
 0x169   : > { %v6360_v56 = vpop.f32.mrb[56].mxu1  ;;  %v6424_v4 = vpop.f32.mrb[56].mxu0 }
 0x16a   : > { %v6361_v57 = vpop.f32.mrb[57].mxu1  ;;  %v6425_v31 = vpop.f32.mrb[57].mxu0 }
 0x16b   : > { %v6362_v62 = vadd.f32 %v6361_v57, %v6360_v56  ;;  %v6426_v23 = vadd.f32 %v6425_v31, %v6424_v4  ;;  %v6363_v39 = vpop.f32.mrb[58].mxu1  ;;  %v6427_v2 = vpop.f32.mrb[58].mxu0 }
 0x16c   : > { %v6364_v40 = vpop.f32.mrb[59].mxu1  ;;  %v6428_v13 = vpop.f32.mrb[59].mxu0 }
 0x16d   : > { %v6365_v61 = vadd.f32 %v6364_v40, %v6363_v39  ;;  %v6429_v15 = vadd.f32 %v6428_v13, %v6427_v2  ;;  %v8927_v27 = vadd.f32 %v6362_v62, %v3677_v17  ;;  %v8930_v25 = vadd.f32 %v6426_v23, %v8749_v45  ;;  %v7753_v2 = vld [vmem:[%s8227_s9 + $0x9f8] ss:$84 sps:$4 sm:$0xff]  }
 0x16e   : > { %4343 = vmatmul.mubr.bf16.gmra.mrb[164].mxu0 %v7737_v52  ;;  %4440 = vmatmul.mubr.bf16.gmra.mrb[164].mxu1 %v7738_v53  ;;  %v3685_v45 = vadd.f32 %v8847_v8, %v8693_v32  ;;  %v7751_v52 = vld [vmem:[%s8227_s9 + $0x4c4] ss:$84 sps:$4 sm:$0xff]   ;;  %v3688_v53 = vadd.f32 %v8861_v20, %v8693_v32 }
 0x16f   : > { %4350 = vmatprep.mubr.bf16.mxu0 %v7739_v24  ;;  %4447 = vmatprep.mubr.bf16.mxu1 %v7741_v11  ;;  %v8932_v28 = vadd.f32 %v6365_v61, %v3680_v12  ;;  %v8935_v46 = vadd.f32 %v6429_v15, %v8753_v60  ;;  %v7754_v24 = vld [vmem:[%s8227_s9 + $0x4c0] ss:$84 sps:$4 sm:$0xff]  }
 0x170   : > { %v7759_v15 = vld [vmem:[%s8227_s9 + $0x34] ss:$84 sps:$4 sm:$0xff]  }
 0x171   : > { %v6366_v9 = vpop.f32.mrb[60].mxu1  ;;  %v6430_v49 = vpop.f32.mrb[60].mxu0 }
 0x172   : > { %v6367_v59 = vpop.f32.mrb[61].mxu1  ;;  %v6431_v29 = vpop.f32.mrb[61].mxu0 }
 0x173   : > { %v6368_v37 = vadd.f32 %v6367_v59, %v6366_v9  ;;  %v6432_v41 = vadd.f32 %v6431_v29, %v6430_v49  ;;  %v6369_v35 = vpop.f32.mrb[62].mxu1  ;;  %v6433_v43 = vpop.f32.mrb[62].mxu0 }
 0x174   : > { %v6370_v60 = vpop.f32.mrb[63].mxu1  ;;  %v6434_v56 = vpop.f32.mrb[63].mxu0 }
 0x175   : > { %v6371_v4 = vadd.f32 %v6370_v60, %v6369_v35  ;;  %v6435_v57 = vadd.f32 %v6434_v56, %v6433_v43  ;;  %v8945_v31 = vadd.f32 %v6368_v37, %v3685_v45  ;;  %v8948_v17 = vadd.f32 %v6432_v41, %v8765_v6  ;;  %v8960_v6 = vld [vmem:[%s10100_s2] ss:$0 sm:$0xff] }
 0x176   : > { %4351 = vmatmul.mubr.bf16.gmra.mrb[168].mxu0 %v7743_v33  ;;  %4448 = vmatmul.mubr.bf16.gmra.mrb[168].mxu1 %v7744_v34  ;;  %v3693_v11 = vadd.f32 %v8960_v6, %v8608_v22  ;;  %v3696_v9 = vadd.f32 %v8960_v6, %v8614_v30 }
 0x177   : > { %4358 = vmatprep.mubr.bf16.mxu0 %v7749_v50  ;;  %4455 = vmatprep.mubr.bf16.mxu1 %v7751_v52  ;;  %v8950_v8 = vadd.f32 %v6371_v4, %v3688_v53  ;;  %v8953_v32 = vadd.f32 %v6435_v57, %v8769_v16  ;;  %v7755_v16 = vld [vmem:[%s8227_s9 + $0x56c] ss:$84 sps:$4 sm:$0xff]   ;;  %v7757_v50 = vld [vmem:[%s8227_s9 + $0x30] ss:$84 sps:$4 sm:$0xff]   ;;  %v7760_v52 = vld [vmem:[%s8227_s9 + $0x568] ss:$84 sps:$4 sm:$0xff]  }
 0x178   : > { %v7764_v57 = vld [vmem:[%s10099_s1 + $0x400] sm:$0xff]  }
 0x179   : > { %v6372_v20 = vpop.f32.mrb[64].mxu1  ;;  %v6436_v62 = vpop.f32.mrb[64].mxu0 }
 0x17a   : > { %v6373_v23 = vpop.f32.mrb[65].mxu1  ;;  %v6437_v39 = vpop.f32.mrb[65].mxu0 }
 0x17b   : > { %v6374_v12 = vadd.f32 %v6373_v23, %v6372_v20  ;;  %v6438_v40 = vadd.f32 %v6437_v39, %v6436_v62  ;;  %v6375_v13 = vpop.f32.mrb[66].mxu1  ;;  %v6439_v61 = vpop.f32.mrb[66].mxu0  ;;  %v3704_v20 = vadd.f32 %v8960_v6, %v8632_v48  ;;  %v7767_v39 = vld [vmem:[%s8227_s9 + $0xdc] ss:$84 sps:$4 sm:$0xff]   ;;  %v7780_v48 = vld [vmem:[%s10099_s1 + $0x408] sm:$0xff]  }
 0x17c   : > { %v6376_v49 = vpop.f32.mrb[67].mxu1  ;;  %v6440_v59 = vpop.f32.mrb[67].mxu0 }
 0x17d   : > { %v6377_v29 = vadd.f32 %v6376_v49, %v6375_v13  ;;  %v6441_v33 = vadd.f32 %v6440_v59, %v6439_v61  ;;  %v8968_v34 = vadd.f32 %v6374_v12, %v3693_v11  ;;  %v8971_v45 = vadd.f32 %v6438_v40, %v8781_v36  ;;  %v7769_v49 = vld [vmem:[%s8227_s9 + $0x610] ss:$84 sps:$4 sm:$0xff]   ;;  %v7770_v59 = vld [vmem:[%s8227_s9 + $0xd8] ss:$84 sps:$4 sm:$0xff]  }
 0x17e   : > { %4359 = vmatmul.mubr.bf16.gmra.mrb[172].mxu0 %v7753_v2  ;;  %4456 = vmatmul.mubr.bf16.gmra.mrb[172].mxu1 %v7754_v24  ;;  %v3701_v36 = vadd.f32 %v8960_v6, %v8620_v38  ;;  %v7779_v2 = vld [vmem:[%s10099_s1 + $0x448] sm:$0xff]  }
 0x17f   : > { %4463 = vmatprep.mubr.bf16.mxu1 %v7755_v16  ;;  %4560 = vmatprep.mubr.bf16.mxu0 %v7759_v15  ;;  %v8973_v22 = vadd.f32 %v6377_v29, %v3696_v9  ;;  %v8976_v30 = vadd.f32 %v6441_v33, %v8785_v44  ;;  %v7765_v44 = vld [vmem:[%s8227_s9 + $0x614] ss:$84 sps:$4 sm:$0xff]   ;;  %v3709_v29 = vadd.f32 %v8960_v6, %v8644_v58  ;;  %v7811_v58 = vld [vmem:[%s10099_s1 + $0x458] sm:$0xff]  }
 0x181   : > { %v6378_v37 = vpop.f32.mrb[68].mxu1  ;;  %v6442_v41 = vpop.f32.mrb[68].mxu0 }
 0x182   : > { %v6379_v35 = vpop.f32.mrb[69].mxu1  ;;  %v6443_v43 = vpop.f32.mrb[69].mxu0 }
 0x183   : > { %v6380_v53 = vadd.f32 %v6379_v35, %v6378_v37  ;;  %v6444_v60 = vadd.f32 %v6443_v43, %v6442_v41  ;;  %v6381_v56 = vpop.f32.mrb[70].mxu1  ;;  %v6445_v4 = vpop.f32.mrb[70].mxu0  ;;  %v7771_v35 = vld [vmem:[%s8227_s9 + $0x6bc] ss:$84 sps:$4 sm:$0xff]   ;;  %v7773_v43 = vld [vmem:[%s8227_s9 + $0x184] ss:$84 sps:$4 sm:$0xff]  }
 0x184   : > { %v6382_v62 = vpop.f32.mrb[71].mxu1  ;;  %v6446_v23 = vpop.f32.mrb[71].mxu0 }
 0x185   : > { %v6383_v38 = vadd.f32 %v6382_v62, %v6381_v56  ;;  %v6447_v24 = vadd.f32 %v6446_v23, %v6445_v4  ;;  %v8992_v11 = vadd.f32 %v6380_v53, %v3701_v36  ;;  %v8995_v12 = vadd.f32 %v6444_v60, %v8803_v1  ;;  %v7795_v1 = vld [vmem:[%s10099_s1 + $0x450] sm:$0xff]   ;;  %v7827_v23 = vld [vmem:[%s10099_s1 + $0x460] sm:$0xff]  }
 0x186   : > { %4464 = vmatmul.mubr.bf16.gmra.mrb[176].mxu1 %v7760_v52  ;;  %4561 = vmatmul.mubr.bf16.vlgmr.msra.gmra.mrb[176].mxu0 %v7757_v50  ;;  %v3712_v50 = vadd.f32 %v8960_v6, %v8653_v3  ;;  %v7796_v53 = vld [vmem:[%s10099_s1 + $0x410] sm:$0xff]  }
 0x187   : > { %7069 = vmatpush3.bf16.msra.mxu0 %v7764_v57  ;;  %4471 = vmatprep.mubr.bf16.mxu1 %v7765_v44  ;;  %v9000_v40 = vadd.f32 %v6383_v38, %v3704_v20  ;;  %v9003_v13 = vadd.f32 %v6447_v24, %v8807_v7  ;;  %v7812_v20 = vld [vmem:[%s10099_s1 + $0x418] sm:$0xff]   ;;  %v7776_v24 = vld [vmem:[%s8227_s9 + $0x180] ss:$84 sps:$4 sm:$0xff]  }
 0x188   : > { %4568 = vmatprep.mubr.bf16.mxu0 %v7767_v39  ;;  %7070 = vmatprep.subr.bf16.mxu0 %v7779_v2  ;;  %v7775_v38 = vld [vmem:[%s8227_s9 + $0x6b8] ss:$84 sps:$4 sm:$0xff]  }
 0x189   : > { %v6384_v61 = vpop.f32.mrb[72].mxu1  ;;  %v6448_v16 = vpop.f32.mrb[72].mxu0 }
 0x18a   : > { %v6385_v15 = vpop.f32.mrb[73].mxu1  ;;  %v6449_v9 = vpop.f32.mrb[73].mxu0 }
 0x18b   : > { %v6386_v33 = vadd.f32 %v6385_v15, %v6384_v61  ;;  %v6450_v37 = vadd.f32 %v6449_v9, %v6448_v16  ;;  %v6387_v7 = vpop.f32.mrb[74].mxu1  ;;  %v6451_v41 = vpop.f32.mrb[74].mxu0  ;;  %7071 = vmatpush3.bf16.msra.mxu0 %v7780_v48  ;;  %v7781_v15 = vld [vmem:[%s8227_s9 + $0x764] ss:$84 sps:$4 sm:$0xff]   ;;  %v7783_v9 = vld [vmem:[%s8227_s9 + $0x22c] ss:$84 sps:$4 sm:$0xff]  }
 0x18c   : > { %v6388_v52 = vpop.f32.mrb[75].mxu1  ;;  %v6452_v36 = vpop.f32.mrb[75].mxu0  ;;  %7072 = vmatprep.subr.bf16.mxu0 %v7795_v1 }
 0x18d   : > { %v6389_v60 = vadd.f32 %v6388_v52, %v6387_v7  ;;  %v6453_v56 = vadd.f32 %v6452_v36, %v6451_v41  ;;  %v9022_v4 = vadd.f32 %v6386_v33, %v3709_v29  ;;  %v9025_v57 = vadd.f32 %v6450_v37, %v8828_v42  ;;  %v7828_v33 = vld [vmem:[%s10099_s1 + $0x420] sm:$0xff]   ;;  %v7859_v52 = vld [vmem:[%s10099_s1 + $0x470] sm:$0xff]  }
 0x18e   : > { %4472 = vmatmul.mubr.bf16.gmra.mrb[180].mxu1 %v7769_v49  ;;  %4569 = vmatmul.mubr.bf16.gmra.mrb[180].mxu0 %v7770_v59  ;;  %v3720_v49 = vadd.f32 %v8960_v6, %v8680_v26  ;;  %v7843_v26 = vld [vmem:[%s10099_s1 + $0x468] sm:$0xff]  }
 0x18f   : > { %4479 = vmatprep.mubr.bf16.mxu1 %v7771_v35  ;;  %4576 = vmatprep.mubr.bf16.mxu0 %v7773_v43  ;;  %v9027_v3 = vadd.f32 %v6389_v60, %v3712_v50  ;;  %v9030_v44 = vadd.f32 %v6453_v56, %v8838_v55  ;;  %v3717_v55 = vadd.f32 %v8960_v6, %v8668_v14  ;;  %v7785_v60 = vld [vmem:[%s8227_s9 + $0x760] ss:$84 sps:$4 sm:$0xff]   ;;  %v7786_v56 = vld [vmem:[%s8227_s9 + $0x228] ss:$84 sps:$4 sm:$0xff]  }
 0x190   : > { %7073 = vmatpush3.bf16.msra.mxu0 %v7796_v53 }
 0x191   : > { %v6390_v62 = vpop.f32.mrb[76].mxu1  ;;  %v6454_v42 = vpop.f32.mrb[76].mxu0  ;;  %7074 = vmatprep.subr.bf16.mxu0 %v7811_v58 }
 0x192   : > { %v6391_v39 = vpop.f32.mrb[77].mxu1  ;;  %v6455_v2 = vpop.f32.mrb[77].mxu0 }
 0x193   : > { %v6392_v48 = vadd.f32 %v6391_v39, %v6390_v62  ;;  %v6456_v1 = vadd.f32 %v6455_v2, %v6454_v42  ;;  %v6393_v61 = vpop.f32.mrb[78].mxu1  ;;  %v6457_v16 = vpop.f32.mrb[78].mxu0  ;;  %v7787_v42 = vld [vmem:[%s8227_s9 + $0x80c] ss:$84 sps:$4 sm:$0xff]  }
 0x194   : > { %v6394_v59 = vpop.f32.mrb[79].mxu1  ;;  %v6458_v29 = vpop.f32.mrb[79].mxu0  ;;  %7075 = vmatpush3.bf16.msra.mxu0 %v7812_v20 }
 0x195   : > { %v6395_v37 = vadd.f32 %v6394_v59, %v6393_v61  ;;  %v6459_v7 = vadd.f32 %v6458_v29, %v6457_v16  ;;  %7076 = vmatprep.subr.bf16.mxu0 %v7827_v23  ;;  %v9049_v14 = vadd.f32 %v6392_v48, %v3717_v55  ;;  %v9052_v41 = vadd.f32 %v6456_v1, %v8859_v18  ;;  %v7844_v18 = vld [vmem:[%s10099_s1 + $0x428] sm:$0xff]   ;;  %v7875_v61 = vld [vmem:[%s10099_s1 + $0x478] sm:$0xff]   ;;  %v7792_v29 = vld [vmem:[%s8227_s9 + $0x2d0] ss:$84 sps:$4 sm:$0xff]  }
 0x196   : > { %4480 = vmatmul.mubr.bf16.gmra.mrb[184].mxu1 %v7775_v38  ;;  %4577 = vmatmul.mubr.bf16.gmra.mrb[184].mxu0 %v7776_v24  ;;  %v7789_v23 = vld [vmem:[%s8227_s9 + $0x2d4] ss:$84 sps:$4 sm:$0xff]  }
 0x197   : > { %4487 = vmatprep.mubr.bf16.mxu1 %v7781_v15  ;;  %4584 = vmatprep.mubr.bf16.mxu0 %v7783_v9  ;;  %v9057_v6 = vadd.f32 %v6395_v37, %v3720_v49  ;;  %v9060_v35 = vadd.f32 %v6459_v7, %v8863_v21  ;;  %v7860_v38 = vld [vmem:[%s10099_s1 + $0x430] sm:$0xff]   ;;  %v7791_v59 = vld [vmem:[%s8227_s9 + $0x808] ss:$84 sps:$4 sm:$0xff]  }
 0x198   : > { %7077 = vmatpush3.bf16.msra.mxu0 %v7828_v33 }
 0x199   : > { %v6460_v43 = vpop.f32.mrb[80].mxu0  ;;  %v6524_v50 = vpop.f32.mrb[80].mxu1  ;;  %7078 = vmatprep.subr.bf16.mxu0 %v7843_v26 }
 0x19a   : > { %v6461_v36 = vpop.f32.mrb[81].mxu0  ;;  %v6525_v53 = vpop.f32.mrb[81].mxu1 }
 0x19b   : > { %v6462_v58 = vadd.f32 %v6461_v36, %v6460_v43  ;;  %v6526_v21 = vadd.f32 %v6525_v53, %v6524_v50  ;;  %v6463_v20 = vpop.f32.mrb[82].mxu0  ;;  %v6527_v62 = vpop.f32.mrb[82].mxu1  ;;  %v7799_v43 = vld [vmem:[%s8227_s9 + $0x37c] ss:$84 sps:$4 sm:$0xff]  }
 0x19c   : > { %v6464_v39 = vpop.f32.mrb[83].mxu0  ;;  %v6528_v2 = vpop.f32.mrb[83].mxu1  ;;  %7079 = vmatpush3.bf16.msra.mxu0 %v7844_v18  ;;  %v7797_v18 = vld [vmem:[%s8227_s9 + $0x8b4] ss:$84 sps:$4 sm:$0xff]  }
 0x19d   : > { %v9076_v24 = vadd.f32 %v6462_v58, %v8882_v63  ;;  %v9079_v55 = vadd.f32 %v6526_v21, %v8885_v0  ;;  %v6465_v48 = vadd.f32 %v6464_v39, %v6463_v20  ;;  %v6529_v1 = vadd.f32 %v6528_v2, %v6527_v62  ;;  %7080 = vmatprep.subr.bf16.mxu0 %v7859_v52  ;;  %v7876_v0 = vld [vmem:[%s10099_s1 + $0x438] sm:$0xff]  }
 0x19e   : > { %4488 = vmatmul.mubr.bf16.gmra.mrb[188].mxu1 %v7785_v60  ;;  %4585 = vmatmul.mubr.bf16.gmra.mrb[188].mxu0 %v7786_v56 }
 0x19f   : > { %v9085_v16 = vadd.f32 %v6465_v48, %v8893_v10  ;;  %v9088_v63 = vadd.f32 %v6529_v1, %v8896_v19  ;;  %4495 = vmatprep.mubr.bf16.mxu1 %v7787_v42  ;;  %4592 = vmatprep.mubr.bf16.mxu0 %v7789_v23  ;;  %v9096_v10 = vld [vmem:[%s10099_s1 + $0x500] sm:$0xff]   ;;  %v7802_v23 = vld [vmem:[%s8227_s9 + $0x378] ss:$84 sps:$4 sm:$0xff]   ;;  %v7803_v1 = vld [vmem:[%s8227_s9 + $0x95c] ss:$84 sps:$4 sm:$0xff]  }
 0x1a0   : > { %7081 = vmatpush3.bf16.msra.mxu0 %v7860_v38  ;;  %v7801_v42 = vld [vmem:[%s8227_s9 + $0x8b0] ss:$84 sps:$4 sm:$0xff]  }
 0x1a1   : > { %v6466_v15 = vpop.f32.mrb[84].mxu0  ;;  %v6530_v9 = vpop.f32.mrb[84].mxu1  ;;  %7082 = vmatprep.subr.bf16.mxu0 %v7875_v61  ;;  %v7805_v61 = vld [vmem:[%s8227_s9 + $0x424] ss:$84 sps:$4 sm:$0xff]  }
 0x1a2   : > { %v6467_v49 = vpop.f32.mrb[85].mxu0  ;;  %v6531_v19 = vpop.f32.mrb[85].mxu1 }
 0x1a3   : > { %v6468_v33 = vadd.f32 %v6467_v49, %v6466_v15  ;;  %v6532_v37 = vadd.f32 %v6531_v19, %v6530_v9  ;;  %v6469_v7 = vpop.f32.mrb[86].mxu0  ;;  %v6533_v26 = vpop.f32.mrb[86].mxu1 }
 0x1a4   : > { %v6470_v50 = vpop.f32.mrb[87].mxu0  ;;  %v6534_v52 = vpop.f32.mrb[87].mxu1  ;;  %7083 = vmatpush3.bf16.msra.mxu0 %v7876_v0 }
 0x1a5   : > { %v9103_v36 = vadd.f32 %v6468_v33, %v8909_v51  ;;  %v9106_v53 = vadd.f32 %v6532_v37, %v8912_v54  ;;  %v6471_v60 = vadd.f32 %v6470_v50, %v6469_v7  ;;  %v6535_v56 = vadd.f32 %v6534_v52, %v6533_v26  ;;  %7310 = vmatprep.subr.bf16.mxu0 %v9096_v10  ;;  %v7808_v7 = vld [vmem:[%s8227_s9 + $0x420] ss:$84 sps:$4 sm:$0xff]   ;;  %v7813_v52 = vld [vmem:[%s8227_s9 + $0xa04] ss:$84 sps:$4 sm:$0xff]  }
 0x1a6   : > { %4496 = vmatmul.mubr.bf16.gmra.mrb[192].mxu1 %v7791_v59  ;;  %4593 = vmatmul.mubr.bf16.gmra.mrb[192].mxu0 %v7792_v29 }
 0x1a7   : > { %v9110_v58 = vadd.f32 %v6471_v60, %v8914_v47  ;;  %v9113_v21 = vadd.f32 %v6535_v56, %v8917_v5  ;;  %4503 = vmatprep.mubr.bf16.mxu1 %v7797_v18  ;;  %4600 = vmatprep.mubr.bf16.mxu0 %v7799_v43  ;;  %v7815_v60 = vld [vmem:[%s8227_s9 + $0x4cc] ss:$84 sps:$4 sm:$0xff]  }
 0x1a9   : > { %v6472_v51 = vpop.f32.mrb[88].mxu0  ;;  %v6536_v20 = vpop.f32.mrb[88].mxu1 }
 0x1aa   : > { %v6473_v54 = vpop.f32.mrb[89].mxu0  ;;  %v6537_v62 = vpop.f32.mrb[89].mxu1 }
 0x1ab   : > { %v6474_v39 = vadd.f32 %v6473_v54, %v6472_v51  ;;  %v6538_v2 = vadd.f32 %v6537_v62, %v6536_v20  ;;  %v6475_v38 = vpop.f32.mrb[90].mxu0  ;;  %v6539_v48 = vpop.f32.mrb[90].mxu1 }
 0x1ac   : > { %v6476_v0 = vpop.f32.mrb[91].mxu0  ;;  %v6540_v47 = vpop.f32.mrb[91].mxu1 }
 0x1ad   : > { %v9120_v5 = vadd.f32 %v6474_v39, %v8927_v27  ;;  %v9123_v15 = vadd.f32 %v6538_v2, %v8930_v25  ;;  %v6477_v9 = vadd.f32 %v6476_v0, %v6475_v38  ;;  %v6541_v49 = vadd.f32 %v6540_v47, %v6539_v48  ;;  %v7807_v25 = vld [vmem:[%s8227_s9 + $0x958] ss:$84 sps:$4 sm:$0xff]   ;;  %v7818_v38 = vld [vmem:[%s8227_s9 + $0x4c8] ss:$84 sps:$4 sm:$0xff]  }
 0x1ae   : > { %4504 = vmatmul.mubr.bf16.gmra.mrb[196].mxu1 %v7801_v42  ;;  %4601 = vmatmul.mubr.bf16.gmra.mrb[196].mxu0 %v7802_v23  ;;  %v7819_v47 = vld [vmem:[%s8227_s9 + $0x574] ss:$84 sps:$4 sm:$0xff]  }
 0x1af   : > { %v9126_v19 = vadd.f32 %v6477_v9, %v8932_v28  ;;  %v9129_v59 = vadd.f32 %v6541_v49, %v8935_v46  ;;  %4511 = vmatprep.mubr.bf16.mxu1 %v7803_v1  ;;  %4608 = vmatprep.mubr.bf16.mxu0 %v7805_v61  ;;  %v7823_v9 = vld [vmem:[%s8227_s9 + $0x3c] ss:$84 sps:$4 sm:$0xff]  }
 0x1b1   : > { %v6478_v29 = vpop.f32.mrb[92].mxu0  ;;  %v6542_v27 = vpop.f32.mrb[92].mxu1 }
 0x1b2   : > { %v6479_v33 = vpop.f32.mrb[93].mxu0  ;;  %v6543_v37 = vpop.f32.mrb[93].mxu1 }
 0x1b3   : > { %v6480_v26 = vadd.f32 %v6479_v33, %v6478_v29  ;;  %v6544_v18 = vadd.f32 %v6543_v37, %v6542_v27  ;;  %v6481_v43 = vpop.f32.mrb[94].mxu0  ;;  %v6545_v50 = vpop.f32.mrb[94].mxu1 }
 0x1b4   : > { %v6482_v56 = vpop.f32.mrb[95].mxu0  ;;  %v6546_v28 = vpop.f32.mrb[95].mxu1 }
 0x1b5   : > { %v9136_v46 = vadd.f32 %v6480_v26, %v8945_v31  ;;  %v9139_v51 = vadd.f32 %v6544_v18, %v8948_v17  ;;  %v6483_v20 = vadd.f32 %v6482_v56, %v6481_v43  ;;  %v6547_v54 = vadd.f32 %v6546_v28, %v6545_v50  ;;  %v7817_v17 = vld [vmem:[%s8227_s9 + $0xa00] ss:$84 sps:$4 sm:$0xff]   ;;  %v7824_v43 = vld [vmem:[%s8227_s9 + $0x570] ss:$84 sps:$4 sm:$0xff]  }
 0x1b6   : > { %4512 = vmatmul.mubr.bf16.gmra.mrb[200].mxu1 %v7807_v25  ;;  %4609 = vmatmul.mubr.bf16.gmra.mrb[200].mxu0 %v7808_v7  ;;  %v7829_v28 = vld [vmem:[%s8227_s9 + $0x61c] ss:$84 sps:$4 sm:$0xff]  }
 0x1b7   : > { %v9142_v62 = vadd.f32 %v6483_v20, %v8950_v8  ;;  %v9145_v42 = vadd.f32 %v6547_v54, %v8953_v32  ;;  %4519 = vmatprep.mubr.bf16.mxu1 %v7813_v52  ;;  %4616 = vmatprep.mubr.bf16.mxu0 %v7815_v60  ;;  %v7831_v54 = vld [vmem:[%s8227_s9 + $0xe4] ss:$84 sps:$4 sm:$0xff]  }
 0x1b9   : > { %v6484_v23 = vpop.f32.mrb[96].mxu0  ;;  %v6548_v31 = vpop.f32.mrb[96].mxu1 }
 0x1ba   : > { %v6485_v39 = vpop.f32.mrb[97].mxu0  ;;  %v6549_v2 = vpop.f32.mrb[97].mxu1 }
 0x1bb   : > { %v6486_v48 = vadd.f32 %v6485_v39, %v6484_v23  ;;  %v6550_v1 = vadd.f32 %v6549_v2, %v6548_v31  ;;  %v6487_v61 = vpop.f32.mrb[98].mxu0  ;;  %v6551_v0 = vpop.f32.mrb[98].mxu1  ;;  %v7841_v23 = vld [vmem:[%s10099_s1 + $0x4c8] sm:$0xff]  }
 0x1bc   : > { %v6488_v49 = vpop.f32.mrb[99].mxu0  ;;  %v6552_v8 = vpop.f32.mrb[99].mxu1 }
 0x1bd   : > { %v9152_v32 = vadd.f32 %v6486_v48, %v8968_v34  ;;  %v9155_v29 = vadd.f32 %v6550_v1, %v8971_v45  ;;  %v6489_v27 = vadd.f32 %v6488_v49, %v6487_v61  ;;  %v6553_v33 = vadd.f32 %v6552_v8, %v6551_v0  ;;  %v7821_v45 = vld [vmem:[%s8227_s9 + $0x38] ss:$84 sps:$4 sm:$0xff]  }
 0x1be   : > { %4520 = vmatmul.mubr.bf16.gmra.mrb[204].mxu1 %v7817_v17  ;;  %4617 = vmatmul.mubr.bf16.gmra.mrb[204].mxu0 %v7818_v38 }
 0x1bf   : > { %v9158_v37 = vadd.f32 %v6489_v27, %v8973_v22  ;;  %v9161_v25 = vadd.f32 %v6553_v33, %v8976_v30  ;;  %4624 = vmatprep.mubr.bf16.mxu0 %v7819_v47  ;;  %4721 = vmatprep.mubr.bf16.mxu1 %v7823_v9  ;;  %v7826_v22 = vld [vmem:[%s10099_s1 + $0x480] sm:$0xff]  }
 0x1c0   : > { %v7834_v47 = vld [vmem:[%s8227_s9 + $0xe0] ss:$84 sps:$4 sm:$0xff]   ;;  %v7835_v33 = vld [vmem:[%s8227_s9 + $0x6c4] ss:$84 sps:$4 sm:$0xff]  }
 0x1c1   : > { %v6490_v7 = vpop.f32.mrb[100].mxu0  ;;  %v6554_v34 = vpop.f32.mrb[100].mxu1 }
 0x1c2   : > { %v6491_v26 = vpop.f32.mrb[101].mxu0  ;;  %v6555_v18 = vpop.f32.mrb[101].mxu1 }
 0x1c3   : > { %v6492_v50 = vadd.f32 %v6491_v26, %v6490_v7  ;;  %v6556_v52 = vadd.f32 %v6555_v18, %v6554_v34  ;;  %v6493_v60 = vpop.f32.mrb[102].mxu0  ;;  %v6557_v56 = vpop.f32.mrb[102].mxu1  ;;  %v7837_v7 = vld [vmem:[%s8227_s9 + $0x18c] ss:$84 sps:$4 sm:$0xff]   ;;  %v7858_v18 = vld [vmem:[%s10099_s1 + $0x490] sm:$0xff]  }
 0x1c4   : > { %v6494_v30 = vpop.f32.mrb[103].mxu0  ;;  %v6558_v20 = vpop.f32.mrb[103].mxu1 }
 0x1c5   : > { %v9174_v31 = vadd.f32 %v6492_v50, %v8992_v11  ;;  %v9177_v39 = vadd.f32 %v6556_v52, %v8995_v12  ;;  %v6495_v2 = vadd.f32 %v6494_v30, %v6493_v60  ;;  %v6559_v17 = vadd.f32 %v6558_v20, %v6557_v56  ;;  %v7842_v11 = vld [vmem:[%s10099_s1 + $0x488] sm:$0xff]   ;;  %v7857_v12 = vld [vmem:[%s10099_s1 + $0x4d0] sm:$0xff]   ;;  %v7873_v60 = vld [vmem:[%s10099_s1 + $0x4d8] sm:$0xff]  }
 0x1c6   : > { %4625 = vmatmul.mubr.bf16.gmra.mrb[208].mxu0 %v7824_v43  ;;  %4722 = vmatmul.mubr.bf16.vlgmr.msra.gmra.mrb[208].mxu1 %v7821_v45 }
 0x1c7   : > { %v9180_v38 = vadd.f32 %v6495_v2, %v9000_v40  ;;  %v9183_v48 = vadd.f32 %v6559_v17, %v9003_v13  ;;  %7181 = vmatpush3.bf16.msra.mxu1 %v7826_v22  ;;  %4632 = vmatprep.mubr.bf16.mxu0 %v7829_v28  ;;  %v7833_v13 = vld [vmem:[%s8227_s9 + $0x618] ss:$84 sps:$4 sm:$0xff]  }
 0x1c8   : > { %4729 = vmatprep.mubr.bf16.mxu1 %v7831_v54  ;;  %7182 = vmatprep.subr.bf16.mxu1 %v7841_v23  ;;  %v7840_v54 = vld [vmem:[%s8227_s9 + $0x188] ss:$84 sps:$4 sm:$0xff]  }
 0x1c9   : > { %v6496_v1 = vpop.f32.mrb[104].mxu0  ;;  %v6560_v40 = vpop.f32.mrb[104].mxu1 }
 0x1ca   : > { %v6497_v61 = vpop.f32.mrb[105].mxu0  ;;  %v6561_v0 = vpop.f32.mrb[105].mxu1 }
 0x1cb   : > { %v6498_v9 = vadd.f32 %v6497_v61, %v6496_v1  ;;  %v6562_v49 = vadd.f32 %v6561_v0, %v6560_v40  ;;  %v6499_v8 = vpop.f32.mrb[106].mxu0  ;;  %v6563_v27 = vpop.f32.mrb[106].mxu1  ;;  %7183 = vmatpush3.bf16.msra.mxu1 %v7842_v11  ;;  %v7847_v1 = vld [vmem:[%s8227_s9 + $0x234] ss:$84 sps:$4 sm:$0xff]   ;;  %v7890_v0 = vld [vmem:[%s10099_s1 + $0x4a0] sm:$0xff]  }
 0x1cc   : > { %v6500_v34 = vpop.f32.mrb[107].mxu0  ;;  %v6564_v26 = vpop.f32.mrb[107].mxu1  ;;  %7184 = vmatprep.subr.bf16.mxu1 %v7857_v12  ;;  %v7845_v12 = vld [vmem:[%s8227_s9 + $0x76c] ss:$84 sps:$4 sm:$0xff]  }
 0x1cd   : > { %v9199_v45 = vadd.f32 %v6498_v9, %v9022_v4  ;;  %v9202_v43 = vadd.f32 %v6562_v49, %v9025_v57  ;;  %v6501_v50 = vadd.f32 %v6500_v34, %v6499_v8  ;;  %v6565_v52 = vadd.f32 %v6564_v26, %v6563_v27  ;;  %v7874_v4 = vld [vmem:[%s10099_s1 + $0x498] sm:$0xff]   ;;  %v7904_v8 = vld [vmem:[%s10099_s1 + $0x4e8] sm:$0xff]  }
 0x1ce   : > { %4633 = vmatmul.mubr.bf16.gmra.mrb[212].mxu0 %v7833_v13  ;;  %4730 = vmatmul.mubr.bf16.gmra.mrb[212].mxu1 %v7834_v47 }
 0x1cf   : > { %v9208_v56 = vadd.f32 %v6501_v50, %v9027_v3  ;;  %v9211_v22 = vadd.f32 %v6565_v52, %v9030_v44  ;;  %4640 = vmatprep.mubr.bf16.mxu0 %v7835_v33  ;;  %4737 = vmatprep.mubr.bf16.mxu1 %v7837_v7  ;;  %v7889_v3 = vld [vmem:[%s10099_s1 + $0x4e0] sm:$0xff]  }
 0x1d0   : > { %7185 = vmatpush3.bf16.msra.mxu1 %v7858_v18  ;;  %v7839_v44 = vld [vmem:[%s8227_s9 + $0x6c0] ss:$84 sps:$4 sm:$0xff]   ;;  %v7850_v18 = vld [vmem:[%s8227_s9 + $0x230] ss:$84 sps:$4 sm:$0xff]  }
 0x1d1   : > { %v6502_v57 = vpop.f32.mrb[108].mxu0  ;;  %v6566_v28 = vpop.f32.mrb[108].mxu1  ;;  %7186 = vmatprep.subr.bf16.mxu1 %v7873_v60 }
 0x1d2   : > { %v6503_v30 = vpop.f32.mrb[109].mxu0  ;;  %v6567_v20 = vpop.f32.mrb[109].mxu1 }
 0x1d3   : > { %v6504_v23 = vadd.f32 %v6503_v30, %v6502_v57  ;;  %v6568_v2 = vadd.f32 %v6567_v20, %v6566_v28  ;;  %v6505_v17 = vpop.f32.mrb[110].mxu0  ;;  %v6569_v11 = vpop.f32.mrb[110].mxu1  ;;  %v7851_v57 = vld [vmem:[%s8227_s9 + $0x814] ss:$84 sps:$4 sm:$0xff]   ;;  %v7853_v28 = vld [vmem:[%s8227_s9 + $0x2dc] ss:$84 sps:$4 sm:$0xff]  }
 0x1d4   : > { %v6506_v40 = vpop.f32.mrb[111].mxu0  ;;  %v6570_v61 = vpop.f32.mrb[111].mxu1  ;;  %7187 = vmatpush3.bf16.msra.mxu1 %v7874_v4  ;;  %v7919_v20 = vld [vmem:[%s10099_s1 + $0x4b0] sm:$0xff]  }
 0x1d5   : > { %v9227_v13 = vadd.f32 %v6504_v23, %v9049_v14  ;;  %v9230_v47 = vadd.f32 %v6568_v2, %v9052_v41  ;;  %v6507_v9 = vadd.f32 %v6506_v40, %v6505_v17  ;;  %v6571_v49 = vadd.f32 %v6570_v61, %v6569_v11  ;;  %7188 = vmatprep.subr.bf16.mxu1 %v7889_v3  ;;  %v7905_v41 = vld [vmem:[%s10099_s1 + $0x4a8] sm:$0xff]   ;;  %v7932_v17 = vld [vmem:[%s10099_s1 + $0x4f8] sm:$0xff]  }
 0x1d6   : > { %4641 = vmatmul.mubr.bf16.gmra.mrb[216].mxu0 %v7839_v44  ;;  %4738 = vmatmul.mubr.bf16.gmra.mrb[216].mxu1 %v7840_v54 }
 0x1d7   : > { %v9236_v27 = vadd.f32 %v6507_v9, %v9057_v6  ;;  %v9239_v14 = vadd.f32 %v6571_v49, %v9060_v35  ;;  %4648 = vmatprep.mubr.bf16.mxu0 %v7845_v12  ;;  %4745 = vmatprep.mubr.bf16.mxu1 %v7847_v1  ;;  %v7918_v6 = vld [vmem:[%s10099_s1 + $0x4f0] sm:$0xff]   ;;  %v7849_v35 = vld [vmem:[%s8227_s9 + $0x768] ss:$84 sps:$4 sm:$0xff]  }
 0x1d8   : > { %7189 = vmatpush3.bf16.msra.mxu1 %v7890_v0  ;;  %v7855_v0 = vld [vmem:[%s8227_s9 + $0x810] ss:$84 sps:$4 sm:$0xff]  }
 0x1d9   : > { %v6572_v33 = vpop.f32.mrb[112].mxu1  ;;  %v6636_v7 = vpop.f32.mrb[112].mxu0  ;;  %7190 = vmatprep.subr.bf16.mxu1 %v7904_v8 }
 0x1da   : > { %v6573_v34 = vpop.f32.mrb[113].mxu1  ;;  %v6637_v26 = vpop.f32.mrb[113].mxu0 }
 0x1db   : > { %v6574_v50 = vadd.f32 %v6573_v34, %v6572_v33  ;;  %v6638_v52 = vadd.f32 %v6637_v26, %v6636_v7  ;;  %v6575_v60 = vpop.f32.mrb[114].mxu1  ;;  %v6639_v4 = vpop.f32.mrb[114].mxu0  ;;  %v7863_v33 = vld [vmem:[%s8227_s9 + $0x384] ss:$84 sps:$4 sm:$0xff]  }
 0x1dc   : > { %v6576_v3 = vpop.f32.mrb[115].mxu1  ;;  %v6640_v30 = vpop.f32.mrb[115].mxu0  ;;  %7191 = vmatpush3.bf16.msra.mxu1 %v7905_v41  ;;  %v7861_v41 = vld [vmem:[%s8227_s9 + $0x8bc] ss:$84 sps:$4 sm:$0xff]  }
 0x1dd   : > { %v9255_v44 = vadd.f32 %v6574_v50, %v9076_v24  ;;  %v9258_v54 = vadd.f32 %v6638_v52, %v9079_v55  ;;  %v6577_v23 = vadd.f32 %v6576_v3, %v6575_v60  ;;  %v6641_v2 = vadd.f32 %v6640_v30, %v6639_v4  ;;  %7192 = vmatprep.subr.bf16.mxu1 %v7918_v6  ;;  %v7933_v55 = vld [vmem:[%s10099_s1 + $0x4b8] sm:$0xff]  }
 0x1de   : > { %4649 = vmatmul.mubr.bf16.gmra.mrb[220].mxu0 %v7849_v35  ;;  %4746 = vmatmul.mubr.bf16.gmra.mrb[220].mxu1 %v7850_v18 }
 0x1df   : > { %v9264_v11 = vadd.f32 %v6577_v23, %v9085_v16  ;;  %v9267_v24 = vadd.f32 %v6641_v2, %v9088_v63  ;;  %4656 = vmatprep.mubr.bf16.mxu0 %v7851_v57  ;;  %4753 = vmatprep.mubr.bf16.mxu1 %v7853_v28  ;;  %v7856_v16 = vld [vmem:[%s8227_s9 + $0x2d8] ss:$84 sps:$4 sm:$0xff]   ;;  %v7866_v28 = vld [vmem:[%s8227_s9 + $0x380] ss:$84 sps:$4 sm:$0xff]  }
 0x1e0   : > { %7193 = vmatpush3.bf16.msra.mxu1 %v7919_v20  ;;  %v7867_v2 = vld [vmem:[%s8227_s9 + $0x964] ss:$84 sps:$4 sm:$0xff]  }
 0x1e1   : > { %v6578_v12 = vpop.f32.mrb[116].mxu1  ;;  %v6642_v1 = vpop.f32.mrb[116].mxu0  ;;  %7194 = vmatprep.subr.bf16.mxu1 %v7932_v17  ;;  %v7869_v17 = vld [vmem:[%s8227_s9 + $0x42c] ss:$84 sps:$4 sm:$0xff]  }
 0x1e2   : > { %v6579_v40 = vpop.f32.mrb[117].mxu1  ;;  %v6643_v61 = vpop.f32.mrb[117].mxu0 }
 0x1e3   : > { %v6580_v9 = vadd.f32 %v6579_v40, %v6578_v12  ;;  %v6644_v49 = vadd.f32 %v6643_v61, %v6642_v1  ;;  %v6581_v63 = vpop.f32.mrb[118].mxu1  ;;  %v6645_v8 = vpop.f32.mrb[118].mxu0 }
 0x1e4   : > { %v6582_v7 = vpop.f32.mrb[119].mxu1  ;;  %v6646_v6 = vpop.f32.mrb[119].mxu0  ;;  %7195 = vmatpush3.bf16.msra.mxu1 %v7933_v55 }
 0x1e5   : > { %v9277_v34 = vadd.f32 %v6580_v9, %v9103_v36  ;;  %v9280_v26 = vadd.f32 %v6644_v49, %v9106_v53  ;;  %v6583_v35 = vadd.f32 %v6582_v7, %v6581_v63  ;;  %v6647_v18 = vadd.f32 %v6646_v6, %v6645_v8  ;;  %v7865_v53 = vld [vmem:[%s8227_s9 + $0x8b8] ss:$84 sps:$4 sm:$0xff]   ;;  %v7872_v63 = vld [vmem:[%s8227_s9 + $0x428] ss:$84 sps:$4 sm:$0xff]  }
 0x1e6   : > { %4657 = vmatmul.mubr.bf16.gmra.mrb[224].mxu0 %v7855_v0  ;;  %4754 = vmatmul.mubr.bf16.gmra.mrb[224].mxu1 %v7856_v16  ;;  %v7877_v6 = vld [vmem:[%s8227_s9 + $0xa0c] ss:$84 sps:$4 sm:$0xff]  }
 0x1e7   : > { %v9283_v50 = vadd.f32 %v6583_v35, %v9110_v58  ;;  %v9286_v52 = vadd.f32 %v6647_v18, %v9113_v21  ;;  %4664 = vmatprep.mubr.bf16.mxu0 %v7861_v41  ;;  %4761 = vmatprep.mubr.bf16.mxu1 %v7863_v33  ;;  %v7879_v35 = vld [vmem:[%s8227_s9 + $0x4d4] ss:$84 sps:$4 sm:$0xff]  }
 0x1e9   : > { %v6584_v60 = vpop.f32.mrb[120].mxu1  ;;  %v6648_v36 = vpop.f32.mrb[120].mxu0 }
 0x1ea   : > { %v6585_v4 = vpop.f32.mrb[121].mxu1  ;;  %v6649_v57 = vpop.f32.mrb[121].mxu0 }
 0x1eb   : > { %v6586_v3 = vadd.f32 %v6585_v4, %v6584_v60  ;;  %v6650_v30 = vadd.f32 %v6649_v57, %v6648_v36  ;;  %v6587_v20 = vpop.f32.mrb[122].mxu1  ;;  %v6651_v23 = vpop.f32.mrb[122].mxu0 }
 0x1ec   : > { %v6588_v55 = vpop.f32.mrb[123].mxu1  ;;  %v6652_v58 = vpop.f32.mrb[123].mxu0 }
 0x1ed   : > { %v9293_v21 = vadd.f32 %v6586_v3, %v9120_v5  ;;  %v9296_v12 = vadd.f32 %v6650_v30, %v9123_v15  ;;  %v6589_v1 = vadd.f32 %v6588_v55, %v6587_v20  ;;  %v6653_v40 = vadd.f32 %v6652_v58, %v6651_v23  ;;  %v7871_v15 = vld [vmem:[%s8227_s9 + $0x960] ss:$84 sps:$4 sm:$0xff]   ;;  %v7882_v20 = vld [vmem:[%s8227_s9 + $0x4d0] ss:$84 sps:$4 sm:$0xff]  }
 0x1ee   : > { %4665 = vmatmul.mubr.bf16.gmra.mrb[228].mxu0 %v7865_v53  ;;  %4762 = vmatmul.mubr.bf16.gmra.mrb[228].mxu1 %v7866_v28  ;;  %v7883_v58 = vld [vmem:[%s8227_s9 + $0x57c] ss:$84 sps:$4 sm:$0xff]  }
 0x1ef   : > { %v9299_v61 = vadd.f32 %v6589_v1, %v9126_v19  ;;  %v9302_v0 = vadd.f32 %v6653_v40, %v9129_v59  ;;  %4672 = vmatprep.mubr.bf16.mxu0 %v7867_v2  ;;  %4769 = vmatprep.mubr.bf16.mxu1 %v7869_v17  ;;  %v7887_v1 = vld [vmem:[%s8227_s9 + $0x44] ss:$84 sps:$4 sm:$0xff]  }
 0x1f1   : > { %v6590_v16 = vpop.f32.mrb[124].mxu1  ;;  %v6654_v5 = vpop.f32.mrb[124].mxu0 }
 0x1f2   : > { %v6591_v9 = vpop.f32.mrb[125].mxu1  ;;  %v6655_v49 = vpop.f32.mrb[125].mxu0 }
 0x1f3   : > { %v6592_v8 = vadd.f32 %v6591_v9, %v6590_v16  ;;  %v6656_v41 = vadd.f32 %v6655_v49, %v6654_v5  ;;  %v6593_v33 = vpop.f32.mrb[126].mxu1  ;;  %v6657_v7 = vpop.f32.mrb[126].mxu0 }
 0x1f4   : > { %v6594_v18 = vpop.f32.mrb[127].mxu1  ;;  %v6658_v19 = vpop.f32.mrb[127].mxu0 }
 0x1f5   : > { %v9309_v59 = vadd.f32 %v6592_v8, %v9136_v46  ;;  %v9312_v60 = vadd.f32 %v6656_v41, %v9139_v51  ;;  %v6595_v36 = vadd.f32 %v6594_v18, %v6593_v33  ;;  %v6659_v4 = vadd.f32 %v6658_v19, %v6657_v7  ;;  %v7881_v51 = vld [vmem:[%s8227_s9 + $0xa08] ss:$84 sps:$4 sm:$0xff]   ;;  %v7888_v33 = vld [vmem:[%s8227_s9 + $0x578] ss:$84 sps:$4 sm:$0xff]  }
 0x1f6   : > { %4673 = vmatmul.mubr.bf16.gmra.mrb[232].mxu0 %v7871_v15  ;;  %4770 = vmatmul.mubr.bf16.gmra.mrb[232].mxu1 %v7872_v63  ;;  %v7892_v19 = vld [vmem:[%s8227_s9 + $0x624] ss:$84 sps:$4 sm:$0xff]  }
 0x1f7   : > { %v9315_v57 = vadd.f32 %v6595_v36, %v9142_v62  ;;  %v9318_v53 = vadd.f32 %v6659_v4, %v9145_v42  ;;  %4680 = vmatprep.mubr.bf16.mxu0 %v7877_v6  ;;  %4777 = vmatprep.mubr.bf16.mxu1 %v7879_v35  ;;  %v7894_v4 = vld [vmem:[%s8227_s9 + $0xec] ss:$84 sps:$4 sm:$0xff]  }
 0x1f9   : > { %v6596_v28 = vpop.f32.mrb[128].mxu1  ;;  %v6660_v46 = vpop.f32.mrb[128].mxu0 }
 0x1fa   : > { %v6597_v3 = vpop.f32.mrb[129].mxu1  ;;  %v6661_v30 = vpop.f32.mrb[129].mxu0 }
 0x1fb   : > { %v6598_v23 = vadd.f32 %v6597_v3, %v6596_v28  ;;  %v6662_v2 = vadd.f32 %v6661_v30, %v6660_v46  ;;  %v6599_v17 = vpop.f32.mrb[130].mxu1  ;;  %v6663_v55 = vpop.f32.mrb[130].mxu0 }
 0x1fc   : > { %v6600_v40 = vpop.f32.mrb[131].mxu1  ;;  %v6664_v62 = vpop.f32.mrb[131].mxu0 }
 0x1fd   : > { %v9325_v42 = vadd.f32 %v6598_v23, %v9152_v32  ;;  %v9328_v16 = vadd.f32 %v6662_v2, %v9155_v29  ;;  %v6601_v5 = vadd.f32 %v6600_v40, %v6599_v17  ;;  %v6665_v9 = vadd.f32 %v6664_v62, %v6663_v55  ;;  %v7885_v29 = vld [vmem:[%s8227_s9 + $0x40] ss:$84 sps:$4 sm:$0xff]   ;;  %v7897_v55 = vld [vmem:[%s8227_s9 + $0xe8] ss:$84 sps:$4 sm:$0xff]  }
 0x1fe   : > { %4681 = vmatmul.mubr.bf16.gmra.mrb[236].mxu0 %v7881_v51  ;;  %4778 = vmatmul.mubr.bf16.gmra.mrb[236].mxu1 %v7882_v20  ;;  %v7896_v17 = vld [vmem:[%s8227_s9 + $0x620] ss:$84 sps:$4 sm:$0xff]  }
 0x1ff   : > { %v9331_v49 = vadd.f32 %v6601_v5, %v9158_v37  ;;  %v9334_v15 = vadd.f32 %v6665_v9, %v9161_v25  ;;  %4785 = vmatprep.mubr.bf16.mxu1 %v7883_v58  ;;  %4882 = vmatprep.mubr.bf16.mxu0 %v7887_v1  ;;  %v7946_v25 = vld [vmem:[%s10099_s1 + $0x508] sm:$0xff]  }
 0x200   : > { %v7898_v62 = vld [vmem:[%s8227_s9 + $0x6cc] ss:$84 sps:$4 sm:$0xff]   ;;  %v7900_v5 = vld [vmem:[%s8227_s9 + $0x194] ss:$84 sps:$4 sm:$0xff]  }
 0x201   : > { %v6602_v63 = vpop.f32.mrb[132].mxu1  ;;  %v6666_v32 = vpop.f32.mrb[132].mxu0 }
 0x202   : > { %v6603_v8 = vpop.f32.mrb[133].mxu1  ;;  %v6667_v41 = vpop.f32.mrb[133].mxu0 }
 0x203   : > { %v6604_v7 = vadd.f32 %v6603_v8, %v6602_v63  ;;  %v6668_v6 = vadd.f32 %v6667_v41, %v6666_v32  ;;  %v6605_v35 = vpop.f32.mrb[134].mxu1  ;;  %v6669_v18 = vpop.f32.mrb[134].mxu0 }
 0x204   : > { %v6606_v36 = vpop.f32.mrb[135].mxu1  ;;  %v6670_v37 = vpop.f32.mrb[135].mxu0 }
 0x205   : > { %v9344_v28 = vadd.f32 %v6604_v7, %v9174_v31  ;;  %v9347_v46 = vadd.f32 %v6668_v6, %v9177_v39  ;;  %v6607_v3 = vadd.f32 %v6606_v36, %v6605_v35  ;;  %v6671_v30 = vadd.f32 %v6670_v37, %v6669_v18  ;;  %v7903_v35 = vld [vmem:[%s8227_s9 + $0x190] ss:$84 sps:$4 sm:$0xff]  }
 0x206   : > { %4786 = vmatmul.mubr.bf16.gmra.mrb[240].mxu1 %v7888_v33  ;;  %4883 = vmatmul.mubr.bf16.vlgmr.msra.gmra.mrb[240].mxu0 %v7885_v29 }
 0x207   : > { %v9350_v51 = vadd.f32 %v6607_v3, %v9180_v38  ;;  %v9353_v20 = vadd.f32 %v6671_v30, %v9183_v48  ;;  %7311 = vmatpush3.bf16.msra.mxu0 %v9096_v10  ;;  %4793 = vmatprep.mubr.bf16.mxu1 %v7892_v19 }
 0x208   : > { %4890 = vmatprep.mubr.bf16.mxu0 %v7894_v4  ;;  %7312 = vmatprep.subr.bf16.mxu0 %v7946_v25  ;;  %v7906_v4 = vld [vmem:[%s8227_s9 + $0x774] ss:$84 sps:$4 sm:$0xff]  }
 0x209   : > { %v6608_v31 = vpop.f32.mrb[136].mxu1  ;;  %v6672_v39 = vpop.f32.mrb[136].mxu0 }
 0x20a   : > { %v6609_v23 = vpop.f32.mrb[137].mxu1  ;;  %v6673_v2 = vpop.f32.mrb[137].mxu0 }
 0x20b   : > { %v6610_v58 = vadd.f32 %v6609_v23, %v6608_v31  ;;  %v6674_v1 = vadd.f32 %v6673_v2, %v6672_v39  ;;  %v6611_v38 = vpop.f32.mrb[138].mxu1  ;;  %v6675_v40 = vpop.f32.mrb[138].mxu0  ;;  %7313 = vmatpush3.bf16.msra.mxu0 %v7946_v25  ;;  %v7908_v25 = vld [vmem:[%s8227_s9 + $0x23c] ss:$84 sps:$4 sm:$0xff]  }
 0x20c   : > { %v6612_v48 = vpop.f32.mrb[139].mxu1  ;;  %v6676_v9 = vpop.f32.mrb[139].mxu0 }
 0x20d   : > { %v9361_v10 = vadd.f32 %v6610_v58, %v9199_v45  ;;  %v9364_v63 = vadd.f32 %v6674_v1, %v9202_v43  ;;  %v6613_v32 = vadd.f32 %v6612_v48, %v6611_v38  ;;  %v6677_v8 = vadd.f32 %v6676_v9, %v6675_v40  ;;  %v7902_v43 = vld [vmem:[%s8227_s9 + $0x6c8] ss:$84 sps:$4 sm:$0xff]   ;;  %v7911_v1 = vld [vmem:[%s8227_s9 + $0x238] ss:$84 sps:$4 sm:$0xff]  }
 0x20e   : > { %4794 = vmatmul.mubr.bf16.gmra.mrb[244].mxu1 %v7896_v17  ;;  %4891 = vmatmul.mubr.bf16.gmra.mrb[244].mxu0 %v7897_v55  ;;  %v7914_v48 = vld [vmem:[%s8227_s9 + $0x81c] ss:$84 sps:$4 sm:$0xff]   ;;  %v7917_v9 = vld [vmem:[%s8227_s9 + $0x2e4] ss:$84 sps:$4 sm:$0xff]  }
 0x20f   : > { %v9367_v41 = vadd.f32 %v6613_v32, %v9208_v56  ;;  %v9370_v29 = vadd.f32 %v6677_v8, %v9211_v22  ;;  %4801 = vmatprep.mubr.bf16.mxu1 %v7898_v62  ;;  %4898 = vmatprep.mubr.bf16.mxu0 %v7900_v5 }
 0x211   : > { %v6614_v33 = vpop.f32.mrb[140].mxu1  ;;  %v6678_v45 = vpop.f32.mrb[140].mxu0 }
 0x212   : > { %v6615_v7 = vpop.f32.mrb[141].mxu1  ;;  %v6679_v6 = vpop.f32.mrb[141].mxu0 }
 0x213   : > { %v6616_v18 = vadd.f32 %v6615_v7, %v6614_v33  ;;  %v6680_v19 = vadd.f32 %v6679_v6, %v6678_v45  ;;  %v6617_v36 = vpop.f32.mrb[142].mxu1  ;;  %v6681_v37 = vpop.f32.mrb[142].mxu0 }
 0x214   : > { %v6618_v3 = vpop.f32.mrb[143].mxu1  ;;  %v6682_v56 = vpop.f32.mrb[143].mxu0 }
 0x215   : > { %v9377_v22 = vadd.f32 %v6616_v18, %v9227_v13  ;;  %v9380_v30 = vadd.f32 %v6680_v19, %v9230_v47  ;;  %v6619_v31 = vadd.f32 %v6618_v3, %v6617_v36  ;;  %v6683_v39 = vadd.f32 %v6682_v56, %v6681_v37  ;;  %v7910_v47 = vld [vmem:[%s8227_s9 + $0x770] ss:$84 sps:$4 sm:$0xff]   ;;  %v7915_v19 = vld [vmem:[%s8227_s9 + $0x2e0] ss:$84 sps:$4 sm:$0xff]  }
 0x216   : > { %4802 = vmatmul.mubr.bf16.gmra.mrb[248].mxu1 %v7902_v43  ;;  %4899 = vmatmul.mubr.bf16.gmra.mrb[248].mxu0 %v7903_v35  ;;  %v7922_v3 = vld [vmem:[%s8227_s9 + $0x8c4] ss:$84 sps:$4 sm:$0xff]   ;;  %v7925_v56 = vld [vmem:[%s8227_s9 + $0x38c] ss:$84 sps:$4 sm:$0xff]  }
 0x217   : > { %v9383_v23 = vadd.f32 %v6619_v31, %v9236_v27  ;;  %v9386_v2 = vadd.f32 %v6683_v39, %v9239_v14  ;;  %4809 = vmatprep.mubr.bf16.mxu1 %v7906_v4  ;;  %4906 = vmatprep.mubr.bf16.mxu0 %v7908_v25 }
 0x219   : > { %v6684_v17 = vpop.f32.mrb[144].mxu0  ;;  %v6748_v13 = vpop.f32.mrb[144].mxu1 }
 0x21a   : > { %v6685_v55 = vpop.f32.mrb[145].mxu0  ;;  %v6749_v58 = vpop.f32.mrb[145].mxu1 }
 0x21b   : > { %v6686_v38 = vadd.f32 %v6685_v55, %v6684_v17  ;;  %v6750_v40 = vadd.f32 %v6749_v58, %v6748_v13  ;;  %v6687_v62 = vpop.f32.mrb[146].mxu0  ;;  %v6751_v5 = vpop.f32.mrb[146].mxu1 }
 0x21c   : > { %v6688_v32 = vpop.f32.mrb[147].mxu0  ;;  %v6752_v27 = vpop.f32.mrb[147].mxu1 }
 0x21d   : > { %v9393_v14 = vadd.f32 %v6686_v38, %v9255_v44  ;;  %v9396_v8 = vadd.f32 %v6750_v40, %v9258_v54  ;;  %v6689_v33 = vadd.f32 %v6688_v32, %v6687_v62  ;;  %v6753_v45 = vadd.f32 %v6752_v27, %v6751_v5  ;;  %v7912_v54 = vld [vmem:[%s8227_s9 + $0x818] ss:$84 sps:$4 sm:$0xff]   ;;  %v7923_v40 = vld [vmem:[%s8227_s9 + $0x388] ss:$84 sps:$4 sm:$0xff]  }
 0x21e   : > { %4810 = vmatmul.mubr.bf16.gmra.mrb[252].mxu1 %v7910_v47  ;;  %4907 = vmatmul.mubr.bf16.gmra.mrb[252].mxu0 %v7911_v1  ;;  %v7928_v32 = vld [vmem:[%s8227_s9 + $0x96c] ss:$84 sps:$4 sm:$0xff]   ;;  %v7931_v27 = vld [vmem:[%s8227_s9 + $0x434] ss:$84 sps:$4 sm:$0xff]  }
 0x21f   : > { %v9399_v7 = vadd.f32 %v6689_v33, %v9264_v11  ;;  %v9402_v6 = vadd.f32 %v6753_v45, %v9267_v24  ;;  %4817 = vmatprep.mubr.bf16.mxu1 %v7914_v48  ;;  %4914 = vmatprep.mubr.bf16.mxu0 %v7917_v9 }
 0x221   : > { %v6690_v43 = vpop.f32.mrb[148].mxu0  ;;  %v6754_v44 = vpop.f32.mrb[148].mxu1 }
 0x222   : > { %v6691_v35 = vpop.f32.mrb[149].mxu0  ;;  %v6755_v18 = vpop.f32.mrb[149].mxu1 }
 0x223   : > { %v6692_v36 = vadd.f32 %v6691_v35, %v6690_v43  ;;  %v6756_v37 = vadd.f32 %v6755_v18, %v6754_v44  ;;  %v6693_v4 = vpop.f32.mrb[150].mxu0  ;;  %v6757_v25 = vpop.f32.mrb[150].mxu1 }
 0x224   : > { %v6694_v31 = vpop.f32.mrb[151].mxu0  ;;  %v6758_v11 = vpop.f32.mrb[151].mxu1 }
 0x225   : > { %v9409_v24 = vadd.f32 %v6692_v36, %v9277_v34  ;;  %v9412_v39 = vadd.f32 %v6756_v37, %v9280_v26  ;;  %v6695_v17 = vadd.f32 %v6694_v31, %v6693_v4  ;;  %v6759_v13 = vadd.f32 %v6758_v11, %v6757_v25  ;;  %v7920_v26 = vld [vmem:[%s8227_s9 + $0x8c0] ss:$84 sps:$4 sm:$0xff]   ;;  %v7929_v37 = vld [vmem:[%s8227_s9 + $0x430] ss:$84 sps:$4 sm:$0xff]  }
 0x226   : > { %4818 = vmatmul.mubr.bf16.gmra.mrb[0].mxu1 %v7912_v54  ;;  %4915 = vmatmul.mubr.bf16.gmra.mrb[0].mxu0 %v7915_v19  ;;  %v7936_v31 = vld [vmem:[%s8227_s9 + $0xa14] ss:$84 sps:$4 sm:$0xff]   ;;  %v7939_v11 = vld [vmem:[%s8227_s9 + $0x4dc] ss:$84 sps:$4 sm:$0xff]  }
 0x227   : > { %v9415_v55 = vadd.f32 %v6695_v17, %v9283_v50  ;;  %v9418_v58 = vadd.f32 %v6759_v13, %v9286_v52  ;;  %4825 = vmatprep.mubr.bf16.mxu1 %v7922_v3  ;;  %4922 = vmatprep.mubr.bf16.mxu0 %v7925_v56 }
 0x229   : > { %v6696_v47 = vpop.f32.mrb[152].mxu0  ;;  %v6760_v34 = vpop.f32.mrb[152].mxu1 }
 0x22a   : > { %v6697_v1 = vpop.f32.mrb[153].mxu0  ;;  %v6761_v38 = vpop.f32.mrb[153].mxu1 }
 0x22b   : > { %v6698_v62 = vadd.f32 %v6697_v1, %v6696_v47  ;;  %v6762_v5 = vadd.f32 %v6761_v38, %v6760_v34  ;;  %v6699_v48 = vpop.f32.mrb[154].mxu0  ;;  %v6763_v9 = vpop.f32.mrb[154].mxu1 }
 0x22c   : > { %v6700_v33 = vpop.f32.mrb[155].mxu0  ;;  %v6764_v50 = vpop.f32.mrb[155].mxu1 }
 0x22d   : > { %v9425_v52 = vadd.f32 %v6698_v62, %v9293_v21  ;;  %v9428_v45 = vadd.f32 %v6762_v5, %v9296_v12  ;;  %v6701_v43 = vadd.f32 %v6700_v33, %v6699_v48  ;;  %v6765_v44 = vadd.f32 %v6764_v50, %v6763_v9  ;;  %v7926_v12 = vld [vmem:[%s8227_s9 + $0x968] ss:$84 sps:$4 sm:$0xff]   ;;  %v7937_v5 = vld [vmem:[%s8227_s9 + $0x4d8] ss:$84 sps:$4 sm:$0xff]  }
 0x22e   : > { %4826 = vmatmul.mubr.bf16.gmra.mrb[4].mxu1 %v7920_v26  ;;  %4923 = vmatmul.mubr.bf16.gmra.mrb[4].mxu0 %v7923_v40  ;;  %v7942_v33 = vld [vmem:[%s8227_s9 + $0x584] ss:$84 sps:$4 sm:$0xff]   ;;  %v7945_v50 = vld [vmem:[%s8227_s9 + $0x4c] ss:$84 sps:$4 sm:$0xff]  }
 0x22f   : > { %v9431_v35 = vadd.f32 %v6701_v43, %v9299_v61  ;;  %v9434_v18 = vadd.f32 %v6765_v44, %v9302_v0  ;;  %4833 = vmatprep.mubr.bf16.mxu1 %v7928_v32  ;;  %4930 = vmatprep.mubr.bf16.mxu0 %v7931_v27 }
 0x231   : > { %v6702_v54 = vpop.f32.mrb[156].mxu0  ;;  %v6766_v21 = vpop.f32.mrb[156].mxu1 }
 0x232   : > { %v6703_v19 = vpop.f32.mrb[157].mxu0  ;;  %v6767_v36 = vpop.f32.mrb[157].mxu1 }
 0x233   : > { %v6704_v4 = vadd.f32 %v6703_v19, %v6702_v54  ;;  %v6768_v25 = vadd.f32 %v6767_v36, %v6766_v21  ;;  %v6705_v3 = vpop.f32.mrb[158].mxu0  ;;  %v6769_v56 = vpop.f32.mrb[158].mxu1 }
 0x234   : > { %v6706_v17 = vpop.f32.mrb[159].mxu0  ;;  %v6770_v61 = vpop.f32.mrb[159].mxu1 }
 0x235   : > { %v9441_v0 = vadd.f32 %v6704_v4, %v9309_v59  ;;  %v9444_v13 = vadd.f32 %v6768_v25, %v9312_v60  ;;  %v6707_v47 = vadd.f32 %v6706_v17, %v6705_v3  ;;  %v6771_v34 = vadd.f32 %v6770_v61, %v6769_v56  ;;  %v7934_v60 = vld [vmem:[%s8227_s9 + $0xa10] ss:$84 sps:$4 sm:$0xff]   ;;  %v7943_v25 = vld [vmem:[%s8227_s9 + $0x48] ss:$84 sps:$4 sm:$0xff]   ;;  %v7949_v17 = vld [vmem:[%s8227_s9 + $0x62c] ss:$84 sps:$4 sm:$0xff]  }
 0x236   : > { %4834 = vmatmul.mubr.bf16.gmra.mrb[8].mxu1 %v7926_v12  ;;  %4931 = vmatmul.mubr.bf16.gmra.mrb[8].mxu0 %v7929_v37  ;;  %v7952_v61 = vld [vmem:[%s8227_s9 + $0xf4] ss:$84 sps:$4 sm:$0xff]  }
 0x237   : > { %v9447_v1 = vadd.f32 %v6707_v47, %v9315_v57  ;;  %v9450_v38 = vadd.f32 %v6771_v34, %v9318_v53  ;;  %4841 = vmatprep.mubr.bf16.mxu1 %v7936_v31  ;;  %4938 = vmatprep.mubr.bf16.mxu0 %v7939_v11 }
 0x239   : > { %v6708_v26 = vpop.f32.mrb[160].mxu0  ;;  %v6772_v59 = vpop.f32.mrb[160].mxu1 }
 0x23a   : > { %v6709_v40 = vpop.f32.mrb[161].mxu0  ;;  %v6773_v62 = vpop.f32.mrb[161].mxu1 }
 0x23b   : > { %v6710_v48 = vadd.f32 %v6709_v40, %v6708_v26  ;;  %v6774_v9 = vadd.f32 %v6773_v62, %v6772_v59  ;;  %v6711_v32 = vpop.f32.mrb[162].mxu0  ;;  %v6775_v27 = vpop.f32.mrb[162].mxu1 }
 0x23c   : > { %v6712_v43 = vpop.f32.mrb[163].mxu0  ;;  %v6776_v57 = vpop.f32.mrb[163].mxu1 }
 0x23d   : > { %v9457_v53 = vadd.f32 %v6710_v48, %v9325_v42  ;;  %v9460_v44 = vadd.f32 %v6774_v9, %v9328_v16  ;;  %v6713_v54 = vadd.f32 %v6712_v43, %v6711_v32  ;;  %v6777_v21 = vadd.f32 %v6776_v57, %v6775_v27  ;;  %v7940_v16 = vld [vmem:[%s8227_s9 + $0x580] ss:$84 sps:$4 sm:$0xff]   ;;  %v7950_v9 = vld [vmem:[%s8227_s9 + $0xf0] ss:$84 sps:$4 sm:$0xff]  }
 0x23e   : > { %4842 = vmatmul.mubr.bf16.gmra.mrb[12].mxu1 %v7934_v60  ;;  %4939 = vmatmul.mubr.bf16.gmra.mrb[12].mxu0 %v7937_v5  ;;  %v7955_v43 = vld [vmem:[%s8227_s9 + $0x6d4] ss:$84 sps:$4 sm:$0xff]   ;;  %v7958_v57 = vld [vmem:[%s8227_s9 + $0x19c] ss:$84 sps:$4 sm:$0xff]  }
 0x23f   : > { %v9463_v19 = vadd.f32 %v6713_v54, %v9331_v49  ;;  %v9466_v36 = vadd.f32 %v6777_v21, %v9334_v15  ;;  %4946 = vmatprep.mubr.bf16.mxu0 %v7942_v33  ;;  %5043 = vmatprep.mubr.bf16.mxu1 %v7945_v50 }
 0x241   : > { %v6714_v12 = vpop.f32.mrb[164].mxu0  ;;  %v6778_v42 = vpop.f32.mrb[164].mxu1 }
 0x242   : > { %v6715_v37 = vpop.f32.mrb[165].mxu0  ;;  %v6779_v4 = vpop.f32.mrb[165].mxu1 }
 0x243   : > { %v6716_v3 = vadd.f32 %v6715_v37, %v6714_v12  ;;  %v6780_v56 = vadd.f32 %v6779_v4, %v6778_v42  ;;  %v6717_v31 = vpop.f32.mrb[166].mxu0  ;;  %v6781_v11 = vpop.f32.mrb[166].mxu1 }
 0x244   : > { %v6718_v47 = vpop.f32.mrb[167].mxu0  ;;  %v6782_v49 = vpop.f32.mrb[167].mxu1 }
 0x245   : > { %v9473_v15 = vadd.f32 %v6716_v3, %v9344_v28  ;;  %v9476_v34 = vadd.f32 %v6780_v56, %v9347_v46  ;;  %v6719_v26 = vadd.f32 %v6718_v47, %v6717_v31  ;;  %v6783_v59 = vadd.f32 %v6782_v49, %v6781_v11  ;;  %v7947_v46 = vld [vmem:[%s8227_s9 + $0x628] ss:$84 sps:$4 sm:$0xff]   ;;  %v7956_v56 = vld [vmem:[%s8227_s9 + $0x198] ss:$84 sps:$4 sm:$0xff]  }
 0x246   : > { %4947 = vmatmul.mubr.bf16.gmra.mrb[16].mxu0 %v7940_v16  ;;  %5044 = vmatmul.mubr.bf16.vlgmr.msra.gmra.mrb[16].mxu1 %v7943_v25  ;;  %v7961_v47 = vld [vmem:[%s8227_s9 + $0x77c] ss:$84 sps:$4 sm:$0xff]   ;;  %v7964_v49 = vld [vmem:[%s8227_s9 + $0x244] ss:$84 sps:$4 sm:$0xff]  }
 0x247   : > { %v9479_v40 = vadd.f32 %v6719_v26, %v9350_v51  ;;  %v9482_v62 = vadd.f32 %v6783_v59, %v9353_v20  ;;  %4954 = vmatprep.mubr.bf16.mxu0 %v7949_v17  ;;  %5051 = vmatprep.mubr.bf16.mxu1 %v7952_v61 }
 0x249   : > { %v6720_v60 = vpop.f32.mrb[168].mxu0  ;;  %v6784_v28 = vpop.f32.mrb[168].mxu1 }
 0x24a   : > { %v6721_v5 = vpop.f32.mrb[169].mxu0  ;;  %v6785_v48 = vpop.f32.mrb[169].mxu1 }
 0x24b   : > { %v6722_v32 = vadd.f32 %v6721_v5, %v6720_v60  ;;  %v6786_v27 = vadd.f32 %v6785_v48, %v6784_v28  ;;  %v6723_v33 = vpop.f32.mrb[170].mxu0  ;;  %v6787_v50 = vpop.f32.mrb[170].mxu1 }
 0x24c   : > { %v6724_v54 = vpop.f32.mrb[171].mxu0  ;;  %v6788_v51 = vpop.f32.mrb[171].mxu1 }
 0x24d   : > { %v9489_v20 = vadd.f32 %v6722_v32, %v9361_v10  ;;  %v9492_v21 = vadd.f32 %v6786_v27, %v9364_v63  ;;  %v6725_v12 = vadd.f32 %v6724_v54, %v6723_v33  ;;  %v6789_v42 = vadd.f32 %v6788_v51, %v6787_v50  ;;  %v7953_v63 = vld [vmem:[%s8227_s9 + $0x6d0] ss:$84 sps:$4 sm:$0xff]   ;;  %v7962_v27 = vld [vmem:[%s8227_s9 + $0x240] ss:$84 sps:$4 sm:$0xff]  }
 0x24e   : > { %4955 = vmatmul.mubr.bf16.gmra.mrb[20].mxu0 %v7947_v46  ;;  %5052 = vmatmul.mubr.bf16.gmra.mrb[20].mxu1 %v7950_v9  ;;  %v7967_v54 = vld [vmem:[%s8227_s9 + $0x824] ss:$84 sps:$4 sm:$0xff]   ;;  %v7970_v51 = vld [vmem:[%s8227_s9 + $0x2ec] ss:$84 sps:$4 sm:$0xff]  }
 0x24f   : > { %v9495_v37 = vadd.f32 %v6725_v12, %v9367_v41  ;;  %v9498_v4 = vadd.f32 %v6789_v42, %v9370_v29  ;;  %4962 = vmatprep.mubr.bf16.mxu0 %v7955_v43  ;;  %5059 = vmatprep.mubr.bf16.mxu1 %v7958_v57 }
 0x251   : > { %v6726_v16 = vpop.f32.mrb[172].mxu0  ;;  %v6790_v10 = vpop.f32.mrb[172].mxu1 }
 0x252   : > { %v6727_v25 = vpop.f32.mrb[173].mxu0  ;;  %v6791_v3 = vpop.f32.mrb[173].mxu1 }
 0x253   : > { %v6728_v31 = vadd.f32 %v6727_v25, %v6726_v16  ;;  %v6792_v11 = vadd.f32 %v6791_v3, %v6790_v10  ;;  %v6729_v17 = vpop.f32.mrb[174].mxu0  ;;  %v6793_v61 = vpop.f32.mrb[174].mxu1 }
 0x254   : > { %v6730_v26 = vpop.f32.mrb[175].mxu0  ;;  %v6794_v41 = vpop.f32.mrb[175].mxu1 }
 0x255   : > { %v9505_v29 = vadd.f32 %v6728_v31, %v9377_v22  ;;  %v9508_v59 = vadd.f32 %v6792_v11, %v9380_v30  ;;  %v6731_v60 = vadd.f32 %v6730_v26, %v6729_v17  ;;  %v6795_v28 = vadd.f32 %v6794_v41, %v6793_v61  ;;  %v7959_v30 = vld [vmem:[%s8227_s9 + $0x778] ss:$84 sps:$4 sm:$0xff]   ;;  %v7968_v11 = vld [vmem:[%s8227_s9 + $0x2e8] ss:$84 sps:$4 sm:$0xff]  }
 0x256   : > { %4963 = vmatmul.mubr.bf16.gmra.mrb[24].mxu0 %v7953_v63  ;;  %5060 = vmatmul.mubr.bf16.gmra.mrb[24].mxu1 %v7956_v56  ;;  %v7973_v26 = vld [vmem:[%s8227_s9 + $0x8cc] ss:$84 sps:$4 sm:$0xff]   ;;  %v7976_v41 = vld [vmem:[%s8227_s9 + $0x394] ss:$84 sps:$4 sm:$0xff]  }
 0x257   : > { %v9511_v5 = vadd.f32 %v6731_v60, %v9383_v23  ;;  %v9514_v48 = vadd.f32 %v6795_v28, %v9386_v2  ;;  %4970 = vmatprep.mubr.bf16.mxu0 %v7961_v47  ;;  %5067 = vmatprep.mubr.bf16.mxu1 %v7964_v49 }
 0x259   : > { %v6796_v46 = vpop.f32.mrb[176].mxu1  ;;  %v6860_v22 = vpop.f32.mrb[176].mxu0 }
 0x25a   : > { %v6797_v9 = vpop.f32.mrb[177].mxu1  ;;  %v6861_v32 = vpop.f32.mrb[177].mxu0 }
 0x25b   : > { %v6798_v33 = vadd.f32 %v6797_v9, %v6796_v46  ;;  %v6862_v50 = vadd.f32 %v6861_v32, %v6860_v22  ;;  %v6799_v43 = vpop.f32.mrb[178].mxu1  ;;  %v6863_v57 = vpop.f32.mrb[178].mxu0 }
 0x25c   : > { %v6800_v12 = vpop.f32.mrb[179].mxu1  ;;  %v6864_v23 = vpop.f32.mrb[179].mxu0 }
 0x25d   : > { %v9521_v2 = vadd.f32 %v6798_v33, %v9393_v14  ;;  %v9524_v42 = vadd.f32 %v6862_v50, %v9396_v8  ;;  %v6801_v16 = vadd.f32 %v6800_v12, %v6799_v43  ;;  %v6865_v10 = vadd.f32 %v6864_v23, %v6863_v57  ;;  %v7965_v8 = vld [vmem:[%s8227_s9 + $0x820] ss:$84 sps:$4 sm:$0xff]   ;;  %v7974_v50 = vld [vmem:[%s8227_s9 + $0x390] ss:$84 sps:$4 sm:$0xff]  }
 0x25e   : > { %4971 = vmatmul.mubr.bf16.gmra.mrb[28].mxu0 %v7959_v30  ;;  %5068 = vmatmul.mubr.bf16.gmra.mrb[28].mxu1 %v7962_v27  ;;  %v7979_v12 = vld [vmem:[%s8227_s9 + $0x974] ss:$84 sps:$4 sm:$0xff]   ;;  %v7982_v23 = vld [vmem:[%s8227_s9 + $0x43c] ss:$84 sps:$4 sm:$0xff]  }
 0x25f   : > { %v9527_v25 = vadd.f32 %v6801_v16, %v9399_v7  ;;  %v9530_v3 = vadd.f32 %v6865_v10, %v9402_v6  ;;  %4978 = vmatprep.mubr.bf16.mxu0 %v7967_v54  ;;  %5075 = vmatprep.mubr.bf16.mxu1 %v7970_v51 }
 0x261   : > { %v6802_v63 = vpop.f32.mrb[180].mxu1  ;;  %v6866_v14 = vpop.f32.mrb[180].mxu0 }
 0x262   : > { %v6803_v56 = vpop.f32.mrb[181].mxu1  ;;  %v6867_v31 = vpop.f32.mrb[181].mxu0 }
 0x263   : > { %v6804_v17 = vadd.f32 %v6803_v56, %v6802_v63  ;;  %v6868_v61 = vadd.f32 %v6867_v31, %v6866_v14  ;;  %v6805_v47 = vpop.f32.mrb[182].mxu1  ;;  %v6869_v49 = vpop.f32.mrb[182].mxu0 }
 0x264   : > { %v6806_v60 = vpop.f32.mrb[183].mxu1  ;;  %v6870_v7 = vpop.f32.mrb[183].mxu0 }
 0x265   : > { %v9537_v6 = vadd.f32 %v6804_v17, %v9409_v24  ;;  %v9540_v28 = vadd.f32 %v6868_v61, %v9412_v39  ;;  %v6807_v46 = vadd.f32 %v6806_v60, %v6805_v47  ;;  %v6871_v22 = vadd.f32 %v6870_v7, %v6869_v49  ;;  %v7971_v39 = vld [vmem:[%s8227_s9 + $0x8c8] ss:$84 sps:$4 sm:$0xff]   ;;  %v7980_v61 = vld [vmem:[%s8227_s9 + $0x438] ss:$84 sps:$4 sm:$0xff]  }
 0x266   : > { %4979 = vmatmul.mubr.bf16.gmra.mrb[32].mxu0 %v7965_v8  ;;  %5076 = vmatmul.mubr.bf16.gmra.mrb[32].mxu1 %v7968_v11  ;;  %v7985_v60 = vld [vmem:[%s8227_s9 + $0xa1c] ss:$84 sps:$4 sm:$0xff]   ;;  %v7988_v7 = vld [vmem:[%s8227_s9 + $0x4e4] ss:$84 sps:$4 sm:$0xff]  }
 0x267   : > { %v9543_v9 = vadd.f32 %v6807_v46, %v9415_v55  ;;  %v9546_v32 = vadd.f32 %v6871_v22, %v9418_v58  ;;  %4986 = vmatprep.mubr.bf16.mxu0 %v7973_v26  ;;  %5083 = vmatprep.mubr.bf16.mxu1 %v7976_v41 }
 0x269   : > { %v6808_v30 = vpop.f32.mrb[184].mxu1  ;;  %v6872_v24 = vpop.f32.mrb[184].mxu0 }
 0x26a   : > { %v6809_v27 = vpop.f32.mrb[185].mxu1  ;;  %v6873_v33 = vpop.f32.mrb[185].mxu0 }
 0x26b   : > { %v6810_v43 = vadd.f32 %v6809_v27, %v6808_v30  ;;  %v6874_v57 = vadd.f32 %v6873_v33, %v6872_v24  ;;  %v6811_v54 = vpop.f32.mrb[186].mxu1  ;;  %v6875_v51 = vpop.f32.mrb[186].mxu0 }
 0x26c   : > { %v6812_v16 = vpop.f32.mrb[187].mxu1  ;;  %v6876_v55 = vpop.f32.mrb[187].mxu0 }
 0x26d   : > { %v9553_v58 = vadd.f32 %v6810_v43, %v9425_v52  ;;  %v9556_v10 = vadd.f32 %v6874_v57, %v9428_v45  ;;  %v6813_v63 = vadd.f32 %v6812_v16, %v6811_v54  ;;  %v6877_v14 = vadd.f32 %v6876_v55, %v6875_v51  ;;  %v7977_v45 = vld [vmem:[%s8227_s9 + $0x970] ss:$84 sps:$4 sm:$0xff]   ;;  %v7986_v57 = vld [vmem:[%s8227_s9 + $0x4e0] ss:$84 sps:$4 sm:$0xff]  }
 0x26e   : > { %4987 = vmatmul.mubr.bf16.gmra.mrb[36].mxu0 %v7971_v39  ;;  %5084 = vmatmul.mubr.bf16.gmra.mrb[36].mxu1 %v7974_v50  ;;  %v7991_v16 = vld [vmem:[%s8227_s9 + $0x58c] ss:$84 sps:$4 sm:$0xff]   ;;  %v7992_v55 = vld [vmem:[%s8227_s9 + $0x50] ss:$84 sps:$4 sm:$0xff]  }
 0x26f   : > { %v9559_v56 = vadd.f32 %v6813_v63, %v9431_v35  ;;  %v9562_v31 = vadd.f32 %v6877_v14, %v9434_v18  ;;  %4994 = vmatprep.mubr.bf16.mxu0 %v7979_v12  ;;  %5091 = vmatprep.mubr.bf16.mxu1 %v7982_v23 }
 0x271   : > { %v6814_v8 = vpop.f32.mrb[188].mxu1  ;;  %v6878_v52 = vpop.f32.mrb[188].mxu0 }
 0x272   : > { %v6815_v11 = vpop.f32.mrb[189].mxu1  ;;  %v6879_v17 = vpop.f32.mrb[189].mxu0 }
 0x273   : > { %v6816_v47 = vadd.f32 %v6815_v11, %v6814_v8  ;;  %v6880_v49 = vadd.f32 %v6879_v17, %v6878_v52  ;;  %v6817_v26 = vpop.f32.mrb[190].mxu1  ;;  %v6881_v41 = vpop.f32.mrb[190].mxu0 }
 0x274   : > { %v6818_v46 = vpop.f32.mrb[191].mxu1  ;;  %v6882_v35 = vpop.f32.mrb[191].mxu0 }
 0x275   : > { %v9569_v18 = vadd.f32 %v6816_v47, %v9441_v0  ;;  %v9572_v22 = vadd.f32 %v6880_v49, %v9444_v13  ;;  %v6819_v30 = vadd.f32 %v6818_v46, %v6817_v26  ;;  %v6883_v24 = vadd.f32 %v6882_v35, %v6881_v41  ;;  %v7983_v13 = vld [vmem:[%s8227_s9 + $0xa18] ss:$84 sps:$4 sm:$0xff]   ;;  %v7989_v47 = vld [vmem:[%s8227_s9 + $0x588] ss:$84 sps:$4 sm:$0xff]   ;;  %v7997_v35 = vld [vmem:[%s8227_s9 + $0x1a0] ss:$84 sps:$4 sm:$0xff]  }
 0x276   : > { %4995 = vmatmul.mubr.bf16.gmra.mrb[40].mxu0 %v7977_v45  ;;  %5092 = vmatmul.mubr.bf16.gmra.mrb[40].mxu1 %v7980_v61  ;;  %v7993_v49 = vld [vmem:[%s8227_s9 + $0xf8] ss:$84 sps:$4 sm:$0xff]   ;;  %v7996_v46 = vld [vmem:[%s8227_s9 + $0x634] ss:$84 sps:$4 sm:$0xff]  }
 0x277   : > { %v9575_v27 = vadd.f32 %v6819_v30, %v9447_v1  ;;  %v9578_v33 = vadd.f32 %v6883_v24, %v9450_v38  ;;  %5002 = vmatprep.mubr.bf16.mxu0 %v7985_v60  ;;  %5099 = vmatprep.mubr.bf16.mxu1 %v7988_v7 }
 0x279   : > { %v6820_v39 = vpop.f32.mrb[192].mxu1  ;;  %v6884_v0 = vpop.f32.mrb[192].mxu0 }
 0x27a   : > { %v6821_v50 = vpop.f32.mrb[193].mxu1  ;;  %v6885_v43 = vpop.f32.mrb[193].mxu0 }
 0x27b   : > { %v6822_v54 = vadd.f32 %v6821_v50, %v6820_v39  ;;  %v6886_v51 = vadd.f32 %v6885_v43, %v6884_v0  ;;  %v6823_v12 = vpop.f32.mrb[194].mxu1  ;;  %v6887_v23 = vpop.f32.mrb[194].mxu0 }
 0x27c   : > { %v6824_v63 = vpop.f32.mrb[195].mxu1  ;;  %v6888_v1 = vpop.f32.mrb[195].mxu0 }
 0x27d   : > { %v9585_v38 = vadd.f32 %v6822_v54, %v9457_v53  ;;  %v9588_v14 = vadd.f32 %v6886_v51, %v9460_v44  ;;  %v6825_v8 = vadd.f32 %v6824_v63, %v6823_v12  ;;  %v6889_v52 = vadd.f32 %v6888_v1, %v6887_v23  ;;  %v7994_v54 = vld [vmem:[%s8227_s9 + $0x630] ss:$84 sps:$4 sm:$0xff]   ;;  %v7998_v51 = vld [vmem:[%s8227_s9 + $0x248] ss:$84 sps:$4 sm:$0xff]  }
 0x27e   : > { %5003 = vmatmul.mubr.bf16.gmra.mrb[44].mxu0 %v7983_v13  ;;  %5100 = vmatmul.mubr.bf16.gmra.mrb[44].mxu1 %v7986_v57  ;;  %v8001_v63 = vld [vmem:[%s8227_s9 + $0x6dc] ss:$84 sps:$4 sm:$0xff]  }
 0x27f   : > { %v9591_v11 = vadd.f32 %v6825_v8, %v9463_v19  ;;  %v9594_v17 = vadd.f32 %v6889_v52, %v9466_v36  ;;  %5107 = vmatprep.mubr.bf16.mxu1 %v7991_v16  ;;  %7314 = vmatprep.mubr.msk.bf16.mxu0 %vm3513_vm0, %v7992_v55  ;;  %v8002_v1 = vld [vmem:[%s8227_s9 + $0x2f0] ss:$84 sps:$4 sm:$0xff]  }
 0x281   : > { %v6826_v53 = vpop.f32.mrb[196].mxu1  ;;  %v6890_v45 = vpop.f32.mrb[196].mxu0 }
 0x282   : > { %v6827_v61 = vpop.f32.mrb[197].mxu1  ;;  %v6891_v44 = vpop.f32.mrb[197].mxu0 }
 0x283   : > { %v6828_v26 = vadd.f32 %v6827_v61, %v6826_v53  ;;  %v6892_v41 = vadd.f32 %v6891_v44, %v6890_v45  ;;  %v6829_v60 = vpop.f32.mrb[198].mxu1  ;;  %v6893_v7 = vpop.f32.mrb[198].mxu0 }
 0x284   : > { %v6830_v19 = vpop.f32.mrb[199].mxu1  ;;  %v6894_v30 = vpop.f32.mrb[199].mxu0 }
 0x285   : > { %v9602_v36 = vadd.f32 %v6828_v26, %v9473_v15  ;;  %v9605_v24 = vadd.f32 %v6892_v41, %v9476_v34  ;;  %v6831_v39 = vadd.f32 %v6830_v19, %v6829_v60  ;;  %v6895_v0 = vadd.f32 %v6894_v30, %v6893_v7  ;;  %v7999_v26 = vld [vmem:[%s8227_s9 + $0x6d8] ss:$84 sps:$4 sm:$0xff]   ;;  %v8007_v30 = vld [vmem:[%s8227_s9 + $0x440] ss:$84 sps:$4 sm:$0xff]  }
 0x286   : > { %5108 = vmatmul.mubr.bf16.gmra.mrb[48].mxu1 %v7989_v47  ;;  %7315 = vmatmul.mubr.msk.bf16.vlgmr.msra.gmra.mrb[48].mxu0 %vm3513_vm0, %v7993_v49  ;;  %v8003_v41 = vld [vmem:[%s8227_s9 + $0x398] ss:$84 sps:$4 sm:$0xff]  }
 0x287   : > { %v9609_v50 = vadd.f32 %v6831_v39, %v9479_v40  ;;  %v9612_v43 = vadd.f32 %v6895_v0, %v9482_v62  ;;  %5115 = vmatprep.mubr.bf16.mxu1 %v7996_v46  ;;  %7318 = vmatprep.mubr.msk.bf16.mxu0 %vm3513_vm0, %v7997_v35  ;;  %v8006_v19 = vld [vmem:[%s8227_s9 + $0x784] ss:$84 sps:$4 sm:$0xff]  }
 0x289   : > { %v6832_v15 = vpop.f32.mrb[200].mxu1  ;;  %v6896_v13 = vpop.f32.mrb[200].mxu0 }
 0x28a   : > { %v6833_v34 = vpop.f32.mrb[201].mxu1  ;;  %v6897_v57 = vpop.f32.mrb[201].mxu0 }
 0x28b   : > { %v6834_v12 = vadd.f32 %v6833_v34, %v6832_v15  ;;  %v6898_v23 = vadd.f32 %v6897_v57, %v6896_v13  ;;  %v6835_v16 = vpop.f32.mrb[202].mxu1  ;;  %v6899_v55 = vpop.f32.mrb[202].mxu0 }
 0x28c   : > { %v6836_v40 = vpop.f32.mrb[203].mxu1  ;;  %v6900_v8 = vpop.f32.mrb[203].mxu0 }
 0x28d   : > { %v9620_v62 = vadd.f32 %v6834_v12, %v9489_v20  ;;  %v9623_v52 = vadd.f32 %v6898_v23, %v9492_v21  ;;  %v6837_v53 = vadd.f32 %v6836_v40, %v6835_v16  ;;  %v6901_v45 = vadd.f32 %v6900_v8, %v6899_v55  ;;  %v8004_v12 = vld [vmem:[%s8227_s9 + $0x780] ss:$84 sps:$4 sm:$0xff]   ;;  %v8008_v23 = vld [vmem:[%s8227_s9 + $0x4e8] ss:$84 sps:$4 sm:$0xff]   ;;  %v8012_v8 = vld [vmem:[%s8227_s9 + $0x590] ss:$84 sps:$4 sm:$0xff]  }
 0x28e   : > { %5116 = vmatmul.mubr.bf16.gmra.mrb[52].mxu1 %v7994_v54  ;;  %7319 = vmatmul.mubr.msk.bf16.gmra.mrb[52].mxu0 %vm3513_vm0, %v7998_v51  ;;  %v8011_v40 = vld [vmem:[%s8227_s9 + $0x82c] ss:$84 sps:$4 sm:$0xff]  }
 0x28f   : > { %v9627_v61 = vadd.f32 %v6837_v53, %v9495_v37  ;;  %v9630_v44 = vadd.f32 %v6901_v45, %v9498_v4  ;;  %5123 = vmatprep.mubr.bf16.mxu1 %v8001_v63  ;;  %7322 = vmatprep.mubr.msk.bf16.mxu0 %vm3513_vm0, %v8002_v1 }
 0x291   : > { %v6838_v20 = vpop.f32.mrb[204].mxu1  ;;  %v6902_v47 = vpop.f32.mrb[204].mxu0 }
 0x292   : > { %v6839_v21 = vpop.f32.mrb[205].mxu1  ;;  %v6903_v49 = vpop.f32.mrb[205].mxu0 }
 0x293   : > { %v6840_v60 = vadd.f32 %v6839_v21, %v6838_v20  ;;  %v6904_v7 = vadd.f32 %v6903_v49, %v6902_v47  ;;  %v6841_v46 = vpop.f32.mrb[206].mxu1  ;;  %v6905_v35 = vpop.f32.mrb[206].mxu0 }
 0x294   : > { %v6842_v37 = vpop.f32.mrb[207].mxu1  ;;  %v6906_v39 = vpop.f32.mrb[207].mxu0 }
 0x295   : > { %v9638_v4 = vadd.f32 %v6840_v60, %v9505_v29  ;;  %v9641_v0 = vadd.f32 %v6904_v7, %v9508_v59  ;;  %v6843_v15 = vadd.f32 %v6842_v37, %v6841_v46  ;;  %v6907_v13 = vadd.f32 %v6906_v39, %v6905_v35  ;;  %v8009_v60 = vld [vmem:[%s8227_s9 + $0x828] ss:$84 sps:$4 sm:$0xff]   ;;  %v8013_v7 = vld [vmem:[%s8227_s9 + $0x638] ss:$84 sps:$4 sm:$0xff]   ;;  %v8017_v39 = vld [vmem:[%s8227_s9 + $0x6e0] ss:$84 sps:$4 sm:$0xff]  }
 0x296   : > { %5124 = vmatmul.mubr.bf16.gmra.mrb[56].mxu1 %v7999_v26  ;;  %7323 = vmatmul.mubr.msk.bf16.gmra.mrb[56].mxu0 %vm3513_vm0, %v8003_v41  ;;  %v8016_v37 = vld [vmem:[%s8227_s9 + $0x8d4] ss:$84 sps:$4 sm:$0xff]  }
 0x297   : > { %v9645_v34 = vadd.f32 %v6843_v15, %v9511_v5  ;;  %v9648_v57 = vadd.f32 %v6907_v13, %v9514_v48  ;;  %5131 = vmatprep.mubr.bf16.mxu1 %v8006_v19  ;;  %7326 = vmatprep.mubr.msk.bf16.mxu0 %vm3513_vm0, %v8007_v30 }
 0x299   : > { %v6908_v29 = vpop.f32.mrb[208].mxu0  ;;  %v6972_v54 = vpop.f32.mrb[208].mxu1 }
 0x29a   : > { %v6909_v59 = vpop.f32.mrb[209].mxu0  ;;  %v6973_v51 = vpop.f32.mrb[209].mxu1 }
 0x29b   : > { %v6910_v16 = vadd.f32 %v6909_v59, %v6908_v29  ;;  %v6974_v55 = vadd.f32 %v6973_v51, %v6972_v54  ;;  %v6911_v63 = vpop.f32.mrb[210].mxu0  ;;  %v6975_v1 = vpop.f32.mrb[210].mxu1 }
 0x29c   : > { %v6912_v5 = vpop.f32.mrb[211].mxu0  ;;  %v6976_v53 = vpop.f32.mrb[211].mxu1 }
 0x29d   : > { %v9656_v48 = vadd.f32 %v6910_v16, %v9521_v2  ;;  %v9659_v45 = vadd.f32 %v6974_v55, %v9524_v42  ;;  %v6913_v20 = vadd.f32 %v6912_v5, %v6911_v63  ;;  %v6977_v47 = vadd.f32 %v6976_v53, %v6975_v1  ;;  %v8014_v16 = vld [vmem:[%s8227_s9 + $0x8d0] ss:$84 sps:$4 sm:$0xff]   ;;  %v8018_v55 = vld [vmem:[%s8227_s9 + $0x788] ss:$84 sps:$4 sm:$0xff]  }
 0x29e   : > { %5132 = vmatmul.mubr.bf16.gmra.mrb[60].mxu1 %v8004_v12  ;;  %7327 = vmatmul.mubr.msk.bf16.gmra.mrb[60].mxu0 %vm3513_vm0, %v8008_v23  ;;  %v8021_v5 = vld [vmem:[%s8227_s9 + $0x97c] ss:$84 sps:$4 sm:$0xff]  }
 0x29f   : > { %v9663_v21 = vadd.f32 %v6913_v20, %v9527_v25  ;;  %v9666_v49 = vadd.f32 %v6977_v47, %v9530_v3  ;;  %5139 = vmatprep.mubr.bf16.mxu1 %v8011_v40  ;;  %7330 = vmatprep.mubr.msk.bf16.mxu0 %vm3513_vm0, %v8012_v8  ;;  %v8022_v53 = vld [vmem:[%s8227_s9 + $0x830] ss:$84 sps:$4 sm:$0xff]  }
 0x2a1   : > { %v6914_v2 = vpop.f32.mrb[212].mxu0  ;;  %v6978_v26 = vpop.f32.mrb[212].mxu1 }
 0x2a2   : > { %v6915_v42 = vpop.f32.mrb[213].mxu0  ;;  %v6979_v41 = vpop.f32.mrb[213].mxu1 }
 0x2a3   : > { %v6916_v46 = vadd.f32 %v6915_v42, %v6914_v2  ;;  %v6980_v35 = vadd.f32 %v6979_v41, %v6978_v26  ;;  %v6917_v19 = vpop.f32.mrb[214].mxu0  ;;  %v6981_v30 = vpop.f32.mrb[214].mxu1 }
 0x2a4   : > { %v6918_v25 = vpop.f32.mrb[215].mxu0  ;;  %v6982_v15 = vpop.f32.mrb[215].mxu1 }
 0x2a5   : > { %v9674_v3 = vadd.f32 %v6916_v46, %v9537_v6  ;;  %v9677_v13 = vadd.f32 %v6980_v35, %v9540_v28  ;;  %v6919_v29 = vadd.f32 %v6918_v25, %v6917_v19  ;;  %v6983_v54 = vadd.f32 %v6982_v15, %v6981_v30  ;;  %v8019_v46 = vld [vmem:[%s8227_s9 + $0x978] ss:$84 sps:$4 sm:$0xff]   ;;  %v8027_v15 = vld [vmem:[%s8227_s9 + $0x980] ss:$84 sps:$4 sm:$0xff]  }
 0x2a6   : > { %5140 = vmatmul.mubr.bf16.gmra.mrb[64].mxu1 %v8009_v60  ;;  %7331 = vmatmul.mubr.msk.bf16.gmra.mrb[64].mxu0 %vm3513_vm0, %v8013_v7  ;;  %v8023_v35 = vld [vmem:[%s8227_s9 + $0x8d8] ss:$84 sps:$4 sm:$0xff]  }
 0x2a7   : > { %v9681_v59 = vadd.f32 %v6919_v29, %v9543_v9  ;;  %v9684_v51 = vadd.f32 %v6983_v54, %v9546_v32  ;;  %5147 = vmatprep.mubr.bf16.mxu1 %v8016_v37  ;;  %7334 = vmatprep.mubr.msk.bf16.mxu0 %vm3513_vm0, %v8017_v39  ;;  %v8026_v25 = vld [vmem:[%s8227_s9 + $0xa24] ss:$84 sps:$4 sm:$0xff]  }
 0x2a9   : > { %v6920_v6 = vpop.f32.mrb[216].mxu0  ;;  %v6984_v12 = vpop.f32.mrb[216].mxu1 }
 0x2aa   : > { %v6921_v28 = vpop.f32.mrb[217].mxu0  ;;  %v6985_v23 = vpop.f32.mrb[217].mxu1 }
 0x2ab   : > { %v6922_v63 = vadd.f32 %v6921_v28, %v6920_v6  ;;  %v6986_v1 = vadd.f32 %v6985_v23, %v6984_v12  ;;  %v6923_v40 = vpop.f32.mrb[218].mxu0  ;;  %v6987_v8 = vpop.f32.mrb[218].mxu1 }
 0x2ac   : > { %v6924_v9 = vpop.f32.mrb[219].mxu0  ;;  %v6988_v20 = vpop.f32.mrb[219].mxu1 }
 0x2ad   : > { %v9692_v32 = vadd.f32 %v6922_v63, %v9553_v58  ;;  %v9695_v47 = vadd.f32 %v6986_v1, %v9556_v10  ;;  %v6925_v2 = vadd.f32 %v6924_v9, %v6923_v40  ;;  %v6989_v26 = vadd.f32 %v6988_v20, %v6987_v8  ;;  %v8028_v1 = vld [vmem:[%s8227_s9 + $0xa28] ss:$84 sps:$4 sm:$0xff]  }
 0x2ae   : > { %5148 = vmatmul.mubr.bf16.gmra.mrb[68].mxu1 %v8014_v16  ;;  %7335 = vmatmul.mubr.msk.bf16.gmra.mrb[68].mxu0 %vm3513_vm0, %v8018_v55 }
 0x2af   : > { %v9699_v42 = vadd.f32 %v6925_v2, %v9559_v56  ;;  %v9702_v41 = vadd.f32 %v6989_v26, %v9562_v31  ;;  %5155 = vmatprep.mubr.bf16.mxu1 %v8021_v5  ;;  %7338 = vmatprep.mubr.msk.bf16.mxu0 %vm3513_vm0, %v8022_v53 }
 0x2b1   : > { %v6926_v58 = vpop.f32.mrb[220].mxu0  ;;  %v6990_v60 = vpop.f32.mrb[220].mxu1 }
 0x2b2   : > { %v6927_v10 = vpop.f32.mrb[221].mxu0  ;;  %v6991_v7 = vpop.f32.mrb[221].mxu1 }
 0x2b3   : > { %v6928_v19 = vadd.f32 %v6927_v10, %v6926_v58  ;;  %v6992_v30 = vadd.f32 %v6991_v7, %v6990_v60  ;;  %v6929_v37 = vpop.f32.mrb[222].mxu0  ;;  %v6993_v39 = vpop.f32.mrb[222].mxu1 }
 0x2b4   : > { %v6930_v56 = vpop.f32.mrb[223].mxu0  ;;  %v6994_v29 = vpop.f32.mrb[223].mxu1 }
 0x2b5   : > { %v9710_v31 = vadd.f32 %v6928_v19, %v9569_v18  ;;  %v9713_v54 = vadd.f32 %v6992_v30, %v9572_v22  ;;  %v6931_v6 = vadd.f32 %v6930_v56, %v6929_v37  ;;  %v6995_v12 = vadd.f32 %v6994_v29, %v6993_v39  ;;  %v8024_v22 = vld [vmem:[%s8227_s9 + $0xa20] ss:$84 sps:$4 sm:$0xff]   ;;  %s5622_s9 = sshll.u32 %s10103_s16, 3 }
 0x2b6   : > { %5156 = vmatmul.mubr.bf16.gmra.mrb[72].mxu1 %v8019_v46  ;;  %7339 = vmatmul.mubr.msk.bf16.gmra.mrb[72].mxu0 %vm3513_vm0, %v8023_v35  ;;  %s10001_s10 = scalar_lea.vmem %s10101_s3, %s5622_s9 }
 0x2b7   : > { %v9717_v28 = vadd.f32 %v6931_v6, %v9575_v27  ;;  %v9720_v23 = vadd.f32 %v6995_v12, %v9578_v33  ;;  %5163 = vmatprep.mubr.bf16.mxu1 %v8026_v25  ;;  %7342 = vmatprep.mubr.msk.bf16.mxu0 %vm3513_vm0, %v8027_v15 }
 0x2b9   : > { %v6932_v16 = vpop.f32.mrb[224].mxu0  ;;  %v6996_v18 = vpop.f32.mrb[224].mxu1 }
 0x2ba   : > { %v6933_v55 = vpop.f32.mrb[225].mxu0  ;;  %v6997_v63 = vpop.f32.mrb[225].mxu1 }
 0x2bb   : > { %v6934_v40 = vadd.f32 %v6933_v55, %v6932_v16  ;;  %v6998_v8 = vadd.f32 %v6997_v63, %v6996_v18  ;;  %v6935_v5 = vpop.f32.mrb[226].mxu0  ;;  %v6999_v53 = vpop.f32.mrb[226].mxu1 }
 0x2bc   : > { %v6936_v9 = vpop.f32.mrb[227].mxu0  ;;  %v7000_v20 = vpop.f32.mrb[227].mxu1 }
 0x2bd   : > { %v9726_v27 = vadd.f32 %v6934_v40, %v9585_v38  ;;  %v9729_v33 = vadd.f32 %v6998_v8, %v9588_v14  ;;  %v6937_v2 = vadd.f32 %v6936_v9, %v6935_v5  ;;  %v7001_v26 = vadd.f32 %v7000_v20, %v6999_v53 }
 0x2be   : > { %5164 = vmatmul.mubr.bf16.gmra.mrb[76].mxu1 %v8024_v22  ;;  %7343 = vmatmul.mubr.msk.bf16.gmra.mrb[76].mxu0 %vm3513_vm0, %v8028_v1 }
 0x2bf   : > { %v9733_v58 = vadd.f32 %v6937_v2, %v9591_v11  ;;  %v9736_v60 = vadd.f32 %v7001_v26, %v9594_v17 }
 0x2c1   : > { %v6938_v10 = vpop.f32.mrb[228].mxu0  ;;  %v7002_v7 = vpop.f32.mrb[228].mxu1 }
 0x2c2   : > { %v6939_v46 = vpop.f32.mrb[229].mxu0  ;;  %v7003_v35 = vpop.f32.mrb[229].mxu1 }
 0x2c3   : > { %v6940_v38 = vadd.f32 %v6939_v46, %v6938_v10  ;;  %v7004_v19 = vadd.f32 %v7003_v35, %v7002_v7  ;;  %v6941_v30 = vpop.f32.mrb[230].mxu0  ;;  %v7005_v14 = vpop.f32.mrb[230].mxu1 }
 0x2c4   : > { %v6942_v37 = vpop.f32.mrb[231].mxu0  ;;  %v7006_v39 = vpop.f32.mrb[231].mxu1 }
 0x2c5   : > { %v9739_v25 = vadd.f32 %v6940_v38, %v9602_v36  ;;  %v9742_v15 = vadd.f32 %v7004_v19, %v9605_v24  ;;  %v6943_v11 = vadd.f32 %v6942_v37, %v6941_v30  ;;  %v7007_v56 = vadd.f32 %v7006_v39, %v7005_v14 }
 0x2c7   : > { %v9745_v17 = vadd.f32 %v6943_v11, %v9609_v50  ;;  %v9748_v29 = vadd.f32 %v7007_v56, %v9612_v43 }
 0x2c9   : > { %v6944_v6 = vpop.f32.mrb[232].mxu0  ;;  %v7008_v12 = vpop.f32.mrb[232].mxu1 }
 0x2ca   : > { %v6945_v16 = vpop.f32.mrb[233].mxu0  ;;  %v7009_v18 = vpop.f32.mrb[233].mxu1 }
 0x2cb   : > { %v6946_v55 = vadd.f32 %v6945_v16, %v6944_v6  ;;  %v7010_v63 = vadd.f32 %v7009_v18, %v7008_v12  ;;  %v6947_v22 = vpop.f32.mrb[234].mxu0  ;;  %v7011_v36 = vpop.f32.mrb[234].mxu1 }
 0x2cc   : > { %v6948_v1 = vpop.f32.mrb[235].mxu0  ;;  %v7012_v40 = vpop.f32.mrb[235].mxu1 }
 0x2cd   : > { %v9751_v24 = vadd.f32 %v6946_v55, %v9620_v62  ;;  %v9754_v8 = vadd.f32 %v7010_v63, %v9623_v52  ;;  %v6949_v50 = vadd.f32 %v6948_v1, %v6947_v22  ;;  %v7013_v5 = vadd.f32 %v7012_v40, %v7011_v36 }
 0x2cf   : > { %v9757_v43 = vadd.f32 %v6949_v50, %v9627_v61  ;;  %v9760_v53 = vadd.f32 %v7013_v5, %v9630_v44 }
 0x2d1   : > { %v6950_v9 = vpop.f32.mrb[236].mxu0  ;;  %v7014_v20 = vpop.f32.mrb[236].mxu1 }
 0x2d2   : > { %v6951_v2 = vpop.f32.mrb[237].mxu0  ;;  %v7015_v26 = vpop.f32.mrb[237].mxu1 }
 0x2d3   : > { %v6952_v10 = vadd.f32 %v6951_v2, %v6950_v9  ;;  %v7016_v7 = vadd.f32 %v7015_v26, %v7014_v20  ;;  %v6953_v46 = vpop.f32.mrb[238].mxu0  ;;  %v7017_v62 = vpop.f32.mrb[238].mxu1 }
 0x2d4   : > { %v6954_v35 = vpop.f32.mrb[239].mxu0  ;;  %v7018_v38 = vpop.f32.mrb[239].mxu1 }
 0x2d5   : > { %v9763_v52 = vadd.f32 %v6952_v10, %v9638_v4  ;;  %v9766_v19 = vadd.f32 %v7016_v7, %v9641_v0  ;;  %v6955_v61 = vadd.f32 %v6954_v35, %v6953_v46  ;;  %v7019_v30 = vadd.f32 %v7018_v38, %v7017_v62 }
 0x2d7   : > { %v9769_v44 = vadd.f32 %v6955_v61, %v9645_v34  ;;  %v9772_v14 = vadd.f32 %v7019_v30, %v9648_v57 }
 0x2d9   : > { %v7020_v37 = vpop.f32.mrb[240].mxu1  ;;  %v7084_v39 = vpop.f32.mrb[240].mxu0 }
 0x2da   : > { %v7021_v11 = vpop.f32.mrb[241].mxu1  ;;  %v7085_v56 = vpop.f32.mrb[241].mxu0 }
 0x2db   : > { %v7022_v6 = vadd.f32 %v7021_v11, %v7020_v37  ;;  %v7086_v12 = vadd.f32 %v7085_v56, %v7084_v39  ;;  %v7023_v16 = vpop.f32.mrb[242].mxu1  ;;  %v7087_v4 = vpop.f32.mrb[242].mxu0 }
 0x2dc   : > { %v7024_v18 = vpop.f32.mrb[243].mxu1  ;;  %v7088_v55 = vpop.f32.mrb[243].mxu0 }
 0x2dd   : > { %v9775_v0 = vadd.f32 %v7022_v6, %v9656_v48  ;;  %v9778_v63 = vadd.f32 %v7086_v12, %v9659_v45  ;;  %v7025_v34 = vadd.f32 %v7024_v18, %v7023_v16  ;;  %v7089_v22 = vadd.f32 %v7088_v55, %v7087_v4 }
 0x2df   : > { %v9781_v57 = vadd.f32 %v7025_v34, %v9663_v21  ;;  %v9784_v36 = vadd.f32 %v7089_v22, %v9666_v49 }
 0x2e1   : > { %v7026_v1 = vpop.f32.mrb[244].mxu1  ;;  %v7090_v40 = vpop.f32.mrb[244].mxu0 }
 0x2e2   : > { %v7027_v50 = vpop.f32.mrb[245].mxu1  ;;  %v7091_v5 = vpop.f32.mrb[245].mxu0 }
 0x2e3   : > { %v7028_v9 = vadd.f32 %v7027_v50, %v7026_v1  ;;  %v7092_v20 = vadd.f32 %v7091_v5, %v7090_v40  ;;  %v7029_v2 = vpop.f32.mrb[246].mxu1  ;;  %v7093_v48 = vpop.f32.mrb[246].mxu0 }
 0x2e4   : > { %v7030_v26 = vpop.f32.mrb[247].mxu1  ;;  %v7094_v10 = vpop.f32.mrb[247].mxu0 }
 0x2e5   : > { %v9787_v45 = vadd.f32 %v7028_v9, %v9674_v3  ;;  %v9790_v7 = vadd.f32 %v7092_v20, %v9677_v13  ;;  %v7031_v21 = vadd.f32 %v7030_v26, %v7029_v2  ;;  %v7095_v46 = vadd.f32 %v7094_v10, %v7093_v48 }
 0x2e7   : > { %v9793_v49 = vadd.f32 %v7031_v21, %v9681_v59  ;;  %v9796_v62 = vadd.f32 %v7095_v46, %v9684_v51 }
 0x2e9   : > { %v7032_v35 = vpop.f32.mrb[248].mxu1  ;;  %v7096_v38 = vpop.f32.mrb[248].mxu0 }
 0x2ea   : > { %v7033_v61 = vpop.f32.mrb[249].mxu1  ;;  %v7097_v30 = vpop.f32.mrb[249].mxu0 }
 0x2eb   : > { %v7034_v37 = vadd.f32 %v7033_v61, %v7032_v35  ;;  %v7098_v39 = vadd.f32 %v7097_v30, %v7096_v38  ;;  %v7035_v11 = vpop.f32.mrb[250].mxu1  ;;  %v7099_v3 = vpop.f32.mrb[250].mxu0 }
 0x2ec   : > { %v7036_v56 = vpop.f32.mrb[251].mxu1  ;;  %v7100_v6 = vpop.f32.mrb[251].mxu0 }
 0x2ed   : > { %v9799_v13 = vadd.f32 %v7034_v37, %v9692_v32  ;;  %v9802_v12 = vadd.f32 %v7098_v39, %v9695_v47  ;;  %v7037_v59 = vadd.f32 %v7036_v56, %v7035_v11  ;;  %v7101_v16 = vadd.f32 %v7100_v6, %v7099_v3 }
 0x2ef   : > { %v9805_v51 = vadd.f32 %v7037_v59, %v9699_v42  ;;  %v9808_v4 = vadd.f32 %v7101_v16, %v9702_v41 }
 0x2f1   : > { %v7038_v18 = vpop.f32.mrb[252].mxu1  ;;  %v7102_v55 = vpop.f32.mrb[252].mxu0 }
 0x2f2   : > { %v7039_v34 = vpop.f32.mrb[253].mxu1  ;;  %v7103_v22 = vpop.f32.mrb[253].mxu0 }
 0x2f3   : > { %v7040_v1 = vadd.f32 %v7039_v34, %v7038_v18  ;;  %v7104_v40 = vadd.f32 %v7103_v22, %v7102_v55  ;;  %v7041_v50 = vpop.f32.mrb[254].mxu1  ;;  %v7105_v32 = vpop.f32.mrb[254].mxu0 }
 0x2f4   : > { %v7042_v5 = vpop.f32.mrb[255].mxu1  ;;  %v7106_v9 = vpop.f32.mrb[255].mxu0 }
 0x2f5   : > { %v9811_v47 = vadd.f32 %v7040_v1, %v9710_v31  ;;  %v9814_v20 = vadd.f32 %v7104_v40, %v9713_v54  ;;  %v7043_v42 = vadd.f32 %v7042_v5, %v7041_v50  ;;  %v7107_v2 = vadd.f32 %v7106_v9, %v7105_v32 }
 0x2f7   : > { %v9817_v41 = vadd.f32 %v7043_v42, %v9717_v28  ;;  %v9820_v48 = vadd.f32 %v7107_v2, %v9720_v23 }
 0x2f9   : > { %v7044_v26 = vpop.f32.mrb[0].mxu1  ;;  %v7108_v10 = vpop.f32.mrb[0].mxu0 }
 0x2fa   : > { %v7045_v21 = vpop.f32.mrb[1].mxu1  ;;  %v7109_v46 = vpop.f32.mrb[1].mxu0 }
 0x2fb   : > { %v7046_v35 = vadd.f32 %v7045_v21, %v7044_v26  ;;  %v7110_v38 = vadd.f32 %v7109_v46, %v7108_v10  ;;  %v7047_v61 = vpop.f32.mrb[2].mxu1  ;;  %v7111_v31 = vpop.f32.mrb[2].mxu0 }
 0x2fc   : > { %v7048_v30 = vpop.f32.mrb[3].mxu1  ;;  %v7112_v37 = vpop.f32.mrb[3].mxu0 }
 0x2fd   : > { %v9823_v54 = vadd.f32 %v7046_v35, %v9726_v27  ;;  %v9826_v39 = vadd.f32 %v7110_v38, %v9729_v33  ;;  %v7049_v28 = vadd.f32 %v7048_v30, %v7047_v61  ;;  %v7113_v11 = vadd.f32 %v7112_v37, %v7111_v31 }
 0x2ff   : > { %v9829_v23 = vadd.f32 %v7049_v28, %v9733_v58  ;;  %v9832_v3 = vadd.f32 %v7113_v11, %v9736_v60 }
 0x301   : > { %v7050_v56 = vpop.f32.mrb[4].mxu1  ;;  %v7114_v6 = vpop.f32.mrb[4].mxu0 }
 0x302   : > { %v7051_v59 = vpop.f32.mrb[5].mxu1  ;;  %v7115_v16 = vpop.f32.mrb[5].mxu0 }
 0x303   : > { %v7052_v18 = vadd.f32 %v7051_v59, %v7050_v56  ;;  %v7116_v55 = vadd.f32 %v7115_v16, %v7114_v6  ;;  %v7053_v34 = vpop.f32.mrb[6].mxu1  ;;  %v7117_v27 = vpop.f32.mrb[6].mxu0 }
 0x304   : > { %v7054_v22 = vpop.f32.mrb[7].mxu1  ;;  %v7118_v1 = vpop.f32.mrb[7].mxu0 }
 0x305   : > { %v9835_v33 = vadd.f32 %v7052_v18, %v9739_v25  ;;  %v9838_v40 = vadd.f32 %v7116_v55, %v9742_v15  ;;  %v7055_v58 = vadd.f32 %v7054_v22, %v7053_v34  ;;  %v7119_v50 = vadd.f32 %v7118_v1, %v7117_v27 }
 0x307   : > { %v9841_v60 = vadd.f32 %v7055_v58, %v9745_v17  ;;  %v9844_v32 = vadd.f32 %v7119_v50, %v9748_v29 }
 0x309   : > { %v7056_v5 = vpop.f32.mrb[8].mxu1  ;;  %v7120_v9 = vpop.f32.mrb[8].mxu0 }
 0x30a   : > { %v7057_v42 = vpop.f32.mrb[9].mxu1  ;;  %v7121_v2 = vpop.f32.mrb[9].mxu0 }
 0x30b   : > { %v7058_v26 = vadd.f32 %v7057_v42, %v7056_v5  ;;  %v7122_v10 = vadd.f32 %v7121_v2, %v7120_v9  ;;  %v7059_v21 = vpop.f32.mrb[10].mxu1  ;;  %v7123_v25 = vpop.f32.mrb[10].mxu0 }
 0x30c   : > { %v7060_v46 = vpop.f32.mrb[11].mxu1  ;;  %v7124_v35 = vpop.f32.mrb[11].mxu0 }
 0x30d   : > { %v9847_v15 = vadd.f32 %v7058_v26, %v9751_v24  ;;  %v9850_v38 = vadd.f32 %v7122_v10, %v9754_v8  ;;  %v7061_v17 = vadd.f32 %v7060_v46, %v7059_v21  ;;  %v7125_v61 = vadd.f32 %v7124_v35, %v7123_v25 }
 0x30f   : > { %v9853_v29 = vadd.f32 %v7061_v17, %v9757_v43  ;;  %v9856_v31 = vadd.f32 %v7125_v61, %v9760_v53 }
 0x311   : > { %v7062_v30 = vpop.f32.mrb[12].mxu1  ;;  %v7126_v37 = vpop.f32.mrb[12].mxu0 }
 0x312   : > { %v7063_v28 = vpop.f32.mrb[13].mxu1  ;;  %v7127_v11 = vpop.f32.mrb[13].mxu0 }
 0x313   : > { %v7064_v56 = vadd.f32 %v7063_v28, %v7062_v30  ;;  %v7128_v6 = vadd.f32 %v7127_v11, %v7126_v37  ;;  %v7065_v59 = vpop.f32.mrb[14].mxu1  ;;  %v7129_v24 = vpop.f32.mrb[14].mxu0 }
 0x314   : > { %v7066_v16 = vpop.f32.mrb[15].mxu1  ;;  %v7130_v18 = vpop.f32.mrb[15].mxu0 }
 0x315   : > { %v9859_v8 = vadd.f32 %v7064_v56, %v9763_v52  ;;  %v9862_v55 = vadd.f32 %v7128_v6, %v9766_v19  ;;  %v7067_v43 = vadd.f32 %v7066_v16, %v7065_v59  ;;  %v7131_v34 = vadd.f32 %v7130_v18, %v7129_v24 }
 0x317   : > { %v9865_v53 = vadd.f32 %v7067_v43, %v9769_v44  ;;  %v9868_v27 = vadd.f32 %v7131_v34, %v9772_v14 }
 0x319   : > { %v7132_v22 = vpop.f32.mrb[16].mxu0  ;;  %v7196_v1 = vpop.f32.mrb[16].mxu1 }
 0x31a   : > { %v7133_v58 = vpop.f32.mrb[17].mxu0  ;;  %v7197_v50 = vpop.f32.mrb[17].mxu1 }
 0x31b   : > { %v7134_v5 = vadd.f32 %v7133_v58, %v7132_v22  ;;  %v7198_v9 = vadd.f32 %v7197_v50, %v7196_v1  ;;  %v7135_v42 = vpop.f32.mrb[18].mxu0  ;;  %v7199_v52 = vpop.f32.mrb[18].mxu1 }
 0x31c   : > { %v7136_v2 = vpop.f32.mrb[19].mxu0  ;;  %v7200_v26 = vpop.f32.mrb[19].mxu1 }
 0x31d   : > { %v9871_v19 = vadd.f32 %v7134_v5, %v9775_v0  ;;  %v7137_v10 = vadd.f32 %v7136_v2, %v7135_v42  ;;  %v7201_v21 = vadd.f32 %v7200_v26, %v7199_v52  ;;  %v9874_v44 = vadd.f32 %v7198_v9, %v9778_v63 }
 0x31f   : > { %v9877_v14 = vadd.f32 %v7137_v10, %v9781_v57  ;;  %v9880_v25 = vadd.f32 %v7201_v21, %v9784_v36 }
 0x321   : > { %v7138_v46 = vpop.f32.mrb[20].mxu0  ;;  %v7202_v35 = vpop.f32.mrb[20].mxu1 }
 0x322   : > { %v7139_v17 = vpop.f32.mrb[21].mxu0  ;;  %v7203_v61 = vpop.f32.mrb[21].mxu1 }
 0x323   : > { %v7140_v30 = vadd.f32 %v7139_v17, %v7138_v46  ;;  %v7204_v37 = vadd.f32 %v7203_v61, %v7202_v35  ;;  %v7141_v28 = vpop.f32.mrb[22].mxu0  ;;  %v7205_v0 = vpop.f32.mrb[22].mxu1 }
 0x324   : > { %v7142_v11 = vpop.f32.mrb[23].mxu0  ;;  %v7206_v56 = vpop.f32.mrb[23].mxu1 }
 0x325   : > { %v9883_v6 = vadd.f32 %v7140_v30, %v9787_v45  ;;  %v7143_v63 = vadd.f32 %v7142_v11, %v7141_v28  ;;  %v7207_v59 = vadd.f32 %v7206_v56, %v7205_v0  ;;  %v9886_v57 = vadd.f32 %v7204_v37, %v9790_v7 }
 0x327   : > { %v9889_v36 = vadd.f32 %v7143_v63, %v9793_v49  ;;  %v9892_v24 = vadd.f32 %v7207_v59, %v9796_v62 }
 0x329   : > { %v7144_v16 = vpop.f32.mrb[24].mxu0  ;;  %v7208_v18 = vpop.f32.mrb[24].mxu1 }
 0x32a   : > { %v7145_v43 = vpop.f32.mrb[25].mxu0  ;;  %v7209_v34 = vpop.f32.mrb[25].mxu1 }
 0x32b   : > { %v7146_v22 = vadd.f32 %v7145_v43, %v7144_v16  ;;  %v7210_v1 = vadd.f32 %v7209_v34, %v7208_v18  ;;  %v7147_v58 = vpop.f32.mrb[26].mxu0  ;;  %v7211_v45 = vpop.f32.mrb[26].mxu1 }
 0x32c   : > { %v7148_v50 = vpop.f32.mrb[27].mxu0  ;;  %v7212_v5 = vpop.f32.mrb[27].mxu1 }
 0x32d   : > { %v9895_v9 = vadd.f32 %v7146_v22, %v9799_v13  ;;  %v7149_v7 = vadd.f32 %v7148_v50, %v7147_v58  ;;  %v7213_v42 = vadd.f32 %v7212_v5, %v7211_v45  ;;  %v9898_v49 = vadd.f32 %v7210_v1, %v9802_v12 }
 0x32f   : > { %v9901_v62 = vadd.f32 %v7149_v7, %v9805_v51  ;;  %v9904_v52 = vadd.f32 %v7213_v42, %v9808_v4 }
 0x331   : > { %v7150_v2 = vpop.f32.mrb[28].mxu0  ;;  %v7214_v26 = vpop.f32.mrb[28].mxu1 }
 0x332   : > { %v7151_v10 = vpop.f32.mrb[29].mxu0  ;;  %v7215_v21 = vpop.f32.mrb[29].mxu1 }
 0x333   : > { %v7152_v46 = vadd.f32 %v7151_v10, %v7150_v2  ;;  %v7216_v35 = vadd.f32 %v7215_v21, %v7214_v26  ;;  %v7153_v17 = vpop.f32.mrb[30].mxu0  ;;  %v7217_v13 = vpop.f32.mrb[30].mxu1 }
 0x334   : > { %v7154_v61 = vpop.f32.mrb[31].mxu0  ;;  %v7218_v30 = vpop.f32.mrb[31].mxu1 }
 0x335   : > { %v9907_v37 = vadd.f32 %v7152_v46, %v9811_v47  ;;  %v7155_v12 = vadd.f32 %v7154_v61, %v7153_v17  ;;  %v7219_v28 = vadd.f32 %v7218_v30, %v7217_v13  ;;  %v9910_v51 = vadd.f32 %v7216_v35, %v9814_v20 }
 0x337   : > { %v9913_v4 = vadd.f32 %v7155_v12, %v9817_v41  ;;  %v9916_v0 = vadd.f32 %v7219_v28, %v9820_v48 }
 0x339   : > { %v7156_v11 = vpop.f32.mrb[32].mxu0  ;;  %v7220_v56 = vpop.f32.mrb[32].mxu1 }
 0x33a   : > { %v7157_v63 = vpop.f32.mrb[33].mxu0  ;;  %v7221_v59 = vpop.f32.mrb[33].mxu1 }
 0x33b   : > { %v7158_v16 = vadd.f32 %v7157_v63, %v7156_v11  ;;  %v7222_v18 = vadd.f32 %v7221_v59, %v7220_v56  ;;  %v7159_v43 = vpop.f32.mrb[34].mxu0  ;;  %v7223_v47 = vpop.f32.mrb[34].mxu1 }
 0x33c   : > { %v7160_v34 = vpop.f32.mrb[35].mxu0  ;;  %v7224_v22 = vpop.f32.mrb[35].mxu1 }
 0x33d   : > { %v9919_v1 = vadd.f32 %v7158_v16, %v9823_v54  ;;  %v7161_v20 = vadd.f32 %v7160_v34, %v7159_v43  ;;  %v7225_v58 = vadd.f32 %v7224_v22, %v7223_v47  ;;  %v9922_v41 = vadd.f32 %v7222_v18, %v9826_v39 }
 0x33f   : > { %v9925_v48 = vadd.f32 %v7161_v20, %v9829_v23  ;;  %v9928_v45 = vadd.f32 %v7225_v58, %v9832_v3 }
 0x341   : > { %v7162_v50 = vpop.f32.mrb[36].mxu0  ;;  %v7226_v5 = vpop.f32.mrb[36].mxu1 }
 0x342   : > { %v7163_v7 = vpop.f32.mrb[37].mxu0  ;;  %v7227_v42 = vpop.f32.mrb[37].mxu1 }
 0x343   : > { %v7164_v2 = vadd.f32 %v7163_v7, %v7162_v50  ;;  %v7228_v26 = vadd.f32 %v7227_v42, %v7226_v5  ;;  %v7165_v10 = vpop.f32.mrb[38].mxu0  ;;  %v7229_v54 = vpop.f32.mrb[38].mxu1 }
 0x344   : > { %v7166_v21 = vpop.f32.mrb[39].mxu0  ;;  %v7230_v46 = vpop.f32.mrb[39].mxu1 }
 0x345   : > { %v9931_v35 = vadd.f32 %v7164_v2, %v9835_v33  ;;  %v7167_v39 = vadd.f32 %v7166_v21, %v7165_v10  ;;  %v7231_v17 = vadd.f32 %v7230_v46, %v7229_v54  ;;  %v9934_v23 = vadd.f32 %v7228_v26, %v9838_v40 }
 0x347   : > { %v9937_v3 = vadd.f32 %v7167_v39, %v9841_v60  ;;  %v9940_v13 = vadd.f32 %v7231_v17, %v9844_v32 }
 0x349   : > { %v7168_v61 = vpop.f32.mrb[40].mxu0  ;;  %v7232_v30 = vpop.f32.mrb[40].mxu1 }
 0x34a   : > { %v7169_v12 = vpop.f32.mrb[41].mxu0  ;;  %v7233_v28 = vpop.f32.mrb[41].mxu1 }
 0x34b   : > { %v7170_v11 = vadd.f32 %v7169_v12, %v7168_v61  ;;  %v7234_v56 = vadd.f32 %v7233_v28, %v7232_v30  ;;  %v7171_v63 = vpop.f32.mrb[42].mxu0  ;;  %v7235_v33 = vpop.f32.mrb[42].mxu1 }
 0x34c   : > { %v7172_v59 = vpop.f32.mrb[43].mxu0  ;;  %v7236_v16 = vpop.f32.mrb[43].mxu1 }
 0x34d   : > { %v9943_v18 = vadd.f32 %v7170_v11, %v9847_v15  ;;  %v7173_v40 = vadd.f32 %v7172_v59, %v7171_v63  ;;  %v7237_v43 = vadd.f32 %v7236_v16, %v7235_v33  ;;  %v9946_v60 = vadd.f32 %v7234_v56, %v9850_v38 }
 0x34f   : > { %v9949_v32 = vadd.f32 %v7173_v40, %v9853_v29  ;;  %v9952_v47 = vadd.f32 %v7237_v43, %v9856_v31 }
 0x351   : > { %v7174_v34 = vpop.f32.mrb[44].mxu0  ;;  %v7238_v22 = vpop.f32.mrb[44].mxu1 }
 0x352   : > { %v7175_v20 = vpop.f32.mrb[45].mxu0  ;;  %v7239_v58 = vpop.f32.mrb[45].mxu1 }
 0x353   : > { %v7176_v50 = vadd.f32 %v7175_v20, %v7174_v34  ;;  %v7240_v5 = vadd.f32 %v7239_v58, %v7238_v22  ;;  %v7177_v7 = vpop.f32.mrb[46].mxu0  ;;  %v7241_v15 = vpop.f32.mrb[46].mxu1 }
 0x354   : > { %v7178_v42 = vpop.f32.mrb[47].mxu0  ;;  %v7242_v2 = vpop.f32.mrb[47].mxu1 }
 0x355   : > { %v9955_v26 = vadd.f32 %v7176_v50, %v9859_v8  ;;  %v7179_v38 = vadd.f32 %v7178_v42, %v7177_v7  ;;  %v7243_v10 = vadd.f32 %v7242_v2, %v7241_v15  ;;  %v9958_v29 = vadd.f32 %v7240_v5, %v9862_v55 }
 0x357   : > { %v9961_v31 = vadd.f32 %v7179_v38, %v9865_v53  ;;  %v9964_v54 = vadd.f32 %v7243_v10, %v9868_v27 }
 0x359   : > { %v7244_v21 = vpop.f32.mrb[48].mxu1  ;;  %v7316_v46 = vpop.f32.mrb[48].mxu0 }
 0x35a   : > { %v5215_v39 = vadd.f32 %v7316_v46, %v9886_v57  ;;  %v7245_v17 = vpop.f32.mrb[49].mxu1  ;;  %v5206_v61 = vpop.f32.mrb[49].mxu0 }
 0x35b   : > { %v7246_v30 = vadd.f32 %v7245_v17, %v7244_v21  ;;  %v5207_v8 = vadd.f32 %v5206_v61, %v9874_v44  ;;  %v7247_v12 = vpop.f32.mrb[50].mxu1  ;;  %v7317_v28 = vpop.f32.mrb[50].mxu0 }
 0x35c   : > { %v6140_v11 = vmul.f32 -1.442695, %v5215_v39  ;;  %v5218_v55 = vadd.f32 %v7317_v28, %v9892_v24  ;;  %v7248_v56 = vpop.f32.mrb[51].mxu1  ;;  %v5209_v53 = vpop.f32.mrb[51].mxu0 }
 0x35d   : > { %v6138_v63 = vmul.f32 -1.442695, %v5207_v8  ;;  %v7249_v33 = vadd.f32 %v7248_v56, %v7247_v12  ;;  %v5210_v27 = vadd.f32 %v5209_v53, %v9880_v25  ;;  %v9971_v59 = vadd.f32 %v7246_v30, %v9871_v19 }
 0x35e   : > { %8029 = vpow2.f32 %v6140_v11  ;;  %v6141_v57 = vmul.f32 -1.442695, %v5218_v55 }
 0x35f   : > { %8031 = vpow2.f32 %v6138_v63  ;;  %v6139_v16 = vmul.f32 -1.442695, %v5210_v27  ;;  %v9974_v44 = vadd.f32 %v7249_v33, %v9877_v14 }
 0x360   : > { %8033 = vpow2.f32 %v6141_v57 }
 0x361   : > { %8035 = vpow2.f32 %v6139_v16  ;;  %v7250_v40 = vpop.f32.mrb[52].mxu1  ;;  %v7320_v24 = vpop.f32.mrb[52].mxu0 }
 0x362   : > { %v5231_v43 = vadd.f32 %v7320_v24, %v9910_v51  ;;  %v7251_v34 = vpop.f32.mrb[53].mxu1  ;;  %v5222_v22 = vpop.f32.mrb[53].mxu0 }
 0x363   : > { %v7252_v20 = vadd.f32 %v7251_v34, %v7250_v40  ;;  %v5223_v25 = vadd.f32 %v5222_v22, %v9898_v49  ;;  %v7253_v19 = vpop.f32.mrb[54].mxu1  ;;  %v7321_v58 = vpop.f32.mrb[54].mxu0 }
 0x364   : > { %v6144_v50 = vmul.f32 -1.442695, %v5231_v43  ;;  %v5234_v5 = vadd.f32 %v7321_v58, %v9916_v0  ;;  %v7254_v7 = vpop.f32.mrb[55].mxu1  ;;  %v5225_v15 = vpop.f32.mrb[55].mxu0 }
 0x365   : > { %v6142_v14 = vmul.f32 -1.442695, %v5223_v25  ;;  %v7255_v42 = vadd.f32 %v7254_v7, %v7253_v19  ;;  %v5226_v2 = vadd.f32 %v5225_v15, %v9904_v52  ;;  %v9981_v38 = vadd.f32 %v7252_v20, %v9883_v6 }
 0x366   : > { %8037 = vpow2.f32 %v6144_v50  ;;  %v6145_v51 = vmul.f32 -1.442695, %v5234_v5 }
 0x367   : > { %8039 = vpow2.f32 %v6142_v14  ;;  %v6143_v10 = vmul.f32 -1.442695, %v5226_v2  ;;  %v9984_v49 = vadd.f32 %v7255_v42, %v9889_v36 }
 0x368   : > { %v8030_v21 = vpop.eup %8029  ;;  %8041 = vpow2.f32 %v6145_v51 }
 0x369   : > { %v8032_v46 = vpop.eup %8031  ;;  %v5431_v0 = vadd.f32 1.0, %v8030_v21  ;;  %8043 = vpow2.f32 %v6143_v10  ;;  %v7256_v39 = vpop.f32.mrb[56].mxu1 }
 0x36a   : > { %v7324_v17 = vpop.f32.mrb[56].mxu0  ;;  %v8034_v61 = vpop.eup %8033  ;;  %v5429_v30 = vadd.f32 1.0, %v8032_v46 }
 0x36b   : > { %v5247_v52 = vadd.f32 %v7324_v17, %v9934_v23  ;;  %v7257_v6 = vpop.f32.mrb[57].mxu1  ;;  %v5238_v8 = vpop.f32.mrb[57].mxu0  ;;  %8045 = vrcp.f32 %v5431_v0  ;;  %v5432_v28 = vadd.f32 1.0, %v8034_v61 }
 0x36c   : > { %v8036_v12 = vpop.eup %8035  ;;  %v7258_v11 = vadd.f32 %v7257_v6, %v7256_v39  ;;  %v5239_v36 = vadd.f32 %v5238_v8, %v9922_v41  ;;  %v7259_v55 = vpop.f32.mrb[58].mxu1  ;;  %8047 = vrcp.f32 %v5429_v30 }
 0x36d   : > { %v7325_v56 = vpop.f32.mrb[58].mxu0  ;;  %v5430_v53 = vadd.f32 1.0, %v8036_v12  ;;  %v6148_v63 = vmul.f32 -1.442695, %v5247_v52  ;;  %v7260_v27 = vpop.f32.mrb[59].mxu1  ;;  %8049 = vrcp.f32 %v5432_v28 }
 0x36e   : > { %v5250_v33 = vadd.f32 %v7325_v56, %v9940_v13  ;;  %v5241_v57 = vpop.f32.mrb[59].mxu0  ;;  %v6146_v23 = vmul.f32 -1.442695, %v5239_v36  ;;  %v7261_v16 = vadd.f32 %v7260_v27, %v7259_v55  ;;  %v9991_v43 = vadd.f32 %v7258_v11, %v9895_v9 }
 0x36f   : > { %v5242_v40 = vadd.f32 %v5241_v57, %v9928_v45  ;;  %8051 = vrcp.f32 %v5430_v53 }
 0x370   : > { %v6149_v24 = vmul.f32 -1.442695, %v5250_v33  ;;  %8053 = vpow2.f32 %v6148_v63  ;;  %v9994_v34 = vadd.f32 %v7261_v16, %v9901_v62  ;;  %v8038_v22 = vpop.eup %8037 }
 0x371   : > { %v6147_v41 = vmul.f32 -1.442695, %v5242_v40  ;;  %8055 = vpow2.f32 %v6146_v23  ;;  %v8040_v13 = vpop.eup %8039  ;;  %v5435_v20 = vadd.f32 1.0, %v8038_v22  ;;  %v7262_v25 = vpop.f32.mrb[60].mxu1 }
 0x372   : > { %8057 = vpow2.f32 %v6149_v24  ;;  %v7328_v19 = vpop.f32.mrb[60].mxu0  ;;  %v8042_v58 = vpop.eup %8041  ;;  %v5433_v45 = vadd.f32 1.0, %v8040_v13 }
 0x373   : > { %8059 = vpow2.f32 %v6147_v41  ;;  %v5263_v9 = vadd.f32 %v7328_v19, %v9958_v29  ;;  %v7263_v50 = vpop.f32.mrb[61].mxu1  ;;  %v5254_v5 = vpop.f32.mrb[61].mxu0  ;;  %v5436_v62 = vadd.f32 1.0, %v8042_v58 }
 0x374   : > { %v8044_v7 = vpop.eup %8043  ;;  %8061 = vrcp.f32 %v5435_v20  ;;  %v7264_v15 = vadd.f32 %v7263_v50, %v7262_v25  ;;  %v5255_v14 = vadd.f32 %v5254_v5, %v9946_v60  ;;  %v7265_v42 = vpop.f32.mrb[62].mxu1 }
 0x375   : > { %v7329_v2 = vpop.f32.mrb[62].mxu0  ;;  %8063 = vrcp.f32 %v5433_v45  ;;  %v5434_v51 = vadd.f32 1.0, %v8044_v7  ;;  %v6152_v29 = vmul.f32 -1.442695, %v5263_v9  ;;  %v7266_v21 = vpop.f32.mrb[63].mxu1 }
 0x376   : > { %v5266_v10 = vadd.f32 %v7329_v2, %v9964_v54  ;;  %v5257_v46 = vpop.f32.mrb[63].mxu0  ;;  %v8046_v0 = vpop.eup %8045  ;;  %8065 = vrcp.f32 %v5436_v62  ;;  %v6150_v39 = vmul.f32 -1.442695, %v5255_v14  ;;  %v7267_v17 = vadd.f32 %v7266_v21, %v7265_v42 }
 0x377   : > { %v5258_v61 = vadd.f32 %v5257_v46, %v9952_v47  ;;  %v8048_v30 = vpop.eup %8047  ;;  %5528 = vst.msk [vmem:[%s10001_s10 + $0x10] sm:$0xff] %vm5525_vm1, %v8046_v0  ;;  %8067 = vrcp.f32 %v5434_v51  ;;  %v5134_v52 = vadd.f32 %v7264_v15, %v9907_v37 }
 0x378   : > { %v6153_v60 = vmul.f32 -1.442695, %v5266_v10  ;;  %v8050_v6 = vpop.eup %8049  ;;  %5526 = vst.msk [vmem:[%s10001_s10] sm:$0xff] %vm5525_vm1, %v8048_v30  ;;  %8069 = vpow2.f32 %v6152_v29  ;;  %v10012_v8 = vadd.f32 %v7267_v17, %v9913_v4 }
 0x379   : > { %v6151_v54 = vmul.f32 -1.442695, %v5258_v61  ;;  %v8052_v12 = vpop.eup %8051  ;;  %5529 = vst.msk [vmem:[%s10001_s10 + $0x18] sm:$0xff] %vm5525_vm1, %v8050_v6  ;;  %8071 = vpow2.f32 %v6150_v39  ;;  %v7268_v28 = vpop.f32.mrb[64].mxu1 }
 0x37a   : > { %v8054_v47 = vpop.eup %8053  ;;  %5527 = vst.msk [vmem:[%s10001_s10 + $0x8] sm:$0xff] %vm5525_vm1, %v8052_v12  ;;  %8073 = vpow2.f32 %v6153_v60  ;;  %v7332_v11 = vpop.f32.mrb[64].mxu0 }
 0x37b   : > { %v8056_v36 = vpop.eup %8055  ;;  %v5439_v37 = vadd.f32 1.0, %v8054_v47  ;;  %8075 = vpow2.f32 %v6151_v54  ;;  %v5279_v55 = vadd.f32 %v7332_v11, %v9981_v38  ;;  %v7269_v56 = vpop.f32.mrb[65].mxu1 }
 0x37c   : > { %v5270_v53 = vpop.f32.mrb[65].mxu0  ;;  %v8058_v63 = vpop.eup %8057  ;;  %v5437_v4 = vadd.f32 1.0, %v8056_v36  ;;  %v7270_v33 = vadd.f32 %v7269_v56, %v7268_v28 }
 0x37d   : > { %v5271_v27 = vadd.f32 %v5270_v53, %v9971_v59  ;;  %v7271_v57 = vpop.f32.mrb[66].mxu1  ;;  %v7333_v23 = vpop.f32.mrb[66].mxu0  ;;  %8077 = vrcp.f32 %v5439_v37  ;;  %v5440_v40 = vadd.f32 1.0, %v8058_v63  ;;  %v6156_v24 = vmul.f32 -1.442695, %v5279_v55 }
 0x37e   : > { %v8060_v16 = vpop.eup %8059  ;;  %v5282_v41 = vadd.f32 %v7333_v23, %v9984_v49  ;;  %v7272_v22 = vpop.f32.mrb[67].mxu1  ;;  %8079 = vrcp.f32 %v5437_v4  ;;  %v10025_v9 = vadd.f32 %v7270_v33, %v9919_v1 }
 0x37f   : > { %v5273_v13 = vpop.f32.mrb[67].mxu0  ;;  %v8062_v38 = vpop.eup %8061  ;;  %v5438_v20 = vadd.f32 1.0, %v8060_v16  ;;  %v6154_v25 = vmul.f32 -1.442695, %v5271_v27  ;;  %v7273_v19 = vadd.f32 %v7272_v22, %v7271_v57  ;;  %8081 = vrcp.f32 %v5440_v40 }
 0x380   : > { %v8064_v59 = vpop.eup %8063  ;;  %5532 = vst.msk [vmem:[%s10001_s10 + $0x30] sm:$0xff] %vm5525_vm1, %v8062_v38  ;;  %v6157_v58 = vmul.f32 -1.442695, %v5282_v41  ;;  %v5274_v45 = vadd.f32 %v5273_v13, %v9974_v44 }
 0x381   : > { %v8066_v49 = vpop.eup %8065  ;;  %5530 = vst.msk [vmem:[%s10001_s10 + $0x20] sm:$0xff] %vm5525_vm1, %v8064_v59  ;;  %8083 = vrcp.f32 %v5438_v20  ;;  %v10030_v50 = vadd.f32 %v7273_v19, %v9925_v48  ;;  %v7274_v44 = vpop.f32.mrb[68].mxu1 }
 0x382   : > { %v8068_v5 = vpop.eup %8067  ;;  %5533 = vst.msk [vmem:[%s10001_s10 + $0x38] sm:$0xff] %vm5525_vm1, %v8066_v49  ;;  %8085 = vpow2.f32 %v6156_v24  ;;  %v6155_v7 = vmul.f32 -1.442695, %v5274_v45  ;;  %v7336_v15 = vpop.f32.mrb[68].mxu0 }
 0x383   : > { %v8070_v62 = vpop.eup %8069  ;;  %5531 = vst.msk [vmem:[%s10001_s10 + $0x28] sm:$0xff] %vm5525_vm1, %v8068_v5  ;;  %8087 = vpow2.f32 %v6154_v25  ;;  %v5295_v42 = vadd.f32 %v7336_v15, %v5134_v52  ;;  %v7275_v2 = vpop.f32.mrb[69].mxu1 }
 0x384   : > { %v8072_v1 = vpop.eup %8071  ;;  %v5443_v14 = vadd.f32 1.0, %v8070_v62  ;;  %8089 = vpow2.f32 %v6157_v58  ;;  %v5286_v51 = vpop.f32.mrb[69].mxu0  ;;  %v7276_v10 = vadd.f32 %v7275_v2, %v7274_v44 }
 0x385   : > { %v8074_v29 = vpop.eup %8073  ;;  %v5441_v48 = vadd.f32 1.0, %v8072_v1  ;;  %8091 = vpow2.f32 %v6155_v7  ;;  %v5287_v21 = vadd.f32 %v5286_v51, %v9991_v43  ;;  %v7277_v46 = vpop.f32.mrb[70].mxu1  ;;  %v6160_v61 = vmul.f32 -1.442695, %v5295_v42 }
 0x386   : > { %v7337_v0 = vpop.f32.mrb[70].mxu0  ;;  %v8076_v39 = vpop.eup %8075  ;;  %8093 = vrcp.f32 %v5443_v14  ;;  %v5444_v17 = vadd.f32 1.0, %v8074_v29  ;;  %v5150_v11 = vadd.f32 %v7276_v10, %v9931_v35 }
 0x387   : > { %v5298_v30 = vadd.f32 %v7337_v0, %v10012_v8  ;;  %v7278_v60 = vpop.f32.mrb[71].mxu1  ;;  %v5289_v52 = vpop.f32.mrb[71].mxu0  ;;  %8095 = vrcp.f32 %v5441_v48  ;;  %v5442_v6 = vadd.f32 1.0, %v8076_v39  ;;  %v6158_v54 = vmul.f32 -1.442695, %v5287_v21 }
 0x388   : > { %v7279_v12 = vadd.f32 %v7278_v60, %v7277_v46  ;;  %v8078_v47 = vpop.eup %8077  ;;  %8097 = vrcp.f32 %v5444_v17  ;;  %v5290_v28 = vadd.f32 %v5289_v52, %v9994_v34 }
 0x389   : > { %v6161_v43 = vmul.f32 -1.442695, %v5298_v30  ;;  %v8080_v36 = vpop.eup %8079  ;;  %5536 = vst.msk [vmem:[%s10001_s10 + $0x50] sm:$0xff] %vm5525_vm1, %v8078_v47  ;;  %8099 = vrcp.f32 %v5442_v6  ;;  %v7280_v53 = vpop.f32.mrb[72].mxu1 }
 0x38a   : > { %v5153_v8 = vadd.f32 %v7279_v12, %v9937_v3  ;;  %v8082_v37 = vpop.eup %8081  ;;  %5534 = vst.msk [vmem:[%s10001_s10 + $0x40] sm:$0xff] %vm5525_vm1, %v8080_v36  ;;  %8101 = vpow2.f32 %v6160_v61  ;;  %v6159_v55 = vmul.f32 -1.442695, %v5290_v28  ;;  %v7340_v34 = vpop.f32.mrb[72].mxu0 }
 0x38b   : > { %v8084_v56 = vpop.eup %8083  ;;  %5537 = vst.msk [vmem:[%s10001_s10 + $0x58] sm:$0xff] %vm5525_vm1, %v8082_v37  ;;  %8103 = vpow2.f32 %v6158_v54  ;;  %v5311_v35 = vadd.f32 %v7340_v34, %v5150_v11  ;;  %v7281_v4 = vpop.f32.mrb[73].mxu1 }
 0x38c   : > { %v8086_v63 = vpop.eup %8085  ;;  %5535 = vst.msk [vmem:[%s10001_s10 + $0x48] sm:$0xff] %vm5525_vm1, %v8084_v56  ;;  %8105 = vpow2.f32 %v6161_v43  ;;  %v5302_v33 = vpop.f32.mrb[73].mxu0  ;;  %v7282_v57 = vadd.f32 %v7281_v4, %v7280_v53 }
 0x38d   : > { %v8088_v27 = vpop.eup %8087  ;;  %v5447_v3 = vadd.f32 1.0, %v8086_v63  ;;  %8107 = vpow2.f32 %v6159_v55  ;;  %v5303_v23 = vadd.f32 %v5302_v33, %v10025_v9  ;;  %v7283_v16 = vpop.f32.mrb[74].mxu1  ;;  %v6164_v19 = vmul.f32 -1.442695, %v5311_v35 }
 0x38e   : > { %v7341_v40 = vpop.f32.mrb[74].mxu0  ;;  %v8090_v24 = vpop.eup %8089  ;;  %v5445_v41 = vadd.f32 1.0, %v8088_v27  ;;  %v5158_v62 = vadd.f32 %v7282_v57, %v9943_v18 }
 0x38f   : > { %v5314_v22 = vadd.f32 %v7341_v40, %v5153_v8  ;;  %v7284_v13 = vpop.f32.mrb[75].mxu1  ;;  %v5305_v38 = vpop.f32.mrb[75].mxu0  ;;  %8109 = vrcp.f32 %v5447_v3  ;;  %v5448_v25 = vadd.f32 1.0, %v8090_v24  ;;  %v6162_v49 = vmul.f32 -1.442695, %v5303_v23 }
 0x390   : > { %v8092_v20 = vpop.eup %8091  ;;  %v7285_v59 = vadd.f32 %v7284_v13, %v7283_v16  ;;  %8111 = vrcp.f32 %v5445_v41  ;;  %v5306_v9 = vadd.f32 %v5305_v38, %v10030_v50 }
 0x391   : > { %v8094_v58 = vpop.eup %8093  ;;  %v5446_v45 = vadd.f32 1.0, %v8092_v20  ;;  %8113 = vrcp.f32 %v5448_v25  ;;  %v6165_v7 = vmul.f32 -1.442695, %v5314_v22  ;;  %v7286_v50 = vpop.f32.mrb[76].mxu1 }
 0x392   : > { %v8096_v5 = vpop.eup %8095  ;;  %5540 = vst.msk [vmem:[%s10001_s10 + $0x70] sm:$0xff] %vm5525_vm1, %v8094_v58  ;;  %v5161_v44 = vadd.f32 %v7285_v59, %v9949_v32  ;;  %v6163_v1 = vmul.f32 -1.442695, %v5306_v9  ;;  %v7344_v42 = vpop.f32.mrb[76].mxu0 }
 0x393   : > { %v8098_v15 = vpop.eup %8097  ;;  %5538 = vst.msk [vmem:[%s10001_s10 + $0x60] sm:$0xff] %vm5525_vm1, %v8096_v5  ;;  %8115 = vrcp.f32 %v5446_v45  ;;  %v7287_v51 = vpop.f32.mrb[77].mxu1 }
 0x394   : > { %v8100_v14 = vpop.eup %8099  ;;  %5541 = vst.msk [vmem:[%s10001_s10 + $0x78] sm:$0xff] %vm5525_vm1, %v8098_v15  ;;  %8117 = vpow2.f32 %v6164_v19  ;;  %v5318_v29 = vpop.f32.mrb[77].mxu0  ;;  %v7288_v32 = vadd.f32 %v7287_v51, %v7286_v50 }
 0x395   : > { %v8102_v2 = vpop.eup %8101  ;;  %5539 = vst.msk [vmem:[%s10001_s10 + $0x68] sm:$0xff] %vm5525_vm1, %v8100_v14  ;;  %8119 = vpow2.f32 %v6162_v49  ;;  %v5319_v10 = vadd.f32 %v5318_v29, %v5158_v62  ;;  %v7289_v21 = vpop.f32.mrb[78].mxu1 }
 0x396   : > { %v8104_v18 = vpop.eup %8103  ;;  %v5451_v48 = vadd.f32 1.0, %v8102_v2  ;;  %8121 = vpow2.f32 %v6165_v7  ;;  %v7345_v46 = vpop.f32.mrb[78].mxu0  ;;  %v5166_v52 = vadd.f32 %v7288_v32, %v9955_v26 }
 0x397   : > { %v8106_v0 = vpop.eup %8105  ;;  %v5449_v39 = vadd.f32 1.0, %v8104_v18  ;;  %8123 = vpow2.f32 %v6163_v1  ;;  %v7290_v17 = vpop.f32.mrb[79].mxu1  ;;  %v6166_v6 = vmul.f32 -1.442695, %v5319_v10 }
 0x398   : > { %v5321_v61 = vpop.f32.mrb[79].mxu0  ;;  %v8108_v30 = vpop.eup %8107  ;;  %8125 = vrcp.f32 %v5451_v48  ;;  %v5452_v60 = vadd.f32 1.0, %v8106_v0  ;;  %v7291_v12 = vadd.f32 %v7290_v17, %v7289_v21  ;;  %v5327_v28 = vadd.f32 %v7344_v42, %v5166_v52 }
 0x399   : > { %8127 = vrcp.f32 %v5449_v39  ;;  %v5450_v54 = vadd.f32 1.0, %v8108_v30  ;;  %v5322_v47 = vadd.f32 %v5321_v61, %v5161_v44  ;;  %v8110_v43 = vpop.eup %8109 }
 0x39a   : > { %8129 = vrcp.f32 %v5452_v60  ;;  %v8112_v11 = vpop.eup %8111  ;;  %5544 = vst.msk [vmem:[%s10001_s10 + $0x90] sm:$0xff] %vm5525_vm1, %v8110_v43  ;;  %v5169_v36 = vadd.f32 %v7291_v12, %v9961_v31  ;;  %v6168_v26 = vmul.f32 -1.442695, %v5327_v28 }
 0x39b   : > { %8131 = vrcp.f32 %v5450_v54  ;;  %v6167_v8 = vmul.f32 -1.442695, %v5322_v47  ;;  %v8114_v37 = vpop.eup %8113  ;;  %5542 = vst.msk [vmem:[%s10001_s10 + $0x80] sm:$0xff] %vm5525_vm1, %v8112_v11 }
 0x39c   : > { %8133 = vpow2.f32 %v6166_v6  ;;  %5545 = vst.msk [vmem:[%s10001_s10 + $0x98] sm:$0xff] %vm5525_vm1, %v8114_v37  ;;  %v5330_v56 = vadd.f32 %v7345_v46, %v5169_v36 }
 0x39d   : > { %v8116_v55 = vpop.eup %8115  ;;  %8135 = vpow2.f32 %v6167_v8 }
 0x39e   : > { %v8118_v53 = vpop.eup %8117  ;;  %5543 = vst.msk [vmem:[%s10001_s10 + $0x88] sm:$0xff] %vm5525_vm1, %v8116_v55  ;;  %8137 = vpow2.f32 %v6168_v26  ;;  %v6169_v27 = vmul.f32 -1.442695, %v5330_v56 }
 0x39f   : > { %v8120_v34 = vpop.eup %8119  ;;  %v5455_v63 = vadd.f32 1.0, %v8118_v53 }
 0x3a0   : > { %v8122_v31 = vpop.eup %8121  ;;  %v5453_v35 = vadd.f32 1.0, %v8120_v34 }
 0x3a1   : > { %v8124_v4 = vpop.eup %8123  ;;  %8139 = vrcp.f32 %v5455_v63  ;;  %v5456_v33 = vadd.f32 1.0, %v8122_v31 }
 0x3a2   : > { %v8126_v3 = vpop.eup %8125  ;;  %8141 = vrcp.f32 %v5453_v35  ;;  %v5454_v57 = vadd.f32 1.0, %v8124_v4 }
 0x3a3   : > { %v8128_v23 = vpop.eup %8127  ;;  %5548 = vst.msk [vmem:[%s10001_s10 + $0xb0] sm:$0xff] %vm5525_vm1, %v8126_v3  ;;  %8143 = vrcp.f32 %v5456_v33 }
 0x3a4   : > { %v8130_v16 = vpop.eup %8129  ;;  %5546 = vst.msk [vmem:[%s10001_s10 + $0xa0] sm:$0xff] %vm5525_vm1, %v8128_v23  ;;  %8145 = vrcp.f32 %v5454_v57 }
 0x3a5   : > { %v8132_v40 = vpop.eup %8131  ;;  %5549 = vst.msk [vmem:[%s10001_s10 + $0xb8] sm:$0xff] %vm5525_vm1, %v8130_v16  ;;  %8147 = vpow2.f32 %v6169_v27 }
 0x3a6   : > { %v8134_v24 = vpop.eup %8133  ;;  %5547 = vst.msk [vmem:[%s10001_s10 + $0xa8] sm:$0xff] %vm5525_vm1, %v8132_v40 }
 0x3a7   : > { %v8136_v41 = vpop.eup %8135  ;;  %v5457_v22 = vadd.f32 1.0, %v8134_v24 }
 0x3a8   : > { %v8138_v13 = vpop.eup %8137  ;;  %v5458_v38 = vadd.f32 1.0, %v8136_v41 }
 0x3a9   : > { %v5459_v20 = vadd.f32 1.0, %v8138_v13  ;;  %8149 = vrcp.f32 %v5457_v22 }
 0x3aa   : > { %8151 = vrcp.f32 %v5458_v38 }
 0x3ab   : > { %v8140_v25 = vpop.eup %8139  ;;  %8153 = vrcp.f32 %v5459_v20 }
 0x3ac   : > { %v8142_v19 = vpop.eup %8141  ;;  %5552 = vst.msk [vmem:[%s10001_s10 + $0xd0] sm:$0xff] %vm5525_vm1, %v8140_v25 }
 0x3ad   : > { %v8144_v59 = vpop.eup %8143  ;;  %5550 = vst.msk [vmem:[%s10001_s10 + $0xc0] sm:$0xff] %vm5525_vm1, %v8142_v19 }
 0x3ae   : > { %v8146_v58 = vpop.eup %8145  ;;  %5553 = vst.msk [vmem:[%s10001_s10 + $0xd8] sm:$0xff] %vm5525_vm1, %v8144_v59 }
 0x3af   : > { %v8148_v45 = vpop.eup %8147  ;;  %5551 = vst.msk [vmem:[%s10001_s10 + $0xc8] sm:$0xff] %vm5525_vm1, %v8146_v58 }
 0x3b0   : > { %v5460_v49 = vadd.f32 1.0, %v8148_v45 }
 0x3b2   : > { %8155 = vrcp.f32 %v5460_v49 }
 0x3b3   : > { %v8150_v9 = vpop.eup %8149 }
 0x3b4   : > { %v8152_v5 = vpop.eup %8151  ;;  %5554 = vst.msk [vmem:[%s10001_s10 + $0xe0] sm:$0xff] %vm5525_vm1, %v8150_v9 }
 0x3b5   : > { %v8154_v7 = vpop.eup %8153  ;;  %5555 = vst.msk [vmem:[%s10001_s10 + $0xe8] sm:$0xff] %vm5525_vm1, %v8152_v5 }
 0x3b6   : > { %5556 = vst.msk [vmem:[%s10001_s10 + $0xf0] sm:$0xff] %vm5525_vm1, %v8154_v7 }
 0x3bc   : > { %v8156_v62 = vpop.eup %8155 }
 0x3bd   : > { %5557 = vst.msk [vmem:[%s10001_s10 + $0xf8] sm:$0xff] %vm5525_vm1, %v8156_v62 }
 0x3be PF: > { %s13_s12 = sadd.s32 1, %s8164_s12  }
 0x3bf   : > { %p10_p4 = scmp.ge.s32.totalorder %s13_s12, 4  }
 0x3c1   :  { %12 = sbr.rel (!%p10_p4) target bundleno = 1 (0x1), region = 62 }

</bundles_post_ra>
